<compile_context>
chip_gen: v7x
topology: tpu7x:2x2x1
jax: 0.10.0
libtpu: 0.0.40
codegen_flags: <defaults>
</compile_context>

<pallas_src>
import functools

import jax
import jax.numpy as jnp
from jax import lax
from jax.experimental import pallas as pl
from jax.experimental.pallas import tpu as pltpu

HIGH = jax.lax.Precision.HIGHEST


# ------------------------------- kernel --------------------------------------

def aspp_kernel(xp_ref, w2_ref, wdil_ref, wb_ref, bias_ref, out_ref,
                *, h, w, cin, dils, dmax):
    hw = h * w

    def tap(dy, dx):
        # static shifted slice of the zero-padded image -> (HW, Cin)
        blk = xp_ref[dmax + dy:dmax + dy + h, dmax + dx:dmax + dx + w, :]
        return blk.reshape(hw, cin)

    x_c = tap(0, 0)  # un-shifted pixels: 1x1 branch + the three 3x3 center taps

    # branch 2: 1x1 conv (BN folded into the weight)
    feats = [jnp.dot(x_c, w2_ref[...], preferred_element_type=jnp.float32)]

    # branches 3-5: dilated 3x3 convs as 9 accumulating tap matmuls each
    for bi, d in enumerate(dils):
        acc = jnp.dot(x_c, wdil_ref[bi, 4 * cin:5 * cin, :],
                      preferred_element_type=jnp.float32)          # center tap (t=4)
        for t in range(9):
            ky, kx = t // 3, t % 3
            if ky == 1 and kx == 1:
                continue
            acc = acc + jnp.dot(tap((ky - 1) * d, (kx - 1) * d),
                                wdil_ref[bi, t * cin:(t + 1) * cin, :],
                                preferred_element_type=jnp.float32)
        feats.append(acc)

    # fused bottleneck: lane-concat the 4 spatial branches -> single K=4*Ci matmul
    fcat = jnp.concatenate(feats, axis=-1).astype(jnp.bfloat16)    # (HW, 4*Ci)
    out = jnp.dot(fcat, wb_ref[...], preferred_element_type=jnp.float32)

    # bias row carries: pooled branch (per image, grid-invariant) + all BN biases.
    # Dropout2d(0.1) is identity in eval mode.
    # TODO(synk): training-mode Dropout2d (stochastic channel zeroing) not implemented.
    out_ref[...] = (out + bias_ref[...]).astype(out_ref.dtype)


# ------------------------------- wrapper --------------------------------------

def aspp_forward(x_nchw, p):
    n, cin, h, w = x_nchw.shape
    cout = p["wb_pt"].shape[0]
    cout_pad = p["cout_pad"]
    dils = p["dil"]
    dmax = max(dils)
    hw = h * w
    hp, wp = h + 2 * dmax, w + 2 * dmax

    x = jnp.transpose(x_nchw, (0, 2, 3, 1)).astype(jnp.float32)          # NHWC
    # spatial halo only (no im2col): the kernel forms the dilated taps itself
    xp = jnp.pad(x, ((0, 0), (dmax, dmax), (dmax, dmax), (0, 0))).astype(jnp.bfloat16)

    # pooled branch (per-image constant) + all BN bias terms -> one bias row
    pooled = x.reshape(n, hw, cin).mean(axis=1)                          # (N, Cin)
    f1 = jnp.dot(pooled, p["w1k"], precision=HIGH) * p["s1"][None, :] + p["b1"][None, :]
    bias = jnp.dot(f1, p["wb1"], precision=HIGH) + p["b_const"]          # (N, Cout_pad)
    bias = bias[:, None, :]                                              # (N, 1, Cout_pad)

    sq = pl.Squeezed()
    kern = functools.partial(aspp_kernel, h=h, w=w, cin=cin, dils=dils, dmax=dmax)

    # TODO(synk): for production ASPP sizes (Cin~2048, 65x65 maps) the whole
    # padded image no longer fits VMEM (esp. v7x's 64 MiB); switch to halo'd
    # row-band tiling + K-blocked weights with a VMEM accumulator.
    out = pl.pallas_call(
        kern,
        out_shape=jax.ShapeDtypeStruct((n, hw, cout_pad), jnp.float32),
        grid=(n,),
        in_specs=[
            pl.BlockSpec((sq, hp, wp, cin), lambda i: (i, 0, 0, 0)),     # padded image
            pl.BlockSpec(p["w2k"].shape, lambda i: (0, 0)),              # 1x1 weight
            pl.BlockSpec(p["wdilk"].shape, lambda i: (0, 0, 0)),         # 3x3 tap weights
            pl.BlockSpec(p["wbk"].shape, lambda i: (0, 0)),              # bottleneck weight
            pl.BlockSpec((sq, 1, cout_pad), lambda i: (i, 0, 0)),        # per-image bias
        ],
        out_specs=pl.BlockSpec((sq, hw, cout_pad), lambda i: (i, 0, 0)),
        compiler_params=pltpu.CompilerParams(dimension_semantics=("parallel",)),
    )(xp, p["w2k"], p["wdilk"], p["wbk"], bias)

    out = out[:, :, :cout]                                               # drop lane padding
    return jnp.transpose(out.reshape(n, h, w, cout), (0, 3, 1, 2))       # back to NCHW


# ----------------------------- parameters -------------------------------------

def make_params(key, features, inner, out_features, dilations, eps=1e-5):
    keys = iter(jax.random.split(key, 32))

    def conv_w(cout, cin, kh, kw):
        fan_in = cin * kh * kw
        return jax.random.normal(next(keys), (cout, cin, kh, kw), jnp.float32) / jnp.sqrt(fan_in)

    def bn(c):
        gamma = jax.random.uniform(next(keys), (c,), jnp.float32, 0.5, 1.5)
        beta = 0.1 * jax.random.normal(next(keys), (c,), jnp.float32)
        mean = 0.1 * jax.random.normal(next(keys), (c,), jnp.float32)
        var = jax.random.uniform(next(keys), (c,), jnp.float32, 0.5, 1.5)
        scale = gamma / jnp.sqrt(var + eps)
        bias = beta - mean * scale
        return scale, bias

    w1_pt = conv_w(inner, features, 1, 1)
    w2_pt = conv_w(inner, features, 1, 1)
    w3_pt = conv_w(inner, features, 3, 3)
    w4_pt = conv_w(inner, features, 3, 3)
    w5_pt = conv_w(inner, features, 3, 3)
    wb_pt = conv_w(out_features, 5 * inner, 1, 1)

    bns = [bn(inner) for _ in range(5)]
    s = [t[0] for t in bns]
    b = [t[1] for t in bns]
    sb, bb = bn(out_features)

    def k1(wpt):      # (O, I, 1, 1) -> (I, O)
        return jnp.transpose(wpt[:, :, 0, 0], (1, 0))

    def k3(wpt):      # (O, I, 3, 3) -> (9*I, O), tap-major / channel-minor
        return jnp.transpose(wpt, (2, 3, 1, 0)).reshape(9 * wpt.shape[1], wpt.shape[0])

    cout_pad = ((out_features + 127) // 128) * 128

    # ---- BN folded into the weights (exact: the module is purely affine) ----
    w2k = k1(w2_pt) * s[1][None, :]                                     # (Cin, Ci)
    wdilk = jnp.stack([k3(w3_pt) * s[2][None, :],
                       k3(w4_pt) * s[3][None, :],
                       k3(w5_pt) * s[4][None, :]])                      # (3, 9*Cin, Ci)
    wbf = k1(wb_pt) * sb[None, :]                                       # (5*Ci, Cout)
    wbf = jnp.pad(wbf, ((0, 0), (0, cout_pad - out_features)))          # lane-dense pad

    # constant part of the output bias: output BN bias + branch BN biases
    # pushed through their bottleneck slices
    b_const = jnp.pad(bb, (0, cout_pad - out_features))[None, :]
    for k in range(1, 5):   # branches 2..5
        b_const = b_const + jnp.dot(b[k][None, :], wbf[k * inner:(k + 1) * inner, :],
                                    precision=HIGH)

    return {
        # kernel-side (bf16 matmul operands; bias math stays f32)
        "w2k": w2k.astype(jnp.bfloat16),
        "wdilk": wdilk.astype(jnp.bfloat16),
        "wbk": wbf[inner:, :].astype(jnp.bfloat16),                     # (4*Ci, Cout_pad)
        "wb1": wbf[:inner, :],                                          # f32, pooled-branch slice
        "w1k": k1(w1_pt),                                               # f32, used in wrapper only
        "s1": s[0], "b1": b[0],
        "b_const": b_const,                                             # (1, Cout_pad) f32
        "cout_pad": cout_pad,
        # reference-side (PyTorch layouts, f32, un-folded)
        "w1_pt": w1_pt, "w2_pt": w2_pt, "w3_pt": w3_pt, "w4_pt": w4_pt, "w5_pt": w5_pt,
        "wb_pt": wb_pt, "s": s, "b": b, "sb": sb, "bb": bb,
        "dil": tuple(dilations),
    }


# ----------------------------- pure-JAX reference -----------------------------

def ref_forward(x, p):
    n, c, h, w = x.shape

    def bn_apply(y, s, b):
        return y * s[None, :, None, None] + b[None, :, None, None]

    def conv(inp, wgt, dil=1, pad=0):
        return lax.conv_general_dilated(
            inp, wgt, window_strides=(1, 1),
            padding=[(pad, pad), (pad, pad)], rhs_dilation=(dil, dil),
            dimension_numbers=("NCHW", "OIHW", "NCHW"), precision=HIGH)

    pooled = x.mean(axis=(2, 3), keepdims=True)
    f1 = bn_apply(conv(pooled, p["w1_pt"]), p["s"][0], p["b"][0])
    f1 = jnp.broadcast_to(f1, (n, f1.shape[1], h, w))     # bilinear from 1x1 == broadcast
    f2 = bn_apply(conv(x, p["w2_pt"]), p["s"][1], p["b"][1])
    f3 = bn_apply(conv(x, p["w3_pt"], p["dil"][0], p["dil"][0]), p["s"][2], p["b"][2])
    f4 = bn_apply(conv(x, p["w4_pt"], p["dil"][1], p["dil"][1]), p["s"][3], p["b"][3])
    f5 = bn_apply(conv(x, p["w5_pt"], p["dil"][2], p["dil"][2]), p["s"][4], p["b"][4])
    cat = jnp.concatenate([f1, f2, f3, f4, f5], axis=1)
    return bn_apply(conv(cat, p["wb_pt"]), p["sb"], p["bb"])   # Dropout2d: identity (eval)


# ----------------------------------- main --------------------------------------

if __name__ == "__main__":
    N, FEATURES, H, W = 2, 8, 16, 16
    INNER, OUT, DIL = 32, 64, (12, 24, 36)

    key = jax.random.PRNGKey(0)
    kx, kp = jax.random.split(key)
    x = jax.random.normal(kx, (N, FEATURES, H, W), jnp.float32)
    params = make_params(kp, FEATURES, INNER, OUT, DIL)

    out = jax.block_until_ready(aspp_forward(x, params))
    assert out.shape == (N, OUT, H, W), out.shape

    ref = jax.block_until_ready(ref_forward(x, params))
    err = float(jnp.max(jnp.abs(out - ref)))
    scale = float(jnp.max(jnp.abs(ref)))
    # bf16 MXU operands (f32 accumulation) vs an f32/HIGHEST reference:
    # allow ~3% of the output scale. A real bug (wrong tap / weight slice)
    # would produce O(scale) errors, far above this threshold.
    assert err <= 3e-2 * scale + 3e-2, (err, scale)
    print("KERNEL_OK")
</pallas_src>

<mosaic_0001>
module attributes {stable_mosaic.version = 11 : i64} {
  func.func @aspp_kernel(%arg0: i32, %arg1: memref<1x88x88x8xbf16, #tpu.memory_space<vmem>>, %arg2: memref<8x32xbf16, #tpu.memory_space<vmem>>, %arg3: memref<3x72x32xbf16, #tpu.memory_space<vmem>>, %arg4: memref<128x128xbf16, #tpu.memory_space<vmem>>, %arg5: memref<1x1x128xf32, #tpu.memory_space<vmem>>, %arg6: memref<1x256x128xf32, #tpu.memory_space<vmem>>) attributes {dimension_semantics = [#tpu.dimension_semantics<parallel>], iteration_bounds = array<i64: 2>, scalar_prefetch = 0 : i64, scratch_operands = 0 : i64, tpu.core_type = #tpu.core_type<tc>, window_params = [{transform_indices = @transform_0, window_bounds = array<i64: 1, 88, 88, 8>}, {pipeline_mode = #tpu.pipeline_mode<synchronous>, transform_indices = @transform_1, window_bounds = array<i64: 8, 32>}, {pipeline_mode = #tpu.pipeline_mode<synchronous>, transform_indices = @transform_2, window_bounds = array<i64: 3, 72, 32>}, {pipeline_mode = #tpu.pipeline_mode<synchronous>, transform_indices = @transform_3, window_bounds = array<i64: 128, 128>}, {transform_indices = @transform_4, window_bounds = array<i64: 1, 1, 128>}, {transform_indices = @transform_5, window_bounds = array<i64: 1, 256, 128>}]} {
    %c0 = arith.constant 0 : index
    %c36 = arith.constant 36 : index
    %c36_0 = arith.constant 36 : index
    %c0_1 = arith.constant 0 : index
    %0 = vector.load %arg1[%c0, %c36, %c36_0, %c0_1] : memref<1x88x88x8xbf16, #tpu.memory_space<vmem>>, vector<1x16x16x8xbf16>
    %1 = vector.shape_cast %0 : vector<1x16x16x8xbf16> to vector<16x16x8xbf16>
    %2 = vector.shape_cast %1 : vector<16x16x8xbf16> to vector<256x8xbf16>
    %c0_2 = arith.constant 0 : index
    %c0_3 = arith.constant 0 : index
    %3 = vector.load %arg2[%c0_2, %c0_3] : memref<8x32xbf16, #tpu.memory_space<vmem>>, vector<8x32xbf16>
    %cst = arith.constant dense<0.000000e+00> : vector<256x32xf32>
    %4 = tpu.matmul %2, %3, %cst {dimension_numbers = #tpu.dot_dimension_numbers<[1], [0], [0], [1], [0, 0, 1, 1], [], []>} : vector<256x8xbf16>, vector<8x32xbf16>, vector<256x32xf32> -> vector<256x32xf32>
    %c0_4 = arith.constant 0 : index
    %c32 = arith.constant 32 : index
    %c0_5 = arith.constant 0 : index
    %5 = vector.load %arg3[%c0_4, %c32, %c0_5] : memref<3x72x32xbf16, #tpu.memory_space<vmem>>, vector<1x8x32xbf16>
    %6 = vector.shape_cast %5 : vector<1x8x32xbf16> to vector<8x32xbf16>
    %cst_6 = arith.constant dense<0.000000e+00> : vector<256x32xf32>
    %7 = tpu.matmul %2, %6, %cst_6 {dimension_numbers = #tpu.dot_dimension_numbers<[1], [0], [0], [1], [0, 0, 1, 1], [], []>} : vector<256x8xbf16>, vector<8x32xbf16>, vector<256x32xf32> -> vector<256x32xf32>
    %c0_7 = arith.constant 0 : index
    %c24 = arith.constant 24 : index
    %c24_8 = arith.constant 24 : index
    %c0_9 = arith.constant 0 : index
    %8 = vector.load %arg1[%c0_7, %c24, %c24_8, %c0_9] : memref<1x88x88x8xbf16, #tpu.memory_space<vmem>>, vector<1x16x16x8xbf16>
    %9 = vector.shape_cast %8 : vector<1x16x16x8xbf16> to vector<16x16x8xbf16>
    %10 = vector.shape_cast %9 : vector<16x16x8xbf16> to vector<256x8xbf16>
    %c0_10 = arith.constant 0 : index
    %c0_11 = arith.constant 0 : index
    %c0_12 = arith.constant 0 : index
    %11 = vector.load %arg3[%c0_10, %c0_11, %c0_12] : memref<3x72x32xbf16, #tpu.memory_space<vmem>>, vector<1x8x32xbf16>
    %12 = vector.shape_cast %11 : vector<1x8x32xbf16> to vector<8x32xbf16>
    %cst_13 = arith.constant dense<0.000000e+00> : vector<256x32xf32>
    %13 = tpu.matmul %10, %12, %cst_13 {dimension_numbers = #tpu.dot_dimension_numbers<[1], [0], [0], [1], [0, 0, 1, 1], [], []>} : vector<256x8xbf16>, vector<8x32xbf16>, vector<256x32xf32> -> vector<256x32xf32>
    %14 = arith.addf %7, %13 : vector<256x32xf32>
    %c0_14 = arith.constant 0 : index
    %c24_15 = arith.constant 24 : index
    %c36_16 = arith.constant 36 : index
    %c0_17 = arith.constant 0 : index
    %15 = vector.load %arg1[%c0_14, %c24_15, %c36_16, %c0_17] : memref<1x88x88x8xbf16, #tpu.memory_space<vmem>>, vector<1x16x16x8xbf16>
    %16 = vector.shape_cast %15 : vector<1x16x16x8xbf16> to vector<16x16x8xbf16>
    %17 = vector.shape_cast %16 : vector<16x16x8xbf16> to vector<256x8xbf16>
    %c0_18 = arith.constant 0 : index
    %c8 = arith.constant 8 : index
    %c0_19 = arith.constant 0 : index
    %18 = vector.load %arg3[%c0_18, %c8, %c0_19] : memref<3x72x32xbf16, #tpu.memory_space<vmem>>, vector<1x8x32xbf16>
    %19 = vector.shape_cast %18 : vector<1x8x32xbf16> to vector<8x32xbf16>
    %cst_20 = arith.constant dense<0.000000e+00> : vector<256x32xf32>
    %20 = tpu.matmul %17, %19, %cst_20 {dimension_numbers = #tpu.dot_dimension_numbers<[1], [0], [0], [1], [0, 0, 1, 1], [], []>} : vector<256x8xbf16>, vector<8x32xbf16>, vector<256x32xf32> -> vector<256x32xf32>
    %21 = arith.addf %14, %20 : vector<256x32xf32>
    %c0_21 = arith.constant 0 : index
    %c24_22 = arith.constant 24 : index
    %c48 = arith.constant 48 : index
    %c0_23 = arith.constant 0 : index
    %22 = vector.load %arg1[%c0_21, %c24_22, %c48, %c0_23] : memref<1x88x88x8xbf16, #tpu.memory_space<vmem>>, vector<1x16x16x8xbf16>
    %23 = vector.shape_cast %22 : vector<1x16x16x8xbf16> to vector<16x16x8xbf16>
    %24 = vector.shape_cast %23 : vector<16x16x8xbf16> to vector<256x8xbf16>
    %c0_24 = arith.constant 0 : index
    %c16 = arith.constant 16 : index
    %c0_25 = arith.constant 0 : index
    %25 = vector.load %arg3[%c0_24, %c16, %c0_25] : memref<3x72x32xbf16, #tpu.memory_space<vmem>>, vector<1x8x32xbf16>
    %26 = vector.shape_cast %25 : vector<1x8x32xbf16> to vector<8x32xbf16>
    %cst_26 = arith.constant dense<0.000000e+00> : vector<256x32xf32>
    %27 = tpu.matmul %24, %26, %cst_26 {dimension_numbers = #tpu.dot_dimension_numbers<[1], [0], [0], [1], [0, 0, 1, 1], [], []>} : vector<256x8xbf16>, vector<8x32xbf16>, vector<256x32xf32> -> vector<256x32xf32>
    %28 = arith.addf %21, %27 : vector<256x32xf32>
    %c0_27 = arith.constant 0 : index
    %c36_28 = arith.constant 36 : index
    %c24_29 = arith.constant 24 : index
    %c0_30 = arith.constant 0 : index
    %29 = vector.load %arg1[%c0_27, %c36_28, %c24_29, %c0_30] : memref<1x88x88x8xbf16, #tpu.memory_space<vmem>>, vector<1x16x16x8xbf16>
    %30 = vector.shape_cast %29 : vector<1x16x16x8xbf16> to vector<16x16x8xbf16>
    %31 = vector.shape_cast %30 : vector<16x16x8xbf16> to vector<256x8xbf16>
    %c0_31 = arith.constant 0 : index
    %c24_32 = arith.constant 24 : index
    %c0_33 = arith.constant 0 : index
    %32 = vector.load %arg3[%c0_31, %c24_32, %c0_33] : memref<3x72x32xbf16, #tpu.memory_space<vmem>>, vector<1x8x32xbf16>
    %33 = vector.shape_cast %32 : vector<1x8x32xbf16> to vector<8x32xbf16>
    %cst_34 = arith.constant dense<0.000000e+00> : vector<256x32xf32>
    %34 = tpu.matmul %31, %33, %cst_34 {dimension_numbers = #tpu.dot_dimension_numbers<[1], [0], [0], [1], [0, 0, 1, 1], [], []>} : vector<256x8xbf16>, vector<8x32xbf16>, vector<256x32xf32> -> vector<256x32xf32>
    %35 = arith.addf %28, %34 : vector<256x32xf32>
    %c0_35 = arith.constant 0 : index
    %c36_36 = arith.constant 36 : index
    %c48_37 = arith.constant 48 : index
    %c0_38 = arith.constant 0 : index
    %36 = vector.load %arg1[%c0_35, %c36_36, %c48_37, %c0_38] : memref<1x88x88x8xbf16, #tpu.memory_space<vmem>>, vector<1x16x16x8xbf16>
    %37 = vector.shape_cast %36 : vector<1x16x16x8xbf16> to vector<16x16x8xbf16>
    %38 = vector.shape_cast %37 : vector<16x16x8xbf16> to vector<256x8xbf16>
    %c0_39 = arith.constant 0 : index
    %c40 = arith.constant 40 : index
    %c0_40 = arith.constant 0 : index
    %39 = vector.load %arg3[%c0_39, %c40, %c0_40] : memref<3x72x32xbf16, #tpu.memory_space<vmem>>, vector<1x8x32xbf16>
    %40 = vector.shape_cast %39 : vector<1x8x32xbf16> to vector<8x32xbf16>
    %cst_41 = arith.constant dense<0.000000e+00> : vector<256x32xf32>
    %41 = tpu.matmul %38, %40, %cst_41 {dimension_numbers = #tpu.dot_dimension_numbers<[1], [0], [0], [1], [0, 0, 1, 1], [], []>} : vector<256x8xbf16>, vector<8x32xbf16>, vector<256x32xf32> -> vector<256x32xf32>
    %42 = arith.addf %35, %41 : vector<256x32xf32>
    %c0_42 = arith.constant 0 : index
    %c48_43 = arith.constant 48 : index
    %c24_44 = arith.constant 24 : index
    %c0_45 = arith.constant 0 : index
    %43 = vector.load %arg1[%c0_42, %c48_43, %c24_44, %c0_45] : memref<1x88x88x8xbf16, #tpu.memory_space<vmem>>, vector<1x16x16x8xbf16>
    %44 = vector.shape_cast %43 : vector<1x16x16x8xbf16> to vector<16x16x8xbf16>
    %45 = vector.shape_cast %44 : vector<16x16x8xbf16> to vector<256x8xbf16>
    %c0_46 = arith.constant 0 : index
    %c48_47 = arith.constant 48 : index
    %c0_48 = arith.constant 0 : index
    %46 = vector.load %arg3[%c0_46, %c48_47, %c0_48] : memref<3x72x32xbf16, #tpu.memory_space<vmem>>, vector<1x8x32xbf16>
    %47 = vector.shape_cast %46 : vector<1x8x32xbf16> to vector<8x32xbf16>
    %cst_49 = arith.constant dense<0.000000e+00> : vector<256x32xf32>
    %48 = tpu.matmul %45, %47, %cst_49 {dimension_numbers = #tpu.dot_dimension_numbers<[1], [0], [0], [1], [0, 0, 1, 1], [], []>} : vector<256x8xbf16>, vector<8x32xbf16>, vector<256x32xf32> -> vector<256x32xf32>
    %49 = arith.addf %42, %48 : vector<256x32xf32>
    %c0_50 = arith.constant 0 : index
    %c48_51 = arith.constant 48 : index
    %c36_52 = arith.constant 36 : index
    %c0_53 = arith.constant 0 : index
    %50 = vector.load %arg1[%c0_50, %c48_51, %c36_52, %c0_53] : memref<1x88x88x8xbf16, #tpu.memory_space<vmem>>, vector<1x16x16x8xbf16>
    %51 = vector.shape_cast %50 : vector<1x16x16x8xbf16> to vector<16x16x8xbf16>
    %52 = vector.shape_cast %51 : vector<16x16x8xbf16> to vector<256x8xbf16>
    %c0_54 = arith.constant 0 : index
    %c56 = arith.constant 56 : index
    %c0_55 = arith.constant 0 : index
    %53 = vector.load %arg3[%c0_54, %c56, %c0_55] : memref<3x72x32xbf16, #tpu.memory_space<vmem>>, vector<1x8x32xbf16>
    %54 = vector.shape_cast %53 : vector<1x8x32xbf16> to vector<8x32xbf16>
    %cst_56 = arith.constant dense<0.000000e+00> : vector<256x32xf32>
    %55 = tpu.matmul %52, %54, %cst_56 {dimension_numbers = #tpu.dot_dimension_numbers<[1], [0], [0], [1], [0, 0, 1, 1], [], []>} : vector<256x8xbf16>, vector<8x32xbf16>, vector<256x32xf32> -> vector<256x32xf32>
    %56 = arith.addf %49, %55 : vector<256x32xf32>
    %c0_57 = arith.constant 0 : index
    %c48_58 = arith.constant 48 : index
    %c48_59 = arith.constant 48 : index
    %c0_60 = arith.constant 0 : index
    %57 = vector.load %arg1[%c0_57, %c48_58, %c48_59, %c0_60] : memref<1x88x88x8xbf16, #tpu.memory_space<vmem>>, vector<1x16x16x8xbf16>
    %58 = vector.shape_cast %57 : vector<1x16x16x8xbf16> to vector<16x16x8xbf16>
    %59 = vector.shape_cast %58 : vector<16x16x8xbf16> to vector<256x8xbf16>
    %c0_61 = arith.constant 0 : index
    %c64 = arith.constant 64 : index
    %c0_62 = arith.constant 0 : index
    %60 = vector.load %arg3[%c0_61, %c64, %c0_62] : memref<3x72x32xbf16, #tpu.memory_space<vmem>>, vector<1x8x32xbf16>
    %61 = vector.shape_cast %60 : vector<1x8x32xbf16> to vector<8x32xbf16>
    %cst_63 = arith.constant dense<0.000000e+00> : vector<256x32xf32>
    %62 = tpu.matmul %59, %61, %cst_63 {dimension_numbers = #tpu.dot_dimension_numbers<[1], [0], [0], [1], [0, 0, 1, 1], [], []>} : vector<256x8xbf16>, vector<8x32xbf16>, vector<256x32xf32> -> vector<256x32xf32>
    %63 = arith.addf %56, %62 : vector<256x32xf32>
    %c1 = arith.constant 1 : index
    %c32_64 = arith.constant 32 : index
    %c0_65 = arith.constant 0 : index
    %64 = vector.load %arg3[%c1, %c32_64, %c0_65] : memref<3x72x32xbf16, #tpu.memory_space<vmem>>, vector<1x8x32xbf16>
    %65 = vector.shape_cast %64 : vector<1x8x32xbf16> to vector<8x32xbf16>
    %cst_66 = arith.constant dense<0.000000e+00> : vector<256x32xf32>
    %66 = tpu.matmul %2, %65, %cst_66 {dimension_numbers = #tpu.dot_dimension_numbers<[1], [0], [0], [1], [0, 0, 1, 1], [], []>} : vector<256x8xbf16>, vector<8x32xbf16>, vector<256x32xf32> -> vector<256x32xf32>
    %c0_67 = arith.constant 0 : index
    %c12 = arith.constant 12 : index
    %c12_68 = arith.constant 12 : index
    %c0_69 = arith.constant 0 : index
    %67 = vector.load %arg1[%c0_67, %c12, %c12_68, %c0_69] : memref<1x88x88x8xbf16, #tpu.memory_space<vmem>>, vector<1x16x16x8xbf16>
    %68 = vector.shape_cast %67 : vector<1x16x16x8xbf16> to vector<16x16x8xbf16>
    %69 = vector.shape_cast %68 : vector<16x16x8xbf16> to vector<256x8xbf16>
    %c1_70 = arith.constant 1 : index
    %c0_71 = arith.constant 0 : index
    %c0_72 = arith.constant 0 : index
    %70 = vector.load %arg3[%c1_70, %c0_71, %c0_72] : memref<3x72x32xbf16, #tpu.memory_space<vmem>>, vector<1x8x32xbf16>
    %71 = vector.shape_cast %70 : vector<1x8x32xbf16> to vector<8x32xbf16>
    %cst_73 = arith.constant dense<0.000000e+00> : vector<256x32xf32>
    %72 = tpu.matmul %69, %71, %cst_73 {dimension_numbers = #tpu.dot_dimension_numbers<[1], [0], [0], [1], [0, 0, 1, 1], [], []>} : vector<256x8xbf16>, vector<8x32xbf16>, vector<256x32xf32> -> vector<256x32xf32>
    %73 = arith.addf %66, %72 : vector<256x32xf32>
    %c0_74 = arith.constant 0 : index
    %c12_75 = arith.constant 12 : index
    %c36_76 = arith.constant 36 : index
    %c0_77 = arith.constant 0 : index
    %74 = vector.load %arg1[%c0_74, %c12_75, %c36_76, %c0_77] : memref<1x88x88x8xbf16, #tpu.memory_space<vmem>>, vector<1x16x16x8xbf16>
    %75 = vector.shape_cast %74 : vector<1x16x16x8xbf16> to vector<16x16x8xbf16>
    %76 = vector.shape_cast %75 : vector<16x16x8xbf16> to vector<256x8xbf16>
    %c1_78 = arith.constant 1 : index
    %c8_79 = arith.constant 8 : index
    %c0_80 = arith.constant 0 : index
    %77 = vector.load %arg3[%c1_78, %c8_79, %c0_80] : memref<3x72x32xbf16, #tpu.memory_space<vmem>>, vector<1x8x32xbf16>
    %78 = vector.shape_cast %77 : vector<1x8x32xbf16> to vector<8x32xbf16>
    %cst_81 = arith.constant dense<0.000000e+00> : vector<256x32xf32>
    %79 = tpu.matmul %76, %78, %cst_81 {dimension_numbers = #tpu.dot_dimension_numbers<[1], [0], [0], [1], [0, 0, 1, 1], [], []>} : vector<256x8xbf16>, vector<8x32xbf16>, vector<256x32xf32> -> vector<256x32xf32>
    %80 = arith.addf %73, %79 : vector<256x32xf32>
    %c0_82 = arith.constant 0 : index
    %c12_83 = arith.constant 12 : index
    %c60 = arith.constant 60 : index
    %c0_84 = arith.constant 0 : index
    %81 = vector.load %arg1[%c0_82, %c12_83, %c60, %c0_84] : memref<1x88x88x8xbf16, #tpu.memory_space<vmem>>, vector<1x16x16x8xbf16>
    %82 = vector.shape_cast %81 : vector<1x16x16x8xbf16> to vector<16x16x8xbf16>
    %83 = vector.shape_cast %82 : vector<16x16x8xbf16> to vector<256x8xbf16>
    %c1_85 = arith.constant 1 : index
    %c16_86 = arith.constant 16 : index
    %c0_87 = arith.constant 0 : index
    %84 = vector.load %arg3[%c1_85, %c16_86, %c0_87] : memref<3x72x32xbf16, #tpu.memory_space<vmem>>, vector<1x8x32xbf16>
    %85 = vector.shape_cast %84 : vector<1x8x32xbf16> to vector<8x32xbf16>
    %cst_88 = arith.constant dense<0.000000e+00> : vector<256x32xf32>
    %86 = tpu.matmul %83, %85, %cst_88 {dimension_numbers = #tpu.dot_dimension_numbers<[1], [0], [0], [1], [0, 0, 1, 1], [], []>} : vector<256x8xbf16>, vector<8x32xbf16>, vector<256x32xf32> -> vector<256x32xf32>
    %87 = arith.addf %80, %86 : vector<256x32xf32>
    %c0_89 = arith.constant 0 : index
    %c36_90 = arith.constant 36 : index
    %c12_91 = arith.constant 12 : index
    %c0_92 = arith.constant 0 : index
    %88 = vector.load %arg1[%c0_89, %c36_90, %c12_91, %c0_92] : memref<1x88x88x8xbf16, #tpu.memory_space<vmem>>, vector<1x16x16x8xbf16>
    %89 = vector.shape_cast %88 : vector<1x16x16x8xbf16> to vector<16x16x8xbf16>
    %90 = vector.shape_cast %89 : vector<16x16x8xbf16> to vector<256x8xbf16>
    %c1_93 = arith.constant 1 : index
    %c24_94 = arith.constant 24 : index
    %c0_95 = arith.constant 0 : index
    %91 = vector.load %arg3[%c1_93, %c24_94, %c0_95] : memref<3x72x32xbf16, #tpu.memory_space<vmem>>, vector<1x8x32xbf16>
    %92 = vector.shape_cast %91 : vector<1x8x32xbf16> to vector<8x32xbf16>
    %cst_96 = arith.constant dense<0.000000e+00> : vector<256x32xf32>
    %93 = tpu.matmul %90, %92, %cst_96 {dimension_numbers = #tpu.dot_dimension_numbers<[1], [0], [0], [1], [0, 0, 1, 1], [], []>} : vector<256x8xbf16>, vector<8x32xbf16>, vector<256x32xf32> -> vector<256x32xf32>
    %94 = arith.addf %87, %93 : vector<256x32xf32>
    %c0_97 = arith.constant 0 : index
    %c36_98 = arith.constant 36 : index
    %c60_99 = arith.constant 60 : index
    %c0_100 = arith.constant 0 : index
    %95 = vector.load %arg1[%c0_97, %c36_98, %c60_99, %c0_100] : memref<1x88x88x8xbf16, #tpu.memory_space<vmem>>, vector<1x16x16x8xbf16>
    %96 = vector.shape_cast %95 : vector<1x16x16x8xbf16> to vector<16x16x8xbf16>
    %97 = vector.shape_cast %96 : vector<16x16x8xbf16> to vector<256x8xbf16>
    %c1_101 = arith.constant 1 : index
    %c40_102 = arith.constant 40 : index
    %c0_103 = arith.constant 0 : index
    %98 = vector.load %arg3[%c1_101, %c40_102, %c0_103] : memref<3x72x32xbf16, #tpu.memory_space<vmem>>, vector<1x8x32xbf16>
    %99 = vector.shape_cast %98 : vector<1x8x32xbf16> to vector<8x32xbf16>
    %cst_104 = arith.constant dense<0.000000e+00> : vector<256x32xf32>
    %100 = tpu.matmul %97, %99, %cst_104 {dimension_numbers = #tpu.dot_dimension_numbers<[1], [0], [0], [1], [0, 0, 1, 1], [], []>} : vector<256x8xbf16>, vector<8x32xbf16>, vector<256x32xf32> -> vector<256x32xf32>
    %101 = arith.addf %94, %100 : vector<256x32xf32>
    %c0_105 = arith.constant 0 : index
    %c60_106 = arith.constant 60 : index
    %c12_107 = arith.constant 12 : index
    %c0_108 = arith.constant 0 : index
    %102 = vector.load %arg1[%c0_105, %c60_106, %c12_107, %c0_108] : memref<1x88x88x8xbf16, #tpu.memory_space<vmem>>, vector<1x16x16x8xbf16>
    %103 = vector.shape_cast %102 : vector<1x16x16x8xbf16> to vector<16x16x8xbf16>
    %104 = vector.shape_cast %103 : vector<16x16x8xbf16> to vector<256x8xbf16>
    %c1_109 = arith.constant 1 : index
    %c48_110 = arith.constant 48 : index
    %c0_111 = arith.constant 0 : index
    %105 = vector.load %arg3[%c1_109, %c48_110, %c0_111] : memref<3x72x32xbf16, #tpu.memory_space<vmem>>, vector<1x8x32xbf16>
    %106 = vector.shape_cast %105 : vector<1x8x32xbf16> to vector<8x32xbf16>
    %cst_112 = arith.constant dense<0.000000e+00> : vector<256x32xf32>
    %107 = tpu.matmul %104, %106, %cst_112 {dimension_numbers = #tpu.dot_dimension_numbers<[1], [0], [0], [1], [0, 0, 1, 1], [], []>} : vector<256x8xbf16>, vector<8x32xbf16>, vector<256x32xf32> -> vector<256x32xf32>
    %108 = arith.addf %101, %107 : vector<256x32xf32>
    %c0_113 = arith.constant 0 : index
    %c60_114 = arith.constant 60 : index
    %c36_115 = arith.constant 36 : index
    %c0_116 = arith.constant 0 : index
    %109 = vector.load %arg1[%c0_113, %c60_114, %c36_115, %c0_116] : memref<1x88x88x8xbf16, #tpu.memory_space<vmem>>, vector<1x16x16x8xbf16>
    %110 = vector.shape_cast %109 : vector<1x16x16x8xbf16> to vector<16x16x8xbf16>
    %111 = vector.shape_cast %110 : vector<16x16x8xbf16> to vector<256x8xbf16>
    %c1_117 = arith.constant 1 : index
    %c56_118 = arith.constant 56 : index
    %c0_119 = arith.constant 0 : index
    %112 = vector.load %arg3[%c1_117, %c56_118, %c0_119] : memref<3x72x32xbf16, #tpu.memory_space<vmem>>, vector<1x8x32xbf16>
    %113 = vector.shape_cast %112 : vector<1x8x32xbf16> to vector<8x32xbf16>
    %cst_120 = arith.constant dense<0.000000e+00> : vector<256x32xf32>
    %114 = tpu.matmul %111, %113, %cst_120 {dimension_numbers = #tpu.dot_dimension_numbers<[1], [0], [0], [1], [0, 0, 1, 1], [], []>} : vector<256x8xbf16>, vector<8x32xbf16>, vector<256x32xf32> -> vector<256x32xf32>
    %115 = arith.addf %108, %114 : vector<256x32xf32>
    %c0_121 = arith.constant 0 : index
    %c60_122 = arith.constant 60 : index
    %c60_123 = arith.constant 60 : index
    %c0_124 = arith.constant 0 : index
    %116 = vector.load %arg1[%c0_121, %c60_122, %c60_123, %c0_124] : memref<1x88x88x8xbf16, #tpu.memory_space<vmem>>, vector<1x16x16x8xbf16>
    %117 = vector.shape_cast %116 : vector<1x16x16x8xbf16> to vector<16x16x8xbf16>
    %118 = vector.shape_cast %117 : vector<16x16x8xbf16> to vector<256x8xbf16>
    %c1_125 = arith.constant 1 : index
    %c64_126 = arith.constant 64 : index
    %c0_127 = arith.constant 0 : index
    %119 = vector.load %arg3[%c1_125, %c64_126, %c0_127] : memref<3x72x32xbf16, #tpu.memory_space<vmem>>, vector<1x8x32xbf16>
    %120 = vector.shape_cast %119 : vector<1x8x32xbf16> to vector<8x32xbf16>
    %cst_128 = arith.constant dense<0.000000e+00> : vector<256x32xf32>
    %121 = tpu.matmul %118, %120, %cst_128 {dimension_numbers = #tpu.dot_dimension_numbers<[1], [0], [0], [1], [0, 0, 1, 1], [], []>} : vector<256x8xbf16>, vector<8x32xbf16>, vector<256x32xf32> -> vector<256x32xf32>
    %122 = arith.addf %115, %121 : vector<256x32xf32>
    %c2 = arith.constant 2 : index
    %c32_129 = arith.constant 32 : index
    %c0_130 = arith.constant 0 : index
    %123 = vector.load %arg3[%c2, %c32_129, %c0_130] : memref<3x72x32xbf16, #tpu.memory_space<vmem>>, vector<1x8x32xbf16>
    %124 = vector.shape_cast %123 : vector<1x8x32xbf16> to vector<8x32xbf16>
    %cst_131 = arith.constant dense<0.000000e+00> : vector<256x32xf32>
    %125 = tpu.matmul %2, %124, %cst_131 {dimension_numbers = #tpu.dot_dimension_numbers<[1], [0], [0], [1], [0, 0, 1, 1], [], []>} : vector<256x8xbf16>, vector<8x32xbf16>, vector<256x32xf32> -> vector<256x32xf32>
    %c0_132 = arith.constant 0 : index
    %c0_133 = arith.constant 0 : index
    %c0_134 = arith.constant 0 : index
    %c0_135 = arith.constant 0 : index
    %126 = vector.load %arg1[%c0_132, %c0_133, %c0_134, %c0_135] : memref<1x88x88x8xbf16, #tpu.memory_space<vmem>>, vector<1x16x16x8xbf16>
    %127 = vector.shape_cast %126 : vector<1x16x16x8xbf16> to vector<16x16x8xbf16>
    %128 = vector.shape_cast %127 : vector<16x16x8xbf16> to vector<256x8xbf16>
    %c2_136 = arith.constant 2 : index
    %c0_137 = arith.constant 0 : index
    %c0_138 = arith.constant 0 : index
    %129 = vector.load %arg3[%c2_136, %c0_137, %c0_138] : memref<3x72x32xbf16, #tpu.memory_space<vmem>>, vector<1x8x32xbf16>
    %130 = vector.shape_cast %129 : vector<1x8x32xbf16> to vector<8x32xbf16>
    %cst_139 = arith.constant dense<0.000000e+00> : vector<256x32xf32>
    %131 = tpu.matmul %128, %130, %cst_139 {dimension_numbers = #tpu.dot_dimension_numbers<[1], [0], [0], [1], [0, 0, 1, 1], [], []>} : vector<256x8xbf16>, vector<8x32xbf16>, vector<256x32xf32> -> vector<256x32xf32>
    %132 = arith.addf %125, %131 : vector<256x32xf32>
    %c0_140 = arith.constant 0 : index
    %c0_141 = arith.constant 0 : index
    %c36_142 = arith.constant 36 : index
    %c0_143 = arith.constant 0 : index
    %133 = vector.load %arg1[%c0_140, %c0_141, %c36_142, %c0_143] : memref<1x88x88x8xbf16, #tpu.memory_space<vmem>>, vector<1x16x16x8xbf16>
    %134 = vector.shape_cast %133 : vector<1x16x16x8xbf16> to vector<16x16x8xbf16>
    %135 = vector.shape_cast %134 : vector<16x16x8xbf16> to vector<256x8xbf16>
    %c2_144 = arith.constant 2 : index
    %c8_145 = arith.constant 8 : index
    %c0_146 = arith.constant 0 : index
    %136 = vector.load %arg3[%c2_144, %c8_145, %c0_146] : memref<3x72x32xbf16, #tpu.memory_space<vmem>>, vector<1x8x32xbf16>
    %137 = vector.shape_cast %136 : vector<1x8x32xbf16> to vector<8x32xbf16>
    %cst_147 = arith.constant dense<0.000000e+00> : vector<256x32xf32>
    %138 = tpu.matmul %135, %137, %cst_147 {dimension_numbers = #tpu.dot_dimension_numbers<[1], [0], [0], [1], [0, 0, 1, 1], [], []>} : vector<256x8xbf16>, vector<8x32xbf16>, vector<256x32xf32> -> vector<256x32xf32>
    %139 = arith.addf %132, %138 : vector<256x32xf32>
    %c0_148 = arith.constant 0 : index
    %c0_149 = arith.constant 0 : index
    %c72 = arith.constant 72 : index
    %c0_150 = arith.constant 0 : index
    %140 = vector.load %arg1[%c0_148, %c0_149, %c72, %c0_150] : memref<1x88x88x8xbf16, #tpu.memory_space<vmem>>, vector<1x16x16x8xbf16>
    %141 = vector.shape_cast %140 : vector<1x16x16x8xbf16> to vector<16x16x8xbf16>
    %142 = vector.shape_cast %141 : vector<16x16x8xbf16> to vector<256x8xbf16>
    %c2_151 = arith.constant 2 : index
    %c16_152 = arith.constant 16 : index
    %c0_153 = arith.constant 0 : index
    %143 = vector.load %arg3[%c2_151, %c16_152, %c0_153] : memref<3x72x32xbf16, #tpu.memory_space<vmem>>, vector<1x8x32xbf16>
    %144 = vector.shape_cast %143 : vector<1x8x32xbf16> to vector<8x32xbf16>
    %cst_154 = arith.constant dense<0.000000e+00> : vector<256x32xf32>
    %145 = tpu.matmul %142, %144, %cst_154 {dimension_numbers = #tpu.dot_dimension_numbers<[1], [0], [0], [1], [0, 0, 1, 1], [], []>} : vector<256x8xbf16>, vector<8x32xbf16>, vector<256x32xf32> -> vector<256x32xf32>
    %146 = arith.addf %139, %145 : vector<256x32xf32>
    %c0_155 = arith.constant 0 : index
    %c36_156 = arith.constant 36 : index
    %c0_157 = arith.constant 0 : index
    %c0_158 = arith.constant 0 : index
    %147 = vector.load %arg1[%c0_155, %c36_156, %c0_157, %c0_158] : memref<1x88x88x8xbf16, #tpu.memory_space<vmem>>, vector<1x16x16x8xbf16>
    %148 = vector.shape_cast %147 : vector<1x16x16x8xbf16> to vector<16x16x8xbf16>
    %149 = vector.shape_cast %148 : vector<16x16x8xbf16> to vector<256x8xbf16>
    %c2_159 = arith.constant 2 : index
    %c24_160 = arith.constant 24 : index
    %c0_161 = arith.constant 0 : index
    %150 = vector.load %arg3[%c2_159, %c24_160, %c0_161] : memref<3x72x32xbf16, #tpu.memory_space<vmem>>, vector<1x8x32xbf16>
    %151 = vector.shape_cast %150 : vector<1x8x32xbf16> to vector<8x32xbf16>
    %cst_162 = arith.constant dense<0.000000e+00> : vector<256x32xf32>
    %152 = tpu.matmul %149, %151, %cst_162 {dimension_numbers = #tpu.dot_dimension_numbers<[1], [0], [0], [1], [0, 0, 1, 1], [], []>} : vector<256x8xbf16>, vector<8x32xbf16>, vector<256x32xf32> -> vector<256x32xf32>
    %153 = arith.addf %146, %152 : vector<256x32xf32>
    %c0_163 = arith.constant 0 : index
    %c36_164 = arith.constant 36 : index
    %c72_165 = arith.constant 72 : index
    %c0_166 = arith.constant 0 : index
    %154 = vector.load %arg1[%c0_163, %c36_164, %c72_165, %c0_166] : memref<1x88x88x8xbf16, #tpu.memory_space<vmem>>, vector<1x16x16x8xbf16>
    %155 = vector.shape_cast %154 : vector<1x16x16x8xbf16> to vector<16x16x8xbf16>
    %156 = vector.shape_cast %155 : vector<16x16x8xbf16> to vector<256x8xbf16>
    %c2_167 = arith.constant 2 : index
    %c40_168 = arith.constant 40 : index
    %c0_169 = arith.constant 0 : index
    %157 = vector.load %arg3[%c2_167, %c40_168, %c0_169] : memref<3x72x32xbf16, #tpu.memory_space<vmem>>, vector<1x8x32xbf16>
    %158 = vector.shape_cast %157 : vector<1x8x32xbf16> to vector<8x32xbf16>
    %cst_170 = arith.constant dense<0.000000e+00> : vector<256x32xf32>
    %159 = tpu.matmul %156, %158, %cst_170 {dimension_numbers = #tpu.dot_dimension_numbers<[1], [0], [0], [1], [0, 0, 1, 1], [], []>} : vector<256x8xbf16>, vector<8x32xbf16>, vector<256x32xf32> -> vector<256x32xf32>
    %160 = arith.addf %153, %159 : vector<256x32xf32>
    %c0_171 = arith.constant 0 : index
    %c72_172 = arith.constant 72 : index
    %c0_173 = arith.constant 0 : index
    %c0_174 = arith.constant 0 : index
    %161 = vector.load %arg1[%c0_171, %c72_172, %c0_173, %c0_174] : memref<1x88x88x8xbf16, #tpu.memory_space<vmem>>, vector<1x16x16x8xbf16>
    %162 = vector.shape_cast %161 : vector<1x16x16x8xbf16> to vector<16x16x8xbf16>
    %163 = vector.shape_cast %162 : vector<16x16x8xbf16> to vector<256x8xbf16>
    %c2_175 = arith.constant 2 : index
    %c48_176 = arith.constant 48 : index
    %c0_177 = arith.constant 0 : index
    %164 = vector.load %arg3[%c2_175, %c48_176, %c0_177] : memref<3x72x32xbf16, #tpu.memory_space<vmem>>, vector<1x8x32xbf16>
    %165 = vector.shape_cast %164 : vector<1x8x32xbf16> to vector<8x32xbf16>
    %cst_178 = arith.constant dense<0.000000e+00> : vector<256x32xf32>
    %166 = tpu.matmul %163, %165, %cst_178 {dimension_numbers = #tpu.dot_dimension_numbers<[1], [0], [0], [1], [0, 0, 1, 1], [], []>} : vector<256x8xbf16>, vector<8x32xbf16>, vector<256x32xf32> -> vector<256x32xf32>
    %167 = arith.addf %160, %166 : vector<256x32xf32>
    %c0_179 = arith.constant 0 : index
    %c72_180 = arith.constant 72 : index
    %c36_181 = arith.constant 36 : index
    %c0_182 = arith.constant 0 : index
    %168 = vector.load %arg1[%c0_179, %c72_180, %c36_181, %c0_182] : memref<1x88x88x8xbf16, #tpu.memory_space<vmem>>, vector<1x16x16x8xbf16>
    %169 = vector.shape_cast %168 : vector<1x16x16x8xbf16> to vector<16x16x8xbf16>
    %170 = vector.shape_cast %169 : vector<16x16x8xbf16> to vector<256x8xbf16>
    %c2_183 = arith.constant 2 : index
    %c56_184 = arith.constant 56 : index
    %c0_185 = arith.constant 0 : index
    %171 = vector.load %arg3[%c2_183, %c56_184, %c0_185] : memref<3x72x32xbf16, #tpu.memory_space<vmem>>, vector<1x8x32xbf16>
    %172 = vector.shape_cast %171 : vector<1x8x32xbf16> to vector<8x32xbf16>
    %cst_186 = arith.constant dense<0.000000e+00> : vector<256x32xf32>
    %173 = tpu.matmul %170, %172, %cst_186 {dimension_numbers = #tpu.dot_dimension_numbers<[1], [0], [0], [1], [0, 0, 1, 1], [], []>} : vector<256x8xbf16>, vector<8x32xbf16>, vector<256x32xf32> -> vector<256x32xf32>
    %174 = arith.addf %167, %173 : vector<256x32xf32>
    %c0_187 = arith.constant 0 : index
    %c72_188 = arith.constant 72 : index
    %c72_189 = arith.constant 72 : index
    %c0_190 = arith.constant 0 : index
    %175 = vector.load %arg1[%c0_187, %c72_188, %c72_189, %c0_190] : memref<1x88x88x8xbf16, #tpu.memory_space<vmem>>, vector<1x16x16x8xbf16>
    %176 = vector.shape_cast %175 : vector<1x16x16x8xbf16> to vector<16x16x8xbf16>
    %177 = vector.shape_cast %176 : vector<16x16x8xbf16> to vector<256x8xbf16>
    %c2_191 = arith.constant 2 : index
    %c64_192 = arith.constant 64 : index
    %c0_193 = arith.constant 0 : index
    %178 = vector.load %arg3[%c2_191, %c64_192, %c0_193] : memref<3x72x32xbf16, #tpu.memory_space<vmem>>, vector<1x8x32xbf16>
    %179 = vector.shape_cast %178 : vector<1x8x32xbf16> to vector<8x32xbf16>
    %cst_194 = arith.constant dense<0.000000e+00> : vector<256x32xf32>
    %180 = tpu.matmul %177, %179, %cst_194 {dimension_numbers = #tpu.dot_dimension_numbers<[1], [0], [0], [1], [0, 0, 1, 1], [], []>} : vector<256x8xbf16>, vector<8x32xbf16>, vector<256x32xf32> -> vector<256x32xf32>
    %181 = arith.addf %174, %180 : vector<256x32xf32>
    %182 = tpu.concatenate %4, %63, %122, %181 in 1 : vector<256x32xf32>, vector<256x32xf32>, vector<256x32xf32>, vector<256x32xf32> -> vector<256x128xf32>
    %183 = arith.truncf %182 : vector<256x128xf32> to vector<256x128xbf16>
    %c0_195 = arith.constant 0 : index
    %c0_196 = arith.constant 0 : index
    %184 = vector.load %arg4[%c0_195, %c0_196] : memref<128x128xbf16, #tpu.memory_space<vmem>>, vector<128x128xbf16>
    %cst_197 = arith.constant dense<0.000000e+00> : vector<256x128xf32>
    %185 = tpu.matmul %183, %184, %cst_197 {dimension_numbers = #tpu.dot_dimension_numbers<[1], [0], [0], [1], [0, 0, 1, 1], [], []>} : vector<256x128xbf16>, vector<128x128xbf16>, vector<256x128xf32> -> vector<256x128xf32>
    %c0_198 = arith.constant 0 : index
    %c0_199 = arith.constant 0 : index
    %c0_200 = arith.constant 0 : index
    %186 = vector.load %arg5[%c0_198, %c0_199, %c0_200] : memref<1x1x128xf32, #tpu.memory_space<vmem>>, vector<1x1x128xf32>
    %187 = vector.shape_cast %186 : vector<1x1x128xf32> to vector<1x128xf32>
    %188 = vector.broadcast %187 : vector<1x128xf32> to vector<256x128xf32>
    %189 = arith.addf %185, %188 : vector<256x128xf32>
    %c0_201 = arith.constant 0 : index
    %c0_202 = arith.constant 0 : index
    %c0_203 = arith.constant 0 : index
    %190 = vector.load %arg6[%c0_201, %c0_202, %c0_203] : memref<1x256x128xf32, #tpu.memory_space<vmem>>, vector<1x256x128xf32>
    %191 = vector.shape_cast %190 : vector<1x256x128xf32> to vector<256x128xf32>
    %192 = vector.shape_cast %189 : vector<256x128xf32> to vector<1x256x128xf32>
    tpu.vector_store %arg6[%c0_201, %c0_202, %c0_203], %192 {strides = array<i32>} : memref<1x256x128xf32, #tpu.memory_space<vmem>>, vector<1x256x128xf32>,
    return
  }
  func.func @transform_0(%arg0: i32) -> (i32, i32, i32, i32) {
    %c0_i32 = arith.constant 0 : i32
    %c0_i32_0 = arith.constant 0 : i32
    %c0_i32_1 = arith.constant 0 : i32
    %c0_i32_2 = arith.constant 0 : i32
    return %arg0, %c0_i32, %c0_i32_0, %c0_i32_1 : i32, i32, i32, i32
  }
  func.func @transform_1(%arg0: i32) -> (i32, i32) {
    %c0_i32 = arith.constant 0 : i32
    %c0_i32_0 = arith.constant 0 : i32
    %c0_i32_1 = arith.constant 0 : i32
    return %c0_i32, %c0_i32_0 : i32, i32
  }
  func.func @transform_2(%arg0: i32) -> (i32, i32, i32) {
    %c0_i32 = arith.constant 0 : i32
    %c0_i32_0 = arith.constant 0 : i32
    %c0_i32_1 = arith.constant 0 : i32
    %c0_i32_2 = arith.constant 0 : i32
    return %c0_i32, %c0_i32_0, %c0_i32_1 : i32, i32, i32
  }
  func.func @transform_3(%arg0: i32) -> (i32, i32) {
    %c0_i32 = arith.constant 0 : i32
    %c0_i32_0 = arith.constant 0 : i32
    %c0_i32_1 = arith.constant 0 : i32
    return %c0_i32, %c0_i32_0 : i32, i32
  }
  func.func @transform_4(%arg0: i32) -> (i32, i32, i32) {
    %c0_i32 = arith.constant 0 : i32
    %c0_i32_0 = arith.constant 0 : i32
    %c0_i32_1 = arith.constant 0 : i32
    return %arg0, %c0_i32, %c0_i32_0 : i32, i32, i32
  }
  func.func @transform_5(%arg0: i32) -> (i32, i32, i32) {
    %c0_i32 = arith.constant 0 : i32
    %c0_i32_0 = arith.constant 0 : i32
    %c0_i32_1 = arith.constant 0 : i32
    return %arg0, %c0_i32, %c0_i32_0 : i32, i32, i32
  }
}

</mosaic_0001>

<bundles_post_ra>
// kernel: tpu_custom_call.1
= control target key start
LH: loop header
LB: loop body
LE: loop exit
PB: predicated region body
PF: predicated region fallthrough
CT: control target
= control target key end

     0   :  { %10 = vsyncpa [#allocation3], 0  ;;  %s20985_s0 = inlined_call_operand.vmem [shape: bf16[2,88,88,8], index: 0, kind: input, shape index: {}]   ;;  %s20986_s1 = inlined_call_operand.vmem [shape: bf16[8,32], index: 1, kind: input, shape index: {}]   ;;  %s20987_s2 = inlined_call_operand.vmem [shape: bf16[3,72,32], index: 2, kind: input, shape index: {}]   ;;  %s20988_s3 = inlined_call_operand.vmem [shape: bf16[128,128], index: 3, kind: input, shape index: {}]   ;;  %s20989_s4 = inlined_call_operand.vmem [shape: f32[2,1,128], index: 4, kind: input, shape index: {}]   ;;  %s20990_s5 = inlined_call_operand.hbm [shape: f32[2,256,128], index: 5, kind: output, shape index: {}]  }
   0x1   :  { %12 = vsyncpa [#allocation3 + $0x1], 0  ;;  %s17138_s18 = smov 0   ;;  %s17140_s19 = smov 0  }
   0x2   :  { %s17142_s20 = smov 0   ;;  %s17144_s21 = smov 0  }
   0x3 LB: > { %s17159_s22 = sadd.s32 4294967295, %s17100_s21   ;;  %s12263_s23 = sadd.s32 4294967294, %s17100_s21   ;;  %s17100_s21 = sphi %s17144_s21, %s21242_s21   ;;  %s17096_s20 = sphi %s17142_s20, %s21241_s20   ;;  %s17092_s19 = sphi %s17140_s19, %s21240_s19   ;;  %s17088_s18 = sphi %s17138_s18, %s21239_s18  }
   0x4   : > { %s17163_s24 = sadd.s32 1, %s17100_s21   ;;  %s140_s25 = sadd.s32 1, %s17096_s20 }
   0x5   : > { %s137_s26 = ssub.s32 %s17100_s21, %s17163_s24  ;;  %p150_p0 = scmp.ne.s32.totalorder %s17096_s20, %s17092_s19 }
   0x6   : > { %p138_p1 = scmp.eq.s32.totalorder %s137_s26, 0  ;;  %p151_p2 = scmp.eq.s32.totalorder %s17159_s22, 1 }
   0x7   : > { %p156_p3 = scmp.ne.s32.totalorder %s17092_s19, %s17088_s18  ;;  %p157_p4 = scmp.eq.s32.totalorder %s12263_s23, 1 }
   0x8   : > { %s17174_s27 = scalar_select %p138_p1, %s17096_s20, %s140_s25  }
   0x9   : > { %p17176_p5 = por %p151_p2, %p150_p0  ;;  %p17180_p6 = por %p157_p4, %p156_p3 }
   0xa   : > { %p12266_p7 = scmp.ge.s32.totalorder %s17100_s21, 1  ;;  %p198_p8 = scmp.lt.s32.totalorder %s17100_s21, 3 }
   0xc   : > { %p199_p9 = pnand %p12266_p7, %p198_p8 }
   0xe   : > { %202 = sbr.rel (%p199_p9) target bundleno = 1520 (0x5f0), region = 40 }
  0x15   : > { %vm548_vm0 = vcmask 1043456   ;;  %v17189_v0 = vld [vmem:[%s20987_s2 + $0x8] sm:$0xf]  ;;  %p229_p10 = scmp.lt.s32.totalorder %s17159_s22, 1  ;;  %v2094_v2 = vld [vmem:[%s20987_s2 + $0xc] sm:$0xf] }
  0x16   : > { %16529 = vmatprep.subr.msk.bf16.mxu1 %vm548_vm0, %v17189_v0  ;;  %v17196_v1 = vsel %vm548_vm0, %v17189_v0, 0  ;;  %v450_v3 = vld [vmem:[%s20986_s1] sm:$0xf]  ;;  %vm335_vm1 = vcmask 1041408   ;;  %vm336_vm2 = vcmask 1045508   ;;  %vm499_vm3 = vcmask 64512  }
  0x17   : > { %15755 = vmatpush3.bf16.msra.mxu1 %v17196_v1  ;;  %s17206_s11 = scalar_select %p229_p10, %s17159_s22, 1  ;;  %16524 = vmatprep.subr.msk.bf16.mxu0 %vm548_vm0, %v450_v3  ;;  %v550_v4 = vsel %vm548_vm0, %v450_v3, 0  ;;  %v747_v5 = vld [vmem:[%s20987_s2] sm:$0xf]  ;;  %vm17216_vm4 = vmor %vm335_vm1, %vm336_vm2  ;;  %v17229_v8 = vld [vmem:[%s20987_s2 + $0x14] sm:$0xf] }
  0x18   : > { %16530 = vmatprep.subr.msk.bf16.mxu1 %vm548_vm0, %v2094_v2  ;;  %14755 = vmatpush3.bf16.msra.mxu0 %v550_v4  ;;  %v2224_v10 = vsel %vm548_vm0, %v2094_v2, 0  ;;  %v877_v22 = vsel %vm548_vm0, %v747_v5, 0  ;;  %v17267_v44 = vld [vmem:[%s20987_s2 + $0x10] sm:$0xf]  ;;  %s17102_s8 = smov 32   ;;  %s17103_s15 = smov 64  }
  0x19   : > { %s16553_s14 = smul.u32 3872, %s17206_s11  ;;  %16525 = vmatprep.subr.msk.bf16.mxu0 %vm548_vm0, %v747_v5  ;;  %vm11799_vm5 = vcmask 261120   ;;  %vm11832_vm6 = vcmask 523264   ;;  %vm11865_vm7 = vcmask 785408   ;;  %s236_s16 = scalar_lea.vmem %s20989_s4, %s17206_s11 }
  0x1a   : > { %s14253_s11 = sshll.u32 %s17159_s22, 12  ;;  %s17105_s10 = smov [#allocation2]  }
  0x1b   : > { %s17223_s17 = scalar_lea.vmem %s20985_s0, %s16553_s14  ;;  %s17104_s14 = smov 96  }
  0x1c   : > { %v16838_v7 = vld [vmem:[%s17223_s17 + $0x598] sm:$0xff]   ;;  %v16839_v9 = vld [vmem:[%s17223_s17 + $0x5c4] sm:$0xff]   ;;  %v12269_v11 = vld [vmem:[%s17223_s17 + $0x640] sm:$0xc]  ;;  %s20934_s7 = scalar_lea.hbm %s20990_s5, %s14253_s11  ;;  %s17042_s12 = sshll.u32 %s17105_s10, 4  ;;  %s17043_s12 = int_to_ptr.vmem [resolvable:$false] %s17042_s12 }
  0x1d   : > { %14908 = vmatprep.mubr.msk.bf16.mxu1 %vm499_vm3, %v16838_v7  ;;  %v12270_v12 = vld [vmem:[%s17223_s17 + $0x644] sm:$0xf]  ;;  %v12271_v13 = vld [vmem:[%s17223_s17 + $0x648] sm:$0x3]  ;;  %v12317_v14 = vrot.slane %v12269_v11, 10  ;;  %v16840_v18 = vld [vmem:[%s17223_s17 + $0x5f0] sm:$0xff]  }
  0x1e   : > { %14909 = vmatmul.mubr.msk.bf16.vlgmr.msra.gmra.mrb[0].mxu1 %vm499_vm3, %v16839_v9  ;;  %v340_v15 = vrot.slane %v12270_v12, 6  ;;  %v343_v16 = vrot.slane %v12271_v13, 6  ;;  %v12272_v17 = vld [vmem:[%s17223_s17 + $0x66c] sm:$0xc]  ;;  %v12273_v19 = vld [vmem:[%s17223_s17 + $0x670] sm:$0xf] }
  0x1f   : > { %14925 = vmatpush3.bf16.msra.mxu1 %v2224_v10  ;;  %v12274_v20 = vld [vmem:[%s17223_s17 + $0x674] sm:$0x3]  ;;  %v12318_v21 = vrot.slane %v12272_v17, 10  ;;  %v347_v25 = vrot.slane %v12273_v19, 6  ;;  %14912 = vmatprep.mubr.msk.bf16.mxu1 %vm499_vm3, %v16840_v18  ;;  %v16841_v27 = vld [vmem:[%s17223_s17 + $0x61c] sm:$0xff]   ;;  %v16842_v33 = vld [vmem:[%s17223_s17 + $0x648] sm:$0xff]  }
  0x20   : > { %v341_v23 = vsel %vm17216_vm4, %v12317_v14, %v340_v15  ;;  %v342_v24 = vrot.slane %v340_v15, 4  ;;  %v350_v26 = vrot.slane %v12274_v20, 6  ;;  %16531 = vmatprep.subr.msk.bf16.mxu1 %vm548_vm0, %v17229_v8  ;;  %v12275_v31 = vld [vmem:[%s17223_s17 + $0x698] sm:$0xc]  ;;  %v12276_v32 = vld [vmem:[%s17223_s17 + $0x69c] sm:$0xf] }
  0x21   : > { %v348_v29 = vsel %vm17216_vm4, %v12318_v21, %v347_v25  ;;  %v349_v30 = vrot.slane %v347_v25, 4  ;;  %v12277_v35 = vld [vmem:[%s17223_s17 + $0x6a0] sm:$0x3]  ;;  %v12319_v36 = vrot.slane %v12275_v31, 10  ;;  %v354_v37 = vrot.slane %v12276_v32, 6  ;;  %v16843_v61 = vld [vmem:[%s17223_s17 + $0x674] sm:$0xff]  }
  0x22   : > { %v344_v28 = vsel %vm17216_vm4, %v342_v24, %v343_v16  ;;  %v12278_v38 = vld [vmem:[%s17223_s17 + $0x6c4] sm:$0xc]  ;;  %v357_v40 = vrot.slane %v12277_v35, 6  ;;  %v12279_v41 = vld [vmem:[%s17223_s17 + $0x6c8] sm:$0xf]  ;;  %v16845_v32 = vld [vmem:[%s17223_s17 + $0x6cc] sm:$0xff]  }
  0x23   : > { %v17256_v34 = vcombine.low %v341_v23, %v344_v28  ;;  %v351_v39 = vsel %vm17216_vm4, %v349_v30, %v350_v26  ;;  %v12280_v42 = vld [vmem:[%s17223_s17 + $0x6cc] sm:$0x3]  ;;  %v12320_v43 = vrot.slane %v12278_v38, 10  ;;  %v355_v46 = vsel %vm17216_vm4, %v12319_v36, %v354_v37  ;;  %v12281_v52 = vld [vmem:[%s17223_s17 + $0x6f0] sm:$0xc]  ;;  %v16844_v10 = vld [vmem:[%s17223_s17 + $0x6a0] sm:$0xff]  }
  0x24   : > { %v17271_v45 = vcombine.low %v348_v29, %v351_v39  ;;  %v356_v47 = vrot.slane %v354_v37, 4  ;;  %v361_v48 = vrot.slane %v12279_v41, 6  ;;  %v364_v49 = vrot.slane %v12280_v42, 6  ;;  %v12282_v53 = vld [vmem:[%s17223_s17 + $0x6f4] sm:$0xf]  ;;  %v17019_v6 = vld [vmem:[%s17223_s17 + $0xd60] sm:$0xff]  }
  0x25   : > { %21042 = vst [vmem:[#allocation5_spill] sm:$0xff] %v17256_v34  ;;  %14756 = vmatprep.mubr.msk.bf16.mxu0 %vm499_vm3, %v17256_v34  ;;  %v12283_v56 = vld [vmem:[%s17223_s17 + $0x6f8] sm:$0x3]  ;;  %v12321_v57 = vrot.slane %v12281_v52, 10  ;;  %v368_v58 = vrot.slane %v12282_v53, 6  ;;  %s17044_s13 = scalar_lea.vmem %s17043_s12, 8192 }
  0x26   : > { %21043 = vst [vmem:[#allocation6_spill] sm:$0xff] %v17271_v45  ;;  %14913 = vmatmul.mubr.msk.bf16.gmra.mrb[4].mxu1 %vm499_vm3, %v16841_v27  ;;  %14757 = vmatmul.mubr.msk.bf16.vlgmr.msra.gmra.mrb[0].mxu0 %vm499_vm3, %v17271_v45  ;;  %v358_v50 = vsel %vm17216_vm4, %v356_v47, %v357_v40  ;;  %v363_v51 = vrot.slane %v361_v48, 4  ;;  %v362_v55 = vsel %vm17216_vm4, %v12320_v43, %v361_v48  ;;  %v12284_v59 = vld [vmem:[%s17223_s17 + $0x71c] sm:$0xc]  ;;  %v371_v62 = vrot.slane %v12283_v56, 6  ;;  %v16847_v56 = vld [vmem:[%s17223_s17 + $0x668] sm:$0xff]  }
  0x27   : > { %14916 = vmatprep.mubr.msk.bf16.mxu1 %vm499_vm3, %v16842_v33  ;;  %v17283_v54 = vcombine.low %v355_v46, %v358_v50  ;;  %14789 = vmatpush3.bf16.msra.mxu0 %v877_v22  ;;  %v12285_v63 = vld [vmem:[%s17223_s17 + $0x720] sm:$0xf]  ;;  %v12286_v2 = vld [vmem:[%s17223_s17 + $0x724] sm:$0x3]  ;;  %v369_v3 = vsel %vm17216_vm4, %v12321_v57, %v368_v58  ;;  %v370_v4 = vrot.slane %v368_v58, 4  ;;  %v12322_v9 = vrot.slane %v12284_v59, 10 }
  0x28   : > { %v365_v60 = vsel %vm17216_vm4, %v363_v51, %v364_v49  ;;  %16526 = vmatprep.subr.msk.bf16.mxu0 %vm548_vm0, %v17267_v44  ;;  %v375_v5 = vrot.slane %v12285_v63, 6  ;;  %v378_v13 = vrot.slane %v12286_v2, 6  ;;  %v12287_v14 = vld [vmem:[%s17223_s17 + $0x748] sm:$0xc]  ;;  %v12288_v15 = vld [vmem:[%s17223_s17 + $0x74c] sm:$0xf] }
  0x29   : > { %21044 = vst [vmem:[#allocation7_spill] sm:$0xff] %v17283_v54  ;;  %14760 = vmatprep.mubr.msk.bf16.mxu0 %vm499_vm3, %v17283_v54  ;;  %v17300_v7 = vcombine.low %v362_v55, %v365_v60  ;;  %v372_v11 = vsel %vm17216_vm4, %v370_v4, %v371_v62  ;;  %v12289_v17 = vld [vmem:[%s17223_s17 + $0x750] sm:$0x3]  ;;  %v12323_v18 = vrot.slane %v12287_v14, 10  ;;  %v382_v19 = vrot.slane %v12288_v15, 6  ;;  %v16846_v40 = vld [vmem:[%s17223_s17 + $0x63c] sm:$0xff]  }
  0x2a   : > { %v377_v12 = vrot.slane %v375_v5, 4  ;;  %v17307_v16 = vcombine.low %v369_v3, %v372_v11  ;;  %v385_v20 = vrot.slane %v12289_v17, 6  ;;  %v12290_v21 = vld [vmem:[%s17223_s17 + $0x774] sm:$0xc]  ;;  %v12291_v22 = vld [vmem:[%s17223_s17 + $0x778] sm:$0xf]  ;;  %v376_v25 = vsel %vm17216_vm4, %v12322_v9, %v375_v5 }
  0x2b   : > { %21045 = vst [vmem:[#allocation8_spill] sm:$0xff] %v17300_v7  ;;  %v384_v23 = vrot.slane %v382_v19, 4  ;;  %v389_v24 = vrot.slane %v12291_v22, 6  ;;  %v12292_v27 = vld [vmem:[%s17223_s17 + $0x77c] sm:$0x3]  ;;  %v383_v28 = vsel %vm17216_vm4, %v12323_v18, %v382_v19  ;;  %v12324_v33 = vrot.slane %v12290_v21, 10 }
  0x2c   : > { %21046 = vst [vmem:[#allocation9_spill] sm:$0xff] %v17307_v16  ;;  %v379_v26 = vsel %vm17216_vm4, %v377_v12, %v378_v13  ;;  %v12293_v30 = vld [vmem:[%s17223_s17 + $0x7a0] sm:$0xc]  ;;  %v12294_v31 = vld [vmem:[%s17223_s17 + $0x7a4] sm:$0xf]  ;;  %v392_v39 = vrot.slane %v12292_v27, 6 }
  0x2d   : > { %v386_v29 = vsel %vm17216_vm4, %v384_v23, %v385_v20  ;;  %v12295_v35 = vld [vmem:[%s17223_s17 + $0x7a8] sm:$0x3]  ;;  %v396_v36 = vrot.slane %v12294_v31, 6  ;;  %v17331_v37 = vcombine.low %v376_v25, %v379_v26  ;;  %v391_v38 = vrot.slane %v389_v24, 4  ;;  %v12297_v43 = vld [vmem:[%s17223_s17 + $0x7d0] sm:$0xf] }
  0x2e   : > { %14917 = vmatmul.mubr.msk.bf16.gmra.mrb[8].mxu1 %vm499_vm3, %v16843_v61  ;;  %14761 = vmatmul.mubr.msk.bf16.gmra.mrb[4].mxu0 %vm499_vm3, %v17300_v7  ;;  %v12325_v41 = vrot.slane %v12293_v30, 10  ;;  %v17334_v42 = vcombine.low %v383_v28, %v386_v29  ;;  %v399_v47 = vrot.slane %v12295_v35, 6  ;;  %v12300_v48 = vld [vmem:[%s17223_s17 + $0x7fc] sm:$0xf]  ;;  %v12296_v49 = vld [vmem:[%s17223_s17 + $0x7cc] sm:$0xc]  ;;  %v390_v50 = vsel %vm17216_vm4, %v12324_v33, %v389_v24 }
  0x2f   : > { %14920 = vmatprep.mubr.msk.bf16.mxu1 %vm499_vm3, %v16844_v10  ;;  %14764 = vmatprep.mubr.msk.bf16.mxu0 %vm499_vm3, %v17307_v16  ;;  %21047 = vst [vmem:[#allocation10_spill] sm:$0xff] %v17331_v37  ;;  %v398_v46 = vrot.slane %v396_v36, 4  ;;  %v393_v51 = vsel %vm17216_vm4, %v391_v38, %v392_v39  ;;  %v12298_v52 = vld [vmem:[%s17223_s17 + $0x7d4] sm:$0x3]  ;;  %v403_v53 = vrot.slane %v12297_v43, 6  ;;  %v410_v59 = vrot.slane %v12300_v48, 6 }
  0x30   : > { %21048 = vst [vmem:[#allocation11_spill] sm:$0xff] %v17334_v42  ;;  %v12299_v55 = vld [vmem:[%s17223_s17 + $0x7f8] sm:$0xc]  ;;  %v397_v57 = vsel %vm17216_vm4, %v12325_v41, %v396_v36  ;;  %v12301_v60 = vld [vmem:[%s17223_s17 + $0x800] sm:$0x3]  ;;  %v17357_v61 = vcombine.low %v390_v50, %v393_v51  ;;  %v2581_v62 = vsel %vm548_vm0, %v17229_v8, 0 }
  0x31   : > { %v400_v58 = vsel %vm17216_vm4, %v398_v46, %v399_v47  ;;  %v12326_v63 = vrot.slane %v12296_v49, 10  ;;  %v12303_v2 = vld [vmem:[%s17223_s17 + $0x828] sm:$0xf]  ;;  %v405_v4 = vrot.slane %v403_v53, 4  ;;  %v406_v5 = vrot.slane %v12298_v52, 6  ;;  %v16848_v9 = vld [vmem:[%s17223_s17 + $0x694] sm:$0xff]  }
  0x32   : > { %21049 = vst [vmem:[#allocation12_spill] sm:$0xff] %v17357_v61  ;;  %v17362_v3 = vcombine.low %v397_v57, %v400_v58  ;;  %v12327_v10 = vrot.slane %v12299_v55, 10  ;;  %v17368_v11 = vld [vmem:[%s20987_s2 + $0x18] sm:$0xf]  ;;  %v412_v12 = vrot.slane %v410_v59, 4  ;;  %v413_v13 = vrot.slane %v12301_v60, 6 }
  0x33   : > { %v12302_v14 = vld [vmem:[%s17223_s17 + $0x824] sm:$0xc]  ;;  %v12304_v8 = vld [vmem:[%s17223_s17 + $0x82c] sm:$0x3]  ;;  %v12306_v15 = vld [vmem:[%s17223_s17 + $0x854] sm:$0xf]  ;;  %v404_v19 = vsel %vm17216_vm4, %v12326_v63, %v403_v53  ;;  %v407_v20 = vsel %vm17216_vm4, %v405_v4, %v406_v5 }
  0x34   : > { %21050 = vst [vmem:[#allocation13_spill] sm:$0xff] %v17362_v3  ;;  %v417_v17 = vrot.slane %v12303_v2, 6  ;;  %v12305_v18 = vld [vmem:[%s17223_s17 + $0x850] sm:$0xc]  ;;  %v424_v21 = vrot.slane %v12306_v15, 6  ;;  %v16849_v22 = vld [vmem:[%s17223_s17 + $0x6c0] sm:$0xff]   ;;  %v411_v23 = vsel %vm17216_vm4, %v12327_v10, %v410_v59  ;;  %v414_v24 = vsel %vm17216_vm4, %v412_v12, %v413_v13 }
  0x35   : > { %v16850_v25 = vld [vmem:[%s17223_s17 + $0x6ec] sm:$0xff]   ;;  %v12307_v26 = vld [vmem:[%s17223_s17 + $0x858] sm:$0x3]  ;;  %v12328_v27 = vrot.slane %v12302_v14, 10  ;;  %v420_v29 = vrot.slane %v12304_v8, 6  ;;  %v12329_v30 = vrot.slane %v12305_v18, 10  ;;  %v17397_v35 = vcombine.low %v411_v23, %v414_v24 }
  0x36   : > { %14921 = vmatmul.mubr.msk.bf16.gmra.mrb[12].mxu1 %vm499_vm3, %v16845_v32  ;;  %14765 = vmatmul.mubr.msk.bf16.gmra.mrb[8].mxu0 %vm499_vm3, %v17331_v37  ;;  %v419_v28 = vrot.slane %v417_v17, 4  ;;  %v12308_v31 = vld [vmem:[%s17223_s17 + $0x87c] sm:$0xc]  ;;  %v17394_v32 = vcombine.low %v404_v19, %v407_v20  ;;  %v12309_v33 = vld [vmem:[%s17223_s17 + $0x880] sm:$0xf]  ;;  %v426_v36 = vrot.slane %v424_v21, 4 }
  0x37   : > { %14926 = vmatprep.mubr.msk.bf16.mxu1 %vm499_vm3, %v16846_v40  ;;  %14768 = vmatprep.mubr.msk.bf16.mxu0 %vm499_vm3, %v17334_v42  ;;  %21052 = vst [vmem:[#allocation15_spill] sm:$0xff] %v17397_v35  ;;  %v427_v38 = vrot.slane %v12307_v26, 6  ;;  %v12310_v39 = vld [vmem:[%s17223_s17 + $0x884] sm:$0x3]  ;;  %v12312_v40 = vld [vmem:[%s17223_s17 + $0x8ac] sm:$0xf]  ;;  %v418_v46 = vsel %vm17216_vm4, %v12328_v27, %v417_v17  ;;  %v425_v50 = vsel %vm17216_vm4, %v12329_v30, %v424_v21 }
  0x38   : > { %21051 = vst [vmem:[#allocation14_spill] sm:$0xff] %v17394_v32  ;;  %v12330_v41 = vrot.slane %v12308_v31, 10  ;;  %v431_v43 = vrot.slane %v12309_v33, 6  ;;  %v421_v47 = vsel %vm17216_vm4, %v419_v28, %v420_v29  ;;  %v16851_v48 = vld [vmem:[%s17223_s17 + $0x718] sm:$0xff]   ;;  %v12311_v49 = vld [vmem:[%s17223_s17 + $0x8a8] sm:$0xc] }
  0x39   : > { %v428_v51 = vsel %vm17216_vm4, %v426_v36, %v427_v38  ;;  %v434_v52 = vrot.slane %v12310_v39, 6  ;;  %v16852_v53 = vld [vmem:[%s17223_s17 + $0x744] sm:$0xff]   ;;  %v438_v55 = vrot.slane %v12312_v40, 6  ;;  %v17419_v57 = vcombine.low %v418_v46, %v421_v47  ;;  %v12314_v4 = vld [vmem:[%s17223_s17 + $0x8d4] sm:$0xc]  ;;  %v16854_v18 = vld [vmem:[%s17223_s17 + $0x79c] sm:$0xff]  }
  0x3a   : > { %v433_v58 = vrot.slane %v431_v43, 4  ;;  %v12331_v59 = vrot.slane %v12311_v49, 10  ;;  %v17421_v60 = vcombine.low %v425_v50, %v428_v51  ;;  %v432_v5 = vsel %vm17216_vm4, %v12330_v41, %v431_v43  ;;  %v12316_v14 = vld [vmem:[%s17223_s17 + $0x8dc] sm:$0x3]  ;;  %v16853_v8 = vld [vmem:[%s17223_s17 + $0x770] sm:$0xff]   ;;  %v16855_v24 = vld [vmem:[%s17223_s17 + $0x7c8] sm:$0xff]  }
  0x3b   : > { %21053 = vst [vmem:[#allocation16_spill] sm:$0xff] %v17419_v57  ;;  %v440_v63 = vrot.slane %v438_v55, 4  ;;  %v12332_v17 = vrot.slane %v12314_v4, 10  ;;  %v448_v21 = vrot.slane %v12316_v14, 6  ;;  %v16858_v26 = vld [vmem:[%s17223_s17 + $0x7f4] sm:$0xff]   ;;  %v16856_v27 = vld [vmem:[%s17223_s17 + $0x42c] sm:$0xff]  }
  0x3c   : > { %21054 = vst [vmem:[#allocation17_spill] sm:$0xff] %v17421_v60  ;;  %v439_v12 = vsel %vm17216_vm4, %v12331_v59, %v438_v55  ;;  %v16857_v28 = vld [vmem:[%s17223_s17 + $0x458] sm:$0xff]   ;;  %v16859_v29 = vld [vmem:[%s17223_s17 + $0x820] sm:$0xff]   ;;  %v16862_v30 = vld [vmem:[%s17223_s17 + $0x84c] sm:$0xff]   ;;  %v1041_v33 = vsel %vm548_vm0, %v17267_v44, 0  ;;  %v2939_v50 = vsel %vm548_vm0, %v17368_v11, 0 }
  0x3d   : > { %v16860_v31 = vld [vmem:[%s17223_s17 + $0x484] sm:$0xff]   ;;  %v16863_v36 = vld [vmem:[%s17223_s17 + $0x878] sm:$0xff]   ;;  %v16861_v38 = vld [vmem:[%s17223_s17 + $0x4b0] sm:$0xff]  }
  0x3e   : > { %14927 = vmatmul.mubr.msk.bf16.vlgmr.msra.gmra.mrb[16].mxu1 %vm499_vm3, %v16847_v56  ;;  %14769 = vmatmul.mubr.msk.bf16.gmra.mrb[12].mxu0 %vm499_vm3, %v17357_v61  ;;  %v12313_v56 = vld [vmem:[%s17223_s17 + $0x8b0] sm:$0x3]  ;;  %v16866_v39 = vld [vmem:[%s17223_s17 + $0x8a4] sm:$0xff]   ;;  %v16864_v40 = vld [vmem:[%s17223_s17 + $0x4dc] sm:$0xff]  }
  0x3f   : > { %14959 = vmatpush3.bf16.msra.mxu1 %v2581_v62  ;;  %14772 = vmatprep.mubr.msk.bf16.mxu0 %vm499_vm3, %v17362_v3  ;;  %v12315_v62 = vld [vmem:[%s17223_s17 + $0x8d8] sm:$0xf]  ;;  %v441_v2 = vrot.slane %v12313_v56, 6  ;;  %v1412_v44 = vld [vmem:[%s20987_s2 + $0x4] sm:$0xf]  ;;  %v16865_v41 = vld [vmem:[%s17223_s17 + $0x508] sm:$0xff]  }
  0x40   : > { %14930 = vmatprep.mubr.msk.bf16.mxu1 %vm499_vm3, %v16848_v9  ;;  %16532 = vmatprep.subr.msk.bf16.mxu1 %vm548_vm0, %v17368_v11  ;;  %v435_v9 = vsel %vm17216_vm4, %v433_v58, %v434_v52  ;;  %v445_v10 = vrot.slane %v12315_v62, 6  ;;  %v16867_v43 = vld [vmem:[%s17223_s17 + $0x8d0] sm:$0xff]   ;;  %v16870_v46 = vld [vmem:[%s17223_s17 + $0x648] sm:$0xff]   ;;  %v16869_v49 = vld [vmem:[%s17223_s17 + $0x560] sm:$0xff]  }
  0x41   : > { %v442_v13 = vsel %vm17216_vm4, %v440_v63, %v441_v2  ;;  %v17441_v15 = vcombine.low %v432_v5, %v435_v9  ;;  %v16868_v47 = vld [vmem:[%s17223_s17 + $0x534] sm:$0xff]   ;;  %v16872_v51 = vld [vmem:[%s17223_s17 + $0x58c] sm:$0xff]   ;;  %v16874_v52 = vld [vmem:[%s17223_s17 + $0x6a0] sm:$0xff]  }
  0x42   : > { %v17444_v19 = vcombine.low %v439_v12, %v442_v13  ;;  %v447_v20 = vrot.slane %v445_v10, 4  ;;  %v16873_v11 = vld [vmem:[%s17223_s17 + $0x5b8] sm:$0xff]   ;;  %v16875_v55 = vld [vmem:[%s17223_s17 + $0x6cc] sm:$0xff]   ;;  %v16876_v58 = vld [vmem:[%s17223_s17 + $0x5e4] sm:$0xff]  }
  0x43   : > { %21055 = vst [vmem:[#allocation18_spill] sm:$0xff] %v17441_v15  ;;  %v16878_v56 = vld [vmem:[%s17223_s17 + $0x6f8] sm:$0xff]   ;;  %v16879_v59 = vld [vmem:[%s17223_s17 + $0x724] sm:$0xff]   ;;  %v16877_v62 = vld [vmem:[%s17223_s17 + $0x610] sm:$0xff]  }
  0x44   : > { %21056 = vst [vmem:[#allocation19_spill] sm:$0xff] %v17444_v19  ;;  %v449_v23 = vsel %vm17216_vm4, %v447_v20, %v448_v21  ;;  %v16882_v63 = vld [vmem:[%s17223_s17 + $0x750] sm:$0xff]   ;;  %v16880_v2 = vld [vmem:[%s17223_s17 + $0x63c] sm:$0xff]   ;;  %v16881_v5 = vld [vmem:[%s17223_s17 + $0x668] sm:$0xff]  }
  0x45   : > { %v16883_v4 = vld [vmem:[%s17223_s17 + $0x77c] sm:$0xff]   ;;  %v16886_v9 = vld [vmem:[%s17223_s17 + $0x7a8] sm:$0xff]   ;;  %v16887_v12 = vld [vmem:[%s17223_s17 + $0x7d4] sm:$0xff]  }
  0x46   : > { %14931 = vmatmul.mubr.msk.bf16.gmra.mrb[20].mxu1 %vm499_vm3, %v16849_v22  ;;  %14773 = vmatmul.mubr.msk.bf16.gmra.mrb[16].mxu0 %vm499_vm3, %v17394_v32  ;;  %v446_v22 = vsel %vm17216_vm4, %v12332_v17, %v445_v10  ;;  %v16884_v10 = vld [vmem:[%s17223_s17 + $0x694] sm:$0xff]   ;;  %v16885_v13 = vld [vmem:[%s17223_s17 + $0x6c0] sm:$0xff]  }
  0x47   : > { %14934 = vmatprep.mubr.msk.bf16.mxu1 %vm499_vm3, %v16850_v25  ;;  %14776 = vmatprep.mubr.msk.bf16.mxu0 %vm499_vm3, %v17397_v35  ;;  %v17457_v25 = vcombine.low %v446_v22, %v449_v23  ;;  %v16888_v14 = vld [vmem:[%s17223_s17 + $0x800] sm:$0xff]   ;;  %v16890_v17 = vld [vmem:[%s17223_s17 + $0x858] sm:$0xff]   ;;  %v16892_v21 = vld [vmem:[%s17223_s17 + $0x8b0] sm:$0xff]  }
  0x48   : > { %v16891_v20 = vld [vmem:[%s17223_s17 + $0x884] sm:$0xff]   ;;  %v16893_v22 = vld [vmem:[%s17223_s17 + $0x8dc] sm:$0xff]   ;;  %v16894_v23 = vld [vmem:[%s17223_s17 + $0x84c] sm:$0xff]  }
  0x49   : > { %21057 = vst [vmem:[#allocation20_spill] sm:$0xff] %v17457_v25 }
  0x4e   : > { %14935 = vmatmul.mubr.msk.bf16.gmra.mrb[24].mxu1 %vm499_vm3, %v16851_v48  ;;  %14777 = vmatmul.mubr.msk.bf16.gmra.mrb[20].mxu0 %vm499_vm3, %v17419_v57  ;;  %v16871_v48 = vld [vmem:[%s17223_s17 + $0x674] sm:$0xff]  }
  0x4f   : > { %14938 = vmatprep.mubr.msk.bf16.mxu1 %vm499_vm3, %v16852_v53  ;;  %14780 = vmatprep.mubr.msk.bf16.mxu0 %vm499_vm3, %v17421_v60  ;;  %v3342_v53 = vld [vmem:[%s20987_s2 + $0x1c] sm:$0xf] }
  0x56   : > { %14939 = vmatmul.mubr.msk.bf16.gmra.mrb[28].mxu1 %vm499_vm3, %v16853_v8  ;;  %14781 = vmatmul.mubr.msk.bf16.gmra.mrb[24].mxu0 %vm499_vm3, %v17441_v15  ;;  %v16889_v8 = vld [vmem:[%s17223_s17 + $0x82c] sm:$0xff]  }
  0x57   : > { %14942 = vmatprep.mubr.msk.bf16.mxu1 %vm499_vm3, %v16854_v18  ;;  %14784 = vmatprep.mubr.msk.bf16.mxu0 %vm499_vm3, %v17444_v19  ;;  %v1510_v18 = vsel %vm548_vm0, %v1412_v44, 0 }
  0x5e   : > { %14943 = vmatmul.mubr.msk.bf16.gmra.mrb[0].mxu1 %vm499_vm3, %v16855_v24  ;;  %14785 = vmatmul.mubr.msk.bf16.gmra.mrb[28].mxu0 %vm499_vm3, %v17457_v25  ;;  %v3440_v24 = vsel %vm548_vm0, %v3342_v53, 0 }
  0x5f   : > { %14946 = vmatprep.mubr.msk.bf16.mxu1 %vm499_vm3, %v16858_v26  ;;  %14790 = vmatprep.mubr.msk.bf16.mxu0 %vm499_vm3, %v16856_v27  ;;  %v16896_v26 = vld [vmem:[%s17223_s17 + $0x8a4] sm:$0xff]   ;;  %v17574_v27 = vld [vmem:[%s17223_s17 + $0x430] sm:$0xc] }
  0x66   : > { %14947 = vmatmul.mubr.msk.bf16.gmra.mrb[4].mxu1 %vm499_vm3, %v16859_v29  ;;  %14791 = vmatmul.mubr.msk.bf16.vlgmr.msra.gmra.mrb[32].mxu0 %vm499_vm3, %v16857_v28  ;;  %v17579_v28 = vld [vmem:[%s20987_s2 + $0x20] sm:$0xf]  ;;  %v17584_v29 = vld [vmem:[%s17223_s17 + $0x434] sm:$0xf] }
  0x67   : > { %14950 = vmatprep.mubr.msk.bf16.mxu1 %vm499_vm3, %v16862_v30  ;;  %14794 = vmatprep.mubr.msk.bf16.mxu0 %vm499_vm3, %v16860_v31  ;;  %v17587_v30 = vld [vmem:[%s17223_s17 + $0x460] sm:$0xf]  ;;  %v16897_v31 = vld [vmem:[%s17223_s17 + $0x8d0] sm:$0xff]  }
  0x68   : > { %14823 = vmatpush3.bf16.msra.mxu0 %v1041_v33  ;;  %v16898_v33 = vld [vmem:[%s17223_s17 + $0x8fc] sm:$0xff]  }
  0x69   : > { %16527 = vmatprep.subr.msk.bf16.mxu0 %vm548_vm0, %v1412_v44  ;;  %v17605_v44 = vld [vmem:[%s17223_s17 + $0x464] sm:$0x3] }
  0x6e   : > { %14951 = vmatmul.mubr.msk.bf16.gmra.mrb[8].mxu1 %vm499_vm3, %v16863_v36  ;;  %14795 = vmatmul.mubr.msk.bf16.gmra.mrb[36].mxu0 %vm499_vm3, %v16861_v38  ;;  %v12493_v36 = vrot.slane %v17574_v27, 10  ;;  %v17598_v38 = vld [vmem:[%s17223_s17 + $0x438] sm:$0x3] }
  0x6f   : > { %14954 = vmatprep.mubr.msk.bf16.mxu1 %vm499_vm3, %v16866_v39  ;;  %14798 = vmatprep.mubr.msk.bf16.mxu0 %vm499_vm3, %v16864_v40  ;;  %v1302_v39 = vrot.slane %v17584_v29, 6  ;;  %v17602_v40 = vld [vmem:[%s17223_s17 + $0x45c] sm:$0xc]  ;;  %v17779_v29 = vld [vmem:[%s17223_s17 + $0x884] sm:$0x3] }
  0x76   : > { %14955 = vmatmul.mubr.msk.bf16.gmra.mrb[12].mxu1 %vm499_vm3, %v16867_v43  ;;  %14799 = vmatmul.mubr.msk.bf16.gmra.mrb[40].mxu0 %vm499_vm3, %v16865_v41  ;;  %v20995_v41 = vrot.slane %v17587_v30, 6  ;;  %v17609_v43 = vld [vmem:[%s17223_s17 + $0x488] sm:$0xc] }
  0x77   : > { %14960 = vmatprep.mubr.msk.bf16.mxu1 %vm499_vm3, %v16870_v46  ;;  %14802 = vmatprep.mubr.msk.bf16.mxu0 %vm499_vm3, %v16868_v47  ;;  %v17612_v46 = vld [vmem:[%s17223_s17 + $0x48c] sm:$0xf]  ;;  %v17615_v47 = vld [vmem:[%s17223_s17 + $0x490] sm:$0x3] }
  0x78   : > { %v21065_v27 = vrot.slane %v17612_v46, 6 }
  0x7e   : > { %14961 = vmatmul.mubr.msk.bf16.vlgmr.msra.gmra.mrb[16].mxu1 %vm499_vm3, %v16871_v48  ;;  %14803 = vmatmul.mubr.msk.bf16.gmra.mrb[44].mxu0 %vm499_vm3, %v16869_v49  ;;  %v17619_v48 = vld [vmem:[%s17223_s17 + $0x4b4] sm:$0xc]  ;;  %v17622_v49 = vld [vmem:[%s17223_s17 + $0x4b8] sm:$0xf] }
  0x7f   : > { %14993 = vmatpush3.bf16.msra.mxu1 %v2939_v50  ;;  %14806 = vmatprep.mubr.msk.bf16.mxu0 %vm499_vm3, %v16872_v51  ;;  %v17629_v50 = vrot.slane %v1302_v39, 4  ;;  %v17754_v51 = vld [vmem:[%s17223_s17 + $0x594] sm:$0xf] }
  0x80   : > { %14964 = vmatprep.mubr.msk.bf16.mxu1 %vm499_vm3, %v16874_v52  ;;  %16533 = vmatprep.subr.msk.bf16.mxu1 %vm548_vm0, %v3342_v53  ;;  %v17733_v52 = vld [vmem:[%s17223_s17 + $0x880] sm:$0xf]  ;;  %v21058_v53 = vrot.slane %v17598_v38, 6  ;;  %v21061_v38 = vrot.slane %v17602_v40, 10  ;;  %v17819_v40 = vld [vmem:[%s17223_s17 + $0x8a8] sm:$0xc] }
  0x86   : > { %14965 = vmatmul.mubr.msk.bf16.gmra.mrb[20].mxu1 %vm499_vm3, %v16875_v55  ;;  %14807 = vmatmul.mubr.msk.bf16.gmra.mrb[48].mxu0 %vm499_vm3, %v16873_v11  ;;  %v16899_v11 = vld [vmem:[%s17223_s17 + $0x928] sm:$0xff]   ;;  %v17639_v55 = vrot.slane %v20995_v41, 4 }
  0x87   : > { %14968 = vmatprep.mubr.msk.bf16.mxu1 %vm499_vm3, %v16878_v56  ;;  %14810 = vmatprep.mubr.msk.bf16.mxu0 %vm499_vm3, %v16876_v58  ;;  %v17643_v58 = vld [vmem:[%s17223_s17 + $0x4e4] sm:$0xf]  ;;  %v17726_v56 = vld [vmem:[%s17223_s17 + $0x858] sm:$0x3] }
  0x8e   : > { %14969 = vmatmul.mubr.msk.bf16.gmra.mrb[24].mxu1 %vm499_vm3, %v16879_v59  ;;  %14811 = vmatmul.mubr.msk.bf16.gmra.mrb[52].mxu0 %vm499_vm3, %v16877_v62  ;;  %v17646_v59 = vld [vmem:[%s17223_s17 + $0x510] sm:$0xf]  ;;  %v16900_v62 = vld [vmem:[%s17223_s17 + $0x954] sm:$0xff]  }
  0x8f   : > { %14972 = vmatprep.mubr.msk.bf16.mxu1 %vm499_vm3, %v16882_v63  ;;  %14814 = vmatprep.mubr.msk.bf16.mxu0 %vm499_vm3, %v16880_v2  ;;  %v20994_v63 = vrot.slane %v17612_v46, 6 }
  0x96   : > { %14973 = vmatmul.mubr.msk.bf16.gmra.mrb[28].mxu1 %vm499_vm3, %v16883_v4  ;;  %14815 = vmatmul.mubr.msk.bf16.gmra.mrb[56].mxu0 %vm499_vm3, %v16881_v5  ;;  %v17652_v4 = vld [vmem:[%s17223_s17 + $0x4bc] sm:$0x3] }
  0x97   : > { %14976 = vmatprep.mubr.msk.bf16.mxu1 %vm499_vm3, %v16886_v9  ;;  %14818 = vmatprep.mubr.msk.bf16.mxu0 %vm499_vm3, %v16884_v10  ;;  %v20992_v9 = vrot.slane %v17622_v49, 6  ;;  %v17657_v10 = vld [vmem:[%s17223_s17 + $0x4e0] sm:$0xc] }
  0x9e   : > { %14977 = vmatmul.mubr.msk.bf16.gmra.mrb[0].mxu1 %vm499_vm3, %v16887_v12  ;;  %14819 = vmatmul.mubr.msk.bf16.gmra.mrb[60].mxu0 %vm499_vm3, %v16885_v13  ;;  %v17660_v12 = vld [vmem:[%s17223_s17 + $0x4e8] sm:$0x3]  ;;  %v17663_v13 = vld [vmem:[%s17223_s17 + $0x50c] sm:$0xc] }
  0x9f   : > { %14980 = vmatprep.mubr.msk.bf16.mxu1 %vm499_vm3, %v16888_v14  ;;  %14824 = vmatprep.mubr.msk.bf16.mxu0 %vm499_vm3, %v17256_v34  ;;  %v20991_v14 = vrot.slane %v17643_v58, 6  ;;  %v17966_v34 = vld [vmem:[%s17223_s17 + $0x644] sm:$0xf] }
  0xa6   : > { %14981 = vmatmul.mubr.msk.bf16.gmra.mrb[4].mxu1 %vm499_vm3, %v16889_v8  ;;  %14825 = vmatmul.mubr.msk.bf16.vlgmr.msra.gmra.mrb[32].mxu0 %vm499_vm3, %v17271_v45  ;;  %v17667_v8 = vld [vmem:[%s17223_s17 + $0x514] sm:$0x3]  ;;  %v17963_v45 = vld [vmem:[%s17223_s17 + $0x640] sm:$0xc] }
  0xa7   : > { %14984 = vmatprep.mubr.msk.bf16.mxu1 %vm499_vm3, %v16890_v17  ;;  %14828 = vmatprep.mubr.msk.bf16.mxu0 %vm499_vm3, %v17283_v54  ;;  %v20993_v17 = vrot.slane %v17646_v59, 6  ;;  %v17956_v54 = vld [vmem:[%s17223_s17 + $0x92c] sm:$0xc]  ;;  %21078 = vst [vmem:[#allocation23_spill] sm:$0xff] %v17963_v45 }
  0xa8   : > { %14857 = vmatpush3.bf16.msra.mxu0 %v1510_v18  ;;  %v17673_v18 = vrot.slane %v20994_v63, 4  ;;  %v1303_v63 = vsel %vm17216_vm4, %v12493_v36, %v1302_v39  ;;  %v17786_v36 = vld [vmem:[%s17223_s17 + $0x598] sm:$0x3]  ;;  %v17790_v39 = vld [vmem:[%s17223_s17 + $0x5bc] sm:$0xc] }
  0xa9   : > { %16528 = vmatprep.subr.msk.bf16.mxu0 %vm548_vm0, %v17189_v0  ;;  %v16895_v0 = vld [vmem:[%s17223_s17 + $0x878] sm:$0xff]  }
  0xae   : > { %14985 = vmatmul.mubr.msk.bf16.gmra.mrb[8].mxu1 %vm499_vm3, %v16891_v20  ;;  %14829 = vmatmul.mubr.msk.bf16.gmra.mrb[36].mxu0 %vm499_vm3, %v17300_v7  ;;  %v17712_v20 = vld [vmem:[%s17223_s17 + $0x540] sm:$0x3]  ;;  %v17879_v7 = vld [vmem:[%s17223_s17 + $0x614] sm:$0xc] }
  0xaf   : > { %14988 = vmatprep.mubr.msk.bf16.mxu1 %vm499_vm3, %v16892_v21  ;;  %14832 = vmatprep.mubr.msk.bf16.mxu0 %vm499_vm3, %v17307_v16  ;;  %v17677_v21 = vld [vmem:[%s17223_s17 + $0x53c] sm:$0xf]  ;;  %21069 = vst [vmem:[#allocation21_spill] sm:$0xff] %v17879_v7  ;;  %v21080_v7 = vrot.slane %v17663_v13, 10  ;;  %v21084_v13 = vrot.slane %v17712_v20, 6 }
  0xb0   : > { %v20996_v5 = vrot.slane %v17677_v21, 6  ;;  %v18006_v20 = vld [vmem:[%s17223_s17 + $0x95c] sm:$0xf] }
  0xb2   : > { %v17740_v41 = vrot.slane %v20996_v5, 4 }
  0xb6   : > { %14989 = vmatmul.mubr.msk.bf16.gmra.mrb[12].mxu1 %vm499_vm3, %v16893_v22  ;;  %14833 = vmatmul.mubr.msk.bf16.gmra.mrb[40].mxu0 %vm499_vm3, %v17331_v37  ;;  %v17684_v22 = vrot.slane %v20992_v9, 4  ;;  %v17719_v9 = vld [vmem:[%s17223_s17 + $0x56c] sm:$0x3]  ;;  %v17875_v37 = vld [vmem:[%s17223_s17 + $0x5f0] sm:$0x3] }
  0xb7   : > { %14994 = vmatprep.mubr.msk.bf16.mxu1 %vm499_vm3, %v16894_v23  ;;  %14836 = vmatprep.mubr.msk.bf16.mxu0 %vm499_vm3, %v17334_v42  ;;  %v16902_v23 = vld [vmem:[%s17223_s17 + $0x9ac] sm:$0xff]  }
  0xbe   : > { %14995 = vmatmul.mubr.msk.bf16.vlgmr.msra.gmra.mrb[16].mxu1 %vm499_vm3, %v16895_v0  ;;  %14837 = vmatmul.mubr.msk.bf16.gmra.mrb[44].mxu0 %vm499_vm3, %v17357_v61  ;;  %v17709_v0 = vld [vmem:[%s17223_s17 + $0x538] sm:$0xc] }
  0xbf   : > { %15027 = vmatpush3.bf16.msra.mxu1 %v3440_v24  ;;  %14840 = vmatprep.mubr.msk.bf16.mxu0 %vm499_vm3, %v17362_v3  ;;  %v17706_v24 = vrot.slane %v20993_v17, 4  ;;  %v16903_v17 = vld [vmem:[%s17223_s17 + $0x9d8] sm:$0xff]  }
  0xc0   : > { %14998 = vmatprep.mubr.msk.bf16.mxu1 %vm499_vm3, %v16896_v26  ;;  %16534 = vmatprep.subr.msk.bf16.mxu1 %vm548_vm0, %v17579_v28  ;;  %v16901_v26 = vld [vmem:[%s17223_s17 + $0x980] sm:$0xff]  }
  0xc6   : > { %14999 = vmatmul.mubr.msk.bf16.gmra.mrb[20].mxu1 %vm499_vm3, %v16897_v31  ;;  %14841 = vmatmul.mubr.msk.bf16.gmra.mrb[48].mxu0 %vm499_vm3, %v17394_v32  ;;  %v17694_v31 = vrot.slane %v20991_v14, 4  ;;  %v17716_v14 = vld [vmem:[%s17223_s17 + $0x564] sm:$0xc]  ;;  %v21060_v32 = vrot.slane %v17587_v30, 6  ;;  %v17854_v30 = vld [vmem:[%s17223_s17 + $0x8d8] sm:$0xf] }
  0xc7   : > { %15002 = vmatprep.mubr.msk.bf16.mxu1 %vm499_vm3, %v16898_v33  ;;  %14844 = vmatprep.mubr.msk.bf16.mxu0 %vm499_vm3, %v17397_v35  ;;  %v17722_v33 = vld [vmem:[%s17223_s17 + $0x850] sm:$0xc]  ;;  %v17797_v35 = vld [vmem:[%s17223_s17 + $0x5c4] sm:$0x3]  ;;  %v21024_v46 = vrot.slane %v17854_v30, 6 }
  0xce   : > { %15003 = vmatmul.mubr.msk.bf16.gmra.mrb[24].mxu1 %vm499_vm3, %v16899_v11  ;;  %14845 = vmatmul.mubr.msk.bf16.gmra.mrb[52].mxu0 %vm499_vm3, %v17419_v57  ;;  %v17698_v11 = vld [vmem:[%s17223_s17 + $0x568] sm:$0xf]  ;;  %v17783_v57 = vld [vmem:[%s17223_s17 + $0x590] sm:$0xc] }
  0xcf   : > { %15006 = vmatprep.mubr.msk.bf16.mxu1 %vm499_vm3, %v16900_v62  ;;  %14848 = vmatprep.mubr.msk.bf16.mxu0 %vm499_vm3, %v17421_v60  ;;  %v17701_v62 = vld [vmem:[%s17223_s17 + $0x854] sm:$0xf]  ;;  %v20997_v2 = vrot.slane %v17698_v11, 6  ;;  %v17776_v60 = vld [vmem:[%s17223_s17 + $0x87c] sm:$0xc] }
  0xd0   : > { %v21059_v5 = vrot.slane %v17701_v62, 6 }
  0xd6   : > { %15007 = vmatmul.mubr.msk.bf16.gmra.mrb[28].mxu1 %vm499_vm3, %v16901_v26  ;;  %14849 = vmatmul.mubr.msk.bf16.gmra.mrb[56].mxu0 %vm499_vm3, %v17441_v15  ;;  %v17757_v26 = vld [vmem:[%s17223_s17 + $0x5c0] sm:$0xf]  ;;  %v17773_v15 = vrot.slane %v21059_v5, 4 }
  0xd7   : > { %15010 = vmatprep.mubr.msk.bf16.mxu1 %vm499_vm3, %v16902_v23  ;;  %14852 = vmatprep.mubr.msk.bf16.mxu0 %vm499_vm3, %v17444_v19  ;;  %v17750_v23 = vrot.slane %v20997_v2, 4  ;;  %v1306_v2 = vsel %vm17216_vm4, %v17629_v50, %v21058_v53  ;;  %v16904_v19 = vld [vmem:[%s17223_s17 + $0xa04] sm:$0xff]   ;;  %v1310_v50 = vsel %vm17216_vm4, %v21061_v38, %v21060_v32  ;;  %v17822_v32 = vld [vmem:[%s17223_s17 + $0x8ac] sm:$0xf]  ;;  %v21068_v3 = vrot.slane %v17757_v26, 6 }
  0xd8   : > { %v12509_v53 = vcombine.low %v1303_v63, %v1306_v2  ;;  %v21062_v63 = vrot.slane %v17605_v44, 6  ;;  %v16905_v44 = vld [vmem:[%s17223_s17 + $0xa30] sm:$0xff]  }
  0xda   : > { %v1313_v2 = vsel %vm17216_vm4, %v17639_v55, %v21062_v63  ;;  %v21063_v55 = vrot.slane %v17733_v52, 6  ;;  %v17850_v63 = vrot.slane %v21068_v3, 4  ;;  %v17871_v3 = vld [vmem:[%s17223_s17 + $0x5e8] sm:$0xc] }
  0xdb   : > { %v12510_v61 = vcombine.low %v1310_v50, %v1313_v2  ;;  %v21072_v2 = vrot.slane %v17652_v4, 6 }
  0xde   : > { %15011 = vmatmul.mubr.msk.bf16.gmra.mrb[0].mxu1 %vm499_vm3, %v16903_v17  ;;  %14853 = vmatmul.mubr.msk.bf16.gmra.mrb[60].mxu0 %vm499_vm3, %v17457_v25  ;;  %v17815_v17 = vsel %vm548_vm0, %v17579_v28, 0  ;;  %v21064_v28 = vrot.slane %v17754_v51, 6  ;;  %v21067_v25 = vrot.slane %v17615_v47, 6  ;;  %v21070_v47 = vrot.slane %v17622_v49, 6  ;;  %v17899_v49 = vld [vmem:[%s20987_s2 + $0x24] sm:$0xf] }
  0xdf   : > { %15014 = vmatprep.mubr.msk.bf16.mxu1 %vm499_vm3, %v16904_v19  ;;  %14858 = vmatprep.mubr.msk.bf16.mxu0 %vm499_vm3, %v12509_v53  ;;  %v17828_v19 = vrot.slane %v21063_v55, 4  ;;  %v21066_v53 = vrot.slane %v17609_v43, 10  ;;  %v17857_v43 = vld [vmem:[%s17223_s17 + $0x5ec] sm:$0xf]  ;;  %21073 = vst [vmem:[#allocation22_spill] sm:$0xff] %v17899_v49 }
  0xe0   : > { %v17832_v38 = vrot.slane %v21064_v28, 4  ;;  %v1320_v55 = vsel %vm17216_vm4, %v17673_v18, %v21067_v25  ;;  %v16906_v28 = vld [vmem:[%s17223_s17 + $0xa5c] sm:$0xff]   ;;  %v17865_v25 = vld [vmem:[%s17223_s17 + $0x8d4] sm:$0xc]  ;;  %v21025_v16 = vrot.slane %v17857_v43, 6 }
  0xe1   : > { %v1317_v5 = vsel %vm17216_vm4, %v21066_v53, %v21065_v27  ;;  %v17860_v27 = vld [vmem:[%s17223_s17 + $0x8b0] sm:$0x3]  ;;  %v17868_v18 = vld [vmem:[%s17223_s17 + $0x8dc] sm:$0x3]  ;;  %v21071_v53 = vrot.slane %v17619_v48, 10  ;;  %v21074_v48 = vrot.slane %v17822_v32, 6 }
  0xe2   : > { %v12511_v42 = vcombine.low %v1317_v5, %v1320_v55  ;;  %v1327_v5 = vsel %vm17216_vm4, %v17684_v22, %v21072_v2  ;;  %v17894_v55 = vld [vmem:[%s17223_s17 + $0x618] sm:$0xf]  ;;  %v21076_v2 = vrot.slane %v17657_v10, 10  ;;  %v17929_v10 = vld [vmem:[%s17223_s17 + $0x904] sm:$0xf] }
  0xe3   : > { %v1324_v50 = vsel %vm17216_vm4, %v21071_v53, %v21070_v47  ;;  %v17905_v4 = vrot.slane %v21074_v48, 4  ;;  %v21075_v53 = vrot.slane %v17643_v58, 6  ;;  %v17946_v58 = vld [vmem:[%s17223_s17 + $0x61c] sm:$0x3] }
  0xe4   : > { %v12512_v22 = vcombine.low %v1324_v50, %v1327_v5  ;;  %v21081_v5 = vrot.slane %v17667_v8, 6  ;;  %v21085_v8 = vrot.slane %v17701_v62, 6  ;;  %v18052_v62 = vld [vmem:[%s17223_s17 + $0x69c] sm:$0xf] }
  0xe6   : > { %15015 = vmatmul.mubr.msk.bf16.gmra.mrb[4].mxu1 %vm499_vm3, %v16905_v44  ;;  %14859 = vmatmul.mubr.msk.bf16.vlgmr.msra.gmra.mrb[32].mxu0 %vm499_vm3, %v12510_v61  ;;  %v1331_v61 = vsel %vm17216_vm4, %v21076_v2, %v21075_v53  ;;  %v17932_v53 = vld [vmem:[%s17223_s17 + $0x930] sm:$0xf]  ;;  %v16908_v2 = vld [vmem:[%s17223_s17 + $0xab4] sm:$0xff]   ;;  %v17949_v44 = vld [vmem:[%s17223_s17 + $0x900] sm:$0xc] }
  0xe7   : > { %15018 = vmatprep.mubr.msk.bf16.mxu1 %vm499_vm3, %v16906_v28  ;;  %14862 = vmatprep.mubr.msk.bf16.mxu0 %vm499_vm3, %v12511_v42  ;;  %v21077_v28 = vrot.slane %v17660_v12, 6  ;;  %v17925_v42 = vrot.slane %v21024_v46, 4  ;;  %v16907_v12 = vld [vmem:[%s17223_s17 + $0xa88] sm:$0xff]  }
  0xe8   : > { %14891 = vmatpush3.bf16.msra.mxu0 %v17196_v1  ;;  %v17952_v46 = vld [vmem:[%s17223_s17 + $0x908] sm:$0x3]  ;;  %v17959_v1 = vld [vmem:[%s17223_s17 + $0x934] sm:$0x3] }
  0xe9   : > { %v1334_v48 = vsel %vm17216_vm4, %v17694_v31, %v21077_v28  ;;  %v17938_v31 = vrot.slane %v21025_v16, 4  ;;  %16535 = vmatprep.subr.msk.bf16.mxu0 %vm548_vm0, %v17899_v49  ;;  %v21034_v28 = vrot.slane %v17932_v53, 6  ;;  %v21079_v49 = vrot.slane %v17646_v59, 6 }
  0xea   : > { %v12513_v47 = vcombine.low %v1331_v61, %v1334_v48  ;;  %v1341_v16 = vsel %vm17216_vm4, %v17706_v24, %v21081_v5  ;;  %v21082_v61 = vrot.slane %v17677_v21, 6  ;;  %v21083_v48 = vrot.slane %v17709_v0, 10 }
  0xeb   : > { %v1338_v50 = vsel %vm17216_vm4, %v21080_v7, %v21079_v49  ;;  %v1348_v7 = vsel %vm17216_vm4, %v17740_v41, %v21084_v13  ;;  %v21086_v49 = vrot.slane %v17722_v33, 10  ;;  %v21087_v21 = vrot.slane %v17726_v56, 6  ;;  %v16909_v13 = vld [vmem:[%s17223_s17 + $0xae0] sm:$0xff]   ;;  %v18040_v56 = vld [vmem:[%s17223_s17 + $0x988] sm:$0xf] }
  0xec   : > { %v1345_v59 = vsel %vm17216_vm4, %v21083_v48, %v21082_v61  ;;  %v21088_v41 = vrot.slane %v17894_v55, 6  ;;  %v18025_v61 = vrot.slane %v21034_v28, 4  ;;  %v18043_v48 = vld [vmem:[%s17223_s17 + $0x674] sm:$0x3] }
  0xed   : > { %v3233_v24 = vsel %vm17216_vm4, %v21086_v49, %v21085_v8  ;;  %v3236_v0 = vsel %vm17216_vm4, %v17773_v15, %v21087_v21  ;;  %v18046_v15 = vld [vmem:[%s17223_s17 + $0x958] sm:$0xc]  ;;  %v18049_v8 = vld [vmem:[%s17223_s17 + $0x960] sm:$0x3]  ;;  %v12515_v49 = vcombine.low %v1345_v59, %v1348_v7  ;;  %v21090_v21 = vrot.slane %v17698_v11, 6 }
  0xee   : > { %15019 = vmatmul.mubr.msk.bf16.gmra.mrb[8].mxu1 %vm499_vm3, %v16907_v12  ;;  %v18003_v12 = vld [vmem:[%s17223_s17 + $0x670] sm:$0xf]  ;;  %14863 = vmatmul.mubr.msk.bf16.gmra.mrb[36].mxu0 %vm499_vm3, %v12512_v22  ;;  %v18012_v33 = vrot.slane %v21088_v41, 4  ;;  %v21089_v22 = vrot.slane %v17929_v10, 6  ;;  %v18034_v41 = vld [vmem:[%s17223_s17 + $0x648] sm:$0x3]  ;;  %v12861_v28 = vcombine.low %v3233_v24, %v3236_v0 }
  0xef   : > { %15022 = vmatprep.mubr.msk.bf16.mxu1 %vm499_vm3, %v16908_v2  ;;  %14866 = vmatprep.mubr.msk.bf16.mxu0 %vm499_vm3, %v12513_v47  ;;  %v12514_v2 = vcombine.low %v1338_v50, %v1341_v16  ;;  %v21091_v47 = vrot.slane %v17716_v14, 10  ;;  %v21092_v16 = vrot.slane %v17719_v9, 6  ;;  %v21093_v24 = vrot.slane %v17733_v52, 6 }
  0xf0   : > { %v18020_v5 = vrot.slane %v21089_v22, 4  ;;  %v18037_v22 = vld [vmem:[%s17223_s17 + $0x66c] sm:$0xc]  ;;  %v21094_v0 = vrot.slane %v17776_v60, 10  ;;  %v21095_v11 = vrot.slane %v17779_v29, 6  ;;  %v21096_v9 = vrot.slane %v17754_v51, 6 }
  0xf1   : > { %v1352_v45 = vsel %vm17216_vm4, %v21091_v47, %v21090_v21  ;;  %v1355_v50 = vsel %vm17216_vm4, %v17750_v23, %v21092_v16  ;;  %v21097_v23 = vrot.slane %v17783_v57, 10  ;;  %v21098_v60 = vrot.slane %v17786_v36, 6  ;;  %v18103_v36 = vld [vmem:[%s17223_s17 + $0x98c] sm:$0x3]  ;;  %v18115_v21 = vld [vmem:[%s17223_s17 + $0x698] sm:$0xc] }
  0xf2   : > { %v3240_v59 = vsel %vm17216_vm4, %v21094_v0, %v21093_v24  ;;  %v3243_v14 = vsel %vm17216_vm4, %v17828_v19, %v21095_v11  ;;  %v21099_v29 = vrot.slane %v17822_v32, 6  ;;  %v21100_v47 = vrot.slane %v17819_v40, 10 }
  0xf3   : > { %v1359_v52 = vsel %vm17216_vm4, %v21097_v23, %v21096_v9  ;;  %v1362_v7 = vsel %vm17216_vm4, %v17832_v38, %v21098_v60  ;;  %v21101_v51 = vrot.slane %v17860_v27, 6  ;;  %v21102_v40 = vrot.slane %v17966_v34, 6  ;;  %v18151_v60 = vld [vmem:[%s17223_s17 + $0x6cc] sm:$0x3] }
  0xf4   : > { %v3247_v19 = vsel %vm17216_vm4, %v21100_v47, %v21099_v29  ;;  %v1400_v24 = vrot.slane %v18052_v62, 6  ;;  %v21103_v0 = vrot.slane %v18003_v12, 6  ;;  %v21104_v9 = vrot.slane %v18006_v20, 6  ;;  %v18133_v29 = vld [vmem:[%s17223_s17 + $0x6a0] sm:$0x3] }
  0xf5   : > { %v3250_v57 = vsel %vm17216_vm4, %v17905_v4, %v21101_v51  ;;  %v18109_v32 = vrot.slane %v21102_v40, 4  ;;  %v21036_v4 = vrot.slane %v18040_v56, 6  ;;  %v12862_v47 = vcombine.low %v3240_v59, %v3243_v14 }
  0xf6   : > { %15023 = vmatmul.mubr.msk.bf16.gmra.mrb[12].mxu1 %vm499_vm3, %v16909_v13  ;;  %v18100_v13 = vld [vmem:[%s17223_s17 + $0x984] sm:$0xc]  ;;  %14867 = vmatmul.mubr.msk.bf16.gmra.mrb[40].mxu0 %vm499_vm3, %v12514_v2  ;;  %v18124_v11 = vrot.slane %v21103_v0, 4  ;;  %v18128_v23 = vrot.slane %v21104_v9, 4  ;;  %v18142_v0 = vld [vmem:[%s17223_s17 + $0x6c8] sm:$0xf]  ;;  %v12516_v27 = vcombine.low %v1352_v45, %v1355_v50  ;;  %v12517_v59 = vcombine.low %v1359_v52, %v1362_v7 }
  0xf7   : > { %15028 = vmatprep.mubr.msk.bf16.mxu1 %vm499_vm3, %v12861_v28  ;;  %14870 = vmatprep.mubr.msk.bf16.mxu0 %vm499_vm3, %v12515_v49  ;;  %v18139_v2 = vld [vmem:[%s17223_s17 + $0x6c4] sm:$0xc]  ;;  %v18148_v9 = vrot.slane %v21036_v4, 4  ;;  %v18154_v49 = vld [vmem:[%s17223_s17 + $0x9b4] sm:$0xf]  ;;  %v12863_v14 = vcombine.low %v3247_v19, %v3250_v57  ;;  %v18160_v40 = vrot.slane %v1400_v24, 4 }
  0xf8   : > { %v18166_v28 = vld [vmem:[%s17223_s17 + $0x9b0] sm:$0xc]  ;;  %v21109_v4 = vrot.slane %v17757_v26, 6  ;;  %v21110_v52 = vrot.slane %v17790_v39, 10  ;;  %v21111_v19 = vrot.slane %v17797_v35, 6  ;;  %v21112_v26 = vrot.slane %v17854_v30, 6 }
  0xf9   : > { %v18135_v51 = vpop.f32.mrb[0].mxu0  ;;  %v18183_v50 = vld [vmem:[%s20987_s2 + $0x48] sm:$0xf]  ;;  %v21113_v39 = vrot.slane %v17865_v25, 10  ;;  %v21116_v30 = vrot.slane %v17949_v44, 10 }
  0xfa   : > { %21105 = vst [vmem:[#allocation24_spill] sm:$0xff] %v18135_v51  ;;  %v18144_v38 = vpop.f32.mrb[1].mxu0  ;;  %v1366_v7 = vsel %vm17216_vm4, %v21110_v52, %v21109_v4  ;;  %v1369_v57 = vsel %vm17216_vm4, %v17850_v63, %v21111_v19  ;;  %v21114_v63 = vrot.slane %v17868_v18, 6  ;;  %v18201_v52 = vld [vmem:[%s17223_s17 + $0x9b8] sm:$0x3]  ;;  %v21117_v18 = vrot.slane %v17952_v46, 6 }
  0xfb   : > { %21106 = vst [vmem:[#allocation25_spill] sm:$0xff] %v18144_v38  ;;  %v18156_v16 = vpop.f32.mrb[2].mxu0  ;;  %v3254_v35 = vsel %vm17216_vm4, %v21113_v39, %v21112_v26  ;;  %v1410_v19 = vrot.slane %v18151_v60, 6  ;;  %v3288_v26 = vrot.slane %v18154_v49, 6  ;;  %v18230_v39 = vld [vmem:[%s17223_s17 + $0x9dc] sm:$0xc] }
  0xfc   : > { %21107 = vst [vmem:[#allocation26_spill] sm:$0xff] %v18156_v16  ;;  %v18162_v45 = vpop.f32.mrb[3].mxu0  ;;  %v3257_v4 = vsel %vm17216_vm4, %v17925_v42, %v21114_v63  ;;  %v3264_v42 = vsel %vm17216_vm4, %v18020_v5, %v21117_v18  ;;  %v18233_v5 = vld [vmem:[%s17223_s17 + $0x9e0] sm:$0xf]  ;;  %v12518_v63 = vcombine.low %v1366_v7, %v1369_v57  ;;  %v21125_v57 = vrot.slane %v17932_v53, 6 }
  0xfd   : > { %21108 = vst [vmem:[#allocation27_spill] sm:$0xff] %v18162_v45  ;;  %v3295_v7 = vrot.slane %v18233_v5, 6  ;;  %v19175_v45 = vld [vmem:[%s17223_s17 + $0x338] sm:$0xf]  ;;  %v19274_v51 = vld [vmem:[%s17223_s17 + $0x3bc] sm:$0xf] }
  0xfe   : > { %15029 = vmatmul.mubr.msk.bf16.vlgmr.msra.gmra.mrb[16].mxu1 %vm499_vm3, %v12862_v47  ;;  %14871 = vmatmul.mubr.msk.bf16.gmra.mrb[44].mxu0 %vm499_vm3, %v12516_v27  ;;  %v12508_v47 = vrot.slane %v18139_v2, 10  ;;  %v1407_v27 = vrot.slane %v18142_v0, 6  ;;  %v19303_v16 = vld [vmem:[%s17223_s17 + $0x3c0] sm:$0x3] }
  0xff   : > { %15061 = vmatpush3.bf16.msra.mxu1 %v17815_v17  ;;  %14874 = vmatprep.mubr.msk.bf16.mxu0 %vm499_vm3, %v12517_v59  ;;  %v21115_v17 = vrot.slane %v17929_v10, 6  ;;  %v21118_v59 = vrot.slane %v17857_v43, 6  ;;  %v21120_v10 = vrot.slane %v17875_v37, 6  ;;  %v12864_v43 = vcombine.low %v3254_v35, %v3257_v4  ;;  %v18252_v4 = vld [vmem:[%s17223_s17 + $0x9e4] sm:$0x3] }
 0x100   : > { %15032 = vmatprep.mubr.msk.bf16.mxu1 %vm499_vm3, %v12863_v14  ;;  %v21119_v14 = vrot.slane %v17871_v3, 10  ;;  %16544 = vmatprep.subr.msk.bf16.mxu1 %vm548_vm0, %v18183_v50  ;;  %v12853_v3 = vrot.slane %v18166_v28, 10  ;;  %v3290_v35 = vrot.slane %v3288_v26, 4  ;;  %v12854_v28 = vrot.slane %v18230_v39, 10 }
 0x101   : > { %v3261_v25 = vsel %vm17216_vm4, %v21116_v30, %v21115_v17  ;;  %v1376_v46 = vsel %vm17216_vm4, %v17938_v31, %v21120_v10  ;;  %v18237_v49 = vpop.f32.mrb[4].mxu0  ;;  %v18244_v31 = vrot.slane %v1407_v27, 4  ;;  %v18271_v10 = vld [vmem:[%s17223_s17 + $0xa08] sm:$0xc] }
 0x102   : > { %v1373_v44 = vsel %vm17216_vm4, %v21119_v14, %v21118_v59  ;;  %21121 = vst [vmem:[#allocation28_spill] sm:$0xff] %v18237_v49  ;;  %v12865_v17 = vcombine.low %v3261_v25, %v3264_v42  ;;  %v18240_v37 = vpop.f32.mrb[5].mxu0  ;;  %v3291_v59 = vrot.slane %v18201_v52, 6  ;;  %v21126_v52 = vrot.slane %v17956_v54, 10  ;;  %v8648_v49 = vld [vmem:[%s17223_s17 + $0x144] sm:$0xc] }
 0x103   : > { %21122 = vst [vmem:[#allocation29_spill] sm:$0xff] %v18240_v37  ;;  %v12519_v30 = vcombine.low %v1373_v44, %v1376_v46  ;;  %v18246_v18 = vpop.f32.mrb[6].mxu0  ;;  %v21127_v42 = vrot.slane %v17959_v1, 6  ;;  %v21128_v46 = vrot.slane %v17894_v55, 6  ;;  %v21134_v55 = vrot.slane %v18049_v8, 6 }
 0x104   : > { %21123 = vst [vmem:[#allocation30_spill] sm:$0xff] %v18246_v18  ;;  %v18249_v14 = vpop.f32.mrb[7].mxu0  ;;  %v3268_v25 = vsel %vm17216_vm4, %v21126_v52, %v21125_v57  ;;  %v12828_v52 = vld [vmem:[%s17223_s17 + $0xa0c] sm:$0xf]  ;;  %v1411_v39 = vsel %vm17216_vm4, %v18244_v31, %v1410_v19  ;;  %v12840_v19 = vld [vmem:[%s17223_s17 + $0xabc] sm:$0xf] }
 0x105   : > { %21124 = vst [vmem:[#allocation31_spill] sm:$0xff] %v18249_v14  ;;  %v3271_v44 = vsel %vm17216_vm4, %v18025_v61, %v21127_v42  ;;  %v21133_v61 = vrot.slane %v18046_v15, 10  ;;  %v3278_v57 = vsel %vm17216_vm4, %v18128_v23, %v21134_v55  ;;  %v21136_v42 = vld [vmem:[#allocation23_spill] sm:$0xff] }
 0x106   : > { %15033 = vmatmul.mubr.msk.bf16.gmra.mrb[20].mxu1 %vm499_vm3, %v12864_v43  ;;  %14875 = vmatmul.mubr.msk.bf16.gmra.mrb[48].mxu0 %vm499_vm3, %v12518_v63  ;;  %v21129_v43 = vld [vmem:[#allocation21_spill] sm:$0xff]  ;;  %v21131_v63 = vrot.slane %v17946_v58, 6  ;;  %v21135_v58 = vrot.slane %v17966_v34, 6  ;;  %v12866_v8 = vcombine.low %v3268_v25, %v3271_v44  ;;  %v12829_v23 = vld [vmem:[%s17223_s17 + $0xa10] sm:$0x3] }
 0x107   : > { %15036 = vmatprep.mubr.msk.bf16.mxu1 %vm499_vm3, %v12865_v17  ;;  %14878 = vmatprep.mubr.msk.bf16.mxu0 %vm499_vm3, %v12519_v30  ;;  %v21130_v53 = vrot.slane %v21129_v43, 10  ;;  %v21132_v17 = vrot.slane %v18006_v20, 6  ;;  %v21138_v20 = vrot.slane %v18034_v41, 6  ;;  %v3298_v43 = vrot.slane %v18252_v4, 6  ;;  %v18326_v44 = vld [vmem:[%s17223_s17 + $0xa34] sm:$0xc] }
 0x108   : > { %v1383_v1 = vsel %vm17216_vm4, %v18012_v33, %v21131_v63  ;;  %v18313_v63 = vld [vmem:[%s17223_s17 + $0xa38] sm:$0xf]  ;;  %v3302_v4 = vrot.slane %v12828_v52, 6  ;;  %v3305_v52 = vrot.slane %v12829_v23, 6  ;;  %v12834_v23 = vld [vmem:[%s17223_s17 + $0xa64] sm:$0xf] }
 0x109   : > { %v1380_v54 = vsel %vm17216_vm4, %v21130_v53, %v21128_v46  ;;  %v3275_v30 = vsel %vm17216_vm4, %v21133_v61, %v21132_v17  ;;  %v21137_v46 = vrot.slane %v21136_v42, 10  ;;  %v1390_v15 = vsel %vm17216_vm4, %v18109_v32, %v21138_v20  ;;  %v18309_v53 = vpop.f32.mrb[8].mxu0  ;;  %v12832_v42 = vld [vmem:[%s17223_s17 + $0xa3c] sm:$0x3] }
 0x10a   : > { %21139 = vst [vmem:[#allocation21_spill] sm:$0xff] %v18309_v53  ;;  %v12520_v34 = vcombine.low %v1380_v54, %v1383_v1  ;;  %v12867_v17 = vcombine.low %v3275_v30, %v3278_v57  ;;  %v3297_v61 = vrot.slane %v3295_v7, 4  ;;  %v18317_v41 = vpop.f32.mrb[9].mxu0  ;;  %v12855_v32 = vrot.slane %v18271_v10, 10 }
 0x10b   : > { %v1387_v33 = vsel %vm17216_vm4, %v21137_v46, %v21135_v58  ;;  %21140 = vst [vmem:[#allocation23_spill] sm:$0xff] %v18317_v41  ;;  %v18319_v58 = vpop.f32.mrb[10].mxu0  ;;  %v21143_v54 = vrot.slane %v18040_v56, 6  ;;  %v21144_v1 = vrot.slane %v18100_v13, 10  ;;  %v21145_v30 = vrot.slane %v18103_v36, 6 }
 0x10c   : > { %v12521_v55 = vcombine.low %v1387_v33, %v1390_v15  ;;  %21141 = vst [vmem:[#allocation32_spill] sm:$0xff] %v18319_v58  ;;  %v18322_v25 = vpop.f32.mrb[11].mxu0  ;;  %v3309_v46 = vrot.slane %v18313_v63, 6  ;;  %v21146_v33 = vrot.slane %v18003_v12, 6  ;;  %v21147_v56 = vrot.slane %v18037_v22, 10 }
 0x10d   : > { %21142 = vst [vmem:[#allocation33_spill] sm:$0xff] %v18322_v25  ;;  %v3282_v10 = vsel %vm17216_vm4, %v21144_v1, %v21143_v54  ;;  %v3285_v57 = vsel %vm17216_vm4, %v18148_v9, %v21145_v30  ;;  %v21148_v20 = vrot.slane %v18043_v48, 6  ;;  %v3289_v9 = vsel %vm17216_vm4, %v12853_v3, %v3288_v26  ;;  %v12837_v30 = vld [vmem:[%s17223_s17 + $0xa90] sm:$0xf]  ;;  %v19099_v58 = vld [vmem:[%s17223_s17 + $0x11c] sm:$0xf] }
 0x10e   : > { %15037 = vmatmul.mubr.msk.bf16.gmra.mrb[24].mxu1 %vm499_vm3, %v12866_v8  ;;  %14879 = vmatmul.mubr.msk.bf16.gmra.mrb[52].mxu0 %vm499_vm3, %v12520_v34  ;;  %v1394_v13 = vsel %vm17216_vm4, %v21147_v56, %v21146_v33  ;;  %v3292_v15 = vsel %vm17216_vm4, %v3290_v35, %v3291_v59  ;;  %v21149_v12 = vrot.slane %v18115_v21, 10  ;;  %v21150_v8 = vrot.slane %v18133_v29, 6 }
 0x10f   : > { %15040 = vmatprep.mubr.msk.bf16.mxu1 %vm499_vm3, %v12867_v17  ;;  %14882 = vmatprep.mubr.msk.bf16.mxu0 %vm499_vm3, %v12521_v55  ;;  %v1397_v36 = vsel %vm17216_vm4, %v18124_v11, %v21148_v20  ;;  %v12833_v11 = vld [vmem:[%s17223_s17 + $0xa60] sm:$0xc]  ;;  %v12868_v26 = vcombine.low %v3282_v10, %v3285_v57  ;;  %v12856_v3 = vrot.slane %v18326_v44, 10  ;;  %v12869_v35 = vcombine.low %v3289_v9, %v3292_v15  ;;  %v12835_v55 = vld [vmem:[%s17223_s17 + $0xa68] sm:$0x3] }
 0x110   : > { %v1401_v22 = vsel %vm17216_vm4, %v21149_v12, %v1400_v24  ;;  %v1404_v48 = vsel %vm17216_vm4, %v18160_v40, %v21150_v8  ;;  %v12522_v62 = vcombine.low %v1394_v13, %v1397_v36  ;;  %v3304_v21 = vrot.slane %v3302_v4, 4  ;;  %v12839_v36 = vld [vmem:[%s17223_s17 + $0xab8] sm:$0xc]  ;;  %v12841_v9 = vld [vmem:[%s17223_s17 + $0xac0] sm:$0x3] }
 0x111   : > { %v18373_v59 = vpop.f32.mrb[12].mxu0  ;;  %v12523_v24 = vcombine.low %v1401_v22, %v1404_v48  ;;  %v3312_v29 = vrot.slane %v12832_v42, 6  ;;  %v3311_v17 = vrot.slane %v3309_v46, 4  ;;  %v12857_v44 = vrot.slane %v12833_v11, 10  ;;  %v16911_v48 = vld [vmem:[%s17223_s17 + $0x464] sm:$0xff]  }
 0x112   : > { %21151 = vst [vmem:[#allocation34_spill] sm:$0xff] %v18373_v59  ;;  %v18375_v63 = vpop.f32.mrb[13].mxu0  ;;  %v3316_v54 = vrot.slane %v12834_v23, 6  ;;  %v3296_v1 = vsel %vm17216_vm4, %v12854_v28, %v3295_v7  ;;  %v3299_v10 = vsel %vm17216_vm4, %v3297_v61, %v3298_v43  ;;  %v1408_v57 = vsel %vm17216_vm4, %v12508_v47, %v1407_v27  ;;  %v12836_v7 = vld [vmem:[%s17223_s17 + $0xa8c] sm:$0xc]  ;;  %v16910_v61 = vld [vmem:[%s17223_s17 + $0x438] sm:$0xff]  }
 0x113   : > { %21152 = vst [vmem:[#allocation35_spill] sm:$0xff] %v18375_v63  ;;  %v18377_v34 = vpop.f32.mrb[14].mxu0  ;;  %v3303_v5 = vsel %vm17216_vm4, %v12855_v32, %v3302_v4  ;;  %v3306_v28 = vsel %vm17216_vm4, %v3304_v21, %v3305_v52  ;;  %v12838_v43 = vld [vmem:[%s17223_s17 + $0xa94] sm:$0x3]  ;;  %v12870_v0 = vcombine.low %v3296_v1, %v3299_v10  ;;  %v3319_v2 = vrot.slane %v12835_v55, 6 }
 0x114   : > { %21153 = vst [vmem:[#allocation36_spill] sm:$0xff] %v18377_v34  ;;  %v18379_v40 = vpop.f32.mrb[15].mxu0  ;;  %v12524_v47 = vcombine.low %v1408_v57, %v1411_v39  ;;  %v12871_v60 = vcombine.low %v3303_v5, %v3306_v28  ;;  %v3318_v27 = vrot.slane %v3316_v54, 4  ;;  %v3323_v31 = vrot.slane %v12837_v30, 6  ;;  %v16912_v23 = vld [vmem:[%s17223_s17 + $0x490] sm:$0xff]  }
 0x115   : > { %21154 = vst [vmem:[#allocation37_spill] sm:$0xff] %v18379_v40  ;;  %v12858_v52 = vrot.slane %v12836_v7, 10  ;;  %v3326_v56 = vrot.slane %v12838_v43, 6  ;;  %v3310_v13 = vsel %vm17216_vm4, %v12856_v3, %v3309_v46  ;;  %v3313_v20 = vsel %vm17216_vm4, %v3311_v17, %v3312_v29  ;;  %v12843_v3 = vld [vmem:[%s17223_s17 + $0xae8] sm:$0xf]  ;;  %v16913_v43 = vld [vmem:[%s17223_s17 + $0x4bc] sm:$0xff]  }
 0x116   : > { %15041 = vmatmul.mubr.msk.bf16.gmra.mrb[28].mxu1 %vm499_vm3, %v12868_v26  ;;  %14883 = vmatmul.mubr.msk.bf16.gmra.mrb[56].mxu0 %vm499_vm3, %v12522_v62  ;;  %v3317_v15 = vsel %vm17216_vm4, %v12857_v44, %v3316_v54  ;;  %v3320_v12 = vsel %vm17216_vm4, %v3318_v27, %v3319_v2  ;;  %v3325_v22 = vrot.slane %v3323_v31, 4  ;;  %v3330_v8 = vrot.slane %v12840_v19, 6  ;;  %v12842_v26 = vld [vmem:[%s17223_s17 + $0xae4] sm:$0xc]  ;;  %v12844_v55 = vld [vmem:[%s17223_s17 + $0xaec] sm:$0x3] }
 0x117   : > { %15044 = vmatprep.mubr.msk.bf16.mxu1 %vm499_vm3, %v12869_v35  ;;  %14886 = vmatprep.mubr.msk.bf16.mxu0 %vm499_vm3, %v12523_v24  ;;  %v12872_v11 = vcombine.low %v3310_v13, %v3313_v20  ;;  %v12859_v46 = vrot.slane %v12839_v36, 10  ;;  %v12873_v35 = vcombine.low %v3317_v15, %v3320_v12  ;;  %v3333_v21 = vrot.slane %v12841_v9, 6  ;;  %v21163_v54 = vld [vmem:[#allocation22_spill] sm:$0xff]  ;;  %v18455_v10 = vld [vmem:[%s20987_s2 + $0x34] sm:$0xf] }
 0x118   : > { %v3332_v29 = vrot.slane %v3330_v8, 4  ;;  %v4301_v1 = vsel %vm548_vm0, %v21163_v54, 0  ;;  %v3324_v30 = vsel %vm17216_vm4, %v12858_v52, %v3323_v31  ;;  %v3327_v57 = vsel %vm17216_vm4, %v3325_v22, %v3326_v56  ;;  %v16914_v31 = vld [vmem:[%s17223_s17 + $0x4e8] sm:$0xff]   ;;  %v12958_v9 = vld [vmem:[%s17223_s17 + $0x214] sm:$0xc] }
 0x119   : > { %v18413_v42 = vpop.f32.mrb[16].mxu0  ;;  %v12860_v39 = vrot.slane %v12842_v26, 10  ;;  %v3337_v5 = vrot.slane %v12843_v3, 6  ;;  %v3331_v28 = vsel %vm17216_vm4, %v12859_v46, %v3330_v8  ;;  %v3340_v2 = vrot.slane %v12844_v55, 6  ;;  %v12960_v15 = vld [vmem:[%s17223_s17 + $0x21c] sm:$0x3] }
 0x11a   : > { %21155 = vst [vmem:[#allocation38_spill] sm:$0xff] %v18413_v42  ;;  %v18415_v33 = vpop.f32.mrb[17].mxu0  ;;  %v3334_v7 = vsel %vm17216_vm4, %v3332_v29, %v3333_v21  ;;  %v16915_v12 = vld [vmem:[%s17223_s17 + $0x514] sm:$0xff]   ;;  %v16916_v8 = vld [vmem:[%s17223_s17 + $0x540] sm:$0xff]   ;;  %v12965_v46 = vld [vmem:[%s17223_s17 + $0x270] sm:$0xf] }
 0x11b   : > { %21156 = vst [vmem:[#allocation39_spill] sm:$0xff] %v18415_v33  ;;  %v18418_v32 = vpop.f32.mrb[18].mxu0  ;;  %v3339_v27 = vrot.slane %v3337_v5, 4  ;;  %v3338_v20 = vsel %vm17216_vm4, %v12860_v39, %v3337_v5  ;;  %v13006_v26 = vrot.slane %v12958_v9, 10  ;;  %v4096_v29 = vrot.slane %v12960_v15, 6  ;;  %v16919_v5 = vld [vmem:[%s17223_s17 + $0x884] sm:$0xff]  }
 0x11c   : > { %21157 = vst [vmem:[#allocation40_spill] sm:$0xff] %v18418_v32  ;;  %v18420_v4 = vpop.f32.mrb[19].mxu0  ;;  %v8300_v54 = vsel %vm548_vm0, %v18183_v50, 0  ;;  %v4107_v39 = vrot.slane %v12965_v46, 6  ;;  %v12968_v15 = vld [vmem:[%s17223_s17 + $0x29c] sm:$0xf] }
 0x11d   : > { %21158 = vst [vmem:[#allocation41_spill] sm:$0xff] %v18420_v4  ;;  %v3341_v36 = vsel %vm17216_vm4, %v3339_v27, %v3340_v2  ;;  %v8632_v33 = vld [vmem:[%s17223_s17 + $0x44] sm:$0x3]  ;;  %v13168_v42 = vld [vmem:[%s17223_s17 + $0x22c] sm:$0xc] }
 0x11e   : > { %15045 = vmatmul.mubr.msk.bf16.gmra.mrb[0].mxu1 %vm499_vm3, %v12870_v0  ;;  %14887 = vmatmul.mubr.msk.bf16.gmra.mrb[60].mxu0 %vm499_vm3, %v12524_v47  ;;  %v12959_v0 = vld [vmem:[%s17223_s17 + $0x218] sm:$0xf]  ;;  %v12876_v22 = vcombine.low %v3338_v20, %v3341_v36  ;;  %v4109_v36 = vrot.slane %v4107_v39, 4  ;;  %v8635_v63 = vld [vmem:[%s17223_s17 + $0x70] sm:$0x3] }
 0x11f   : > { %15048 = vmatprep.mubr.msk.bf16.mxu1 %vm499_vm3, %v12871_v60  ;;  %14892 = vmatprep.mubr.msk.bf16.mxu0 %vm499_vm3, %v16910_v61  ;;  %v12874_v61 = vcombine.low %v3324_v30, %v3327_v57  ;;  %v12875_v60 = vcombine.low %v3331_v28, %v3334_v7  ;;  %v4093_v13 = vrot.slane %v12959_v0, 6  ;;  %v12963_v30 = vld [vmem:[%s17223_s17 + $0x248] sm:$0x3]  ;;  %v12964_v28 = vld [vmem:[%s17223_s17 + $0x26c] sm:$0xc] }
 0x120   : > { %v12966_v7 = vld [vmem:[%s17223_s17 + $0x274] sm:$0x3]  ;;  %v4103_v27 = vrot.slane %v12963_v30, 6  ;;  %v13008_v20 = vrot.slane %v12964_v28, 10  ;;  %v12972_v30 = vld [vmem:[%s17223_s17 + $0x2cc] sm:$0x3] }
 0x121   : > { %v18440_v62 = vpop.f32.mrb[20].mxu0  ;;  %v4094_v50 = vsel %vm17216_vm4, %v13006_v26, %v4093_v13  ;;  %v4110_v9 = vrot.slane %v12966_v7, 6  ;;  %v12967_v26 = vld [vmem:[%s17223_s17 + $0x298] sm:$0xc]  ;;  %v19014_v40 = vld [vmem:[%s17223_s17 + $0x94] sm:$0xc] }
 0x122   : > { %21159 = vst [vmem:[#allocation42_spill] sm:$0xff] %v18440_v62  ;;  %v18442_v24 = vpop.f32.mrb[21].mxu0  ;;  %v13009_v7 = vrot.slane %v12967_v26, 10  ;;  %v19017_v59 = vld [vmem:[%s17223_s17 + $0x288] sm:$0xf] }
 0x123   : > { %21160 = vst [vmem:[#allocation43_spill] sm:$0xff] %v18442_v24  ;;  %v18444_v17 = vpop.f32.mrb[22].mxu0  ;;  %v4111_v46 = vsel %vm17216_vm4, %v4109_v36, %v4110_v9  ;;  %v13116_v24 = vld [vmem:[%s17223_s17 + $0x4b4] sm:$0xc] }
 0x124   : > { %21161 = vst [vmem:[#allocation44_spill] sm:$0xff] %v18444_v17  ;;  %v18447_v44 = vpop.f32.mrb[23].mxu0 }
 0x125   : > { %21162 = vst [vmem:[#allocation45_spill] sm:$0xff] %v18447_v44 }
 0x126   : > { %15049 = vmatmul.mubr.msk.bf16.gmra.mrb[4].mxu1 %vm499_vm3, %v12872_v11  ;;  %14893 = vmatmul.mubr.msk.bf16.vlgmr.msra.gmra.mrb[32].mxu0 %vm499_vm3, %v16911_v48  ;;  %v16918_v48 = vld [vmem:[%s17223_s17 + $0x858] sm:$0xff]   ;;  %v12962_v11 = vld [vmem:[%s17223_s17 + $0x244] sm:$0xf] }
 0x127   : > { %15052 = vmatprep.mubr.msk.bf16.mxu1 %vm499_vm3, %v12873_v35  ;;  %14896 = vmatprep.mubr.msk.bf16.mxu0 %vm499_vm3, %v16912_v23  ;;  %v4095_v35 = vrot.slane %v4093_v13, 4  ;;  %v4100_v57 = vrot.slane %v12962_v11, 6  ;;  %v18527_v13 = vld [vmem:[%s20987_s2 + $0x58] sm:$0xf]  ;;  %v4108_v11 = vsel %vm17216_vm4, %v13008_v20, %v4107_v39 }
 0x128   : > { %15095 = vmatpush3.bf16.msra.mxu0 %v4301_v1  ;;  %v12961_v1 = vld [vmem:[%s17223_s17 + $0x240] sm:$0xc]  ;;  %v13025_v28 = vcombine.low %v4108_v11, %v4111_v46  ;;  %v12976_v11 = vld [vmem:[%s17223_s17 + $0x31c] sm:$0xc]  ;;  %v12978_v46 = vld [vmem:[%s17223_s17 + $0x324] sm:$0x3] }
 0x129   : > { %16536 = vmatprep.subr.msk.bf16.mxu0 %vm548_vm0, %v18455_v10  ;;  %v18472_v47 = vpop.f32.mrb[24].mxu0  ;;  %v4097_v0 = vsel %vm17216_vm4, %v4095_v35, %v4096_v29  ;;  %v13007_v2 = vrot.slane %v12961_v1, 10  ;;  %v12969_v35 = vld [vmem:[%s17223_s17 + $0x2a0] sm:$0x3]  ;;  %v12970_v1 = vld [vmem:[%s17223_s17 + $0x2c4] sm:$0xc] }
 0x12a   : > { %21164 = vst [vmem:[#allocation22_spill] sm:$0xff] %v18472_v47  ;;  %v18474_v19 = vpop.f32.mrb[25].mxu0  ;;  %v4117_v39 = vrot.slane %v12969_v35, 6  ;;  %v16924_v35 = vld [vmem:[%s17223_s17 + $0x960] sm:$0xff]   ;;  %v8628_v47 = vld [vmem:[%s17223_s17 + $0x14] sm:$0xf] }
 0x12b   : > { %21165 = vst [vmem:[#allocation46_spill] sm:$0xff] %v18474_v19  ;;  %v18477_v52 = vpop.f32.mrb[26].mxu0 }
 0x12c   : > { %21166 = vst [vmem:[#allocation47_spill] sm:$0xff] %v18477_v52  ;;  %v18479_v56 = vpop.f32.mrb[27].mxu0  ;;  %v18947_v52 = vld [vmem:[%s17223_s17 + $0x40] sm:$0xf] }
 0x12d   : > { %21167 = vst [vmem:[#allocation48_spill] sm:$0xff] %v18479_v56  ;;  %v18922_v56 = vld [vmem:[%s17223_s17 + $0x4b8] sm:$0xf]  ;;  %v8732_v4 = vrot.slane %v18947_v52, 6 }
 0x12e   : > { %15053 = vmatmul.mubr.msk.bf16.gmra.mrb[8].mxu1 %vm499_vm3, %v12874_v61  ;;  %14897 = vmatmul.mubr.msk.bf16.gmra.mrb[36].mxu0 %vm499_vm3, %v16913_v43  ;;  %v16917_v43 = vld [vmem:[%s17223_s17 + $0x56c] sm:$0xff]   ;;  %v13023_v61 = vcombine.low %v4094_v50, %v4097_v0  ;;  %v13010_v50 = vrot.slane %v12970_v1, 10 }
 0x12f   : > { %15056 = vmatprep.mubr.msk.bf16.mxu1 %vm499_vm3, %v12875_v60  ;;  %14900 = vmatprep.mubr.msk.bf16.mxu0 %vm499_vm3, %v16914_v31  ;;  %v4102_v60 = vrot.slane %v4100_v57, 4  ;;  %v16920_v31 = vld [vmem:[%s17223_s17 + $0x8b0] sm:$0xff]  }
 0x131   : > { %v18495_v23 = vpop.f32.mrb[28].mxu0 }
 0x132   : > { %21168 = vst [vmem:[#allocation49_spill] sm:$0xff] %v18495_v23  ;;  %v18498_v3 = vpop.f32.mrb[29].mxu0 }
 0x133   : > { %21169 = vst [vmem:[#allocation50_spill] sm:$0xff] %v18498_v3  ;;  %v18500_v21 = vpop.f32.mrb[30].mxu0 }
 0x134   : > { %21170 = vst [vmem:[#allocation51_spill] sm:$0xff] %v18500_v21  ;;  %v18502_v55 = vpop.f32.mrb[31].mxu0 }
 0x135   : > { %21171 = vst [vmem:[#allocation52_spill] sm:$0xff] %v18502_v55 }
 0x136   : > { %15057 = vmatmul.mubr.msk.bf16.gmra.mrb[12].mxu1 %vm499_vm3, %v12876_v22  ;;  %14901 = vmatmul.mubr.msk.bf16.gmra.mrb[40].mxu0 %vm499_vm3, %v16915_v12  ;;  %v12971_v12 = vld [vmem:[%s17223_s17 + $0x2c8] sm:$0xf]  ;;  %v4101_v22 = vsel %vm17216_vm4, %v13007_v2, %v4100_v57  ;;  %v12974_v2 = vld [vmem:[%s17223_s17 + $0x2f4] sm:$0xf] }
 0x137   : > { %15062 = vmatprep.mubr.msk.bf16.mxu1 %vm499_vm3, %v16918_v48  ;;  %14904 = vmatprep.mubr.msk.bf16.mxu0 %vm499_vm3, %v16916_v8  ;;  %v4104_v8 = vsel %vm17216_vm4, %v4102_v60, %v4103_v27  ;;  %v4114_v48 = vrot.slane %v12968_v15, 6  ;;  %v4121_v29 = vrot.slane %v12971_v12, 6  ;;  %v4465_v60 = vsel %vm548_vm0, %v18455_v10, 0  ;;  %v12977_v27 = vld [vmem:[%s17223_s17 + $0x320] sm:$0xf] }
 0x138   : > { %v13024_v57 = vcombine.low %v4101_v22, %v4104_v8  ;;  %v4128_v36 = vrot.slane %v12974_v2, 6  ;;  %v12973_v12 = vld [vmem:[%s17223_s17 + $0x2f0] sm:$0xc]  ;;  %v12975_v22 = vld [vmem:[%s17223_s17 + $0x2f8] sm:$0x3]  ;;  %v4135_v8 = vrot.slane %v12977_v27, 6 }
 0x139   : > { %v4123_v0 = vrot.slane %v4121_v29, 4  ;;  %v4115_v10 = vsel %vm17216_vm4, %v13009_v7, %v4114_v48  ;;  %v4122_v9 = vsel %vm17216_vm4, %v13010_v50, %v4121_v29  ;;  %v13011_v1 = vrot.slane %v12973_v12, 10  ;;  %v12980_v7 = vld [vmem:[%s17223_s17 + $0x34c] sm:$0xf]  ;;  %v12981_v27 = vld [vmem:[%s17223_s17 + $0x350] sm:$0x3] }
 0x13a   : > { %v4131_v29 = vrot.slane %v12975_v22, 6 }
 0x13e   : > { %15063 = vmatmul.mubr.msk.bf16.vlgmr.msra.gmra.mrb[16].mxu1 %vm499_vm3, %v16919_v5  ;;  %14905 = vmatmul.mubr.msk.bf16.gmra.mrb[44].mxu0 %vm499_vm3, %v16917_v43  ;;  %v16922_v5 = vld [vmem:[%s17223_s17 + $0x908] sm:$0xff]   ;;  %v4116_v43 = vrot.slane %v4114_v48, 4  ;;  %v16923_v48 = vld [vmem:[%s17223_s17 + $0x934] sm:$0xff]  }
 0x13f   : > { %15401 = vmatpush3.bf16.msra.mxu1 %v8300_v54  ;;  %15096 = vmatprep.mubr.msk.bf16.mxu0 %vm499_vm3, %v13023_v61  ;;  %v16921_v54 = vld [vmem:[%s17223_s17 + $0x8dc] sm:$0xff]   ;;  %v4124_v61 = vrot.slane %v12972_v30, 6  ;;  %v4130_v30 = vrot.slane %v4128_v36, 4 }
 0x140   : > { %15066 = vmatprep.mubr.msk.bf16.mxu1 %vm499_vm3, %v16920_v31  ;;  %16545 = vmatprep.subr.msk.bf16.mxu1 %vm548_vm0, %v18527_v13  ;;  %v18556_v31 = vld [vmem:[%s20987_s2 + $0x28] sm:$0xf]  ;;  %v4118_v20 = vsel %vm17216_vm4, %v4116_v43, %v4117_v39  ;;  %v12983_v43 = vld [vmem:[%s17223_s17 + $0x378] sm:$0xf]  ;;  %v4129_v39 = vsel %vm17216_vm4, %v13011_v1, %v4128_v36  ;;  %v12989_v1 = vld [vmem:[%s17223_s17 + $0x3d0] sm:$0xf] }
 0x141   : > { %v4125_v15 = vsel %vm17216_vm4, %v4123_v0, %v4124_v61  ;;  %v13026_v26 = vcombine.low %v4115_v10, %v4118_v20  ;;  %v4132_v50 = vsel %vm17216_vm4, %v4130_v30, %v4131_v29  ;;  %v4142_v0 = vrot.slane %v12980_v7, 6  ;;  %v16925_v20 = vld [vmem:[%s17223_s17 + $0x98c] sm:$0xff]   ;;  %v16926_v36 = vld [vmem:[%s17223_s17 + $0x9b8] sm:$0xff]   ;;  %v12985_v7 = vld [vmem:[%s17223_s17 + $0x3a0] sm:$0xc] }
 0x142   : > { %v4149_v10 = vrot.slane %v12983_v43, 6  ;;  %v13028_v12 = vcombine.low %v4129_v39, %v4132_v50  ;;  %v12987_v43 = vld [vmem:[%s17223_s17 + $0x3a8] sm:$0x3]  ;;  %v4163_v39 = vrot.slane %v12989_v1, 6  ;;  %v12993_v1 = vld [vmem:[%s17223_s17 + $0x400] sm:$0x3] }
 0x143   : > { %v16927_v50 = vld [vmem:[%s17223_s17 + $0x9e4] sm:$0xff]  }
 0x146   : > { %15067 = vmatmul.mubr.msk.bf16.gmra.mrb[20].mxu1 %vm499_vm3, %v16921_v54  ;;  %15097 = vmatmul.mubr.msk.bf16.vlgmr.msra.gmra.mrb[64].mxu0 %vm499_vm3, %v13024_v57  ;;  %v13027_v54 = vcombine.low %v4122_v9, %v4125_v15  ;;  %v13012_v57 = vrot.slane %v12976_v11, 10  ;;  %v12982_v9 = vld [vmem:[%s17223_s17 + $0x374] sm:$0xc]  ;;  %v12984_v15 = vld [vmem:[%s17223_s17 + $0x37c] sm:$0x3]  ;;  %v4144_v11 = vrot.slane %v4142_v0, 4 }
 0x147   : > { %15070 = vmatprep.mubr.msk.bf16.mxu1 %vm499_vm3, %v16922_v5  ;;  %15100 = vmatprep.mubr.msk.bf16.mxu0 %vm499_vm3, %v13025_v28  ;;  %v4137_v5 = vrot.slane %v4135_v8, 4  ;;  %v4138_v28 = vrot.slane %v12978_v46, 6  ;;  %v4145_v46 = vrot.slane %v12981_v27, 6 }
 0x148   : > { %15129 = vmatpush3.bf16.msra.mxu0 %v4465_v60  ;;  %v4136_v61 = vsel %vm17216_vm4, %v13012_v57, %v4135_v8  ;;  %v12979_v60 = vld [vmem:[%s17223_s17 + $0x348] sm:$0xc]  ;;  %v13014_v8 = vrot.slane %v12982_v9, 10 }
 0x149   : > { %16537 = vmatprep.subr.msk.bf16.mxu0 %vm548_vm0, %v18556_v31  ;;  %v4139_v2 = vsel %vm17216_vm4, %v4137_v5, %v4138_v28  ;;  %v4146_v29 = vsel %vm17216_vm4, %v4144_v11, %v4145_v46 }
 0x14a   : > { %v13029_v22 = vcombine.low %v4136_v61, %v4139_v2  ;;  %v4150_v5 = vsel %vm17216_vm4, %v13014_v8, %v4149_v10  ;;  %v12988_v61 = vld [vmem:[%s17223_s17 + $0x3cc] sm:$0xc]  ;;  %v12990_v2 = vld [vmem:[%s17223_s17 + $0x3d4] sm:$0x3] }
 0x14e   : > { %15071 = vmatmul.mubr.msk.bf16.gmra.mrb[24].mxu1 %vm499_vm3, %v16923_v48  ;;  %15101 = vmatmul.mubr.msk.bf16.gmra.mrb[68].mxu0 %vm499_vm3, %v13026_v26  ;;  %v13013_v48 = vrot.slane %v12979_v60, 10  ;;  %v4151_v26 = vrot.slane %v4149_v10, 4  ;;  %v13016_v10 = vrot.slane %v12988_v61, 10 }
 0x14f   : > { %15074 = vmatprep.mubr.msk.bf16.mxu1 %vm499_vm3, %v16924_v35  ;;  %15104 = vmatprep.mubr.msk.bf16.mxu0 %vm499_vm3, %v13027_v54  ;;  %v4152_v35 = vrot.slane %v12984_v15, 6  ;;  %v12986_v54 = vld [vmem:[%s17223_s17 + $0x3a4] sm:$0xf]  ;;  %v4159_v15 = vrot.slane %v12987_v43, 6 }
 0x150   : > { %v4143_v30 = vsel %vm17216_vm4, %v13013_v48, %v4142_v0  ;;  %v4156_v57 = vrot.slane %v12986_v54, 6  ;;  %v16928_v0 = vld [vmem:[%s17223_s17 + $0xa10] sm:$0xff]   ;;  %v12995_v48 = vld [vmem:[%s17223_s17 + $0x428] sm:$0xf]  ;;  %v12991_v54 = vld [vmem:[%s17223_s17 + $0x3f8] sm:$0xc] }
 0x151   : > { %v4153_v28 = vsel %vm17216_vm4, %v4151_v26, %v4152_v35  ;;  %v13030_v60 = vcombine.low %v4143_v30, %v4146_v29  ;;  %v4164_v26 = vsel %vm17216_vm4, %v13016_v10, %v4163_v39  ;;  %v4177_v30 = vrot.slane %v12995_v48, 6  ;;  %v16929_v29 = vld [vmem:[%s17223_s17 + $0xa3c] sm:$0xff]   ;;  %v12999_v48 = vld [vmem:[%s17223_s17 + $0x458] sm:$0x3] }
 0x152   : > { %v13031_v27 = vcombine.low %v4150_v5, %v4153_v28  ;;  %v4158_v9 = vrot.slane %v4156_v57, 4  ;;  %v12994_v5 = vld [vmem:[%s17223_s17 + $0x424] sm:$0xc]  ;;  %v12996_v28 = vld [vmem:[%s17223_s17 + $0x42c] sm:$0x3] }
 0x154   : > { %v4160_v46 = vsel %vm17216_vm4, %v4158_v9, %v4159_v15 }
 0x156   : > { %15075 = vmatmul.mubr.msk.bf16.gmra.mrb[28].mxu1 %vm499_vm3, %v16925_v20  ;;  %15105 = vmatmul.mubr.msk.bf16.gmra.mrb[72].mxu0 %vm499_vm3, %v13028_v12  ;;  %v13015_v20 = vrot.slane %v12985_v7, 10  ;;  %v4165_v12 = vrot.slane %v4163_v39, 4  ;;  %v13018_v39 = vrot.slane %v12994_v5, 10 }
 0x157   : > { %15078 = vmatprep.mubr.msk.bf16.mxu1 %vm499_vm3, %v16926_v36  ;;  %15108 = vmatprep.mubr.msk.bf16.mxu0 %vm499_vm3, %v13029_v22  ;;  %v4166_v36 = vrot.slane %v12990_v2, 6  ;;  %v12992_v22 = vld [vmem:[%s17223_s17 + $0x3fc] sm:$0xf]  ;;  %v4173_v2 = vrot.slane %v12993_v1, 6  ;;  %v16932_v1 = vld [vmem:[%s17223_s17 + $0xac0] sm:$0xff]  }
 0x158   : > { %v4157_v11 = vsel %vm17216_vm4, %v13015_v20, %v4156_v57  ;;  %v4170_v8 = vrot.slane %v12992_v22, 6  ;;  %v16930_v57 = vld [vmem:[%s17223_s17 + $0xa68] sm:$0xff]   ;;  %v13001_v20 = vld [vmem:[%s17223_s17 + $0x480] sm:$0xf]  ;;  %v12997_v22 = vld [vmem:[%s17223_s17 + $0x450] sm:$0xc] }
 0x159   : > { %v4167_v35 = vsel %vm17216_vm4, %v4165_v12, %v4166_v36  ;;  %v13032_v7 = vcombine.low %v4157_v11, %v4160_v46  ;;  %v4178_v12 = vsel %vm17216_vm4, %v13018_v39, %v4177_v30  ;;  %v4191_v11 = vrot.slane %v13001_v20, 6  ;;  %v16931_v46 = vld [vmem:[%s17223_s17 + $0xa94] sm:$0xff]   ;;  %v16933_v20 = vld [vmem:[%s17223_s17 + $0xaec] sm:$0xff]  }
 0x15a   : > { %v13033_v43 = vcombine.low %v4164_v26, %v4167_v35  ;;  %v4172_v61 = vrot.slane %v4170_v8, 4  ;;  %v13000_v26 = vld [vmem:[%s17223_s17 + $0x47c] sm:$0xc]  ;;  %v13002_v35 = vld [vmem:[%s17223_s17 + $0x484] sm:$0x3] }
 0x15c   : > { %v4174_v15 = vsel %vm17216_vm4, %v4172_v61, %v4173_v2 }
 0x15e   : > { %15079 = vmatmul.mubr.msk.bf16.gmra.mrb[0].mxu1 %vm499_vm3, %v16927_v50  ;;  %15109 = vmatmul.mubr.msk.bf16.gmra.mrb[76].mxu0 %vm499_vm3, %v13030_v60  ;;  %v13017_v50 = vrot.slane %v12991_v54, 10  ;;  %v4179_v60 = vrot.slane %v4177_v30, 4  ;;  %v13020_v30 = vrot.slane %v13000_v26, 10 }
 0x15f   : > { %15082 = vmatprep.mubr.msk.bf16.mxu1 %vm499_vm3, %v16928_v0  ;;  %15112 = vmatprep.mubr.msk.bf16.mxu0 %vm499_vm3, %v13031_v27  ;;  %v4180_v0 = vrot.slane %v12996_v28, 6  ;;  %v12998_v27 = vld [vmem:[%s17223_s17 + $0x454] sm:$0xf]  ;;  %v4187_v28 = vrot.slane %v12999_v48, 6 }
 0x160   : > { %v4171_v9 = vsel %vm17216_vm4, %v13017_v50, %v4170_v8  ;;  %v4184_v10 = vrot.slane %v12998_v27, 6  ;;  %v4192_v39 = vsel %vm17216_vm4, %v13020_v30, %v4191_v11  ;;  %v13005_v27 = vld [vmem:[%s17223_s17 + $0x4b0] sm:$0x3]  ;;  %v21173_v30 = vld [vmem:[#allocation6_spill] sm:$0xff] }
 0x161   : > { %v4181_v36 = vsel %vm17216_vm4, %v4179_v60, %v4180_v0  ;;  %v13034_v54 = vcombine.low %v4171_v9, %v4174_v15  ;;  %v13003_v0 = vld [vmem:[%s17223_s17 + $0x4a8] sm:$0xc]  ;;  %v16934_v15 = vld [vmem:[%s17223_s17] sm:$0xff]  }
 0x162   : > { %v13035_v8 = vcombine.low %v4178_v12, %v4181_v36  ;;  %v4186_v5 = vrot.slane %v4184_v10, 4  ;;  %v13021_v36 = vrot.slane %v13003_v0, 10  ;;  %v16943_v0 = vld [vmem:[%s17223_s17 + $0x18c] sm:$0xff]  }
 0x164   : > { %v4188_v61 = vsel %vm17216_vm4, %v4186_v5, %v4187_v28  ;;  %v4934_v5 = vsel %vm548_vm0, %v18556_v31, 0  ;;  %v18706_v28 = vld [vmem:[%s20987_s2 + $0x2c] sm:$0xf]  ;;  %v16939_v31 = vld [vmem:[%s17223_s17 + $0xdc] sm:$0xff]  }
 0x166   : > { %15083 = vmatmul.mubr.msk.bf16.gmra.mrb[4].mxu1 %vm499_vm3, %v16929_v29  ;;  %15113 = vmatmul.mubr.msk.bf16.gmra.mrb[80].mxu0 %vm499_vm3, %v13032_v7  ;;  %v13019_v29 = vrot.slane %v12997_v22, 10  ;;  %v4193_v7 = vrot.slane %v4191_v11, 4  ;;  %v4201_v22 = vrot.slane %v13005_v27, 6  ;;  %v16944_v27 = vld [vmem:[%s17223_s17 + $0x1b8] sm:$0xff]  }
 0x167   : > { %15086 = vmatprep.mubr.msk.bf16.mxu1 %vm499_vm3, %v16930_v57  ;;  %15116 = vmatprep.mubr.msk.bf16.mxu0 %vm499_vm3, %v13033_v43  ;;  %v4194_v57 = vrot.slane %v13002_v35, 6  ;;  %v13004_v43 = vld [vmem:[%s17223_s17 + $0x4ac] sm:$0xf]  ;;  %v8464_v35 = vsel %vm548_vm0, %v18527_v13, 0  ;;  %v16937_v13 = vld [vmem:[%s17223_s17 + $0x84] sm:$0xff]  }
 0x168   : > { %v4185_v50 = vsel %vm17216_vm4, %v13019_v29, %v4184_v10  ;;  %v4198_v2 = vrot.slane %v13004_v43, 6  ;;  %v16938_v29 = vld [vmem:[%s17223_s17 + $0xb0] sm:$0xff]   ;;  %v21175_v43 = vld [vmem:[#allocation8_spill] sm:$0xff] }
 0x169   : > { %v4195_v60 = vsel %vm17216_vm4, %v4193_v7, %v4194_v57  ;;  %v13036_v9 = vcombine.low %v4185_v50, %v4188_v61  ;;  %v21174_v7 = vld [vmem:[#allocation7_spill] sm:$0xff]  ;;  %v16940_v57 = vld [vmem:[%s17223_s17 + $0x108] sm:$0xff]   ;;  %v21176_v50 = vld [vmem:[#allocation9_spill] sm:$0xff] }
 0x16a   : > { %v13037_v12 = vcombine.low %v4192_v39, %v4195_v60  ;;  %v4200_v10 = vrot.slane %v4198_v2, 4  ;;  %v4199_v48 = vsel %vm17216_vm4, %v13021_v36, %v4198_v2  ;;  %v16941_v61 = vld [vmem:[%s17223_s17 + $0x134] sm:$0xff]   ;;  %v16942_v2 = vld [vmem:[%s17223_s17 + $0x160] sm:$0xff]   ;;  %v21177_v39 = vld [vmem:[#allocation10_spill] sm:$0xff] }
 0x16b   : > { %v21178_v60 = vld [vmem:[#allocation11_spill] sm:$0xff]  ;;  %v21181_v36 = vld [vmem:[#allocation14_spill] sm:$0xff] }
 0x16c   : > { %v4202_v11 = vsel %vm17216_vm4, %v4200_v10, %v4201_v22  ;;  %v21182_v10 = vld [vmem:[#allocation15_spill] sm:$0xff]  ;;  %v16947_v22 = vld [vmem:[%s17223_s17 + $0x23c] sm:$0xff]  }
 0x16d   : > { %v13038_v26 = vcombine.low %v4199_v48, %v4202_v11  ;;  %v16948_v48 = vld [vmem:[%s17223_s17 + $0x268] sm:$0xff]   ;;  %v13072_v11 = vld [vmem:[%s17223_s17 + $0x224] sm:$0xf] }
 0x16e   : > { %15087 = vmatmul.mubr.msk.bf16.gmra.mrb[8].mxu1 %vm499_vm3, %v16931_v46  ;;  %15117 = vmatmul.mubr.msk.bf16.gmra.mrb[84].mxu0 %vm499_vm3, %v13034_v54  ;;  %v16935_v46 = vld [vmem:[%s17223_s17 + $0x2c] sm:$0xff]   ;;  %v16936_v54 = vld [vmem:[%s17223_s17 + $0x58] sm:$0xff]  }
 0x16f   : > { %15090 = vmatprep.mubr.msk.bf16.mxu1 %vm499_vm3, %v16932_v1  ;;  %15120 = vmatprep.mubr.msk.bf16.mxu0 %vm499_vm3, %v13035_v8  ;;  %v18690_v1 = vld [vmem:[%s20987_s2 + $0x4c] sm:$0xf]  ;;  %v21172_v8 = vld [vmem:[#allocation5_spill] sm:$0xff] }
 0x176   : > { %15091 = vmatmul.mubr.msk.bf16.gmra.mrb[12].mxu1 %vm499_vm3, %v16933_v20  ;;  %15121 = vmatmul.mubr.msk.bf16.gmra.mrb[88].mxu0 %vm499_vm3, %v13036_v9  ;;  %v21179_v20 = vld [vmem:[#allocation12_spill] sm:$0xff]  ;;  %v21180_v9 = vld [vmem:[#allocation13_spill] sm:$0xff] }
 0x177   : > { %15402 = vmatprep.mubr.msk.bf16.mxu1 %vm499_vm3, %v16934_v15  ;;  %15124 = vmatprep.mubr.msk.bf16.mxu0 %vm499_vm3, %v13037_v12  ;;  %v16945_v15 = vld [vmem:[%s17223_s17 + $0x1e4] sm:$0xff]   ;;  %v16946_v12 = vld [vmem:[%s17223_s17 + $0x210] sm:$0xff]  }
 0x17e   : > { %15403 = vmatmul.mubr.msk.bf16.vlgmr.msra.gmra.mrb[32].mxu1 %vm499_vm3, %v16935_v46  ;;  %15125 = vmatmul.mubr.msk.bf16.gmra.mrb[92].mxu0 %vm499_vm3, %v13038_v26  ;;  %v21183_v46 = vld [vmem:[#allocation16_spill] sm:$0xff]  ;;  %v21184_v26 = vld [vmem:[#allocation17_spill] sm:$0xff] }
 0x17f   : > { %15435 = vmatpush3.bf16.msra.mxu1 %v8464_v35  ;;  %15130 = vmatprep.mubr.msk.bf16.mxu0 %vm499_vm3, %v21172_v8  ;;  %v4726_v35 = vrot.slane %v13072_v11, 6  ;;  %v13076_v11 = vld [vmem:[%s17223_s17 + $0x254] sm:$0x3] }
 0x180   : > { %15406 = vmatprep.mubr.msk.bf16.mxu1 %vm499_vm3, %v16936_v54  ;;  %16546 = vmatprep.subr.msk.bf16.mxu1 %vm548_vm0, %v18690_v1  ;;  %v16949_v54 = vld [vmem:[%s17223_s17 + $0x294] sm:$0xff]  }
 0x186   : > { %15407 = vmatmul.mubr.msk.bf16.gmra.mrb[36].mxu1 %vm499_vm3, %v16937_v13  ;;  %15131 = vmatmul.mubr.msk.bf16.vlgmr.msra.gmra.mrb[64].mxu0 %vm499_vm3, %v21173_v30  ;;  %v13071_v13 = vld [vmem:[%s17223_s17 + $0x220] sm:$0xc] }
 0x187   : > { %15410 = vmatprep.mubr.msk.bf16.mxu1 %vm499_vm3, %v16938_v29  ;;  %15134 = vmatprep.mubr.msk.bf16.mxu0 %vm499_vm3, %v21174_v7  ;;  %v13073_v29 = vld [vmem:[%s17223_s17 + $0x228] sm:$0x3] }
 0x188   : > { %15163 = vmatpush3.bf16.msra.mxu0 %v4934_v5  ;;  %v13119_v5 = vrot.slane %v13071_v13, 10  ;;  %v13077_v13 = vld [vmem:[%s17223_s17 + $0x278] sm:$0xc] }
 0x189   : > { %16538 = vmatprep.subr.msk.bf16.mxu0 %vm548_vm0, %v18706_v28  ;;  %v13121_v21 = vrot.slane %v13077_v13, 10  ;;  %v13082_v13 = vld [vmem:[%s17223_s17 + $0x2ac] sm:$0x3] }
 0x18e   : > { %15411 = vmatmul.mubr.msk.bf16.gmra.mrb[40].mxu1 %vm499_vm3, %v16939_v31  ;;  %15135 = vmatmul.mubr.msk.bf16.gmra.mrb[68].mxu0 %vm499_vm3, %v21175_v43  ;;  %v4728_v31 = vrot.slane %v4726_v35, 4 }
 0x18f   : > { %15414 = vmatprep.mubr.msk.bf16.mxu1 %vm499_vm3, %v16940_v57  ;;  %15138 = vmatprep.mubr.msk.bf16.mxu0 %vm499_vm3, %v21176_v50  ;;  %v4729_v57 = vrot.slane %v13073_v29, 6  ;;  %v13079_v29 = vld [vmem:[%s17223_s17 + $0x280] sm:$0x3] }
 0x196   : > { %15415 = vmatmul.mubr.msk.bf16.gmra.mrb[44].mxu1 %vm499_vm3, %v16941_v61  ;;  %15139 = vmatmul.mubr.msk.bf16.gmra.mrb[72].mxu0 %vm499_vm3, %v21177_v39  ;;  %v13075_v61 = vld [vmem:[%s17223_s17 + $0x250] sm:$0xf] }
 0x197   : > { %15418 = vmatprep.mubr.msk.bf16.mxu1 %vm499_vm3, %v16942_v2  ;;  %15142 = vmatprep.mubr.msk.bf16.mxu0 %vm499_vm3, %v21178_v60  ;;  %v13078_v2 = vld [vmem:[%s17223_s17 + $0x27c] sm:$0xf] }
 0x19e   : > { %15419 = vmatmul.mubr.msk.bf16.gmra.mrb[48].mxu1 %vm499_vm3, %v16943_v0  ;;  %15143 = vmatmul.mubr.msk.bf16.gmra.mrb[76].mxu0 %vm499_vm3, %v21179_v20  ;;  %v21185_v0 = vld [vmem:[#allocation18_spill] sm:$0xff] }
 0x19f   : > { %15422 = vmatprep.mubr.msk.bf16.mxu1 %vm499_vm3, %v16944_v27  ;;  %15146 = vmatprep.mubr.msk.bf16.mxu0 %vm499_vm3, %v21180_v9  ;;  %v21186_v27 = vld [vmem:[#allocation19_spill] sm:$0xff] }
 0x1a6   : > { %15423 = vmatmul.mubr.msk.bf16.gmra.mrb[52].mxu1 %vm499_vm3, %v16945_v15  ;;  %15147 = vmatmul.mubr.msk.bf16.gmra.mrb[80].mxu0 %vm499_vm3, %v21181_v36  ;;  %v4733_v15 = vrot.slane %v13075_v61, 6  ;;  %v4736_v61 = vrot.slane %v13076_v11, 6  ;;  %v13080_v11 = vld [vmem:[%s17223_s17 + $0x2a4] sm:$0xc] }
 0x1a7   : > { %15426 = vmatprep.mubr.msk.bf16.mxu1 %vm499_vm3, %v16946_v12  ;;  %15150 = vmatprep.mubr.msk.bf16.mxu0 %vm499_vm3, %v21182_v10  ;;  %v4727_v12 = vsel %vm17216_vm4, %v13119_v5, %v4726_v35  ;;  %v4743_v35 = vrot.slane %v13079_v29, 6  ;;  %v13081_v5 = vld [vmem:[%s17223_s17 + $0x2a8] sm:$0xf] }
 0x1a8   : > { %v4735_v23 = vrot.slane %v4733_v15, 4 }
 0x1ae   : > { %15427 = vmatmul.mubr.msk.bf16.gmra.mrb[56].mxu1 %vm499_vm3, %v16947_v22  ;;  %15151 = vmatmul.mubr.msk.bf16.gmra.mrb[84].mxu0 %vm499_vm3, %v21183_v46  ;;  %v4730_v22 = vsel %vm17216_vm4, %v4728_v31, %v4729_v57  ;;  %v13084_v31 = vld [vmem:[%s17223_s17 + $0x2d4] sm:$0xf]  ;;  %v21187_v57 = vld [vmem:[#allocation20_spill] sm:$0xff] }
 0x1af   : > { %15430 = vmatprep.mubr.msk.bf16.mxu1 %vm499_vm3, %v16948_v48  ;;  %15154 = vmatprep.mubr.msk.bf16.mxu0 %vm499_vm3, %v21184_v26  ;;  %v13074_v48 = vld [vmem:[%s17223_s17 + $0x24c] sm:$0xc]  ;;  %v13136_v3 = vcombine.low %v4727_v12, %v4730_v22  ;;  %v4747_v12 = vrot.slane %v13081_v5, 6 }
 0x1b0   : > { %v13120_v55 = vrot.slane %v13074_v48, 10 }
 0x1b6   : > { %15431 = vmatmul.mubr.msk.bf16.gmra.mrb[60].mxu1 %vm499_vm3, %v16949_v54  ;;  %15155 = vmatmul.mubr.msk.bf16.gmra.mrb[88].mxu0 %vm499_vm3, %v21185_v0  ;;  %v4740_v54 = vrot.slane %v13078_v2, 6  ;;  %v4734_v2 = vsel %vm17216_vm4, %v13120_v55, %v4733_v15  ;;  %v13083_v55 = vld [vmem:[%s17223_s17 + $0x2d0] sm:$0xc] }
 0x1b7   : > { %15436 = vmatprep.mubr.msk.bf16.mxu1 %vm499_vm3, %v21172_v8  ;;  %15158 = vmatprep.mubr.msk.bf16.mxu0 %vm499_vm3, %v21186_v27  ;;  %v8933_v8 = vsel %vm548_vm0, %v18690_v1, 0  ;;  %v18785_v1 = vld [vmem:[%s20987_s2 + $0x50] sm:$0xf]  ;;  %v13123_v5 = vrot.slane %v13083_v55, 10 }
 0x1b8   : > { %v4742_v19 = vrot.slane %v4740_v54, 4  ;;  %v4741_v22 = vsel %vm17216_vm4, %v13121_v21, %v4740_v54  ;;  %v13091_v55 = vld [vmem:[%s17223_s17 + $0x330] sm:$0x3] }
 0x1ba   : > { %v4744_v48 = vsel %vm17216_vm4, %v4742_v19, %v4743_v35  ;;  %v13087_v19 = vld [vmem:[%s17223_s17 + $0x300] sm:$0xf]  ;;  %v5435_v35 = vsel %vm548_vm0, %v18706_v28, 0 }
 0x1bb   : > { %v13138_v29 = vcombine.low %v4741_v22, %v4744_v48 }
 0x1be   : > { %15437 = vmatmul.mubr.msk.bf16.vlgmr.msra.gmra.mrb[32].mxu1 %vm499_vm3, %v21173_v30  ;;  %15159 = vmatmul.mubr.msk.bf16.gmra.mrb[92].mxu0 %vm499_vm3, %v21187_v57  ;;  %v4737_v30 = vsel %vm17216_vm4, %v4735_v23, %v4736_v61  ;;  %v13085_v23 = vld [vmem:[%s17223_s17 + $0x2d8] sm:$0x3]  ;;  %v4750_v61 = vrot.slane %v13082_v13, 6 }
 0x1bf   : > { %15469 = vmatpush3.bf16.msra.mxu1 %v8933_v8  ;;  %15164 = vmatprep.mubr.msk.bf16.mxu0 %vm499_vm3, %v13136_v3  ;;  %v4754_v3 = vrot.slane %v13084_v31, 6  ;;  %v13137_v15 = vcombine.low %v4734_v2, %v4737_v30  ;;  %v4749_v8 = vrot.slane %v4747_v12, 4  ;;  %v4757_v54 = vrot.slane %v13085_v23, 6  ;;  %v13090_v31 = vld [vmem:[%s17223_s17 + $0x32c] sm:$0xf] }
 0x1c0   : > { %15440 = vmatprep.mubr.msk.bf16.mxu1 %vm499_vm3, %v21174_v7  ;;  %16547 = vmatprep.subr.msk.bf16.mxu1 %vm548_vm0, %v18785_v1  ;;  %v13122_v7 = vrot.slane %v13080_v11, 10  ;;  %v18815_v2 = vld [vmem:[%s20987_s2 + $0x30] sm:$0xf]  ;;  %v4761_v30 = vrot.slane %v13087_v19, 6  ;;  %v13086_v11 = vld [vmem:[%s17223_s17 + $0x2fc] sm:$0xc] }
 0x1c1   : > { %v4756_v21 = vrot.slane %v4754_v3, 4  ;;  %v4755_v22 = vsel %vm17216_vm4, %v13123_v5, %v4754_v3  ;;  %v4768_v13 = vrot.slane %v13090_v31, 6  ;;  %v4771_v5 = vrot.slane %v13091_v55, 6 }
 0x1c2   : > { %v4748_v28 = vsel %vm17216_vm4, %v13122_v7, %v4747_v12  ;;  %v13089_v12 = vld [vmem:[%s17223_s17 + $0x328] sm:$0xc]  ;;  %v4763_v7 = vrot.slane %v4761_v30, 4 }
 0x1c3   : > { %v4758_v48 = vsel %vm17216_vm4, %v4756_v21, %v4757_v54  ;;  %v13125_v3 = vrot.slane %v13089_v12, 10  ;;  %v13093_v21 = vld [vmem:[%s17223_s17 + $0x358] sm:$0xf]  ;;  %v13096_v54 = vld [vmem:[%s17223_s17 + $0x384] sm:$0xf] }
 0x1c4   : > { %v4775_v31 = vrot.slane %v13093_v21, 6  ;;  %v13098_v21 = vld [vmem:[%s17223_s17 + $0x3ac] sm:$0xc] }
 0x1c6   : > { %15441 = vmatmul.mubr.msk.bf16.gmra.mrb[36].mxu1 %vm499_vm3, %v21175_v43  ;;  %15165 = vmatmul.mubr.msk.bf16.vlgmr.msra.gmra.mrb[64].mxu0 %vm499_vm3, %v13137_v15  ;;  %v4751_v43 = vsel %vm17216_vm4, %v4749_v8, %v4750_v61  ;;  %v13140_v15 = vcombine.low %v4755_v22, %v4758_v48  ;;  %v4770_v61 = vrot.slane %v4768_v13, 4  ;;  %v13094_v22 = vld [vmem:[%s17223_s17 + $0x35c] sm:$0x3]  ;;  %v13095_v48 = vld [vmem:[%s17223_s17 + $0x380] sm:$0xc]  ;;  %v4777_v55 = vrot.slane %v4775_v31, 4 }
 0x1c7   : > { %15444 = vmatprep.mubr.msk.bf16.mxu1 %vm499_vm3, %v21176_v50  ;;  %15168 = vmatprep.mubr.msk.bf16.mxu0 %vm499_vm3, %v13138_v29  ;;  %v13088_v50 = vld [vmem:[%s17223_s17 + $0x304] sm:$0x3]  ;;  %v13139_v23 = vcombine.low %v4748_v28, %v4751_v43  ;;  %v13124_v29 = vrot.slane %v13086_v11, 10  ;;  %v4769_v28 = vsel %vm17216_vm4, %v13125_v3, %v4768_v13  ;;  %v13092_v43 = vld [vmem:[%s17223_s17 + $0x354] sm:$0xc] }
 0x1c8   : > { %15197 = vmatpush3.bf16.msra.mxu0 %v5435_v35  ;;  %v4764_v8 = vrot.slane %v13088_v50, 6  ;;  %v13097_v11 = vld [vmem:[%s17223_s17 + $0x388] sm:$0x3] }
 0x1c9   : > { %16539 = vmatprep.subr.msk.bf16.mxu0 %vm548_vm0, %v18815_v2  ;;  %v4762_v19 = vsel %vm17216_vm4, %v13124_v29, %v4761_v30  ;;  %v13126_v30 = vrot.slane %v13092_v43, 10  ;;  %v13127_v29 = vrot.slane %v13095_v48, 10  ;;  %v4785_v13 = vrot.slane %v13097_v11, 6 }
 0x1ca   : > { %v4765_v35 = vsel %vm17216_vm4, %v4763_v7, %v4764_v8  ;;  %v13102_v8 = vld [vmem:[%s17223_s17 + $0x3dc] sm:$0xf] }
 0x1cb   : > { %v13141_v50 = vcombine.low %v4762_v19, %v4765_v35 }
 0x1ce   : > { %15445 = vmatmul.mubr.msk.bf16.gmra.mrb[40].mxu1 %vm499_vm3, %v21177_v39  ;;  %15169 = vmatmul.mubr.msk.bf16.gmra.mrb[68].mxu0 %vm499_vm3, %v13139_v23  ;;  %v4772_v39 = vsel %vm17216_vm4, %v4770_v61, %v4771_v5  ;;  %v4778_v23 = vrot.slane %v13094_v22, 6  ;;  %v4776_v61 = vsel %vm17216_vm4, %v13126_v30, %v4775_v31  ;;  %v13128_v22 = vrot.slane %v13098_v21, 10  ;;  %v13108_v30 = vld [vmem:[%s17223_s17 + $0x434] sm:$0xf]  ;;  %v13106_v21 = vld [vmem:[%s17223_s17 + $0x40c] sm:$0x3] }
 0x1cf   : > { %15448 = vmatprep.mubr.msk.bf16.mxu1 %vm499_vm3, %v21178_v60  ;;  %15172 = vmatprep.mubr.msk.bf16.mxu0 %vm499_vm3, %v13140_v15  ;;  %v4782_v60 = vrot.slane %v13096_v54, 6  ;;  %v13142_v12 = vcombine.low %v4769_v28, %v4772_v39  ;;  %v13099_v15 = vld [vmem:[%s17223_s17 + $0x3b0] sm:$0xf]  ;;  %v13100_v54 = vld [vmem:[%s17223_s17 + $0x3b4] sm:$0x3] }
 0x1d0   : > { %v4789_v3 = vrot.slane %v13099_v15, 6  ;;  %v4779_v5 = vsel %vm17216_vm4, %v4777_v55, %v4778_v23  ;;  %v13101_v28 = vld [vmem:[%s17223_s17 + $0x3d8] sm:$0xc]  ;;  %v13103_v39 = vld [vmem:[%s17223_s17 + $0x3e0] sm:$0x3]  ;;  %v4792_v11 = vrot.slane %v13100_v54, 6 }
 0x1d1   : > { %v4784_v7 = vrot.slane %v4782_v60, 4  ;;  %v13143_v31 = vcombine.low %v4776_v61, %v4779_v5  ;;  %v13129_v23 = vrot.slane %v13101_v28, 10  ;;  %v13104_v61 = vld [vmem:[%s17223_s17 + $0x404] sm:$0xc]  ;;  %v4810_v5 = vrot.slane %v13108_v30, 6 }
 0x1d2   : > { %v4791_v48 = vrot.slane %v4789_v3, 4  ;;  %v13107_v54 = vld [vmem:[%s17223_s17 + $0x430] sm:$0xc] }
 0x1d3   : > { %v4786_v19 = vsel %vm17216_vm4, %v4784_v7, %v4785_v13  ;;  %v4790_v13 = vsel %vm17216_vm4, %v13128_v22, %v4789_v3  ;;  %v18909_v22 = vld [vmem:[%s17223_s17 + $0x48c] sm:$0xf] }
 0x1d6   : > { %15449 = vmatmul.mubr.msk.bf16.gmra.mrb[44].mxu1 %vm499_vm3, %v21179_v20  ;;  %15173 = vmatmul.mubr.msk.bf16.gmra.mrb[72].mxu0 %vm499_vm3, %v13141_v50  ;;  %v4783_v20 = vsel %vm17216_vm4, %v13127_v29, %v4782_v60  ;;  %v13105_v50 = vld [vmem:[%s17223_s17 + $0x408] sm:$0xf]  ;;  %v4799_v29 = vrot.slane %v13103_v39, 6  ;;  %v13130_v39 = vrot.slane %v13104_v61, 10  ;;  %v8627_v61 = vld [vmem:[%s17223_s17 + $0x10] sm:$0xc] }
 0x1d7   : > { %15452 = vmatprep.mubr.msk.bf16.mxu1 %vm499_vm3, %v21180_v9  ;;  %15176 = vmatprep.mubr.msk.bf16.mxu0 %vm499_vm3, %v13142_v12  ;;  %v4796_v9 = vrot.slane %v13102_v8, 6  ;;  %v13144_v60 = vcombine.low %v4783_v20, %v4786_v19  ;;  %v4803_v7 = vrot.slane %v13105_v50, 6  ;;  %v4793_v8 = vsel %vm17216_vm4, %v4791_v48, %v4792_v11  ;;  %v13109_v19 = vld [vmem:[%s17223_s17 + $0x438] sm:$0x3] }
 0x1d8   : > { %v4806_v11 = vrot.slane %v13106_v21, 6  ;;  %v4812_v50 = vrot.slane %v4810_v5, 4  ;;  %v13113_v21 = vld [vmem:[%s17223_s17 + $0x488] sm:$0xc] }
 0x1d9   : > { %v18873_v35 = vpop.f32.mrb[48].mxu0  ;;  %v4798_v15 = vrot.slane %v4796_v9, 4  ;;  %v4797_v20 = vsel %vm17216_vm4, %v13129_v23, %v4796_v9  ;;  %v13131_v9 = vrot.slane %v13107_v54, 10  ;;  %v4804_v54 = vsel %vm17216_vm4, %v13130_v39, %v4803_v7 }
 0x1da   : > { %v18877_v43 = vpop.f32.mrb[49].mxu0 }
 0x1db   : > { %v18880_v12 = vpop.f32.mrb[50].mxu0  ;;  %v4800_v3 = vsel %vm17216_vm4, %v4798_v15, %v4799_v29  ;;  %v4813_v15 = vrot.slane %v13109_v19, 6  ;;  %v13110_v29 = vld [vmem:[%s17223_s17 + $0x45c] sm:$0xc]  ;;  %v4811_v39 = vsel %vm17216_vm4, %v13131_v9, %v4810_v5 }
 0x1dc   : > { %v18883_v55 = vpop.f32.mrb[51].mxu0  ;;  %v13146_v23 = vcombine.low %v4797_v20, %v4800_v3  ;;  %v13132_v20 = vrot.slane %v13110_v29, 10  ;;  %v13115_v3 = vld [vmem:[%s17223_s17 + $0x490] sm:$0x3] }
 0x1de   : > { %15453 = vmatmul.mubr.msk.bf16.gmra.mrb[48].mxu1 %vm499_vm3, %v21181_v36  ;;  %15177 = vmatmul.mubr.msk.bf16.gmra.mrb[76].mxu0 %vm499_vm3, %v13143_v31  ;;  %v18899_v36 = vld [vmem:[%s17223_s17 + $0x460] sm:$0xf]  ;;  %v4805_v31 = vrot.slane %v4803_v7, 4  ;;  %v8725_v7 = vrot.slane %v8628_v47, 6  ;;  %v18953_v47 = vld [vmem:[%s17223_s17 + $0x230] sm:$0xf] }
 0x1df   : > { %15456 = vmatprep.mubr.msk.bf16.mxu1 %vm499_vm3, %v21182_v10  ;;  %15180 = vmatprep.mubr.msk.bf16.mxu0 %vm499_vm3, %v13144_v60  ;;  %v13145_v10 = vcombine.low %v4790_v13, %v4793_v8  ;;  %v4817_v60 = vrot.slane %v18899_v36, 6  ;;  %v13112_v13 = vld [vmem:[%s17223_s17 + $0x464] sm:$0x3]  ;;  %v5227_v32 = vrot.slane %v18953_v47, 6 }
 0x1e0   : > { %v4807_v36 = vsel %vm17216_vm4, %v4805_v31, %v4806_v11  ;;  %v4820_v19 = vrot.slane %v13112_v13, 6  ;;  %v13133_v31 = vrot.slane %v13113_v21, 10  ;;  %v21188_v11 = vrot.slane %v18909_v22, 6  ;;  %v8630_v21 = vld [vmem:[%s17223_s17 + $0x3c] sm:$0xc] }
 0x1e1   : > { %v18906_v28 = vpop.f32.mrb[52].mxu0  ;;  %v13147_v9 = vcombine.low %v4804_v54, %v4807_v36  ;;  %v8727_v62 = vrot.slane %v8725_v7, 4  ;;  %v18968_v54 = vld [vmem:[%s17223_s17 + $0x25c] sm:$0xf]  ;;  %v13134_v36 = vrot.slane %v13116_v24, 10  ;;  %v13801_v24 = vrot.slane %v8630_v21, 10 }
 0x1e2   : > { %v18911_v48 = vpop.f32.mrb[53].mxu0  ;;  %v4826_v29 = vrot.slane %v21188_v11, 4 }
 0x1e3   : > { %v18914_v30 = vpop.f32.mrb[54].mxu0 }
 0x1e4   : > { %v18918_v8 = vpop.f32.mrb[55].mxu0 }
 0x1e6   : > { %15457 = vmatmul.mubr.msk.bf16.gmra.mrb[52].mxu1 %vm499_vm3, %v21183_v46  ;;  %15181 = vmatmul.mubr.msk.bf16.gmra.mrb[80].mxu0 %vm499_vm3, %v13145_v10  ;;  %v4819_v46 = vrot.slane %v4817_v60, 4  ;;  %v4827_v10 = vrot.slane %v13115_v3, 6 }
 0x1e7   : > { %15460 = vmatprep.mubr.msk.bf16.mxu1 %vm499_vm3, %v21184_v26  ;;  %15184 = vmatprep.mubr.msk.bf16.mxu0 %vm499_vm3, %v13146_v23  ;;  %v4814_v26 = vsel %vm17216_vm4, %v4812_v50, %v4813_v15  ;;  %v8629_v23 = vld [vmem:[%s17223_s17 + $0x18] sm:$0x3]  ;;  %v13118_v50 = vld [vmem:[%s17223_s17 + $0x4bc] sm:$0x3]  ;;  %v13800_v15 = vrot.slane %v8627_v61, 10  ;;  %v4818_v61 = vsel %vm17216_vm4, %v13132_v20, %v4817_v60  ;;  %v8735_v60 = vrot.slane %v8632_v33, 6 }
 0x1e8   : > { %v13148_v44 = vcombine.low %v4811_v39, %v4814_v26  ;;  %v8728_v17 = vrot.slane %v8629_v23, 6  ;;  %v21189_v39 = vrot.slane %v18922_v56, 6  ;;  %v4834_v52 = vrot.slane %v13118_v50, 6  ;;  %v18977_v23 = vld [vmem:[%s17223_s17 + $0x6c] sm:$0xf] }
 0x1e9   : > { %v18949_v13 = vpop.f32.mrb[56].mxu0  ;;  %v4821_v47 = vsel %vm17216_vm4, %v4819_v46, %v4820_v19  ;;  %v13170_v20 = vld [vmem:[%s17223_s17 + $0x234] sm:$0x3]  ;;  %v8734_v50 = vrot.slane %v8732_v4, 4  ;;  %v13216_v46 = vrot.slane %v13168_v42, 10  ;;  %v4828_v33 = vsel %vm17216_vm4, %v4826_v29, %v4827_v10 }
 0x1ea   : > { %v18955_v5 = vpop.f32.mrb[57].mxu0  ;;  %v4833_v26 = vrot.slane %v21189_v39, 4  ;;  %v8633_v39 = vld [vmem:[%s17223_s17 + $0x68] sm:$0xc]  ;;  %v8739_v21 = vrot.slane %v18977_v23, 6  ;;  %v13149_v10 = vcombine.low %v4818_v61, %v4821_v47  ;;  %v8742_v23 = vrot.slane %v8635_v63, 6 }
 0x1eb   : > { %v18959_v11 = vpop.f32.mrb[58].mxu0  ;;  %v19030_v47 = vld [vmem:[%s17223_s17 + $0x2b4] sm:$0xf] }
 0x1ec   : > { %v18963_v3 = vpop.f32.mrb[59].mxu0  ;;  %v4835_v63 = vsel %vm17216_vm4, %v4833_v26, %v4834_v52  ;;  %v21196_v26 = vrot.slane %v18968_v54, 6 }
 0x1ee   : > { %15461 = vmatmul.mubr.msk.bf16.gmra.mrb[56].mxu1 %vm499_vm3, %v21185_v0  ;;  %15185 = vmatmul.mubr.msk.bf16.gmra.mrb[84].mxu0 %vm499_vm3, %v13147_v9  ;;  %v8726_v0 = vsel %vm17216_vm4, %v13800_v15, %v8725_v7  ;;  %v8729_v9 = vsel %vm17216_vm4, %v8727_v62, %v8728_v17  ;;  %v5229_v15 = vrot.slane %v5227_v32, 4  ;;  %v19002_v62 = vld [vmem:[%s17223_s17 + $0x98] sm:$0xf]  ;;  %v19008_v17 = vsel %vm548_vm0, %v18785_v1, 0 }
 0x1ef   : > { %15464 = vmatprep.mubr.msk.bf16.mxu1 %vm499_vm3, %v21186_v27  ;;  %15188 = vmatprep.mubr.msk.bf16.mxu0 %vm499_vm3, %v13148_v44  ;;  %v21190_v27 = vrot.slane %v18909_v22, 6  ;;  %v13171_v44 = vld [vmem:[%s17223_s17 + $0x258] sm:$0xc]  ;;  %v5230_v22 = vrot.slane %v13170_v20, 6  ;;  %v13817_v29 = vcombine.low %v8726_v0, %v8729_v9  ;;  %v21194_v1 = vrot.slane %v18922_v56, 6 }
 0x1f0   : > { %v8746_v61 = vrot.slane %v19002_v62, 6  ;;  %v8733_v9 = vsel %vm17216_vm4, %v13801_v24, %v8732_v4  ;;  %v8736_v56 = vsel %vm17216_vm4, %v8734_v50, %v8735_v60  ;;  %v5228_v62 = vsel %vm17216_vm4, %v13216_v46, %v5227_v32  ;;  %v13176_v46 = vld [vmem:[%s17223_s17 + $0x28c] sm:$0x3] }
 0x1f1   : > { %v4825_v7 = vsel %vm17216_vm4, %v13133_v31, %v21190_v27  ;;  %v19004_v42 = vpop.f32.mrb[60].mxu0  ;;  %v13173_v31 = vld [vmem:[%s17223_s17 + $0x260] sm:$0x3]  ;;  %v13802_v27 = vrot.slane %v8633_v39, 10  ;;  %v19025_v20 = vsel %vm17216_vm4, %v13134_v36, %v21194_v1  ;;  %v8638_v39 = vld [vmem:[%s17223_s17 + $0x9c] sm:$0x3]  ;;  %v5231_v24 = vsel %vm17216_vm4, %v5229_v15, %v5230_v22 }
 0x1f2   : > { %21191 = vst [vmem:[#allocation5_spill] sm:$0xff] %v19004_v42  ;;  %v19011_v19 = vpop.f32.mrb[61].mxu0  ;;  %v13150_v41 = vcombine.low %v4825_v7, %v4828_v33  ;;  %v8741_v7 = vrot.slane %v8739_v21, 4  ;;  %v13174_v36 = vld [vmem:[%s17223_s17 + $0x284] sm:$0xc]  ;;  %v13217_v1 = vrot.slane %v13171_v44, 10 }
 0x1f3   : > { %21192 = vst [vmem:[#allocation6_spill] sm:$0xff] %v19011_v19  ;;  %v19019_v34 = vpop.f32.mrb[62].mxu0  ;;  %v19042_v33 = vld [vmem:[%s17223_s17 + $0xc4] sm:$0xf]  ;;  %v5236_v52 = vrot.slane %v21196_v26, 4  ;;  %v5241_v4 = vrot.slane %v19017_v59, 6 }
 0x1f4   : > { %21193 = vst [vmem:[#allocation7_spill] sm:$0xff] %v19019_v34  ;;  %v19032_v0 = vpop.f32.mrb[63].mxu0  ;;  %v13803_v60 = vrot.slane %v19014_v40, 10  ;;  %v8749_v32 = vrot.slane %v8638_v39, 6  ;;  %v8748_v50 = vrot.slane %v8746_v61, 4  ;;  %v13218_v59 = vrot.slane %v13174_v36, 10 }
 0x1f5   : > { %21195 = vst [vmem:[#allocation8_spill] sm:$0xff] %v19032_v0  ;;  %v8743_v15 = vsel %vm17216_vm4, %v8741_v7, %v8742_v23  ;;  %v19065_v40 = vld [vmem:[%s17223_s17 + $0x2b0] sm:$0xc]  ;;  %v8639_v22 = vld [vmem:[%s17223_s17 + $0xc0] sm:$0xc]  ;;  %v13151_v39 = vcombine.low %v19025_v20, %v4835_v63  ;;  %v13818_v36 = vcombine.low %v8733_v9, %v8736_v56  ;;  %v5243_v26 = vrot.slane %v5241_v4, 4 }
 0x1f6   : > { %15465 = vmatmul.mubr.msk.bf16.gmra.mrb[60].mxu1 %vm499_vm3, %v21187_v57  ;;  %15189 = vmatmul.mubr.msk.bf16.gmra.mrb[88].mxu0 %vm499_vm3, %v13149_v10  ;;  %v5237_v57 = vrot.slane %v13173_v31, 6  ;;  %v8753_v10 = vrot.slane %v19042_v33, 6  ;;  %v19073_v33 = vld [vmem:[%s17223_s17 + $0xf0] sm:$0xf]  ;;  %v19076_v44 = vld [vmem:[%s17223_s17 + $0x2e0] sm:$0xf] }
 0x1f7   : > { %15470 = vmatprep.mubr.msk.bf16.mxu1 %vm499_vm3, %v13817_v29  ;;  %15192 = vmatprep.mubr.msk.bf16.mxu0 %vm499_vm3, %v13150_v41  ;;  %v8740_v29 = vsel %vm17216_vm4, %v13802_v27, %v8739_v21  ;;  %v8641_v41 = vld [vmem:[%s17223_s17 + $0xc8] sm:$0x3]  ;;  %v13233_v27 = vcombine.low %v5228_v62, %v5231_v24  ;;  %v21197_v23 = vrot.slane %v18968_v54, 6  ;;  %v5244_v63 = vrot.slane %v13176_v46, 6  ;;  %v19091_v9 = vld [vmem:[%s17223_s17 + $0x2b8] sm:$0x3] }
 0x1f8   : > { %v19088_v20 = vsel %vm17216_vm4, %v5236_v52, %v5237_v57  ;;  %v19094_v56 = vld [vmem:[%s17223_s17 + $0xec] sm:$0xc]  ;;  %v13819_v62 = vcombine.low %v8740_v29, %v8743_v15  ;;  %v13804_v24 = vrot.slane %v8639_v22, 10  ;;  %v8755_v54 = vrot.slane %v8753_v10, 4  ;;  %v8644_v57 = vld [vmem:[%s17223_s17 + $0xf4] sm:$0x3] }
 0x1f9   : > { %v19069_v31 = vpop.f32.mrb[32].mxu0  ;;  %v19084_v7 = vsel %vm17216_vm4, %v13217_v1, %v21197_v23  ;;  %v8756_v53 = vrot.slane %v8641_v41, 6  ;;  %v13219_v52 = vrot.slane %v19065_v40, 10  ;;  %v8760_v46 = vrot.slane %v19073_v33, 6  ;;  %v19115_v41 = vld [vmem:[%s17223_s17 + $0x2dc] sm:$0xc] }
 0x1fa   : > { %v19078_v21 = vpop.f32.mrb[33].mxu0  ;;  %v21037_v23 = vrot.slane %v19076_v44, 6  ;;  %v13234_v29 = vcombine.low %v19084_v7, %v19088_v20  ;;  %v8747_v15 = vsel %vm17216_vm4, %v13803_v60, %v8746_v61  ;;  %v8750_v22 = vsel %vm17216_vm4, %v8748_v50, %v8749_v32  ;;  %v19118_v40 = vld [vmem:[%s17223_s17 + $0x30c] sm:$0xf]  ;;  %v19123_v33 = vld [vmem:[%s20987_s2 + $0x54] sm:$0xf] }
 0x1fb   : > { %v19096_v25 = vpop.f32.mrb[34].mxu0  ;;  %v5242_v61 = vsel %vm17216_vm4, %v13218_v59, %v5241_v4  ;;  %v5245_v60 = vsel %vm17216_vm4, %v5243_v26, %v5244_v63  ;;  %v21198_v32 = vrot.slane %v19030_v47, 6  ;;  %v8645_v7 = vld [vmem:[%s17223_s17 + $0x118] sm:$0xc]  ;;  %v8767_v20 = vrot.slane %v19099_v58, 6 }
 0x1fc   : > { %v19101_v1 = vpop.f32.mrb[35].mxu0  ;;  %v8754_v4 = vsel %vm17216_vm4, %v13804_v24, %v8753_v10  ;;  %v8757_v59 = vsel %vm17216_vm4, %v8755_v54, %v8756_v53  ;;  %v8647_v26 = vld [vmem:[%s17223_s17 + $0x120] sm:$0x3]  ;;  %v19148_v63 = vld [vmem:[%s17223_s17 + $0x148] sm:$0xf]  ;;  %v8763_v58 = vrot.slane %v8644_v57, 6  ;;  %v13820_v53 = vcombine.low %v8747_v15, %v8750_v22 }
 0x1fd   : > { %v5250_v50 = vrot.slane %v21198_v32, 4  ;;  %v8762_v32 = vrot.slane %v8760_v46, 4  ;;  %v13185_v54 = vld [vmem:[%s17223_s17 + $0x310] sm:$0x3]  ;;  %v13806_v57 = vrot.slane %v8645_v7, 10  ;;  %v8770_v14 = vrot.slane %v8647_v26, 6 }
 0x1fe   : > { %15471 = vmatmul.mubr.msk.bf16.vlgmr.msra.gmra.mrb[32].mxu1 %vm499_vm3, %v13818_v36  ;;  %15193 = vmatmul.mubr.msk.bf16.gmra.mrb[92].mxu0 %vm499_vm3, %v13151_v39  ;;  %v19134_v36 = vld [vmem:[%s17223_s17 + $0x2e4] sm:$0x3]  ;;  %v13805_v39 = vrot.slane %v19094_v56, 10  ;;  %v5257_v56 = vrot.slane %v21037_v23, 4  ;;  %v8774_v18 = vrot.slane %v19148_v63, 6  ;;  %v13235_v15 = vcombine.low %v5242_v61, %v5245_v60 }
 0x1ff   : > { %15503 = vmatpush3.bf16.msra.mxu1 %v19008_v17  ;;  %15198 = vmatprep.mubr.msk.bf16.mxu0 %vm499_vm3, %v13233_v27  ;;  %v5251_v17 = vrot.slane %v19091_v9, 6  ;;  %v13220_v27 = vrot.slane %v19115_v41, 10  ;;  %v5262_v9 = vrot.slane %v19118_v40, 6  ;;  %v5258_v24 = vrot.slane %v19134_v36, 6  ;;  %v8650_v23 = vld [vmem:[%s17223_s17 + $0x14c] sm:$0x3] }
 0x200   : > { %15474 = vmatprep.mubr.msk.bf16.mxu1 %vm499_vm3, %v13819_v62  ;;  %v13183_v62 = vld [vmem:[%s17223_s17 + $0x308] sm:$0xc]  ;;  %16548 = vmatprep.subr.msk.bf16.mxu1 %vm548_vm0, %v19123_v33  ;;  %v13821_v41 = vcombine.low %v8754_v4, %v8757_v59  ;;  %v8769_v40 = vrot.slane %v8767_v20, 4  ;;  %v21199_v22 = vrot.slane %v19030_v47, 6  ;;  %v8761_v26 = vsel %vm17216_vm4, %v13805_v39, %v8760_v46  ;;  %v19188_v61 = vld [vmem:[%s17223_s17 + $0x364] sm:$0xf] }
 0x201   : > { %v19155_v10 = vpop.f32.mrb[36].mxu0  ;;  %v13221_v7 = vrot.slane %v13183_v62, 10  ;;  %v19181_v59 = vsel %vm17216_vm4, %v5250_v50, %v5251_v17  ;;  %v8764_v47 = vsel %vm17216_vm4, %v8762_v32, %v8763_v58  ;;  %v5936_v60 = vsel %vm548_vm0, %v18815_v2, 0  ;;  %v19201_v39 = vld [vmem:[%s20987_s2 + $0x38] sm:$0xf] }
 0x202   : > { %v19161_v37 = vpop.f32.mrb[37].mxu0  ;;  %v19171_v36 = vsel %vm17216_vm4, %v13219_v52, %v21199_v22  ;;  %v19191_v52 = vld [vmem:[%s17223_s17 + $0x174] sm:$0xf]  ;;  %v5264_v63 = vrot.slane %v5262_v9, 4  ;;  %v5265_v50 = vrot.slane %v13185_v54, 6  ;;  %v8768_v46 = vsel %vm17216_vm4, %v13806_v57, %v8767_v20 }
 0x203   : > { %v19165_v38 = vpop.f32.mrb[38].mxu0  ;;  %v13807_v17 = vrot.slane %v8648_v49, 10  ;;  %v8771_v2 = vsel %vm17216_vm4, %v8769_v40, %v8770_v14  ;;  %v8776_v32 = vrot.slane %v8774_v18, 4  ;;  %v8777_v58 = vrot.slane %v8650_v23, 6  ;;  %v13186_v62 = vld [vmem:[%s17223_s17 + $0x334] sm:$0xc] }
 0x204   : > { %v19177_v4 = vpop.f32.mrb[39].mxu0  ;;  %v5269_v49 = vrot.slane %v19175_v45, 6  ;;  %v13236_v20 = vcombine.low %v19171_v36, %v19181_v59  ;;  %v8651_v54 = vld [vmem:[%s17223_s17 + $0x170] sm:$0xc]  ;;  %v8781_v14 = vrot.slane %v19191_v52, 6  ;;  %v13822_v57 = vcombine.low %v8761_v26, %v8764_v47 }
 0x205   : > { %v21200_v23 = vrot.slane %v19076_v44, 6  ;;  %v19224_v40 = vsel %vm17216_vm4, %v13221_v7, %v5262_v9  ;;  %v8653_v22 = vld [vmem:[%s17223_s17 + $0x178] sm:$0x3]  ;;  %v19229_v36 = vld [vmem:[%s17223_s17 + $0x1a0] sm:$0xf]  ;;  %v19237_v44 = vsel %vm17216_vm4, %v5264_v63, %v5265_v50  ;;  %v19241_v9 = vsel %vm17216_vm4, %v13807_v17, %v8774_v18 }
 0x206   : > { %15475 = vmatmul.mubr.msk.bf16.gmra.mrb[36].mxu1 %vm499_vm3, %v13820_v53  ;;  %15199 = vmatmul.mubr.msk.bf16.vlgmr.msra.gmra.mrb[64].mxu0 %vm499_vm3, %v13234_v29  ;;  %v13188_v53 = vld [vmem:[%s17223_s17 + $0x33c] sm:$0x3]  ;;  %v5276_v29 = vrot.slane %v19188_v61, 6  ;;  %v19247_v7 = vld [vmem:[%s17223_s17 + $0x390] sm:$0xf]  ;;  %v19253_v47 = vsel %vm17216_vm4, %v8776_v32, %v8777_v58  ;;  %v5271_v61 = vrot.slane %v5269_v49, 4 }
 0x207   : > { %15478 = vmatprep.mubr.msk.bf16.mxu1 %vm499_vm3, %v13821_v41  ;;  %15202 = vmatprep.mubr.msk.bf16.mxu0 %vm499_vm3, %v13235_v15  ;;  %v5256_v45 = vsel %vm17216_vm4, %v13220_v27, %v21200_v23  ;;  %v5259_v41 = vsel %vm17216_vm4, %v5257_v56, %v5258_v24  ;;  %v13189_v15 = vld [vmem:[%s17223_s17 + $0x360] sm:$0xc]  ;;  %v13823_v27 = vcombine.low %v8768_v46, %v8771_v2  ;;  %v13222_v56 = vrot.slane %v13186_v62, 10  ;;  %v19244_v24 = vld [vmem:[%s17223_s17 + $0x368] sm:$0x3] }
 0x208   : > { %15231 = vmatpush3.bf16.msra.mxu0 %v5936_v60  ;;  %v5272_v52 = vrot.slane %v13188_v53, 6  ;;  %v13808_v60 = vrot.slane %v8651_v54, 10  ;;  %v8654_v63 = vld [vmem:[%s17223_s17 + $0x19c] sm:$0xc]  ;;  %v13237_v18 = vcombine.low %v5256_v45, %v5259_v41  ;;  %v8783_v46 = vrot.slane %v8781_v14, 4 }
 0x209   : > { %16540 = vmatprep.subr.msk.bf16.mxu0 %vm548_vm0, %v19201_v39  ;;  %v19233_v59 = vpop.f32.mrb[40].mxu0  ;;  %v8784_v17 = vrot.slane %v8653_v22, 6  ;;  %v8788_v2 = vrot.slane %v19229_v36, 6  ;;  %v19260_v62 = vld [vmem:[%s17223_s17 + $0x1cc] sm:$0xf]  ;;  %v13223_v32 = vrot.slane %v13189_v15, 10  ;;  %v13238_v54 = vcombine.low %v19224_v40, %v19237_v44 }
 0x20a   : > { %v19249_v26 = vpop.f32.mrb[41].mxu0  ;;  %v8656_v58 = vld [vmem:[%s17223_s17 + $0x1a4] sm:$0x3]  ;;  %v5283_v53 = vrot.slane %v19247_v7, 6  ;;  %v13824_v45 = vcombine.low %v19241_v9, %v19253_v47  ;;  %v5278_v41 = vrot.slane %v5276_v29, 4  ;;  %v5279_v22 = vrot.slane %v19244_v24, 6 }
 0x20b   : > { %v19256_v50 = vpop.f32.mrb[42].mxu0  ;;  %v13192_v36 = vld [vmem:[%s17223_s17 + $0x38c] sm:$0xc]  ;;  %v5273_v40 = vsel %vm17216_vm4, %v5271_v61, %v5272_v52  ;;  %v13809_v15 = vrot.slane %v8654_v63, 10  ;;  %v13194_v44 = vld [vmem:[%s17223_s17 + $0x394] sm:$0x3]  ;;  %v8782_v7 = vsel %vm17216_vm4, %v13808_v60, %v8781_v14  ;;  %v19293_v61 = vsel %vm17216_vm4, %v13223_v32, %v5276_v29 }
 0x20c   : > { %v19262_v23 = vpop.f32.mrb[43].mxu0  ;;  %v8657_v9 = vld [vmem:[%s17223_s17 + $0x1c8] sm:$0xc]  ;;  %v8795_v24 = vrot.slane %v19260_v62, 6  ;;  %v13224_v52 = vrot.slane %v13192_v36, 10  ;;  %v5285_v63 = vrot.slane %v5283_v53, 4 }
 0x20d   : > { %v19296_v62 = vld [vmem:[%s17223_s17 + $0x3b8] sm:$0xc]  ;;  %v13810_v0 = vrot.slane %v8657_v9, 10 }
 0x20e   : > { %15479 = vmatmul.mubr.msk.bf16.gmra.mrb[40].mxu1 %vm499_vm3, %v13822_v57  ;;  %15203 = vmatmul.mubr.msk.bf16.gmra.mrb[68].mxu0 %vm499_vm3, %v13236_v20  ;;  %v5270_v57 = vsel %vm17216_vm4, %v13222_v56, %v5269_v49  ;;  %v8785_v20 = vsel %vm17216_vm4, %v8783_v46, %v8784_v17  ;;  %v8791_v49 = vrot.slane %v8656_v58, 6  ;;  %v8659_v56 = vld [vmem:[%s17223_s17 + $0x1d0] sm:$0x3]  ;;  %v5286_v58 = vrot.slane %v13194_v44, 6  ;;  %v19309_v42 = vld [vmem:[%s17223_s17 + $0x1f8] sm:$0xf] }
 0x20f   : > { %15482 = vmatprep.mubr.msk.bf16.mxu1 %vm499_vm3, %v13823_v27  ;;  %15206 = vmatprep.mubr.msk.bf16.mxu0 %vm499_vm3, %v13237_v18  ;;  %v8790_v27 = vrot.slane %v8788_v2, 4  ;;  %v13239_v17 = vcombine.low %v5270_v57, %v5273_v40  ;;  %v13825_v34 = vcombine.low %v8782_v7, %v8785_v20  ;;  %v8797_v19 = vrot.slane %v8795_v24, 4  ;;  %v19322_v7 = vld [vmem:[%s17223_s17 + $0x3e8] sm:$0xf] }
 0x210   : > { %v8798_v18 = vrot.slane %v8659_v56, 6  ;;  %v19316_v44 = vsel %vm17216_vm4, %v5278_v41, %v5279_v22  ;;  %v13225_v9 = vrot.slane %v19296_v62, 10  ;;  %v21201_v41 = vrot.slane %v19274_v51, 6 }
 0x211   : > { %v15064_v47 = vpop.f32.mrb[16].mxu1  ;;  %v19299_v14 = vpop.f32.mrb[44].mxu0 }
 0x212   : > { %v15756_v60 = vadd.f32 %v15064_v47, %v19069_v31  ;;  %v3833_v46 = vpop.f32.mrb[17].mxu1  ;;  %v19305_v29 = vpop.f32.mrb[45].mxu0  ;;  %v19331_v47 = vsel %vm17216_vm4, %v13224_v52, %v5283_v53  ;;  %v5292_v22 = vrot.slane %v21201_v41, 4  ;;  %v8662_v53 = vld [vmem:[%s17223_s17 + $0x1fc] sm:$0x3] }
 0x213   : > { %v15757_v32 = vadd.f32 %v3833_v46, %v19078_v21  ;;  %v15065_v36 = vpop.f32.mrb[18].mxu1  ;;  %v19311_v31 = vpop.f32.mrb[46].mxu0  ;;  %v8789_v21 = vsel %vm17216_vm4, %v13809_v15, %v8788_v2  ;;  %v8660_v2 = vld [vmem:[%s17223_s17 + $0x1f4] sm:$0xc]  ;;  %v19337_v15 = vld [vmem:[%s17223_s17 + $0x224] sm:$0xf] }
 0x214   : > { %v15758_v57 = vadd.f32 %v15065_v36, %v19096_v25  ;;  %v3836_v40 = vpop.f32.mrb[19].mxu1  ;;  %v19324_v20 = vpop.f32.mrb[47].mxu0  ;;  %v8792_v25 = vsel %vm17216_vm4, %v8790_v27, %v8791_v49  ;;  %v5293_v27 = vrot.slane %v19303_v16, 6  ;;  %v8802_v49 = vrot.slane %v19309_v42, 6  ;;  %v19355_v46 = vld [vmem:[%s17223_s17 + $0x414] sm:$0xf] }
 0x215   : > { %v15759_v56 = vadd.f32 %v3836_v40, %v19101_v1  ;;  %v19342_v1 = vsel %vm17216_vm4, %v5285_v63, %v5286_v58  ;;  %v5297_v63 = vrot.slane %v19322_v7, 6  ;;  %v13811_v16 = vrot.slane %v8660_v2, 10  ;;  %v13198_v42 = vld [vmem:[%s17223_s17 + $0x3e4] sm:$0xc]  ;;  %v8665_v36 = vld [vmem:[%s17223_s17 + $0x228] sm:$0x3] }
 0x216   : > { %15483 = vmatmul.mubr.msk.bf16.gmra.mrb[44].mxu1 %vm499_vm3, %v13824_v45  ;;  %v16598_v62 = vpack.i.bf16 %v15758_v57, %v15756_v60  ;;  %15207 = vmatmul.mubr.msk.bf16.gmra.mrb[72].mxu0 %vm499_vm3, %v13238_v54  ;;  %v8796_v45 = vsel %vm17216_vm4, %v13810_v0, %v8795_v24  ;;  %v8799_v60 = vsel %vm17216_vm4, %v8797_v19, %v8798_v18  ;;  %v8809_v54 = vrot.slane %v19337_v15, 6 }
 0x217   : > { %v16603_v52 = vpack.i.bf16 %v15759_v56, %v15757_v32  ;;  %15486 = vmatprep.mubr.msk.bf16.mxu1 %vm499_vm3, %v13825_v34  ;;  %15210 = vmatprep.mubr.msk.bf16.mxu0 %vm499_vm3, %v13239_v17  ;;  %v13200_v34 = vld [vmem:[%s17223_s17 + $0x3ec] sm:$0x3]  ;;  %v13240_v24 = vcombine.low %v19293_v61, %v19316_v44  ;;  %v13826_v19 = vcombine.low %v8789_v21, %v8792_v25  ;;  %v8805_v58 = vrot.slane %v8662_v53, 6  ;;  %v8663_v32 = vld [vmem:[%s17223_s17 + $0x220] sm:$0xc] }
 0x218   : > { %16599 = vrot.lane.b32.xlu0 %v16598_v62, %s17102_s8  ;;  %v13241_v18 = vcombine.low %v19331_v47, %v19342_v1  ;;  %v13827_v40 = vcombine.low %v8796_v45, %v8799_v60  ;;  %v8804_v7 = vrot.slane %v8802_v49, 4  ;;  %v5304_v56 = vrot.slane %v19355_v46, 6  ;;  %v19372_v25 = vld [vmem:[%s17223_s17 + $0x410] sm:$0xc] }
 0x219   : > { %v15068_v0 = vpop.f32.mrb[20].mxu1  ;;  %v13226_v61 = vrot.slane %v13198_v42, 10  ;;  %v5299_v44 = vrot.slane %v5297_v63, 4  ;;  %v5300_v21 = vrot.slane %v13200_v34, 6  ;;  %v8811_v62 = vrot.slane %v8809_v54, 4 }
 0x21a   : > { %v15760_v57 = vadd.f32 %v15068_v0, %v19155_v10  ;;  %v3849_v17 = vpop.f32.mrb[21].mxu1  ;;  %v13812_v10 = vrot.slane %v8663_v32, 10  ;;  %v8812_v1 = vrot.slane %v8665_v36, 6  ;;  %v19377_v53 = vld [vmem:[%s17223_s17 + $0x250] sm:$0xf]  ;;  %v21202_v45 = vrot.slane %v19274_v51, 6 }
 0x21b   : > { %v15761_v41 = vadd.f32 %v3849_v17, %v19161_v37  ;;  %v15069_v2 = vpop.f32.mrb[22].mxu1  ;;  %v13203_v42 = vld [vmem:[%s17223_s17 + $0x418] sm:$0x3]  ;;  %v19390_v34 = vld [vmem:[%s17223_s17 + $0x27c] sm:$0xf]  ;;  %v13227_v51 = vrot.slane %v19372_v25, 10 }
 0x21c   : > { %v15762_v47 = vadd.f32 %v15069_v2, %v19165_v38  ;;  %v3852_v15 = vpop.f32.mrb[23].mxu1  ;;  %16604 = vrot.lane.b32.xlu0 %v16603_v52, %s17102_s8  ;;  %v5291_v60 = vsel %vm17216_vm4, %v13225_v9, %v21202_v45  ;;  %v5294_v38 = vsel %vm17216_vm4, %v5292_v22, %v5293_v27  ;;  %v8803_v52 = vsel %vm17216_vm4, %v13811_v16, %v8802_v49  ;;  %v19399_v32 = vld [vmem:[%s17223_s17 + $0x440] sm:$0xf]  ;;  %v8666_v16 = vld [vmem:[%s17223_s17 + $0x24c] sm:$0xc] }
 0x21d   : > { %v15763_v37 = vadd.f32 %v3852_v15, %v19177_v4  ;;  %v8806_v4 = vsel %vm17216_vm4, %v8804_v7, %v8805_v58  ;;  %v5306_v9 = vrot.slane %v5304_v56, 4  ;;  %v5298_v27 = vsel %vm17216_vm4, %v13226_v61, %v5297_v63  ;;  %v8668_v36 = vld [vmem:[%s17223_s17 + $0x254] sm:$0x3]  ;;  %v13204_v25 = vld [vmem:[%s17223_s17 + $0x43c] sm:$0xc] }
 0x21e   : > { %15487 = vmatmul.mubr.msk.bf16.gmra.mrb[48].mxu1 %vm499_vm3, %v13826_v19  ;;  %v16608_v0 = vpack.i.bf16 %v15762_v47, %v15760_v57  ;;  %15211 = vmatmul.mubr.msk.bf16.gmra.mrb[76].mxu0 %vm499_vm3, %v13240_v24  ;;  %v5301_v49 = vsel %vm17216_vm4, %v5299_v44, %v5300_v21  ;;  %v8816_v19 = vrot.slane %v19377_v53, 6  ;;  %v5307_v58 = vrot.slane %v13203_v42, 6  ;;  %v13206_v47 = vld [vmem:[%s17223_s17 + $0x444] sm:$0x3] }
 0x21f   : > { %v16613_v22 = vpack.i.bf16 %v15763_v37, %v15761_v41  ;;  %15490 = vmatprep.mubr.msk.bf16.mxu1 %vm499_vm3, %v13827_v40  ;;  %15214 = vmatprep.mubr.msk.bf16.mxu0 %vm499_vm3, %v13241_v18  ;;  %v8810_v24 = vsel %vm17216_vm4, %v13812_v10, %v8809_v54  ;;  %v8813_v63 = vsel %vm17216_vm4, %v8811_v62, %v8812_v1  ;;  %v8823_v57 = vrot.slane %v19390_v34, 6  ;;  %v8669_v41 = vld [vmem:[%s17223_s17 + $0x278] sm:$0xc]  ;;  %v8671_v18 = vld [vmem:[%s17223_s17 + $0x280] sm:$0x3] }
 0x220   : > { %16609 = vrot.lane.b32.xlu1 %v16608_v0, %s17102_s8  ;;  %v13242_v40 = vcombine.low %v5291_v60, %v5294_v38  ;;  %v5311_v7 = vrot.slane %v19399_v32, 6  ;;  %v13828_v54 = vcombine.low %v8803_v52, %v8806_v4  ;;  %v13243_v44 = vcombine.low %v5298_v27, %v5301_v49  ;;  %v8673_v52 = vld [vmem:[%s17223_s17 + $0x2a8] sm:$0xf]  ;;  %v13211_v49 = vld [vmem:[%s17223_s17 + $0x498] sm:$0xf] }
 0x221   : > { %v15072_v17 = vpop.f32.mrb[24].mxu1  ;;  %16614 = vrot.lane.b32.xlu0 %v16613_v22, %s17102_s8  ;;  %v13813_v21 = vrot.slane %v8666_v16, 10  ;;  %v13829_v62 = vcombine.low %v8810_v24, %v8813_v63  ;;  %v8818_v1 = vrot.slane %v8816_v19, 4  ;;  %v8819_v53 = vrot.slane %v8668_v36, 6  ;;  %v13207_v27 = vld [vmem:[%s17223_s17 + $0x468] sm:$0xc] }
 0x222   : > { %v15764_v2 = vadd.f32 %v15072_v17, %v19233_v59  ;;  %v3865_v61 = vpop.f32.mrb[25].mxu1  ;;  %v13814_v59 = vrot.slane %v8669_v41, 10  ;;  %v8825_v60 = vrot.slane %v8823_v57, 4  ;;  %v8826_v38 = vrot.slane %v8671_v18, 6  ;;  %v8672_v24 = vld [vmem:[%s17223_s17 + $0x2a4] sm:$0xc] }
 0x223   : > { %v15765_v15 = vadd.f32 %v3865_v61, %v19249_v26  ;;  %v15073_v10 = vpop.f32.mrb[26].mxu1  ;;  %v13228_v34 = vrot.slane %v13204_v25, 10  ;;  %v5313_v0 = vrot.slane %v5311_v7, 4  ;;  %v5314_v4 = vrot.slane %v13206_v47, 6  ;;  %v13208_v26 = vld [vmem:[%s17223_s17 + $0x46c] sm:$0xf] }
 0x224   : > { %v15766_v37 = vadd.f32 %v15073_v10, %v19256_v50  ;;  %v3868_v45 = vpop.f32.mrb[27].mxu1  ;;  %v5305_v50 = vsel %vm17216_vm4, %v13227_v51, %v5304_v56  ;;  %v5308_v22 = vsel %vm17216_vm4, %v5306_v9, %v5307_v58  ;;  %v8817_v16 = vsel %vm17216_vm4, %v13813_v21, %v8816_v19  ;;  %v8674_v63 = vld [vmem:[%s17223_s17 + $0x2ac] sm:$0x3]  ;;  %v13210_v21 = vld [vmem:[%s17223_s17 + $0x494] sm:$0xc] }
 0x225   : > { %v15767_v42 = vadd.f32 %v3868_v45, %v19262_v23  ;;  %v8820_v46 = vsel %vm17216_vm4, %v8818_v1, %v8819_v53  ;;  %v8830_v56 = vrot.slane %v8673_v52, 6  ;;  %v5318_v51 = vrot.slane %v13208_v26, 6  ;;  %v13212_v25 = vld [vmem:[%s17223_s17 + $0x49c] sm:$0x3] }
 0x226   : > { %v16618_v32 = vpack.i.bf16 %v15766_v37, %v15764_v2  ;;  %15491 = vmatmul.mubr.msk.bf16.gmra.mrb[52].mxu1 %vm499_vm3, %v13828_v54  ;;  %15215 = vmatmul.mubr.msk.bf16.gmra.mrb[80].mxu0 %vm499_vm3, %v13242_v40  ;;  %v8824_v9 = vsel %vm17216_vm4, %v13814_v59, %v8823_v57  ;;  %v8827_v58 = vsel %vm17216_vm4, %v8825_v60, %v8826_v38  ;;  %v13209_v40 = vld [vmem:[%s17223_s17 + $0x470] sm:$0x3]  ;;  %v13229_v41 = vrot.slane %v13207_v27, 10 }
 0x227   : > { %v16623_v23 = vpack.i.bf16 %v15767_v42, %v15765_v15  ;;  %15494 = vmatprep.mubr.msk.bf16.mxu1 %vm499_vm3, %v13829_v62  ;;  %15218 = vmatprep.mubr.msk.bf16.mxu0 %vm499_vm3, %v13243_v44  ;;  %v5312_v36 = vsel %vm17216_vm4, %v13228_v34, %v5311_v7  ;;  %v5315_v17 = vsel %vm17216_vm4, %v5313_v0, %v5314_v4  ;;  %v5325_v18 = vrot.slane %v13211_v49, 6  ;;  %v13214_v42 = vld [vmem:[%s17223_s17 + $0x4c4] sm:$0xf] }
 0x228   : > { %16619 = vrot.lane.b32.xlu1 %v16618_v32, %s17102_s8  ;;  %v13244_v61 = vcombine.low %v5305_v50, %v5308_v22  ;;  %v13830_v54 = vcombine.low %v8817_v16, %v8820_v46  ;;  %v13815_v44 = vrot.slane %v8672_v24, 10  ;;  %v13831_v7 = vcombine.low %v8824_v9, %v8827_v58  ;;  %v13213_v32 = vld [vmem:[%s17223_s17 + $0x4c0] sm:$0xc]  ;;  %v13267_v9 = vld [vmem:[%s17223_s17 + $0x63c] sm:$0x3] }
 0x229   : > { %v15076_v19 = vpop.f32.mrb[28].mxu1  ;;  %16624 = vrot.lane.b32.xlu0 %v16623_v23, %s17102_s8  ;;  %v8832_v10 = vrot.slane %v8830_v56, 4  ;;  %v8833_v62 = vrot.slane %v8674_v63, 6  ;;  %v13245_v37 = vcombine.low %v5312_v36, %v5315_v17  ;;  %v5320_v45 = vrot.slane %v5318_v51, 4  ;;  %v13215_v23 = vld [vmem:[%s17223_s17 + $0x4c8] sm:$0x3] }
 0x22a   : > { %v15768_v2 = vadd.f32 %v15076_v19, %v19299_v14  ;;  %v3881_v57 = vpop.f32.mrb[29].mxu1  ;;  %v5321_v14 = vrot.slane %v13209_v40, 6  ;;  %v13230_v60 = vrot.slane %v13210_v21, 10  ;;  %v5327_v38 = vrot.slane %v5325_v18, 4  ;;  %v16950_v17 = vld [vmem:[%s17223_s17 + $0x24] sm:$0xff]  }
 0x22b   : > { %v15769_v47 = vadd.f32 %v3881_v57, %v19305_v29  ;;  %v15077_v15 = vpop.f32.mrb[30].mxu1  ;;  %v5328_v52 = vrot.slane %v13212_v25, 6  ;;  %v13266_v29 = vld [vmem:[%s17223_s17 + $0x638] sm:$0xf]  ;;  %v5319_v4 = vsel %vm17216_vm4, %v13229_v41, %v5318_v51  ;;  %v5332_v50 = vrot.slane %v13214_v42, 6 }
 0x22c   : > { %v15770_v1 = vadd.f32 %v15077_v15, %v19311_v31  ;;  %v3884_v53 = vpop.f32.mrb[31].mxu1  ;;  %v8831_v31 = vsel %vm17216_vm4, %v13815_v44, %v8830_v56  ;;  %v5322_v26 = vsel %vm17216_vm4, %v5320_v45, %v5321_v14  ;;  %v5326_v27 = vsel %vm17216_vm4, %v13230_v60, %v5325_v18  ;;  %v13265_v51 = vld [vmem:[%s17223_s17 + $0x634] sm:$0xc]  ;;  %v13269_v21 = vld [vmem:[%s17223_s17 + $0x664] sm:$0xf] }
 0x22d   : > { %v15771_v59 = vadd.f32 %v3884_v53, %v19324_v20  ;;  %v8834_v20 = vsel %vm17216_vm4, %v8832_v10, %v8833_v62  ;;  %v5329_v49 = vsel %vm17216_vm4, %v5327_v38, %v5328_v52  ;;  %v5728_v16 = vrot.slane %v13266_v29, 6  ;;  %v13268_v15 = vld [vmem:[%s17223_s17 + $0x660] sm:$0xc]  ;;  %v13270_v53 = vld [vmem:[%s17223_s17 + $0x668] sm:$0x3] }
 0x22e   : > { %v16628_v34 = vpack.i.bf16 %v15770_v1, %v15768_v2  ;;  %15495 = vmatmul.mubr.msk.bf16.gmra.mrb[56].mxu1 %vm499_vm3, %v13830_v54  ;;  %15219 = vmatmul.mubr.msk.bf16.gmra.mrb[84].mxu0 %vm499_vm3, %v13244_v61  ;;  %v13832_v56 = vcombine.low %v8831_v31, %v8834_v20  ;;  %v13246_v19 = vcombine.low %v5319_v4, %v5322_v26  ;;  %v13231_v36 = vrot.slane %v13213_v32, 10  ;;  %v13271_v60 = vld [vmem:[%s17223_s17 + $0x68c] sm:$0xc]  ;;  %v13273_v38 = vld [vmem:[%s17223_s17 + $0x694] sm:$0x3]  ;;  %v16952_v32 = vld [vmem:[%s17223_s17 + $0x7c] sm:$0xff]  }
 0x22f   : > { %v16633_v0 = vpack.i.bf16 %v15771_v59, %v15769_v47  ;;  %15498 = vmatprep.mubr.msk.bf16.mxu1 %vm499_vm3, %v13831_v7  ;;  %15222 = vmatprep.mubr.msk.bf16.mxu0 %vm499_vm3, %v13245_v37  ;;  %v13247_v18 = vcombine.low %v5326_v27, %v5329_v49  ;;  %v5334_v2 = vrot.slane %v5332_v50, 4  ;;  %v5335_v57 = vrot.slane %v13215_v23, 6  ;;  %v16951_v59 = vld [vmem:[%s17223_s17 + $0x50] sm:$0xff]   ;;  %v19537_v23 = vld [vmem:[%s20987_s2 + $0x5c] sm:$0xf] }
 0x230   : > { %16629 = vrot.lane.b32.xlu1 %v16628_v34, %s17102_s8  ;;  %v13313_v61 = vrot.slane %v13265_v51, 10  ;;  %v5730_v54 = vrot.slane %v5728_v16, 4  ;;  %v5731_v44 = vrot.slane %v13267_v9, 6  ;;  %v5735_v7 = vrot.slane %v13269_v21, 6 }
 0x231   : > { %v15080_v22 = vpop.f32.mrb[0].mxu1  ;;  %16634 = vrot.lane.b32.xlu0 %v16633_v0, %s17102_s8  ;;  %v9647_v29 = vsel %vm548_vm0, %v19123_v33, 0  ;;  %v13314_v0 = vrot.slane %v13268_v15, 10  ;;  %v5738_v26 = vrot.slane %v13270_v53, 6  ;;  %v5745_v49 = vrot.slane %v13273_v38, 6 }
 0x232   : > { %v15772_v46 = vadd.f32 %v15080_v22, %v18873_v35  ;;  %v3897_v24 = vpop.f32.mrb[1].mxu1  ;;  %v5729_v62 = vsel %vm17216_vm4, %v13313_v61, %v5728_v16  ;;  %v5732_v1 = vsel %vm17216_vm4, %v5730_v54, %v5731_v44  ;;  %v5737_v4 = vrot.slane %v5735_v7, 4  ;;  %v16954_v44 = vld [vmem:[%s17223_s17 + $0xd4] sm:$0xff]   ;;  %v13280_v53 = vld [vmem:[%s17223_s17 + $0x710] sm:$0xc] }
 0x233   : > { %v15773_v58 = vadd.f32 %v3897_v24, %v18877_v43  ;;  %v15081_v63 = vpop.f32.mrb[2].mxu1  ;;  %v13272_v43 = vld [vmem:[%s17223_s17 + $0x690] sm:$0xf]  ;;  %v13330_v20 = vcombine.low %v5729_v62, %v5732_v1  ;;  %v13281_v15 = vld [vmem:[%s17223_s17 + $0x714] sm:$0xf] }
 0x234   : > { %v15774_v40 = vadd.f32 %v15081_v63, %v18880_v12  ;;  %v3900_v41 = vpop.f32.mrb[3].mxu1  ;;  %v5333_v12 = vsel %vm17216_vm4, %v13231_v36, %v5332_v50  ;;  %v5742_v37 = vrot.slane %v13272_v43, 6  ;;  %v13275_v50 = vld [vmem:[%s17223_s17 + $0x6bc] sm:$0xf]  ;;  %v5739_v24 = vsel %vm17216_vm4, %v5737_v4, %v5738_v26  ;;  %v13276_v63 = vld [vmem:[%s17223_s17 + $0x6c0] sm:$0x3] }
 0x235   : > { %v15775_v35 = vadd.f32 %v3900_v41, %v18883_v55  ;;  %v5336_v55 = vsel %vm17216_vm4, %v5334_v2, %v5335_v57  ;;  %v5749_v16 = vrot.slane %v13275_v50, 6  ;;  %v16953_v41 = vld [vmem:[%s17223_s17 + $0xa8] sm:$0xff]   ;;  %v19582_v62 = vld [vmem:[%s20987_s2 + $0x3c] sm:$0xf]  ;;  %v13282_v38 = vld [vmem:[%s17223_s17 + $0x718] sm:$0x3] }
 0x236   : > { %v16638_v25 = vpack.i.bf16 %v15774_v40, %v15772_v46  ;;  %15499 = vmatmul.mubr.msk.bf16.gmra.mrb[60].mxu1 %vm499_vm3, %v13832_v56  ;;  %15223 = vmatmul.mubr.msk.bf16.gmra.mrb[88].mxu0 %vm499_vm3, %v13246_v19  ;;  %v13248_v34 = vcombine.low %v5333_v12, %v5336_v55  ;;  %v5744_v27 = vrot.slane %v5742_v37, 4  ;;  %v5736_v46 = vsel %vm17216_vm4, %v13314_v0, %v5735_v7  ;;  %v13274_v56 = vld [vmem:[%s17223_s17 + $0x6b8] sm:$0xc]  ;;  %v13277_v19 = vld [vmem:[%s17223_s17 + $0x6e4] sm:$0xc]  ;;  %v21204_v26 = vld [vmem:[#allocation6_spill] sm:$0xff] }
 0x237   : > { %v16643_v47 = vpack.i.bf16 %v15775_v35, %v15773_v58  ;;  %15504 = vmatprep.mubr.msk.bf16.mxu1 %vm499_vm3, %v16950_v17  ;;  %15226 = vmatprep.mubr.msk.bf16.mxu0 %vm499_vm3, %v13247_v18  ;;  %v13279_v18 = vld [vmem:[%s17223_s17 + $0x6ec] sm:$0x3]  ;;  %v13331_v35 = vcombine.low %v5736_v46, %v5739_v24  ;;  %v13316_v61 = vrot.slane %v13274_v56, 10  ;;  %v5751_v54 = vrot.slane %v5749_v16, 4  ;;  %v13285_v4 = vld [vmem:[%s17223_s17 + $0x744] sm:$0x3] }
 0x238   : > { %16639 = vrot.lane.b32.xlu1 %v16638_v25, %s17102_s8  ;;  %v5746_v58 = vsel %vm17216_vm4, %v5744_v27, %v5745_v49  ;;  %v6437_v7 = vsel %vm548_vm0, %v19201_v39, 0  ;;  %v13318_v27 = vrot.slane %v13280_v53, 10  ;;  %v16956_v49 = vld [vmem:[%s17223_s17 + $0x12c] sm:$0xff]  }
 0x239   : > { %v15084_v10 = vpop.f32.mrb[4].mxu1  ;;  %16644 = vrot.lane.b32.xlu0 %v16643_v47, %s17102_s8  ;;  %v13317_v47 = vrot.slane %v13277_v19, 10  ;;  %v5750_v39 = vsel %vm17216_vm4, %v13316_v61, %v5749_v16 }
 0x23a   : > { %v19512_v45 = vadd.f32 %v15084_v10, %v18906_v28  ;;  %v3913_v14 = vpop.f32.mrb[5].mxu1 }
 0x23b   : > { %v19518_v52 = vadd.f32 %v3913_v14, %v18911_v48  ;;  %v15085_v42 = vpop.f32.mrb[6].mxu1  ;;  %v13315_v48 = vrot.slane %v13271_v60, 10 }
 0x23c   : > { %v19523_v31 = vadd.f32 %v15085_v42, %v18914_v30  ;;  %v3916_v28 = vpop.f32.mrb[7].mxu1  ;;  %v13278_v30 = vld [vmem:[%s17223_s17 + $0x6e8] sm:$0xf] }
 0x23d   : > { %v19528_v22 = vadd.f32 %v3916_v28, %v18918_v8  ;;  %v5743_v9 = vsel %vm17216_vm4, %v13315_v48, %v5742_v37  ;;  %v5756_v36 = vrot.slane %v13278_v30, 6  ;;  %v5763_v37 = vrot.slane %v13281_v15, 6  ;;  %v16955_v28 = vld [vmem:[%s17223_s17 + $0x100] sm:$0xff]   ;;  %v21205_v30 = vld [vmem:[#allocation7_spill] sm:$0xff]  ;;  %v13291_v15 = vld [vmem:[%s17223_s17 + $0x79c] sm:$0x3] }
 0x23e   : > { %v16723_v33 = vpack.i.bf16 %v19523_v31, %v19512_v45  ;;  %15505 = vmatmul.mubr.msk.bf16.vlgmr.msra.gmra.mrb[32].mxu1 %vm499_vm3, %v16951_v59  ;;  %15227 = vmatmul.mubr.msk.bf16.gmra.mrb[92].mxu0 %vm499_vm3, %v13248_v34  ;;  %v13332_v43 = vcombine.low %v5743_v9, %v5746_v58  ;;  %v21203_v34 = vld [vmem:[#allocation5_spill] sm:$0xff]  ;;  %v21206_v9 = vld [vmem:[#allocation8_spill] sm:$0xff] }
 0x23f   : > { %v16718_v8 = vpack.i.bf16 %v19528_v22, %v19518_v52  ;;  %15537 = vmatpush3.bf16.msra.mxu1 %v9647_v29  ;;  %15232 = vmatprep.mubr.msk.bf16.mxu0 %vm499_vm3, %v13330_v20  ;;  %v5758_v55 = vrot.slane %v5756_v36, 4  ;;  %v5757_v59 = vsel %vm17216_vm4, %v13317_v47, %v5756_v36  ;;  %v13283_v20 = vld [vmem:[%s17223_s17 + $0x73c] sm:$0xc]  ;;  %v5765_v56 = vrot.slane %v5763_v37, 4 }
 0x240   : > { %15508 = vmatprep.mubr.msk.bf16.mxu1 %vm499_vm3, %v16952_v32  ;;  %16549 = vmatprep.subr.msk.bf16.mxu1 %vm548_vm0, %v19537_v23  ;;  %v5773_v36 = vrot.slane %v13285_v4, 6 }
 0x241   : > { %v15088_v51 = vpop.f32.mrb[8].mxu1 }
 0x242   : > { %v19558_v17 = vadd.f32 %v15088_v51, %v18949_v13  ;;  %v3929_v40 = vpop.f32.mrb[9].mxu1  ;;  %v5752_v13 = vrot.slane %v13276_v63, 6  ;;  %v5766_v51 = vrot.slane %v13282_v38, 6  ;;  %v13319_v63 = vrot.slane %v13283_v20, 10  ;;  %v13293_v38 = vld [vmem:[%s17223_s17 + $0x7c4] sm:$0xf] }
 0x243   : > { %v19563_v2 = vadd.f32 %v3929_v40, %v18955_v5  ;;  %v15089_v57 = vpop.f32.mrb[10].mxu1  ;;  %v5759_v5 = vrot.slane %v13279_v18, 6  ;;  %v13287_v40 = vld [vmem:[%s17223_s17 + $0x76c] sm:$0xf]  ;;  %v13290_v18 = vld [vmem:[%s17223_s17 + $0x798] sm:$0xf] }
 0x244   : > { %v19567_v21 = vadd.f32 %v15089_v57, %v18959_v11  ;;  %v3932_v25 = vpop.f32.mrb[11].mxu1  ;;  %v13284_v11 = vld [vmem:[%s17223_s17 + $0x740] sm:$0xf]  ;;  %v5753_v1 = vsel %vm17216_vm4, %v5751_v54, %v5752_v13  ;;  %v5767_v61 = vsel %vm17216_vm4, %v5765_v56, %v5766_v51  ;;  %v5777_v54 = vrot.slane %v13287_v40, 6  ;;  %v13288_v13 = vld [vmem:[%s17223_s17 + $0x770] sm:$0x3] }
 0x245   : > { %v19570_v12 = vadd.f32 %v3932_v25, %v18963_v3  ;;  %v5760_v60 = vsel %vm17216_vm4, %v5758_v55, %v5759_v5  ;;  %v5770_v42 = vrot.slane %v13284_v11, 6  ;;  %v13333_v48 = vcombine.low %v5750_v39, %v5753_v1  ;;  %v16957_v55 = vld [vmem:[%s17223_s17 + $0x158] sm:$0xff]   ;;  %v13289_v5 = vld [vmem:[%s17223_s17 + $0x794] sm:$0xc]  ;;  %v16958_v11 = vld [vmem:[%s17223_s17 + $0x184] sm:$0xff]  }
 0x246   : > { %v16763_v10 = vpack.i.bf16 %v19567_v21, %v19558_v17  ;;  %15509 = vmatmul.mubr.msk.bf16.gmra.mrb[36].mxu1 %vm499_vm3, %v16953_v41  ;;  %15233 = vmatmul.mubr.msk.bf16.vlgmr.msra.gmra.mrb[64].mxu0 %vm499_vm3, %v13331_v35  ;;  %v13334_v24 = vcombine.low %v5757_v59, %v5760_v60  ;;  %v5764_v35 = vsel %vm17216_vm4, %v13318_v27, %v5763_v37  ;;  %v5784_v47 = vrot.slane %v13290_v18, 6  ;;  %v16959_v27 = vld [vmem:[%s17223_s17 + $0x1b0] sm:$0xff]   ;;  %v13299_v18 = vld [vmem:[%s17223_s17 + $0x81c] sm:$0xf] }
 0x247   : > { %v16758_v3 = vpack.i.bf16 %v19570_v12, %v19563_v2  ;;  %15512 = vmatprep.mubr.msk.bf16.mxu1 %vm499_vm3, %v16954_v44  ;;  %15236 = vmatprep.mubr.msk.bf16.mxu0 %vm499_vm3, %v13332_v43  ;;  %v5772_v19 = vrot.slane %v5770_v42, 4  ;;  %v5771_v44 = vsel %vm17216_vm4, %v13319_v63, %v5770_v42  ;;  %v13286_v43 = vld [vmem:[%s17223_s17 + $0x768] sm:$0xc]  ;;  %v5779_v53 = vrot.slane %v5777_v54, 4  ;;  %v13296_v42 = vld [vmem:[%s17223_s17 + $0x7f0] sm:$0xf] }
 0x248   : > { %15265 = vmatpush3.bf16.msra.mxu0 %v6437_v7  ;;  %v13335_v7 = vcombine.low %v5764_v35, %v5767_v61  ;;  %v13320_v1 = vrot.slane %v13286_v43, 10  ;;  %v5780_v37 = vrot.slane %v13288_v13, 6  ;;  %v5786_v59 = vrot.slane %v5784_v47, 4  ;;  %v13302_v35 = vld [vmem:[%s17223_s17 + $0x848] sm:$0xf] }
 0x249   : > { %v15092_v14 = vpop.f32.mrb[12].mxu1  ;;  %16541 = vmatprep.subr.msk.bf16.mxu0 %vm548_vm0, %v19582_v62  ;;  %v5774_v25 = vsel %vm17216_vm4, %v5772_v19, %v5773_v36  ;;  %v5787_v60 = vrot.slane %v13291_v15, 6  ;;  %v13298_v13 = vld [vmem:[%s17223_s17 + $0x818] sm:$0xc]  ;;  %v13301_v15 = vld [vmem:[%s17223_s17 + $0x844] sm:$0xc] }
 0x24a   : > { %v19602_v29 = vadd.f32 %v15092_v14, %v21203_v34  ;;  %v3945_v0 = vpop.f32.mrb[13].mxu1  ;;  %v13336_v39 = vcombine.low %v5771_v44, %v5774_v25  ;;  %v13321_v14 = vrot.slane %v13289_v5, 10  ;;  %v5778_v34 = vsel %vm17216_vm4, %v13320_v1, %v5777_v54  ;;  %v16961_v5 = vld [vmem:[%s17223_s17 + $0x208] sm:$0xff]  }
 0x24b   : > { %v19608_v32 = vadd.f32 %v3945_v0, %v21204_v26  ;;  %v15093_v50 = vpop.f32.mrb[14].mxu1  ;;  %v5781_v0 = vsel %vm17216_vm4, %v5779_v53, %v5780_v37  ;;  %v5788_v4 = vsel %vm17216_vm4, %v5786_v59, %v5787_v60  ;;  %v13292_v26 = vld [vmem:[%s17223_s17 + $0x7c0] sm:$0xc]  ;;  %v5805_v44 = vrot.slane %v13299_v18, 6 }
 0x24c   : > { %v19612_v16 = vadd.f32 %v15093_v50, %v21205_v30  ;;  %v3948_v46 = vpop.f32.mrb[15].mxu1  ;;  %v5785_v20 = vsel %vm17216_vm4, %v13321_v14, %v5784_v47  ;;  %v13294_v50 = vld [vmem:[%s17223_s17 + $0x7c8] sm:$0x3]  ;;  %v13297_v30 = vld [vmem:[%s17223_s17 + $0x7f4] sm:$0x3]  ;;  %v13322_v51 = vrot.slane %v13292_v26, 10 }
 0x24d   : > { %v19615_v58 = vadd.f32 %v3948_v46, %v21206_v9  ;;  %v13337_v46 = vcombine.low %v5778_v34, %v5781_v0  ;;  %v13338_v56 = vcombine.low %v5785_v20, %v5788_v4  ;;  %v5794_v63 = vrot.slane %v13294_v50, 6  ;;  %v13300_v47 = vld [vmem:[%s17223_s17 + $0x820] sm:$0x3]  ;;  %v13304_v50 = vld [vmem:[%s17223_s17 + $0x870] sm:$0xc] }
 0x24e   : > { %v16803_v41 = vpack.i.bf16 %v19612_v16, %v19602_v29  ;;  %15513 = vmatmul.mubr.msk.bf16.gmra.mrb[40].mxu1 %vm499_vm3, %v16955_v28  ;;  %15237 = vmatmul.mubr.msk.bf16.gmra.mrb[68].mxu0 %vm499_vm3, %v13333_v48  ;;  %v5791_v28 = vrot.slane %v13293_v38, 6  ;;  %v5798_v48 = vrot.slane %v13296_v42, 6  ;;  %v5801_v40 = vrot.slane %v13297_v30, 6  ;;  %v13305_v42 = vld [vmem:[%s17223_s17 + $0x874] sm:$0xf] }
 0x24f   : > { %v16798_v57 = vpack.i.bf16 %v19615_v58, %v19608_v32  ;;  %15516 = vmatprep.mubr.msk.bf16.mxu1 %vm499_vm3, %v16956_v49  ;;  %15240 = vmatprep.mubr.msk.bf16.mxu0 %vm499_vm3, %v13334_v24  ;;  %v13295_v49 = vld [vmem:[%s17223_s17 + $0x7ec] sm:$0xc]  ;;  %v16960_v24 = vld [vmem:[%s17223_s17 + $0x1dc] sm:$0xff]   ;;  %v13324_v53 = vrot.slane %v13298_v13, 10  ;;  %v5807_v37 = vrot.slane %v5805_v44, 4  ;;  %v5808_v14 = vrot.slane %v13300_v47, 6 }
 0x250   : > { %v5793_v9 = vrot.slane %v5791_v28, 4  ;;  %v13323_v19 = vrot.slane %v13295_v49, 10  ;;  %v5800_v36 = vrot.slane %v5798_v48, 4  ;;  %v5792_v61 = vsel %vm17216_vm4, %v13322_v51, %v5791_v28  ;;  %v13308_v34 = vld [vmem:[%s17223_s17 + $0x8a0] sm:$0xf] }
 0x251   : > { %v13325_v59 = vrot.slane %v13301_v15, 10  ;;  %v5806_v0 = vsel %vm17216_vm4, %v13324_v53, %v5805_v44  ;;  %v5809_v28 = vsel %vm17216_vm4, %v5807_v37, %v5808_v14  ;;  %v5819_v20 = vrot.slane %v13305_v42, 6  ;;  %v16963_v49 = vld [vmem:[%s17223_s17 + $0x260] sm:$0xff]   ;;  %v13307_v30 = vld [vmem:[%s17223_s17 + $0x89c] sm:$0xc] }
 0x252   : > { %v5795_v54 = vsel %vm17216_vm4, %v5793_v9, %v5794_v63  ;;  %v5799_v25 = vsel %vm17216_vm4, %v13323_v19, %v5798_v48  ;;  %v5802_v43 = vsel %vm17216_vm4, %v5800_v36, %v5801_v40  ;;  %v13306_v48 = vld [vmem:[%s17223_s17 + $0x878] sm:$0x3]  ;;  %v13326_v9 = vrot.slane %v13304_v50, 10  ;;  %v13310_v47 = vld [vmem:[%s17223_s17 + $0x8c8] sm:$0xc] }
 0x253   : > { %v13340_v1 = vcombine.low %v5799_v25, %v5802_v43  ;;  %v5821_v63 = vrot.slane %v5819_v20, 4  ;;  %v5822_v19 = vrot.slane %v13306_v48, 6  ;;  %v13327_v36 = vrot.slane %v13307_v30, 10  ;;  %v16965_v15 = vld [vmem:[%s17223_s17 + $0x2b8] sm:$0xff]  }
 0x254   : > { %v13328_v37 = vrot.slane %v13310_v47, 10  ;;  %v13365_v48 = vld [vmem:[%s17223_s17 + $0x678] sm:$0xc]  ;;  %v16967_v30 = vld [vmem:[%s17223_s17 + $0x65c] sm:$0xff]  }
 0x255   : > { %v5823_v44 = vsel %vm17216_vm4, %v5821_v63, %v5822_v19  ;;  %v13411_v63 = vrot.slane %v13365_v48, 10 }
 0x256   : > { %15517 = vmatmul.mubr.msk.bf16.gmra.mrb[44].mxu1 %vm499_vm3, %v16957_v55  ;;  %15241 = vmatmul.mubr.msk.bf16.gmra.mrb[72].mxu0 %vm499_vm3, %v13335_v7  ;;  %v5812_v55 = vrot.slane %v13302_v35, 6  ;;  %v13303_v7 = vld [vmem:[%s17223_s17 + $0x84c] sm:$0x3] }
 0x257   : > { %15520 = vmatprep.mubr.msk.bf16.mxu1 %vm499_vm3, %v16958_v11  ;;  %15244 = vmatprep.mubr.msk.bf16.mxu0 %vm499_vm3, %v13336_v39  ;;  %v13339_v11 = vcombine.low %v5792_v61, %v5795_v54  ;;  %v16962_v39 = vld [vmem:[%s17223_s17 + $0x234] sm:$0xff]   ;;  %v5815_v38 = vrot.slane %v13303_v7, 6  ;;  %v13311_v35 = vld [vmem:[%s17223_s17 + $0x8cc] sm:$0xf]  ;;  %v13363_v61 = vld [vmem:[%s17223_s17 + $0x650] sm:$0xf]  ;;  %v5820_v54 = vsel %vm17216_vm4, %v13326_v9, %v5819_v20 }
 0x258   : > { %v5814_v60 = vrot.slane %v5812_v55, 4  ;;  %v5813_v4 = vsel %vm17216_vm4, %v13325_v59, %v5812_v55  ;;  %v5833_v25 = vrot.slane %v13311_v35, 6  ;;  %v13312_v55 = vld [vmem:[%s17223_s17 + $0x8d0] sm:$0x3]  ;;  %v13362_v7 = vld [vmem:[%s17223_s17 + $0x64c] sm:$0xc] }
 0x259   : > { %v5836_v59 = vrot.slane %v13312_v55, 6 }
 0x25a   : > { %v5816_v26 = vsel %vm17216_vm4, %v5814_v60, %v5815_v38  ;;  %v5835_v14 = vrot.slane %v5833_v25, 4  ;;  %v13410_v60 = vrot.slane %v13362_v7, 10 }
 0x25b   : > { %v13342_v51 = vcombine.low %v5813_v4, %v5816_v26 }
 0x25c   : > { %v5837_v20 = vsel %vm17216_vm4, %v5835_v14, %v5836_v59 }
 0x25e   : > { %15521 = vmatmul.mubr.msk.bf16.gmra.mrb[48].mxu1 %vm499_vm3, %v16959_v27  ;;  %15245 = vmatmul.mubr.msk.bf16.gmra.mrb[76].mxu0 %vm499_vm3, %v13337_v46  ;;  %v5826_v27 = vrot.slane %v13308_v34, 6  ;;  %v13309_v46 = vld [vmem:[%s17223_s17 + $0x8a4] sm:$0x3]  ;;  %v13366_v34 = vld [vmem:[%s17223_s17 + $0x67c] sm:$0xf] }
 0x25f   : > { %15524 = vmatprep.mubr.msk.bf16.mxu1 %vm499_vm3, %v16960_v24  ;;  %15248 = vmatprep.mubr.msk.bf16.mxu0 %vm499_vm3, %v13338_v56  ;;  %v13341_v24 = vcombine.low %v5806_v0, %v5809_v28  ;;  %v16964_v56 = vld [vmem:[%s17223_s17 + $0x28c] sm:$0xff]   ;;  %v5829_v18 = vrot.slane %v13309_v46, 6  ;;  %v13369_v0 = vld [vmem:[%s17223_s17 + $0x6a8] sm:$0xf]  ;;  %v5834_v28 = vsel %vm17216_vm4, %v13328_v37, %v5833_v25  ;;  %v6236_v4 = vrot.slane %v13366_v34, 6  ;;  %v16970_v37 = vld [vmem:[%s17223_s17 + $0x6e0] sm:$0xff]  }
 0x260   : > { %v5828_v40 = vrot.slane %v5826_v27, 4  ;;  %v5827_v43 = vsel %vm17216_vm4, %v13327_v36, %v5826_v27  ;;  %v13367_v27 = vld [vmem:[%s17223_s17 + $0x680] sm:$0x3]  ;;  %v13368_v46 = vld [vmem:[%s17223_s17 + $0x6a4] sm:$0xc] }
 0x261   : > { %v6238_v19 = vrot.slane %v6236_v4, 4  ;;  %v6239_v36 = vrot.slane %v13367_v27, 6  ;;  %v6237_v25 = vsel %vm17216_vm4, %v13411_v63, %v6236_v4  ;;  %v13381_v4 = vld [vmem:[%s17223_s17 + $0x758] sm:$0xf] }
 0x262   : > { %v5830_v13 = vsel %vm17216_vm4, %v5828_v40, %v5829_v18  ;;  %v16968_v40 = vld [vmem:[%s17223_s17 + $0x688] sm:$0xff]   ;;  %v13412_v18 = vrot.slane %v13368_v46, 10  ;;  %v13379_v46 = vld [vmem:[%s17223_s17 + $0x730] sm:$0x3] }
 0x263   : > { %v13344_v53 = vcombine.low %v5827_v43, %v5830_v13  ;;  %v6240_v43 = vsel %vm17216_vm4, %v6238_v19, %v6239_v36  ;;  %v16972_v19 = vld [vmem:[%s17223_s17 + $0x738] sm:$0xff]  }
 0x266   : > { %15525 = vmatmul.mubr.msk.bf16.gmra.mrb[52].mxu1 %vm499_vm3, %v16961_v5  ;;  %15249 = vmatmul.mubr.msk.bf16.gmra.mrb[80].mxu0 %vm499_vm3, %v13339_v11  ;;  %v6229_v5 = vrot.slane %v13363_v61, 6  ;;  %v13364_v11 = vld [vmem:[%s17223_s17 + $0x654] sm:$0x3] }
 0x267   : > { %15528 = vmatprep.mubr.msk.bf16.mxu1 %vm499_vm3, %v16962_v39  ;;  %15252 = vmatprep.mubr.msk.bf16.mxu0 %vm499_vm3, %v13340_v1  ;;  %v13343_v39 = vcombine.low %v5820_v54, %v5823_v44  ;;  %v16966_v1 = vld [vmem:[%s17223_s17 + $0x630] sm:$0xff]   ;;  %v6232_v42 = vrot.slane %v13364_v11, 6  ;;  %v13375_v44 = vld [vmem:[%s17223_s17 + $0x700] sm:$0xf] }
 0x268   : > { %v6231_v38 = vrot.slane %v6229_v5, 4  ;;  %v6230_v26 = vsel %vm17216_vm4, %v13410_v60, %v6229_v5  ;;  %v13372_v54 = vld [vmem:[%s17223_s17 + $0x6d4] sm:$0xf]  ;;  %v13371_v5 = vld [vmem:[%s17223_s17 + $0x6d0] sm:$0xc]  ;;  %v6257_v7 = vrot.slane %v13375_v44, 6 }
 0x269   : > { %v6250_v13 = vrot.slane %v13372_v54, 6  ;;  %v16969_v11 = vld [vmem:[%s17223_s17 + $0x6b4] sm:$0xff]   ;;  %v13413_v59 = vrot.slane %v13371_v5, 10 }
 0x26a   : > { %v6233_v50 = vsel %vm17216_vm4, %v6231_v38, %v6232_v42  ;;  %v6259_v34 = vrot.slane %v6257_v7, 4 }
 0x26b   : > { %v13427_v9 = vcombine.low %v6230_v26, %v6233_v50  ;;  %v6252_v60 = vrot.slane %v6250_v13, 4  ;;  %v19778_v26 = vld [vmem:[%s20987_s2 + $0x40] sm:$0xf] }
 0x26e   : > { %15529 = vmatmul.mubr.msk.bf16.gmra.mrb[56].mxu1 %vm499_vm3, %v16963_v49  ;;  %15253 = vmatmul.mubr.msk.bf16.gmra.mrb[84].mxu0 %vm499_vm3, %v13341_v24  ;;  %v6243_v49 = vrot.slane %v13369_v0, 6  ;;  %v13370_v24 = vld [vmem:[%s17223_s17 + $0x6ac] sm:$0x3] }
 0x26f   : > { %15532 = vmatprep.mubr.msk.bf16.mxu1 %vm499_vm3, %v16964_v56  ;;  %15256 = vmatprep.mubr.msk.bf16.mxu0 %vm499_vm3, %v13342_v51  ;;  %v13345_v56 = vcombine.low %v5834_v28, %v5837_v20  ;;  %v10004_v51 = vsel %vm548_vm0, %v19537_v23, 0  ;;  %v6246_v61 = vrot.slane %v13370_v24, 6  ;;  %v19749_v23 = vld [vmem:[%s20987_s2 + $0x60] sm:$0xf]  ;;  %v13378_v28 = vld [vmem:[%s17223_s17 + $0x72c] sm:$0xf] }
 0x270   : > { %v6245_v35 = vrot.slane %v6243_v49, 4  ;;  %v6244_v47 = vsel %vm17216_vm4, %v13412_v18, %v6243_v49  ;;  %v6939_v20 = vsel %vm548_vm0, %v19582_v62, 0  ;;  %v6251_v62 = vsel %vm17216_vm4, %v13413_v59, %v6250_v13  ;;  %v16974_v59 = vld [vmem:[%s17223_s17 + $0x790] sm:$0xff]  }
 0x271   : > { %v6264_v48 = vrot.slane %v13378_v28, 6  ;;  %v6271_v24 = vrot.slane %v13381_v4, 6  ;;  %v13390_v4 = vld [vmem:[%s17223_s17 + $0x7dc] sm:$0xf] }
 0x272   : > { %v6247_v55 = vsel %vm17216_vm4, %v6245_v35, %v6246_v61  ;;  %v6267_v35 = vrot.slane %v13379_v46, 6  ;;  %v13389_v46 = vld [vmem:[%s17223_s17 + $0x7d8] sm:$0xc] }
 0x273   : > { %v13429_v14 = vcombine.low %v6244_v47, %v6247_v55  ;;  %v6266_v18 = vrot.slane %v6264_v48, 4  ;;  %v6273_v54 = vrot.slane %v6271_v24, 4 }
 0x275   : > { %v6268_v47 = vsel %vm17216_vm4, %v6266_v18, %v6267_v35  ;;  %v13419_v18 = vrot.slane %v13389_v46, 10 }
 0x276   : > { %15533 = vmatmul.mubr.msk.bf16.gmra.mrb[60].mxu1 %vm499_vm3, %v16965_v15  ;;  %15257 = vmatmul.mubr.msk.bf16.gmra.mrb[88].mxu0 %vm499_vm3, %v13343_v39  ;;  %v13373_v15 = vld [vmem:[%s17223_s17 + $0x6d8] sm:$0x3]  ;;  %v13374_v39 = vld [vmem:[%s17223_s17 + $0x6fc] sm:$0xc] }
 0x277   : > { %15538 = vmatprep.mubr.msk.bf16.mxu1 %vm499_vm3, %v16966_v1  ;;  %15260 = vmatprep.mubr.msk.bf16.mxu0 %vm499_vm3, %v13344_v53  ;;  %v13376_v1 = vld [vmem:[%s17223_s17 + $0x704] sm:$0x3]  ;;  %v13428_v53 = vcombine.low %v6237_v25, %v6240_v43  ;;  %v6253_v38 = vrot.slane %v13373_v15, 6  ;;  %v13414_v42 = vrot.slane %v13374_v39, 10  ;;  %v13387_v43 = vld [vmem:[%s17223_s17 + $0x7b0] sm:$0xf] }
 0x278   : > { %v6260_v0 = vrot.slane %v13376_v1, 6  ;;  %v13384_v25 = vld [vmem:[%s17223_s17 + $0x784] sm:$0xf]  ;;  %v6285_v39 = vrot.slane %v13387_v43, 6  ;;  %v13396_v43 = vld [vmem:[%s17223_s17 + $0x834] sm:$0xf] }
 0x279   : > { %v6254_v50 = vsel %vm17216_vm4, %v6252_v60, %v6253_v38  ;;  %v6258_v27 = vsel %vm17216_vm4, %v13414_v42, %v6257_v7  ;;  %v6278_v55 = vrot.slane %v13384_v25, 6  ;;  %v13383_v7 = vld [vmem:[%s17223_s17 + $0x780] sm:$0xc]  ;;  %v16973_v1 = vld [vmem:[%s17223_s17 + $0x764] sm:$0xff]  }
 0x27a   : > { %v6261_v49 = vsel %vm17216_vm4, %v6259_v34, %v6260_v0  ;;  %v13430_v63 = vcombine.low %v6251_v62, %v6254_v50  ;;  %v13417_v38 = vrot.slane %v13383_v7, 10  ;;  %v6287_v28 = vrot.slane %v6285_v39, 4  ;;  %v13393_v62 = vld [vmem:[%s17223_s17 + $0x808] sm:$0xf] }
 0x27b   : > { %v13431_v36 = vcombine.low %v6258_v27, %v6261_v49  ;;  %v6280_v42 = vrot.slane %v6278_v55, 4  ;;  %v6292_v27 = vrot.slane %v13390_v4, 6 }
 0x27c   : > { %v6279_v50 = vsel %vm17216_vm4, %v13417_v38, %v6278_v55 }
 0x27d   : > { %v6294_v35 = vrot.slane %v6292_v27, 4 }
 0x27e   : > { %15539 = vmatmul.mubr.msk.bf16.vlgmr.msra.gmra.mrb[32].mxu1 %vm499_vm3, %v16967_v30  ;;  %15261 = vmatmul.mubr.msk.bf16.gmra.mrb[92].mxu0 %vm499_vm3, %v13345_v56  ;;  %v13377_v30 = vld [vmem:[%s17223_s17 + $0x728] sm:$0xc]  ;;  %v16971_v56 = vld [vmem:[%s17223_s17 + $0x70c] sm:$0xff]  }
 0x27f   : > { %15571 = vmatpush3.bf16.msra.mxu1 %v10004_v51  ;;  %15266 = vmatprep.mubr.msk.bf16.mxu0 %vm499_vm3, %v13427_v9  ;;  %v13380_v51 = vld [vmem:[%s17223_s17 + $0x754] sm:$0xc]  ;;  %v13382_v9 = vld [vmem:[%s17223_s17 + $0x75c] sm:$0x3] }
 0x280   : > { %15542 = vmatprep.mubr.msk.bf16.mxu1 %vm499_vm3, %v16968_v40  ;;  %16550 = vmatprep.subr.msk.bf16.mxu1 %vm548_vm0, %v19749_v23  ;;  %v13415_v40 = vrot.slane %v13377_v30, 10  ;;  %v13416_v61 = vrot.slane %v13380_v51, 10  ;;  %v6274_v44 = vrot.slane %v13382_v9, 6  ;;  %v16975_v51 = vld [vmem:[%s17223_s17 + $0x7bc] sm:$0xff]   ;;  %v13392_v9 = vld [vmem:[%s17223_s17 + $0x804] sm:$0xc] }
 0x282   : > { %v6265_v13 = vsel %vm17216_vm4, %v13415_v40, %v6264_v48  ;;  %v6272_v5 = vsel %vm17216_vm4, %v13416_v61, %v6271_v24  ;;  %v6275_v15 = vsel %vm17216_vm4, %v6273_v54, %v6274_v44  ;;  %v13391_v24 = vld [vmem:[%s17223_s17 + $0x7e0] sm:$0x3]  ;;  %v13420_v54 = vrot.slane %v13392_v9, 10  ;;  %v16979_v9 = vld [vmem:[%s17223_s17 + $0x86c] sm:$0xff]  }
 0x283   : > { %v13433_v60 = vcombine.low %v6272_v5, %v6275_v15  ;;  %v6295_v61 = vrot.slane %v13391_v24, 6  ;;  %v6306_v5 = vrot.slane %v13396_v43, 6  ;;  %v13401_v24 = vld [vmem:[%s17223_s17 + $0x888] sm:$0xc] }
 0x285   : > { %v6296_v55 = vsel %vm17216_vm4, %v6294_v35, %v6295_v61  ;;  %v13423_v35 = vrot.slane %v13401_v24, 10 }
 0x286   : > { %15543 = vmatmul.mubr.msk.bf16.gmra.mrb[36].mxu1 %vm499_vm3, %v16969_v11  ;;  %15267 = vmatmul.mubr.msk.bf16.vlgmr.msra.gmra.mrb[64].mxu0 %vm499_vm3, %v13428_v53  ;;  %v13385_v11 = vld [vmem:[%s17223_s17 + $0x788] sm:$0x3]  ;;  %v13386_v53 = vld [vmem:[%s17223_s17 + $0x7ac] sm:$0xc] }
 0x287   : > { %15546 = vmatprep.mubr.msk.bf16.mxu1 %vm499_vm3, %v16970_v37  ;;  %15270 = vmatprep.mubr.msk.bf16.mxu0 %vm499_vm3, %v13429_v14  ;;  %v13388_v37 = vld [vmem:[%s17223_s17 + $0x7b4] sm:$0x3]  ;;  %v13432_v14 = vcombine.low %v6265_v13, %v6268_v47  ;;  %v6281_v34 = vrot.slane %v13385_v11, 6  ;;  %v13418_v0 = vrot.slane %v13386_v53, 10  ;;  %v13399_v13 = vld [vmem:[%s17223_s17 + $0x860] sm:$0xf]  ;;  %v6293_v47 = vsel %vm17216_vm4, %v13419_v18, %v6292_v27 }
 0x288   : > { %15299 = vmatpush3.bf16.msra.mxu0 %v6939_v20  ;;  %v6288_v20 = vrot.slane %v13388_v37, 6  ;;  %v13395_v11 = vld [vmem:[%s17223_s17 + $0x830] sm:$0xc]  ;;  %v16977_v53 = vld [vmem:[%s17223_s17 + $0x814] sm:$0xff]   ;;  %v13398_v37 = vld [vmem:[%s17223_s17 + $0x85c] sm:$0xc] }
 0x289   : > { %16542 = vmatprep.subr.msk.bf16.mxu0 %vm548_vm0, %v19778_v26  ;;  %v6282_v48 = vsel %vm17216_vm4, %v6280_v42, %v6281_v34  ;;  %v6286_v49 = vsel %vm17216_vm4, %v13418_v0, %v6285_v39  ;;  %v13397_v39 = vld [vmem:[%s17223_s17 + $0x838] sm:$0x3]  ;;  %v13421_v42 = vrot.slane %v13395_v11, 10  ;;  %v6308_v34 = vrot.slane %v6306_v5, 4 }
 0x28a   : > { %v6289_v30 = vsel %vm17216_vm4, %v6287_v28, %v6288_v20  ;;  %v6309_v0 = vrot.slane %v13397_v39, 6  ;;  %v13422_v28 = vrot.slane %v13398_v37, 10  ;;  %v13407_v39 = vld [vmem:[%s17223_s17 + $0x8e0] sm:$0xc]  ;;  %v16981_v37 = vld [vmem:[%s17223_s17 + $0x8c4] sm:$0xff]  }
 0x28b   : > { %v13435_v40 = vcombine.low %v6286_v49, %v6289_v30 }
 0x28c   : > { %v6310_v27 = vsel %vm17216_vm4, %v6308_v34, %v6309_v0  ;;  %v13425_v34 = vrot.slane %v13407_v39, 10 }
 0x28e   : > { %15547 = vmatmul.mubr.msk.bf16.gmra.mrb[40].mxu1 %vm499_vm3, %v16971_v56  ;;  %15271 = vmatmul.mubr.msk.bf16.gmra.mrb[68].mxu0 %vm499_vm3, %v13430_v63  ;;  %v6299_v56 = vrot.slane %v13393_v62, 6  ;;  %v13394_v63 = vld [vmem:[%s17223_s17 + $0x80c] sm:$0x3] }
 0x28f   : > { %15550 = vmatprep.mubr.msk.bf16.mxu1 %vm499_vm3, %v16972_v19  ;;  %15274 = vmatprep.mubr.msk.bf16.mxu0 %vm499_vm3, %v13431_v36  ;;  %v13434_v19 = vcombine.low %v6279_v50, %v6282_v48  ;;  %v16976_v36 = vld [vmem:[%s17223_s17 + $0x7e8] sm:$0xff]   ;;  %v6302_v25 = vrot.slane %v13394_v63, 6  ;;  %v13405_v50 = vld [vmem:[%s17223_s17 + $0x8b8] sm:$0xf]  ;;  %v6307_v48 = vsel %vm17216_vm4, %v13421_v42, %v6306_v5  ;;  %v13404_v63 = vld [vmem:[%s17223_s17 + $0x8b4] sm:$0xc] }
 0x290   : > { %v6301_v44 = vrot.slane %v6299_v56, 4  ;;  %v6300_v15 = vsel %vm17216_vm4, %v13420_v54, %v6299_v56  ;;  %v13402_v62 = vld [vmem:[%s17223_s17 + $0x88c] sm:$0xf]  ;;  %v13403_v56 = vld [vmem:[%s17223_s17 + $0x890] sm:$0x3] }
 0x291   : > { %v6320_v49 = vrot.slane %v13402_v62, 6  ;;  %v6323_v54 = vrot.slane %v13403_v56, 6  ;;  %v13462_v56 = vld [vmem:[%s17223_s17 + $0xa80] sm:$0xc] }
 0x292   : > { %v6303_v7 = vsel %vm17216_vm4, %v6301_v44, %v6302_v25  ;;  %v13424_v44 = vrot.slane %v13404_v63, 10  ;;  %v16983_v63 = vld [vmem:[%s17223_s17 + $0x680] sm:$0xff]  }
 0x293   : > { %v13437_v38 = vcombine.low %v6300_v15, %v6303_v7  ;;  %v6322_v61 = vrot.slane %v6320_v49, 4 }
 0x295   : > { %v6324_v5 = vsel %vm17216_vm4, %v6322_v61, %v6323_v54  ;;  %v13508_v61 = vrot.slane %v13462_v56, 10 }
 0x296   : > { %15551 = vmatmul.mubr.msk.bf16.gmra.mrb[44].mxu1 %vm499_vm3, %v16973_v1  ;;  %15275 = vmatmul.mubr.msk.bf16.gmra.mrb[72].mxu0 %vm499_vm3, %v13432_v14  ;;  %v6313_v1 = vrot.slane %v13399_v13, 6  ;;  %v13400_v14 = vld [vmem:[%s17223_s17 + $0x864] sm:$0x3] }
 0x297   : > { %15554 = vmatprep.mubr.msk.bf16.mxu1 %vm499_vm3, %v16974_v59  ;;  %15278 = vmatprep.mubr.msk.bf16.mxu0 %vm499_vm3, %v13433_v60  ;;  %v13436_v59 = vcombine.low %v6293_v47, %v6296_v55  ;;  %v16978_v60 = vld [vmem:[%s17223_s17 + $0x840] sm:$0xff]   ;;  %v6316_v4 = vrot.slane %v13400_v14, 6  ;;  %v13460_v47 = vld [vmem:[%s17223_s17 + $0xa58] sm:$0xf]  ;;  %v6321_v55 = vsel %vm17216_vm4, %v13423_v35, %v6320_v49  ;;  %v13459_v14 = vld [vmem:[%s17223_s17 + $0xa54] sm:$0xc] }
 0x298   : > { %v6315_v20 = vrot.slane %v6313_v1, 4  ;;  %v6314_v30 = vsel %vm17216_vm4, %v13422_v28, %v6313_v1  ;;  %v13408_v13 = vld [vmem:[%s17223_s17 + $0x8e4] sm:$0xf]  ;;  %v13409_v1 = vld [vmem:[%s17223_s17 + $0x8e8] sm:$0x3] }
 0x299   : > { %v6334_v15 = vrot.slane %v13408_v13, 6  ;;  %v6337_v28 = vrot.slane %v13409_v1, 6 }
 0x29a   : > { %v6317_v46 = vsel %vm17216_vm4, %v6315_v20, %v6316_v4  ;;  %v13507_v20 = vrot.slane %v13459_v14, 10 }
 0x29b   : > { %v13439_v18 = vcombine.low %v6314_v30, %v6317_v46  ;;  %v6336_v0 = vrot.slane %v6334_v15, 4 }
 0x29d   : > { %v6338_v49 = vsel %vm17216_vm4, %v6336_v0, %v6337_v28 }
 0x29e   : > { %15555 = vmatmul.mubr.msk.bf16.gmra.mrb[48].mxu1 %vm499_vm3, %v16975_v51  ;;  %15279 = vmatmul.mubr.msk.bf16.gmra.mrb[76].mxu0 %vm499_vm3, %v13434_v19  ;;  %v6327_v51 = vrot.slane %v13405_v50, 6  ;;  %v13406_v19 = vld [vmem:[%s17223_s17 + $0x8bc] sm:$0x3]  ;;  %v13463_v50 = vld [vmem:[%s17223_s17 + $0xa84] sm:$0xf] }
 0x29f   : > { %15558 = vmatprep.mubr.msk.bf16.mxu1 %vm499_vm3, %v16976_v36  ;;  %15282 = vmatprep.mubr.msk.bf16.mxu0 %vm499_vm3, %v13435_v40  ;;  %v13438_v36 = vcombine.low %v6307_v48, %v6310_v27  ;;  %v16980_v40 = vld [vmem:[%s17223_s17 + $0x898] sm:$0xff]   ;;  %v6330_v43 = vrot.slane %v13406_v19, 6  ;;  %v13466_v48 = vld [vmem:[%s17223_s17 + $0xab0] sm:$0xf]  ;;  %v6335_v27 = vsel %vm17216_vm4, %v13425_v34, %v6334_v15  ;;  %v6738_v30 = vrot.slane %v13463_v50, 6  ;;  %v16986_v34 = vld [vmem:[%s17223_s17 + $0x704] sm:$0xff]  }
 0x2a0   : > { %v6329_v25 = vrot.slane %v6327_v51, 4  ;;  %v6328_v7 = vsel %vm17216_vm4, %v13424_v44, %v6327_v51  ;;  %v13464_v51 = vld [vmem:[%s17223_s17 + $0xa88] sm:$0x3]  ;;  %v13465_v19 = vld [vmem:[%s17223_s17 + $0xaac] sm:$0xc] }
 0x2a1   : > { %v6740_v54 = vrot.slane %v6738_v30, 4  ;;  %v6741_v44 = vrot.slane %v13464_v51, 6  ;;  %v6739_v15 = vsel %vm17216_vm4, %v13508_v61, %v6738_v30  ;;  %v13478_v30 = vld [vmem:[%s17223_s17 + $0xb60] sm:$0xf] }
 0x2a2   : > { %v6331_v11 = vsel %vm17216_vm4, %v6329_v25, %v6330_v43  ;;  %v16984_v25 = vld [vmem:[%s17223_s17 + $0x6ac] sm:$0xff]   ;;  %v13509_v43 = vrot.slane %v13465_v19, 10  ;;  %v13476_v19 = vld [vmem:[%s17223_s17 + $0xb38] sm:$0x3] }
 0x2a3   : > { %v13441_v42 = vcombine.low %v6328_v7, %v6331_v11  ;;  %v6742_v7 = vsel %vm17216_vm4, %v6740_v54, %v6741_v44  ;;  %v16988_v54 = vld [vmem:[%s17223_s17 + $0x75c] sm:$0xff]  }
 0x2a6   : > { %15559 = vmatmul.mubr.msk.bf16.gmra.mrb[52].mxu1 %vm499_vm3, %v16977_v53  ;;  %15283 = vmatmul.mubr.msk.bf16.gmra.mrb[80].mxu0 %vm499_vm3, %v13436_v59  ;;  %v6731_v53 = vrot.slane %v13460_v47, 6  ;;  %v13461_v59 = vld [vmem:[%s17223_s17 + $0xa5c] sm:$0x3] }
 0x2a7   : > { %15562 = vmatprep.mubr.msk.bf16.mxu1 %vm499_vm3, %v16978_v60  ;;  %15286 = vmatprep.mubr.msk.bf16.mxu0 %vm499_vm3, %v13437_v38  ;;  %v13440_v60 = vcombine.low %v6321_v55, %v6324_v5  ;;  %v16982_v38 = vld [vmem:[%s17223_s17 + $0x654] sm:$0xff]   ;;  %v6734_v62 = vrot.slane %v13461_v59, 6  ;;  %v13469_v55 = vld [vmem:[%s17223_s17 + $0xadc] sm:$0xf]  ;;  %v13472_v5 = vld [vmem:[%s17223_s17 + $0xb08] sm:$0xf] }
 0x2a8   : > { %v6733_v4 = vrot.slane %v6731_v53, 4  ;;  %v6732_v46 = vsel %vm17216_vm4, %v13507_v20, %v6731_v53  ;;  %v6752_v11 = vrot.slane %v13469_v55, 6  ;;  %v13468_v53 = vld [vmem:[%s17223_s17 + $0xad8] sm:$0xc]  ;;  %v6759_v14 = vrot.slane %v13472_v5, 6 }
 0x2a9   : > { %v16985_v59 = vld [vmem:[%s17223_s17 + $0x6d8] sm:$0xff]   ;;  %v13510_v28 = vrot.slane %v13468_v53, 10 }
 0x2aa   : > { %v6735_v24 = vsel %vm17216_vm4, %v6733_v4, %v6734_v62  ;;  %v6754_v20 = vrot.slane %v6752_v11, 4  ;;  %v6761_v50 = vrot.slane %v6759_v14, 4 }
 0x2ab   : > { %v13524_v35 = vcombine.low %v6732_v46, %v6735_v24  ;;  %v19956_v46 = vld [vmem:[%s20987_s2 + $0x44] sm:$0xf] }
 0x2ae   : > { %15563 = vmatmul.mubr.msk.bf16.gmra.mrb[56].mxu1 %vm499_vm3, %v16979_v9  ;;  %15287 = vmatmul.mubr.msk.bf16.gmra.mrb[84].mxu0 %vm499_vm3, %v13438_v36  ;;  %v6745_v9 = vrot.slane %v13466_v48, 6  ;;  %v13467_v36 = vld [vmem:[%s17223_s17 + $0xab4] sm:$0x3] }
 0x2af   : > { %15566 = vmatprep.mubr.msk.bf16.mxu1 %vm499_vm3, %v16980_v40  ;;  %15290 = vmatprep.mubr.msk.bf16.mxu0 %vm499_vm3, %v13439_v18  ;;  %v13442_v40 = vcombine.low %v6335_v27, %v6338_v49  ;;  %v10362_v18 = vsel %vm548_vm0, %v19749_v23, 0  ;;  %v6748_v47 = vrot.slane %v13467_v36, 6  ;;  %v19927_v23 = vld [vmem:[%s20987_s2 + $0x64] sm:$0xf]  ;;  %v13475_v27 = vld [vmem:[%s17223_s17 + $0xb34] sm:$0xf] }
 0x2b0   : > { %v6747_v13 = vrot.slane %v6745_v9, 4  ;;  %v6746_v39 = vsel %vm17216_vm4, %v13509_v43, %v6745_v9  ;;  %v7440_v49 = vsel %vm548_vm0, %v19778_v26, 0  ;;  %v6753_v26 = vsel %vm17216_vm4, %v13510_v28, %v6752_v11  ;;  %v16990_v28 = vld [vmem:[%s17223_s17 + $0x7b4] sm:$0xff]  }
 0x2b1   : > { %v6766_v56 = vrot.slane %v13475_v27, 6  ;;  %v6773_v36 = vrot.slane %v13478_v30, 6  ;;  %v13487_v30 = vld [vmem:[%s17223_s17 + $0xbe4] sm:$0xf] }
 0x2b2   : > { %v6749_v1 = vsel %vm17216_vm4, %v6747_v13, %v6748_v47  ;;  %v6769_v13 = vrot.slane %v13476_v19, 6  ;;  %v13486_v19 = vld [vmem:[%s17223_s17 + $0xbe0] sm:$0xc] }
 0x2b3   : > { %v13526_v0 = vcombine.low %v6746_v39, %v6749_v1  ;;  %v6768_v43 = vrot.slane %v6766_v56, 4  ;;  %v6775_v55 = vrot.slane %v6773_v36, 4 }
 0x2b5   : > { %v6770_v39 = vsel %vm17216_vm4, %v6768_v43, %v6769_v13  ;;  %v13516_v43 = vrot.slane %v13486_v19, 10 }
 0x2b6   : > { %15567 = vmatmul.mubr.msk.bf16.gmra.mrb[60].mxu1 %vm499_vm3, %v16981_v37  ;;  %15291 = vmatmul.mubr.msk.bf16.gmra.mrb[88].mxu0 %vm499_vm3, %v13440_v60  ;;  %v13470_v37 = vld [vmem:[%s17223_s17 + $0xae0] sm:$0x3]  ;;  %v13471_v60 = vld [vmem:[%s17223_s17 + $0xb04] sm:$0xc] }
 0x2b7   : > { %15572 = vmatprep.mubr.msk.bf16.mxu1 %vm499_vm3, %v16982_v38  ;;  %15294 = vmatprep.mubr.msk.bf16.mxu0 %vm499_vm3, %v13441_v42  ;;  %v13473_v38 = vld [vmem:[%s17223_s17 + $0xb0c] sm:$0x3]  ;;  %v13525_v42 = vcombine.low %v6739_v15, %v6742_v7  ;;  %v6755_v4 = vrot.slane %v13470_v37, 6  ;;  %v13511_v62 = vrot.slane %v13471_v60, 10  ;;  %v13484_v7 = vld [vmem:[%s17223_s17 + $0xbb8] sm:$0xf] }
 0x2b8   : > { %v6762_v48 = vrot.slane %v13473_v38, 6  ;;  %v13481_v15 = vld [vmem:[%s17223_s17 + $0xb8c] sm:$0xf]  ;;  %v6787_v60 = vrot.slane %v13484_v7, 6  ;;  %v13493_v7 = vld [vmem:[%s17223_s17 + $0xc3c] sm:$0xf] }
 0x2b9   : > { %v6756_v24 = vsel %vm17216_vm4, %v6754_v20, %v6755_v4  ;;  %v6760_v51 = vsel %vm17216_vm4, %v13511_v62, %v6759_v14  ;;  %v6780_v1 = vrot.slane %v13481_v15, 6  ;;  %v13480_v14 = vld [vmem:[%s17223_s17 + $0xb88] sm:$0xc] }
 0x2ba   : > { %v6763_v9 = vsel %vm17216_vm4, %v6761_v50, %v6762_v48  ;;  %v13527_v61 = vcombine.low %v6753_v26, %v6756_v24  ;;  %v16989_v38 = vld [vmem:[%s17223_s17 + $0x788] sm:$0xff]   ;;  %v13514_v4 = vrot.slane %v13480_v14, 10  ;;  %v6789_v27 = vrot.slane %v6787_v60, 4  ;;  %v13490_v26 = vld [vmem:[%s17223_s17 + $0xc10] sm:$0xf] }
 0x2bb   : > { %v13528_v44 = vcombine.low %v6760_v51, %v6763_v9  ;;  %v6782_v62 = vrot.slane %v6780_v1, 4  ;;  %v6794_v51 = vrot.slane %v13487_v30, 6 }
 0x2bc   : > { %v6781_v24 = vsel %vm17216_vm4, %v13514_v4, %v6780_v1 }
 0x2bd   : > { %v6796_v13 = vrot.slane %v6794_v51, 4 }
 0x2be   : > { %15573 = vmatmul.mubr.msk.bf16.vlgmr.msra.gmra.mrb[32].mxu1 %vm499_vm3, %v16983_v63  ;;  %15295 = vmatmul.mubr.msk.bf16.gmra.mrb[92].mxu0 %vm499_vm3, %v13442_v40  ;;  %v13474_v63 = vld [vmem:[%s17223_s17 + $0xb30] sm:$0xc] }
 0x2bf   : > { %15605 = vmatpush3.bf16.msra.mxu1 %v10362_v18  ;;  %15300 = vmatprep.mubr.msk.bf16.mxu0 %vm499_vm3, %v13524_v35  ;;  %v16987_v40 = vld [vmem:[%s17223_s17 + $0x730] sm:$0xff]   ;;  %v13477_v18 = vld [vmem:[%s17223_s17 + $0xb5c] sm:$0xc]  ;;  %v13479_v35 = vld [vmem:[%s17223_s17 + $0xb64] sm:$0x3] }
 0x2c0   : > { %15576 = vmatprep.mubr.msk.bf16.mxu1 %vm499_vm3, %v16984_v25  ;;  %16551 = vmatprep.subr.msk.bf16.mxu1 %vm548_vm0, %v19927_v23  ;;  %v13512_v25 = vrot.slane %v13474_v63, 10  ;;  %v13513_v47 = vrot.slane %v13477_v18, 10  ;;  %v6776_v5 = vrot.slane %v13479_v35, 6  ;;  %v16991_v18 = vld [vmem:[%s17223_s17 + $0x7e0] sm:$0xff]   ;;  %v13489_v35 = vld [vmem:[%s17223_s17 + $0xc0c] sm:$0xc] }
 0x2c2   : > { %v6767_v11 = vsel %vm17216_vm4, %v13512_v25, %v6766_v56  ;;  %v6774_v53 = vsel %vm17216_vm4, %v13513_v47, %v6773_v36  ;;  %v6777_v37 = vsel %vm17216_vm4, %v6775_v55, %v6776_v5  ;;  %v13488_v36 = vld [vmem:[%s17223_s17 + $0xbe8] sm:$0x3]  ;;  %v13517_v55 = vrot.slane %v13489_v35, 10  ;;  %v16995_v35 = vld [vmem:[%s17223_s17 + $0x890] sm:$0xff]  }
 0x2c3   : > { %v13530_v20 = vcombine.low %v6774_v53, %v6777_v37  ;;  %v6797_v47 = vrot.slane %v13488_v36, 6  ;;  %v6808_v53 = vrot.slane %v13493_v7, 6  ;;  %v13498_v36 = vld [vmem:[%s17223_s17 + $0xc90] sm:$0xc] }
 0x2c5   : > { %v6798_v1 = vsel %vm17216_vm4, %v6796_v13, %v6797_v47  ;;  %v13520_v13 = vrot.slane %v13498_v36, 10 }
 0x2c6   : > { %15577 = vmatmul.mubr.msk.bf16.gmra.mrb[36].mxu1 %vm499_vm3, %v16985_v59  ;;  %15301 = vmatmul.mubr.msk.bf16.vlgmr.msra.gmra.mrb[64].mxu0 %vm499_vm3, %v13525_v42  ;;  %v13482_v59 = vld [vmem:[%s17223_s17 + $0xb90] sm:$0x3]  ;;  %v13483_v42 = vld [vmem:[%s17223_s17 + $0xbb4] sm:$0xc] }
 0x2c7   : > { %15580 = vmatprep.mubr.msk.bf16.mxu1 %vm499_vm3, %v16986_v34  ;;  %15304 = vmatprep.mubr.msk.bf16.mxu0 %vm499_vm3, %v13526_v0  ;;  %v13485_v34 = vld [vmem:[%s17223_s17 + $0xbbc] sm:$0x3]  ;;  %v13529_v0 = vcombine.low %v6767_v11, %v6770_v39  ;;  %v6783_v50 = vrot.slane %v13482_v59, 6  ;;  %v13515_v48 = vrot.slane %v13483_v42, 10  ;;  %v13496_v11 = vld [vmem:[%s17223_s17 + $0xc68] sm:$0xf]  ;;  %v6795_v39 = vsel %vm17216_vm4, %v13516_v43, %v6794_v51 }
 0x2c8   : > { %15333 = vmatpush3.bf16.msra.mxu0 %v7440_v49  ;;  %v6790_v49 = vrot.slane %v13485_v34, 6  ;;  %v13492_v59 = vld [vmem:[%s17223_s17 + $0xc38] sm:$0xc]  ;;  %v13495_v34 = vld [vmem:[%s17223_s17 + $0xc64] sm:$0xc] }
 0x2c9   : > { %16543 = vmatprep.subr.msk.bf16.mxu0 %vm548_vm0, %v19956_v46  ;;  %v6784_v56 = vsel %vm17216_vm4, %v6782_v62, %v6783_v50  ;;  %v6788_v9 = vsel %vm17216_vm4, %v13515_v48, %v6787_v60  ;;  %v13494_v60 = vld [vmem:[%s17223_s17 + $0xc40] sm:$0x3]  ;;  %v16993_v42 = vld [vmem:[%s17223_s17 + $0x838] sm:$0xff]   ;;  %v13518_v62 = vrot.slane %v13492_v59, 10  ;;  %v6810_v50 = vrot.slane %v6808_v53, 4 }
 0x2ca   : > { %v6791_v63 = vsel %vm17216_vm4, %v6789_v27, %v6790_v49  ;;  %v6811_v48 = vrot.slane %v13494_v60, 6  ;;  %v13519_v27 = vrot.slane %v13495_v34, 10  ;;  %v13504_v60 = vld [vmem:[%s17223_s17 + $0xce8] sm:$0xc] }
 0x2cb   : > { %v13532_v25 = vcombine.low %v6788_v9, %v6791_v63  ;;  %v16997_v34 = vld [vmem:[%s17223_s17 + $0x8e8] sm:$0xff]  }
 0x2cc   : > { %v6812_v51 = vsel %vm17216_vm4, %v6810_v50, %v6811_v48  ;;  %v13522_v50 = vrot.slane %v13504_v60, 10 }
 0x2ce   : > { %15581 = vmatmul.mubr.msk.bf16.gmra.mrb[40].mxu1 %vm499_vm3, %v16987_v40  ;;  %15305 = vmatmul.mubr.msk.bf16.gmra.mrb[68].mxu0 %vm499_vm3, %v13527_v61  ;;  %v6801_v40 = vrot.slane %v13490_v26, 6  ;;  %v13491_v61 = vld [vmem:[%s17223_s17 + $0xc14] sm:$0x3] }
 0x2cf   : > { %15584 = vmatprep.mubr.msk.bf16.mxu1 %vm499_vm3, %v16988_v54  ;;  %15308 = vmatprep.mubr.msk.bf16.mxu0 %vm499_vm3, %v13528_v44  ;;  %v13531_v54 = vcombine.low %v6781_v24, %v6784_v56  ;;  %v16992_v44 = vld [vmem:[%s17223_s17 + $0x80c] sm:$0xff]   ;;  %v6804_v15 = vrot.slane %v13491_v61, 6  ;;  %v13499_v26 = vld [vmem:[%s17223_s17 + $0xc94] sm:$0xf]  ;;  %v13502_v24 = vld [vmem:[%s17223_s17 + $0xcc0] sm:$0xf]  ;;  %v6809_v56 = vsel %vm17216_vm4, %v13518_v62, %v6808_v53 }
 0x2d0   : > { %v6803_v5 = vrot.slane %v6801_v40, 4  ;;  %v6802_v37 = vsel %vm17216_vm4, %v13517_v55, %v6801_v40  ;;  %v6822_v9 = vrot.slane %v13499_v26, 6  ;;  %v13500_v40 = vld [vmem:[%s17223_s17 + $0xc98] sm:$0x3]  ;;  %v13501_v61 = vld [vmem:[%s17223_s17 + $0xcbc] sm:$0xc] }
 0x2d1   : > { %v6825_v55 = vrot.slane %v13500_v40, 6  ;;  %v13559_v40 = vld [vmem:[%s17223_s17 + $0xa8c] sm:$0xc] }
 0x2d2   : > { %v6805_v14 = vsel %vm17216_vm4, %v6803_v5, %v6804_v15  ;;  %v6824_v47 = vrot.slane %v6822_v9, 4  ;;  %v13521_v5 = vrot.slane %v13501_v61, 10  ;;  %v16999_v61 = vld [vmem:[%s17223_s17 + $0xc8c] sm:$0xff]  }
 0x2d3   : > { %v13534_v4 = vcombine.low %v6802_v37, %v6805_v14 }
 0x2d4   : > { %v6826_v53 = vsel %vm17216_vm4, %v6824_v47, %v6825_v55  ;;  %v13605_v47 = vrot.slane %v13559_v40, 10 }
 0x2d6   : > { %15585 = vmatmul.mubr.msk.bf16.gmra.mrb[44].mxu1 %vm499_vm3, %v16989_v38  ;;  %15309 = vmatmul.mubr.msk.bf16.gmra.mrb[72].mxu0 %vm499_vm3, %v13529_v0  ;;  %v6815_v38 = vrot.slane %v13496_v11, 6  ;;  %v13497_v0 = vld [vmem:[%s17223_s17 + $0xc6c] sm:$0x3] }
 0x2d7   : > { %15588 = vmatprep.mubr.msk.bf16.mxu1 %vm499_vm3, %v16990_v28  ;;  %15312 = vmatprep.mubr.msk.bf16.mxu0 %vm499_vm3, %v13530_v20  ;;  %v13533_v28 = vcombine.low %v6795_v39, %v6798_v1  ;;  %v16994_v20 = vld [vmem:[%s17223_s17 + $0x864] sm:$0xff]   ;;  %v6818_v30 = vrot.slane %v13497_v0, 6  ;;  %v13505_v11 = vld [vmem:[%s17223_s17 + $0xcec] sm:$0xf]  ;;  %v6823_v1 = vsel %vm17216_vm4, %v13520_v13, %v6822_v9  ;;  %v13556_v0 = vld [vmem:[%s17223_s17 + $0xa60] sm:$0xc] }
 0x2d8   : > { %v6817_v49 = vrot.slane %v6815_v38, 4  ;;  %v6816_v63 = vsel %vm17216_vm4, %v13519_v27, %v6815_v38  ;;  %v13557_v39 = vld [vmem:[%s17223_s17 + $0xa64] sm:$0xf]  ;;  %v6836_v37 = vrot.slane %v13505_v11, 6  ;;  %v13506_v38 = vld [vmem:[%s17223_s17 + $0xcf0] sm:$0x3] }
 0x2d9   : > { %v6839_v27 = vrot.slane %v13506_v38, 6 }
 0x2da   : > { %v6819_v19 = vsel %vm17216_vm4, %v6817_v49, %v6818_v30  ;;  %v6838_v48 = vrot.slane %v6836_v37, 4  ;;  %v13604_v49 = vrot.slane %v13556_v0, 10 }
 0x2db   : > { %v13536_v43 = vcombine.low %v6816_v63, %v6819_v19 }
 0x2dc   : > { %v6840_v9 = vsel %vm17216_vm4, %v6838_v48, %v6839_v27 }
 0x2de   : > { %15589 = vmatmul.mubr.msk.bf16.gmra.mrb[48].mxu1 %vm499_vm3, %v16991_v18  ;;  %15313 = vmatmul.mubr.msk.bf16.gmra.mrb[76].mxu0 %vm499_vm3, %v13531_v54  ;;  %v6829_v18 = vrot.slane %v13502_v24, 6  ;;  %v13503_v54 = vld [vmem:[%s17223_s17 + $0xcc4] sm:$0x3]  ;;  %v13560_v24 = vld [vmem:[%s17223_s17 + $0xa90] sm:$0xf] }
 0x2df   : > { %15592 = vmatprep.mubr.msk.bf16.mxu1 %vm499_vm3, %v16992_v44  ;;  %15316 = vmatprep.mubr.msk.bf16.mxu0 %vm499_vm3, %v13532_v25  ;;  %v13535_v44 = vcombine.low %v6809_v56, %v6812_v51  ;;  %v16996_v25 = vld [vmem:[%s17223_s17 + $0x8bc] sm:$0xff]   ;;  %v6832_v7 = vrot.slane %v13503_v54, 6  ;;  %v6837_v51 = vsel %vm17216_vm4, %v13522_v50, %v6836_v37  ;;  %v7239_v63 = vrot.slane %v13560_v24, 6  ;;  %v13562_v54 = vld [vmem:[%s17223_s17 + $0xab8] sm:$0xc]  ;;  %v17002_v50 = vld [vmem:[%s17223_s17 + $0xd10] sm:$0xff]  }
 0x2e0   : > { %v6831_v15 = vrot.slane %v6829_v18, 4  ;;  %v6830_v14 = vsel %vm17216_vm4, %v13521_v5, %v6829_v18  ;;  %v13563_v56 = vld [vmem:[%s17223_s17 + $0xabc] sm:$0xf]  ;;  %v13561_v18 = vld [vmem:[%s17223_s17 + $0xa94] sm:$0x3] }
 0x2e1   : > { %v7241_v55 = vrot.slane %v7239_v63, 4  ;;  %v7242_v5 = vrot.slane %v13561_v18, 6  ;;  %v7240_v37 = vsel %vm17216_vm4, %v13605_v47, %v7239_v63  ;;  %v13575_v63 = vld [vmem:[%s17223_s17 + $0xb6c] sm:$0xf] }
 0x2e2   : > { %v6833_v59 = vsel %vm17216_vm4, %v6831_v15, %v6832_v7  ;;  %v17000_v15 = vld [vmem:[%s17223_s17 + $0xcb8] sm:$0xff]   ;;  %v13606_v7 = vrot.slane %v13562_v54, 10  ;;  %v7274_v54 = vrot.slane %v13575_v63, 6  ;;  %v17004_v47 = vld [vmem:[%s17223_s17 + $0xd68] sm:$0xff]  }
 0x2e3   : > { %v13538_v62 = vcombine.low %v6830_v14, %v6833_v59  ;;  %v7243_v14 = vsel %vm17216_vm4, %v7241_v55, %v7242_v5  ;;  %v13587_v63 = vld [vmem:[%s17223_s17 + $0xc1c] sm:$0xf] }
 0x2e6   : > { %15593 = vmatmul.mubr.msk.bf16.gmra.mrb[52].mxu1 %vm499_vm3, %v16993_v42  ;;  %15317 = vmatmul.mubr.msk.bf16.gmra.mrb[80].mxu0 %vm499_vm3, %v13533_v28  ;;  %v7232_v42 = vrot.slane %v13557_v39, 6  ;;  %v13558_v28 = vld [vmem:[%s17223_s17 + $0xa68] sm:$0x3] }
 0x2e7   : > { %15596 = vmatprep.mubr.msk.bf16.mxu1 %vm499_vm3, %v16994_v20  ;;  %15320 = vmatprep.mubr.msk.bf16.mxu0 %vm499_vm3, %v13534_v4  ;;  %v13537_v20 = vcombine.low %v6823_v1, %v6826_v53  ;;  %v16998_v4 = vld [vmem:[%s17223_s17 + $0xc60] sm:$0xff]   ;;  %v7235_v26 = vrot.slane %v13558_v28, 6  ;;  %v13566_v1 = vld [vmem:[%s17223_s17 + $0xae8] sm:$0xf]  ;;  %v13569_v53 = vld [vmem:[%s17223_s17 + $0xb14] sm:$0xf] }
 0x2e8   : > { %v7234_v30 = vrot.slane %v7232_v42, 4  ;;  %v7233_v19 = vsel %vm17216_vm4, %v13604_v49, %v7232_v42  ;;  %v7253_v59 = vrot.slane %v13566_v1, 6  ;;  %v13565_v42 = vld [vmem:[%s17223_s17 + $0xae4] sm:$0xc]  ;;  %v7260_v0 = vrot.slane %v13569_v53, 6 }
 0x2e9   : > { %v17001_v28 = vld [vmem:[%s17223_s17 + $0xce4] sm:$0xff]   ;;  %v13607_v27 = vrot.slane %v13565_v42, 10  ;;  %v13578_v53 = vld [vmem:[%s17223_s17 + $0xb98] sm:$0xf] }
 0x2ea   : > { %v7236_v36 = vsel %vm17216_vm4, %v7234_v30, %v7235_v26  ;;  %v7255_v49 = vrot.slane %v7253_v59, 4  ;;  %v7262_v24 = vrot.slane %v7260_v0, 4 }
 0x2eb   : > { %v13621_v13 = vcombine.low %v7233_v19, %v7236_v36  ;;  %v7254_v19 = vsel %vm17216_vm4, %v13607_v27, %v7253_v59 }
 0x2ee   : > { %15597 = vmatmul.mubr.msk.bf16.gmra.mrb[56].mxu1 %vm499_vm3, %v16995_v35  ;;  %15321 = vmatmul.mubr.msk.bf16.gmra.mrb[84].mxu0 %vm499_vm3, %v13535_v44  ;;  %v7246_v35 = vrot.slane %v13563_v56, 6  ;;  %v13564_v44 = vld [vmem:[%s17223_s17 + $0xac0] sm:$0x3] }
 0x2ef   : > { %15600 = vmatprep.mubr.msk.bf16.mxu1 %vm499_vm3, %v16996_v25  ;;  %15324 = vmatprep.mubr.msk.bf16.mxu0 %vm499_vm3, %v13536_v43  ;;  %v13539_v25 = vcombine.low %v6837_v51, %v6840_v9  ;;  %v10863_v43 = vsel %vm548_vm0, %v19927_v23, 0  ;;  %v7249_v39 = vrot.slane %v13564_v44, 6  ;;  %v20105_v23 = vld [vmem:[%s20987_s2 + $0x68] sm:$0xf]  ;;  %v13572_v51 = vld [vmem:[%s17223_s17 + $0xb40] sm:$0xf] }
 0x2f0   : > { %v7248_v11 = vrot.slane %v7246_v35, 4  ;;  %v7247_v60 = vsel %vm17216_vm4, %v13606_v7, %v7246_v35  ;;  %v7941_v9 = vsel %vm548_vm0, %v19956_v46, 0  ;;  %v7267_v40 = vrot.slane %v13572_v51, 6  ;;  %v13571_v35 = vld [vmem:[%s17223_s17 + $0xb3c] sm:$0xc] }
 0x2f1   : > { %v17003_v44 = vld [vmem:[%s17223_s17 + $0xd3c] sm:$0xff]   ;;  %v13609_v5 = vrot.slane %v13571_v35, 10  ;;  %v7302_v35 = vrot.slane %v13587_v63, 6  ;;  %v14078_v63 = vld [vmem:[%s17223_s17 + $0xc74] sm:$0xf] }
 0x2f2   : > { %v7250_v38 = vsel %vm17216_vm4, %v7248_v11, %v7249_v39  ;;  %v7276_v39 = vrot.slane %v7274_v54, 4 }
 0x2f3   : > { %v13623_v48 = vcombine.low %v7247_v60, %v7250_v38  ;;  %v7281_v60 = vrot.slane %v13578_v53, 6  ;;  %v13590_v53 = vld [vmem:[%s17223_s17 + $0xc48] sm:$0xf] }
 0x2f6   : > { %15601 = vmatmul.mubr.msk.bf16.gmra.mrb[60].mxu1 %vm499_vm3, %v16997_v34  ;;  %15325 = vmatmul.mubr.msk.bf16.gmra.mrb[88].mxu0 %vm499_vm3, %v13537_v20  ;;  %v13567_v34 = vld [vmem:[%s17223_s17 + $0xaec] sm:$0x3]  ;;  %v13568_v20 = vld [vmem:[%s17223_s17 + $0xb10] sm:$0xc] }
 0x2f7   : > { %15606 = vmatprep.mubr.msk.bf16.mxu1 %vm499_vm3, %v16998_v4  ;;  %15328 = vmatprep.mubr.msk.bf16.mxu0 %vm499_vm3, %v13538_v62  ;;  %v13570_v4 = vld [vmem:[%s17223_s17 + $0xb18] sm:$0x3]  ;;  %v13622_v62 = vcombine.low %v7240_v37, %v7243_v14  ;;  %v7256_v30 = vrot.slane %v13567_v34, 6  ;;  %v13608_v26 = vrot.slane %v13568_v20, 10  ;;  %v13581_v37 = vld [vmem:[%s17223_s17 + $0xbc4] sm:$0xf]  ;;  %v7268_v14 = vsel %vm17216_vm4, %v13609_v5, %v7267_v40 }
 0x2f8   : > { %v7263_v56 = vrot.slane %v13570_v4, 6  ;;  %v13577_v34 = vld [vmem:[%s17223_s17 + $0xb94] sm:$0xc]  ;;  %v13580_v4 = vld [vmem:[%s17223_s17 + $0xbc0] sm:$0xc] }
 0x2f9   : > { %v7257_v36 = vsel %vm17216_vm4, %v7255_v49, %v7256_v30  ;;  %v7261_v46 = vsel %vm17216_vm4, %v13608_v26, %v7260_v0  ;;  %v13579_v0 = vld [vmem:[%s17223_s17 + $0xb9c] sm:$0x3]  ;;  %v17005_v20 = vld [vmem:[%s17223_s17 + $0xd94] sm:$0xff]   ;;  %v13611_v49 = vrot.slane %v13577_v34, 10  ;;  %v7283_v30 = vrot.slane %v7281_v60, 4 }
 0x2fa   : > { %v7264_v18 = vsel %vm17216_vm4, %v7262_v24, %v7263_v56  ;;  %v7284_v26 = vrot.slane %v13579_v0, 6  ;;  %v13584_v24 = vld [vmem:[%s17223_s17 + $0xbf0] sm:$0xf]  ;;  %v13612_v56 = vrot.slane %v13580_v4, 10  ;;  %v13591_v34 = vld [vmem:[%s17223_s17 + $0xc4c] sm:$0x3] }
 0x2fb   : > { %v13625_v55 = vcombine.low %v7261_v46, %v7264_v18  ;;  %v13583_v46 = vld [vmem:[%s17223_s17 + $0xbec] sm:$0xc]  ;;  %v13585_v18 = vld [vmem:[%s17223_s17 + $0xbf4] sm:$0x3]  ;;  %v7309_v0 = vrot.slane %v13590_v53, 6 }
 0x2fc   : > { %v7298_v5 = vrot.slane %v13585_v18, 6  ;;  %v13594_v4 = vld [vmem:[%s17223_s17 + $0xc78] sm:$0x3] }
 0x2fe   : > { %15607 = vmatmul.mubr.msk.bf16.vlgmr.msra.gmra.mrb[32].mxu1 %vm499_vm3, %v16999_v61  ;;  %15329 = vmatmul.mubr.msk.bf16.gmra.mrb[92].mxu0 %vm499_vm3, %v13539_v25  ;;  %v13573_v61 = vld [vmem:[%s17223_s17 + $0xb44] sm:$0x3]  ;;  %v13574_v25 = vld [vmem:[%s17223_s17 + $0xb68] sm:$0xc] }
 0x2ff   : > { %15639 = vmatpush3.bf16.msra.mxu1 %v10863_v43  ;;  %15334 = vmatprep.mubr.msk.bf16.mxu0 %vm499_vm3, %v13621_v13  ;;  %v13576_v43 = vld [vmem:[%s17223_s17 + $0xb70] sm:$0x3]  ;;  %v13624_v13 = vcombine.low %v7254_v19, %v7257_v36  ;;  %v7270_v7 = vrot.slane %v13573_v61, 6  ;;  %v13610_v11 = vrot.slane %v13574_v25, 10  ;;  %v7295_v19 = vrot.slane %v13584_v24, 6 }
 0x300   : > { %15610 = vmatprep.mubr.msk.bf16.mxu1 %vm499_vm3, %v17000_v15  ;;  %16552 = vmatprep.subr.msk.bf16.mxu1 %vm548_vm0, %v20105_v23  ;;  %v7269_v15 = vrot.slane %v7267_v40, 4  ;;  %v7277_v1 = vrot.slane %v13576_v43, 6  ;;  %v7282_v36 = vsel %vm17216_vm4, %v13611_v49, %v7281_v60  ;;  %v7285_v40 = vsel %vm17216_vm4, %v7283_v30, %v7284_v26  ;;  %v13588_v25 = vld [vmem:[%s17223_s17 + $0xc20] sm:$0x3]  ;;  %v17007_v43 = vld [vmem:[%s17223_s17 + $0xdec] sm:$0xff]  }
 0x301   : > { %v7275_v38 = vsel %vm17216_vm4, %v13610_v11, %v7274_v54  ;;  %v7312_v49 = vrot.slane %v13591_v34, 6  ;;  %v17010_v30 = vld [vmem:[%s17223_s17 + $0xe70] sm:$0xff]   ;;  %v7311_v26 = vrot.slane %v7309_v0, 4 }
 0x302   : > { %v7271_v59 = vsel %vm17216_vm4, %v7269_v15, %v7270_v7  ;;  %v7278_v42 = vsel %vm17216_vm4, %v7276_v39, %v7277_v1  ;;  %v17008_v15 = vld [vmem:[%s17223_s17 + $0xe18] sm:$0xff]   ;;  %v7304_v39 = vrot.slane %v7302_v35, 4  ;;  %v7305_v1 = vrot.slane %v13588_v25, 6 }
 0x303   : > { %v13627_v27 = vcombine.low %v7275_v38, %v7278_v42  ;;  %v13589_v42 = vld [vmem:[%s17223_s17 + $0xc44] sm:$0xc]  ;;  %v10655_v25 = vrot.slane %v14078_v63, 6 }
 0x304   : > { %v7306_v38 = vsel %vm17216_vm4, %v7304_v39, %v7305_v1 }
 0x306   : > { %15611 = vmatmul.mubr.msk.bf16.gmra.mrb[36].mxu1 %vm499_vm3, %v17001_v28  ;;  %15335 = vmatmul.mubr.msk.bf16.vlgmr.msra.gmra.mrb[64].mxu0 %vm499_vm3, %v13622_v62  ;;  %v7288_v28 = vrot.slane %v13581_v37, 6  ;;  %v13582_v62 = vld [vmem:[%s17223_s17 + $0xbc8] sm:$0x3]  ;;  %v13593_v37 = vld [vmem:[%s17223_s17 + $0xc74] sm:$0xf] }
 0x307   : > { %15614 = vmatprep.mubr.msk.bf16.mxu1 %vm499_vm3, %v17002_v50  ;;  %15338 = vmatprep.mubr.msk.bf16.mxu0 %vm499_vm3, %v13623_v48  ;;  %v13626_v50 = vcombine.low %v7268_v14, %v7271_v59  ;;  %v17006_v48 = vld [vmem:[%s17223_s17 + $0xdc0] sm:$0xff]  }
 0x308   : > { %15367 = vmatpush3.bf16.msra.mxu0 %v7941_v9  ;;  %v7290_v51 = vrot.slane %v7288_v28, 4  ;;  %v7291_v9 = vrot.slane %v13582_v62, 6  ;;  %v7289_v61 = vsel %vm17216_vm4, %v13612_v56, %v7288_v28  ;;  %v7316_v28 = vrot.slane %v13593_v37, 6  ;;  %v17009_v62 = vld [vmem:[%s17223_s17 + $0xe44] sm:$0xff]  }
 0x309   : > { %v17012_v37 = vld [vmem:[%s17223_s17 + $0xec8] sm:$0xff]  }
 0x30a   : > { %v7292_v54 = vsel %vm17216_vm4, %v7290_v51, %v7291_v9  ;;  %v7318_v56 = vrot.slane %v7316_v28, 4  ;;  %v7319_v51 = vrot.slane %v13594_v4, 6  ;;  %v13596_v9 = vld [vmem:[%s17223_s17 + $0xca0] sm:$0xf]  ;;  %v13603_v4 = vld [vmem:[%s17223_s17 + $0xcfc] sm:$0x3] }
 0x30b   : > { %v13629_v7 = vcombine.low %v7289_v61, %v7292_v54  ;;  %v7323_v18 = vrot.slane %v13596_v9, 6  ;;  %v7340_v9 = vrot.slane %v13603_v4, 6  ;;  %v13656_v4 = vld [vmem:[%s17223_s17 + $0xa98] sm:$0xc] }
 0x30c   : > { %v7320_v54 = vsel %vm17216_vm4, %v7318_v56, %v7319_v51 }
 0x30d   : > { %v7325_v53 = vrot.slane %v7323_v18, 4 }
 0x30e   : > { %15615 = vmatmul.mubr.msk.bf16.gmra.mrb[40].mxu1 %vm499_vm3, %v17003_v44  ;;  %15339 = vmatmul.mubr.msk.bf16.gmra.mrb[68].mxu0 %vm499_vm3, %v13624_v13  ;;  %v13586_v44 = vld [vmem:[%s17223_s17 + $0xc18] sm:$0xc]  ;;  %v13628_v13 = vcombine.low %v7282_v36, %v7285_v40  ;;  %v13595_v40 = vld [vmem:[%s17223_s17 + $0xc9c] sm:$0xc] }
 0x30f   : > { %15618 = vmatprep.mubr.msk.bf16.mxu1 %vm499_vm3, %v17004_v47  ;;  %15342 = vmatprep.mubr.msk.bf16.mxu0 %vm499_vm3, %v13625_v55  ;;  %v13613_v47 = vrot.slane %v13583_v46, 10  ;;  %v7297_v55 = vrot.slane %v7295_v19, 4  ;;  %v13614_v11 = vrot.slane %v13586_v44, 10  ;;  %v13597_v46 = vld [vmem:[%s17223_s17 + $0xca4] sm:$0x3] }
 0x310   : > { %v13598_v44 = vld [vmem:[%s17223_s17 + $0xcc8] sm:$0xc] }
 0x311   : > { %v7296_v14 = vsel %vm17216_vm4, %v13613_v47, %v7295_v19  ;;  %v7299_v59 = vsel %vm17216_vm4, %v7297_v55, %v7298_v5  ;;  %v7303_v60 = vsel %vm17216_vm4, %v13614_v11, %v7302_v35  ;;  %v13599_v19 = vld [vmem:[%s17223_s17 + $0xccc] sm:$0xf]  ;;  %v7313_v35 = vsel %vm17216_vm4, %v7311_v26, %v7312_v49  ;;  %v14077_v47 = vld [vmem:[%s17223_s17 + $0xc70] sm:$0xc]  ;;  %v14079_v55 = vld [vmem:[%s17223_s17 + $0xc78] sm:$0x3] }
 0x312   : > { %v13617_v5 = vrot.slane %v13595_v40, 10  ;;  %v13602_v11 = vld [vmem:[%s17223_s17 + $0xcf8] sm:$0xf]  ;;  %v10658_v34 = vrot.slane %v14079_v55, 6  ;;  %v13655_v40 = vld [vmem:[%s17223_s17 + $0xa74] sm:$0x3] }
 0x314   : > { %v7324_v49 = vsel %vm17216_vm4, %v13617_v5, %v7323_v18 }
 0x316   : > { %15619 = vmatmul.mubr.msk.bf16.gmra.mrb[44].mxu1 %vm499_vm3, %v17005_v20  ;;  %15343 = vmatmul.mubr.msk.bf16.gmra.mrb[72].mxu0 %vm499_vm3, %v13626_v50  ;;  %v13592_v20 = vld [vmem:[%s17223_s17 + $0xc70] sm:$0xc]  ;;  %v13630_v50 = vcombine.low %v7296_v14, %v7299_v59  ;;  %v13601_v14 = vld [vmem:[%s17223_s17 + $0xcf4] sm:$0xc]  ;;  %v14081_v59 = vld [vmem:[%s17223_s17 + $0xca0] sm:$0xf] }
 0x317   : > { %15622 = vmatprep.mubr.msk.bf16.mxu1 %vm499_vm3, %v17006_v48  ;;  %15346 = vmatprep.mubr.msk.bf16.mxu0 %vm499_vm3, %v13627_v27  ;;  %v13631_v48 = vcombine.low %v7303_v60, %v7306_v38  ;;  %v13615_v27 = vrot.slane %v13589_v42, 10  ;;  %v13616_v24 = vrot.slane %v13592_v20, 10  ;;  %v13618_v60 = vrot.slane %v13598_v44, 10 }
 0x318   : > { %v14125_v38 = vrot.slane %v14077_v47, 10  ;;  %v10657_v42 = vrot.slane %v10655_v25, 4  ;;  %v13619_v26 = vrot.slane %v13601_v14, 10  ;;  %v14083_v47 = vld [vmem:[%s17223_s17 + $0xcc8] sm:$0xc] }
 0x319   : > { %v7310_v36 = vsel %vm17216_vm4, %v13615_v27, %v7309_v0  ;;  %v7317_v61 = vsel %vm17216_vm4, %v13616_v24, %v7316_v28  ;;  %v13654_v0 = vld [vmem:[%s17223_s17 + $0xa70] sm:$0xf]  ;;  %v14084_v27 = vld [vmem:[%s17223_s17 + $0xccc] sm:$0xf]  ;;  %v14082_v24 = vld [vmem:[%s17223_s17 + $0xca4] sm:$0x3] }
 0x31a   : > { %v13632_v39 = vcombine.low %v7310_v36, %v7313_v35  ;;  %v13633_v1 = vcombine.low %v7317_v61, %v7320_v54  ;;  %v7733_v56 = vrot.slane %v13654_v0, 6  ;;  %v10656_v63 = vsel %vm17216_vm4, %v14125_v38, %v10655_v25  ;;  %v13653_v36 = vld [vmem:[%s17223_s17 + $0xa6c] sm:$0xc]  ;;  %v14085_v25 = vld [vmem:[%s17223_s17 + $0xcd0] sm:$0x3] }
 0x31b   : > { %v10669_v54 = vrot.slane %v14084_v27, 6  ;;  %v13701_v5 = vrot.slane %v13653_v36, 10  ;;  %v14127_v14 = vrot.slane %v14083_v47, 10  ;;  %v14090_v38 = vld [vmem:[%s17223_s17 + $0xd24] sm:$0xf] }
 0x31c   : > { %v13660_v0 = vld [vmem:[%s17223_s17 + $0xac8] sm:$0xf] }
 0x31e   : > { %15623 = vmatmul.mubr.msk.bf16.gmra.mrb[48].mxu1 %vm499_vm3, %v17007_v43  ;;  %15347 = vmatmul.mubr.msk.bf16.gmra.mrb[76].mxu0 %vm499_vm3, %v13628_v13  ;;  %v17011_v43 = vld [vmem:[%s17223_s17 + $0xe9c] sm:$0xff]   ;;  %v7330_v13 = vrot.slane %v13599_v19, 6  ;;  %v10659_v19 = vsel %vm17216_vm4, %v10657_v42, %v10658_v34 }
 0x31f   : > { %15626 = vmatprep.mubr.msk.bf16.mxu1 %vm499_vm3, %v17008_v15  ;;  %15350 = vmatprep.mubr.msk.bf16.mxu0 %vm499_vm3, %v13629_v7  ;;  %v7326_v15 = vrot.slane %v13597_v46, 6  ;;  %v13600_v7 = vld [vmem:[%s17223_s17 + $0xcd0] sm:$0x3]  ;;  %v17013_v46 = vld [vmem:[%s17223_s17 + $0xef4] sm:$0xff]   ;;  %v14142_v55 = vcombine.low %v10656_v63, %v10659_v19  ;;  %v14089_v63 = vld [vmem:[%s17223_s17 + $0xd20] sm:$0xc] }
 0x320   : > { %v7332_v28 = vrot.slane %v7330_v13, 4  ;;  %v7333_v20 = vrot.slane %v13600_v7, 6  ;;  %v7331_v51 = vsel %vm17216_vm4, %v13618_v60, %v7330_v13  ;;  %v10665_v13 = vrot.slane %v14082_v24, 6  ;;  %v14091_v19 = vld [vmem:[%s17223_s17 + $0xd28] sm:$0x3] }
 0x321   : > { %v7736_v7 = vrot.slane %v13655_v40, 6  ;;  %v10672_v60 = vrot.slane %v14085_v25, 6  ;;  %v11220_v24 = vsel %vm548_vm0, %v20105_v23, 0  ;;  %v14129_v25 = vrot.slane %v14089_v63, 10 }
 0x322   : > { %v7334_v18 = vsel %vm17216_vm4, %v7332_v28, %v7333_v20  ;;  %v7734_v28 = vsel %vm17216_vm4, %v13701_v5, %v7733_v56  ;;  %v10686_v5 = vrot.slane %v14091_v19, 6 }
 0x326   : > { %15627 = vmatmul.mubr.msk.bf16.gmra.mrb[52].mxu1 %vm499_vm3, %v17009_v62  ;;  %15351 = vmatmul.mubr.msk.bf16.gmra.mrb[80].mxu0 %vm499_vm3, %v13630_v50  ;;  %v7337_v62 = vrot.slane %v13602_v11, 6  ;;  %v14080_v50 = vld [vmem:[%s17223_s17 + $0xc9c] sm:$0xc]  ;;  %v13635_v11 = vcombine.low %v7331_v51, %v7334_v18 }
 0x327   : > { %15630 = vmatprep.mubr.msk.bf16.mxu1 %vm499_vm3, %v17010_v30  ;;  %15354 = vmatprep.mubr.msk.bf16.mxu0 %vm499_vm3, %v13631_v48  ;;  %v10662_v48 = vrot.slane %v14081_v59, 6  ;;  %v7327_v30 = vsel %vm17216_vm4, %v7325_v53, %v7326_v15  ;;  %v14126_v61 = vrot.slane %v14080_v50, 10  ;;  %v7735_v15 = vrot.slane %v7733_v56, 4  ;;  %v14087_v53 = vld [vmem:[%s17223_s17 + $0xcf8] sm:$0xf] }
 0x328   : > { %v7339_v35 = vrot.slane %v7337_v62, 4  ;;  %v13634_v44 = vcombine.low %v7324_v49, %v7327_v30  ;;  %v10671_v59 = vrot.slane %v10669_v54, 4  ;;  %v14086_v49 = vld [vmem:[%s17223_s17 + $0xcf4] sm:$0xc]  ;;  %v14088_v30 = vld [vmem:[%s17223_s17 + $0xcfc] sm:$0x3]  ;;  %v10670_v56 = vsel %vm17216_vm4, %v14127_v14, %v10669_v54 }
 0x329   : > { %v10663_v42 = vsel %vm17216_vm4, %v14126_v61, %v10662_v48  ;;  %v7737_v20 = vsel %vm17216_vm4, %v7735_v15, %v7736_v7  ;;  %v13661_v61 = vld [vmem:[%s17223_s17 + $0xacc] sm:$0x3]  ;;  %v14128_v23 = vrot.slane %v14086_v49, 10  ;;  %v10679_v54 = vrot.slane %v14088_v30, 6  ;;  %v14093_v15 = vld [vmem:[%s17223_s17 + $0xd50] sm:$0xf] }
 0x32a   : > { %v10673_v51 = vsel %vm17216_vm4, %v10671_v59, %v10672_v60  ;;  %v13718_v40 = vcombine.low %v7734_v28, %v7737_v20  ;;  %v13666_v59 = vld [vmem:[%s17223_s17 + $0xb20] sm:$0xf] }
 0x32b   : > { %v14144_v47 = vcombine.low %v10670_v56, %v10673_v51  ;;  %v7761_v30 = vrot.slane %v13666_v59, 6  ;;  %v14097_v56 = vld [vmem:[%s17223_s17 + $0xd80] sm:$0x3]  ;;  %v13670_v59 = vld [vmem:[%s17223_s17 + $0xb50] sm:$0x3] }
 0x32e   : > { %15631 = vmatmul.mubr.msk.bf16.gmra.mrb[56].mxu1 %vm499_vm3, %v17011_v43  ;;  %15355 = vmatmul.mubr.msk.bf16.gmra.mrb[84].mxu0 %vm499_vm3, %v13632_v39  ;;  %v10664_v43 = vrot.slane %v10662_v48, 4  ;;  %v7338_v39 = vsel %vm17216_vm4, %v13619_v26, %v7337_v62  ;;  %v13658_v62 = vld [vmem:[%s17223_s17 + $0xaa0] sm:$0x3]  ;;  %v10676_v48 = vrot.slane %v14087_v53, 6  ;;  %v10683_v26 = vrot.slane %v14090_v38, 6 }
 0x32f   : > { %15634 = vmatprep.mubr.msk.bf16.mxu1 %vm499_vm3, %v17012_v37  ;;  %15358 = vmatprep.mubr.msk.bf16.mxu0 %vm499_vm3, %v13633_v1  ;;  %v13657_v1 = vld [vmem:[%s17223_s17 + $0xa9c] sm:$0xf]  ;;  %v7341_v37 = vsel %vm17216_vm4, %v7339_v35, %v7340_v9  ;;  %v7747_v9 = vrot.slane %v13660_v0, 6  ;;  %v7743_v18 = vrot.slane %v13658_v62, 6  ;;  %v13659_v35 = vld [vmem:[%s17223_s17 + $0xac4] sm:$0xc] }
 0x330   : > { %v10666_v34 = vsel %vm17216_vm4, %v10664_v43, %v10665_v13  ;;  %v7740_v50 = vrot.slane %v13657_v1, 6  ;;  %v13636_v27 = vcombine.low %v7338_v39, %v7341_v37  ;;  %v10678_v43 = vrot.slane %v10676_v48, 4  ;;  %v13663_v13 = vld [vmem:[%s17223_s17 + $0xaf4] sm:$0xf]  ;;  %v14096_v1 = vld [vmem:[%s17223_s17 + $0xd7c] sm:$0xf] }
 0x331   : > { %v14143_v36 = vcombine.low %v10663_v42, %v10666_v34  ;;  %v13703_v7 = vrot.slane %v13659_v35, 10  ;;  %v7750_v39 = vrot.slane %v13661_v61, 6  ;;  %v13662_v37 = vld [vmem:[%s17223_s17 + $0xaf0] sm:$0xc]  ;;  %v7754_v14 = vrot.slane %v13663_v13, 6 }
 0x332   : > { %v10677_v38 = vsel %vm17216_vm4, %v14128_v23, %v10676_v48  ;;  %v10680_v42 = vsel %vm17216_vm4, %v10678_v43, %v10679_v54  ;;  %v13664_v34 = vld [vmem:[%s17223_s17 + $0xaf8] sm:$0x3]  ;;  %v10690_v0 = vrot.slane %v14093_v15, 6  ;;  %v10684_v28 = vsel %vm17216_vm4, %v14129_v25, %v10683_v26  ;;  %v14094_v62 = vld [vmem:[%s17223_s17 + $0xd54] sm:$0x3] }
 0x333   : > { %v7748_v48 = vsel %vm17216_vm4, %v13703_v7, %v7747_v9  ;;  %v13704_v49 = vrot.slane %v13662_v37, 10  ;;  %v14145_v51 = vcombine.low %v10677_v38, %v10680_v42  ;;  %v7756_v63 = vrot.slane %v7754_v14, 4  ;;  %v13669_v61 = vld [vmem:[%s17223_s17 + $0xb4c] sm:$0xf]  ;;  %v14099_v13 = vld [vmem:[%s17223_s17 + $0xda8] sm:$0xf] }
 0x334   : > { %v7757_v19 = vrot.slane %v13664_v34, 6  ;;  %v10693_v35 = vrot.slane %v14094_v62, 6  ;;  %v10700_v54 = vrot.slane %v14097_v56, 6  ;;  %v7763_v25 = vrot.slane %v7761_v30, 4  ;;  %v13668_v7 = vld [vmem:[%s17223_s17 + $0xb48] sm:$0xc] }
 0x335   : > { %v7755_v15 = vsel %vm17216_vm4, %v13704_v49, %v7754_v14  ;;  %v10704_v14 = vrot.slane %v14099_v13, 6  ;;  %v14098_v42 = vld [vmem:[%s17223_s17 + $0xda4] sm:$0xc]  ;;  %v14100_v34 = vld [vmem:[%s17223_s17 + $0xdac] sm:$0x3]  ;;  %v7771_v56 = vrot.slane %v13670_v59, 6 }
 0x336   : > { %15635 = vmatmul.mubr.msk.bf16.gmra.mrb[60].mxu1 %vm499_vm3, %v17013_v46  ;;  %15359 = vmatmul.mubr.msk.bf16.gmra.mrb[88].mxu0 %vm499_vm3, %v13634_v44  ;;  %v13702_v46 = vrot.slane %v13656_v4, 10  ;;  %v7742_v44 = vrot.slane %v7740_v50, 4  ;;  %v14092_v4 = vld [vmem:[%s17223_s17 + $0xd4c] sm:$0xc]  ;;  %v14106_v59 = vld [vmem:[%s17223_s17 + $0xe04] sm:$0x3] }
 0x337   : > { %15640 = vmatprep.mubr.msk.bf16.mxu1 %vm499_vm3, %v14142_v55  ;;  %15362 = vmatprep.mubr.msk.bf16.mxu0 %vm499_vm3, %v13635_v11  ;;  %v10685_v55 = vrot.slane %v10683_v26, 4  ;;  %v7749_v11 = vrot.slane %v7747_v9, 4  ;;  %v10692_v9 = vrot.slane %v10690_v0, 4 }
 0x338   : > { %v7741_v53 = vsel %vm17216_vm4, %v13702_v46, %v7740_v50  ;;  %v7744_v60 = vsel %vm17216_vm4, %v7742_v44, %v7743_v18  ;;  %v10697_v50 = vrot.slane %v14096_v1, 6  ;;  %v14130_v18 = vrot.slane %v14092_v4, 10 }
 0x339   : > { %v10687_v20 = vsel %vm17216_vm4, %v10685_v55, %v10686_v5  ;;  %v13719_v26 = vcombine.low %v7741_v53, %v7744_v60  ;;  %v14102_v5 = vld [vmem:[%s17223_s17 + $0xdd4] sm:$0xf]  ;;  %v7758_v1 = vsel %vm17216_vm4, %v7756_v63, %v7757_v19  ;;  %v10694_v37 = vsel %vm17216_vm4, %v10692_v9, %v10693_v35 }
 0x33a   : > { %v14146_v46 = vcombine.low %v10684_v28, %v10687_v20  ;;  %v10699_v43 = vrot.slane %v10697_v50, 4  ;;  %v10691_v53 = vsel %vm17216_vm4, %v14130_v18, %v10690_v0  ;;  %v10711_v28 = vrot.slane %v14102_v5, 6 }
 0x33b   : > { %v13706_v4 = vrot.slane %v13668_v7, 10  ;;  %v14147_v49 = vcombine.low %v10691_v53, %v10694_v37  ;;  %v14132_v19 = vrot.slane %v14098_v42, 10  ;;  %v14104_v37 = vld [vmem:[%s17223_s17 + $0xdfc] sm:$0xc] }
 0x33c   : > { %v10701_v38 = vsel %vm17216_vm4, %v10699_v43, %v10700_v54  ;;  %v10713_v9 = vrot.slane %v10711_v28, 4  ;;  %v14108_v54 = vld [vmem:[%s17223_s17 + $0xe2c] sm:$0xf] }
 0x33e   : > { %15641 = vmatmul.mubr.msk.bf16.vlgmr.msra.gmra.mrb[32].mxu1 %vm499_vm3, %v14143_v36  ;;  %15363 = vmatmul.mubr.msk.bf16.gmra.mrb[92].mxu0 %vm499_vm3, %v13636_v27  ;;  %v7751_v27 = vsel %vm17216_vm4, %v7749_v11, %v7750_v39  ;;  %v13665_v36 = vld [vmem:[%s17223_s17 + $0xb1c] sm:$0xc]  ;;  %v7768_v11 = vrot.slane %v13669_v61, 6  ;;  %v13672_v39 = vld [vmem:[%s17223_s17 + $0xb78] sm:$0xf] }
 0x33f   : > { %15673 = vmatpush3.bf16.msra.mxu1 %v11220_v24  ;;  %15368 = vmatprep.mubr.msk.bf16.mxu0 %vm499_vm3, %v13718_v40  ;;  %v14095_v24 = vld [vmem:[%s17223_s17 + $0xd78] sm:$0xc]  ;;  %v13667_v40 = vld [vmem:[%s17223_s17 + $0xb24] sm:$0x3]  ;;  %v13720_v44 = vcombine.low %v7748_v48, %v7751_v27  ;;  %v7775_v62 = vrot.slane %v13672_v39, 6 }
 0x340   : > { %15644 = vmatprep.mubr.msk.bf16.mxu1 %vm499_vm3, %v14144_v47  ;;  %v14131_v23 = vrot.slane %v14095_v24, 10  ;;  %v13705_v47 = vrot.slane %v13665_v36, 10  ;;  %v7764_v55 = vrot.slane %v13667_v40, 6  ;;  %v14101_v48 = vld [vmem:[%s17223_s17 + $0xdd0] sm:$0xc]  ;;  %v7770_v24 = vrot.slane %v7768_v11, 4 }
 0x341   : > { %v14103_v27 = vld [vmem:[%s17223_s17 + $0xdd8] sm:$0x3]  ;;  %v10707_v36 = vrot.slane %v14100_v34, 6  ;;  %v13675_v40 = vld [vmem:[%s17223_s17 + $0xba4] sm:$0xf]  ;;  %v14133_v18 = vrot.slane %v14101_v48, 10  ;;  %v7769_v13 = vsel %vm17216_vm4, %v13706_v4, %v7768_v11 }
 0x342   : > { %v10698_v60 = vsel %vm17216_vm4, %v14131_v23, %v10697_v50  ;;  %v7762_v0 = vsel %vm17216_vm4, %v13705_v47, %v7761_v30  ;;  %v7765_v20 = vsel %vm17216_vm4, %v7763_v25, %v7764_v55  ;;  %v13721_v50 = vcombine.low %v7755_v15, %v7758_v1  ;;  %v14105_v61 = vld [vmem:[%s17223_s17 + $0xe00] sm:$0xf]  ;;  %v13678_v55 = vld [vmem:[%s17223_s17 + $0xbd0] sm:$0xf]  ;;  %v13676_v39 = vld [vmem:[%s17223_s17 + $0xba8] sm:$0x3] }
 0x343   : > { %v14148_v63 = vcombine.low %v10698_v60, %v10701_v38  ;;  %v10706_v30 = vrot.slane %v10704_v14, 4  ;;  %v10714_v35 = vrot.slane %v14103_v27, 6  ;;  %v7777_v23 = vrot.slane %v7775_v62, 4  ;;  %v13674_v47 = vld [vmem:[%s17223_s17 + $0xba0] sm:$0xc] }
 0x344   : > { %v7782_v25 = vrot.slane %v13675_v40, 6  ;;  %v7772_v5 = vsel %vm17216_vm4, %v7770_v24, %v7771_v56  ;;  %v10705_v15 = vsel %vm17216_vm4, %v14132_v19, %v10704_v14  ;;  %v10718_v11 = vrot.slane %v14105_v61, 6  ;;  %v14111_v40 = vld [vmem:[%s17223_s17 + $0xe58] sm:$0xf] }
 0x345   : > { %v10708_v7 = vsel %vm17216_vm4, %v10706_v30, %v10707_v36  ;;  %v10712_v1 = vsel %vm17216_vm4, %v14133_v18, %v10711_v28  ;;  %v10715_v53 = vsel %vm17216_vm4, %v10713_v9, %v10714_v35  ;;  %v10725_v60 = vrot.slane %v14108_v54, 6  ;;  %v14114_v35 = vld [vmem:[%s17223_s17 + $0xe84] sm:$0xf] }
 0x346   : > { %15645 = vmatmul.mubr.msk.bf16.gmra.mrb[36].mxu1 %vm499_vm3, %v14145_v51  ;;  %15369 = vmatmul.mubr.msk.bf16.vlgmr.msra.gmra.mrb[64].mxu0 %vm499_vm3, %v13719_v26  ;;  %v13671_v26 = vld [vmem:[%s17223_s17 + $0xb74] sm:$0xc]  ;;  %v13673_v51 = vld [vmem:[%s17223_s17 + $0xb7c] sm:$0x3]  ;;  %v13708_v42 = vrot.slane %v13674_v47, 10  ;;  %v7789_v34 = vrot.slane %v13678_v55, 6  ;;  %v13723_v28 = vcombine.low %v7769_v13, %v7772_v5  ;;  %v14149_v4 = vcombine.low %v10705_v15, %v10708_v7 }
 0x347   : > { %15648 = vmatprep.mubr.msk.bf16.mxu1 %vm499_vm3, %v14146_v46  ;;  %15372 = vmatprep.mubr.msk.bf16.mxu0 %vm499_vm3, %v13720_v44  ;;  %v13722_v46 = vcombine.low %v7762_v0, %v7765_v20  ;;  %v13707_v44 = vrot.slane %v13671_v26, 10  ;;  %v7778_v43 = vrot.slane %v13673_v51, 6  ;;  %v14107_v0 = vld [vmem:[%s17223_s17 + $0xe28] sm:$0xc]  ;;  %v14109_v20 = vld [vmem:[%s17223_s17 + $0xe30] sm:$0x3]  ;;  %v14150_v24 = vcombine.low %v10712_v1, %v10715_v53 }
 0x348   : > { %v7784_v48 = vrot.slane %v7782_v25, 4  ;;  %v7785_v27 = vrot.slane %v13676_v39, 6  ;;  %v14134_v56 = vrot.slane %v14104_v37, 10  ;;  %v10721_v26 = vrot.slane %v14106_v59, 6  ;;  %v13681_v51 = vld [vmem:[%s17223_s17 + $0xbfc] sm:$0xf] }
 0x349   : > { %v7776_v14 = vsel %vm17216_vm4, %v13707_v44, %v7775_v62  ;;  %v7779_v38 = vsel %vm17216_vm4, %v7777_v23, %v7778_v43  ;;  %v10720_v62 = vrot.slane %v10718_v11, 4  ;;  %v14135_v19 = vrot.slane %v14107_v0, 10  ;;  %v13680_v44 = vld [vmem:[%s17223_s17 + $0xbf8] sm:$0xc]  ;;  %v13684_v43 = vld [vmem:[%s17223_s17 + $0xc28] sm:$0xf] }
 0x34a   : > { %v10727_v30 = vrot.slane %v10725_v60, 4  ;;  %v10728_v36 = vrot.slane %v14109_v20, 6  ;;  %v7791_v18 = vrot.slane %v7789_v34, 4  ;;  %v7783_v61 = vsel %vm17216_vm4, %v13708_v42, %v7782_v25  ;;  %v13682_v55 = vld [vmem:[%s17223_s17 + $0xc00] sm:$0x3] }
 0x34b   : > { %v7796_v23 = vrot.slane %v13681_v51, 6  ;;  %v7786_v54 = vsel %vm17216_vm4, %v7784_v48, %v7785_v27  ;;  %v10719_v13 = vsel %vm17216_vm4, %v14134_v56, %v10718_v11  ;;  %v10722_v47 = vsel %vm17216_vm4, %v10720_v62, %v10721_v26  ;;  %v14110_v7 = vld [vmem:[%s17223_s17 + $0xe54] sm:$0xc]  ;;  %v14112_v39 = vld [vmem:[%s17223_s17 + $0xe5c] sm:$0x3] }
 0x34c   : > { %v10732_v25 = vrot.slane %v14111_v40, 6  ;;  %v10726_v5 = vsel %vm17216_vm4, %v14135_v19, %v10725_v60  ;;  %v10729_v15 = vsel %vm17216_vm4, %v10727_v30, %v10728_v36  ;;  %v10739_v1 = vrot.slane %v14114_v35, 6  ;;  %v14117_v51 = vld [vmem:[%s17223_s17 + $0xeb0] sm:$0xf]  ;;  %v14120_v36 = vld [vmem:[%s17223_s17 + $0xedc] sm:$0xf] }
 0x34d   : > { %v13710_v37 = vrot.slane %v13680_v44, 10  ;;  %v7803_v59 = vrot.slane %v13684_v43, 6  ;;  %v13725_v60 = vcombine.low %v7783_v61, %v7786_v54  ;;  %v14151_v42 = vcombine.low %v10719_v13, %v10722_v47  ;;  %v13688_v43 = vld [vmem:[%s17223_s17 + $0xc58] sm:$0x3]  ;;  %v14116_v47 = vld [vmem:[%s17223_s17 + $0xeac] sm:$0xc] }
 0x34e   : > { %15649 = vmatmul.mubr.msk.bf16.gmra.mrb[40].mxu1 %vm499_vm3, %v14147_v49  ;;  %15373 = vmatmul.mubr.msk.bf16.gmra.mrb[68].mxu0 %vm499_vm3, %v13721_v50  ;;  %v13677_v50 = vld [vmem:[%s17223_s17 + $0xbcc] sm:$0xc]  ;;  %v13679_v49 = vld [vmem:[%s17223_s17 + $0xbd4] sm:$0x3]  ;;  %v7798_v0 = vrot.slane %v7796_v23, 4  ;;  %v7799_v20 = vrot.slane %v13682_v55, 6  ;;  %v14152_v48 = vcombine.low %v10726_v5, %v10729_v15 }
 0x34f   : > { %15652 = vmatprep.mubr.msk.bf16.mxu1 %vm499_vm3, %v14148_v63  ;;  %15376 = vmatprep.mubr.msk.bf16.mxu0 %vm499_vm3, %v13722_v46  ;;  %v13724_v63 = vcombine.low %v7776_v14, %v7779_v38  ;;  %v13709_v46 = vrot.slane %v13677_v50, 10  ;;  %v7792_v9 = vrot.slane %v13679_v49, 6  ;;  %v14113_v14 = vld [vmem:[%s17223_s17 + $0xe80] sm:$0xc]  ;;  %v14115_v38 = vld [vmem:[%s17223_s17 + $0xe88] sm:$0x3]  ;;  %v7797_v40 = vsel %vm17216_vm4, %v13710_v37, %v7796_v23 }
 0x350   : > { %v14136_v27 = vrot.slane %v14110_v7, 10  ;;  %v10735_v50 = vrot.slane %v14112_v39, 6  ;;  %v13687_v49 = vld [vmem:[%s17223_s17 + $0xc54] sm:$0xf]  ;;  %v14137_v56 = vrot.slane %v14113_v14, 10  ;;  %v10741_v62 = vrot.slane %v10739_v1, 4 }
 0x351   : > { %v7790_v11 = vsel %vm17216_vm4, %v13709_v46, %v7789_v34  ;;  %v7793_v53 = vsel %vm17216_vm4, %v7791_v18, %v7792_v9  ;;  %v10734_v34 = vrot.slane %v10732_v25, 4  ;;  %v10742_v26 = vrot.slane %v14115_v38, 6  ;;  %v13686_v46 = vld [vmem:[%s17223_s17 + $0xc50] sm:$0xc]  ;;  %v13690_v9 = vld [vmem:[%s17223_s17 + $0xc80] sm:$0xf] }
 0x352   : > { %v7805_v19 = vrot.slane %v7803_v59, 4  ;;  %v7810_v18 = vrot.slane %v13687_v49, 6  ;;  %v7800_v35 = vsel %vm17216_vm4, %v7798_v0, %v7799_v20  ;;  %v10733_v61 = vsel %vm17216_vm4, %v14136_v27, %v10732_v25  ;;  %v14118_v55 = vld [vmem:[%s17223_s17 + $0xeb4] sm:$0x3] }
 0x353   : > { %v10736_v44 = vsel %vm17216_vm4, %v10734_v34, %v10735_v50  ;;  %v10746_v23 = vrot.slane %v14117_v51, 6  ;;  %v10740_v54 = vsel %vm17216_vm4, %v14137_v56, %v10739_v1  ;;  %v10743_v13 = vsel %vm17216_vm4, %v10741_v62, %v10742_v26  ;;  %v14123_v50 = vld [vmem:[%s17223_s17 + $0xf08] sm:$0xf]  ;;  %v13693_v62 = vld [vmem:[%s17223_s17 + $0xcac] sm:$0xf] }
 0x354   : > { %v10753_v5 = vrot.slane %v14120_v36, 6  ;;  %v13712_v7 = vrot.slane %v13686_v46, 10  ;;  %v7817_v39 = vrot.slane %v13690_v9, 6  ;;  %v13727_v37 = vcombine.low %v7797_v40, %v7800_v35  ;;  %v13696_v51 = vld [vmem:[%s17223_s17 + $0xcd8] sm:$0xf] }
 0x355   : > { %v14153_v1 = vcombine.low %v10733_v61, %v10736_v44  ;;  %v7812_v14 = vrot.slane %v7810_v18, 4  ;;  %v7813_v38 = vrot.slane %v13688_v43, 6  ;;  %v14154_v0 = vcombine.low %v10740_v54, %v10743_v13  ;;  %v14122_v9 = vld [vmem:[%s17223_s17 + $0xf04] sm:$0xc]  ;;  %v14124_v35 = vld [vmem:[%s17223_s17 + $0xf0c] sm:$0x3] }
 0x356   : > { %15653 = vmatmul.mubr.msk.bf16.gmra.mrb[44].mxu1 %vm499_vm3, %v14149_v4  ;;  %15377 = vmatmul.mubr.msk.bf16.gmra.mrb[72].mxu0 %vm499_vm3, %v13723_v28  ;;  %v13683_v28 = vld [vmem:[%s17223_s17 + $0xc24] sm:$0xc]  ;;  %v13685_v4 = vld [vmem:[%s17223_s17 + $0xc2c] sm:$0x3]  ;;  %v14138_v20 = vrot.slane %v14116_v47, 10  ;;  %v10755_v27 = vrot.slane %v10753_v5, 4  ;;  %v7811_v26 = vsel %vm17216_vm4, %v13712_v7, %v7810_v18 }
 0x357   : > { %15656 = vmatprep.mubr.msk.bf16.mxu1 %vm499_vm3, %v14150_v24  ;;  %15380 = vmatprep.mubr.msk.bf16.mxu0 %vm499_vm3, %v13724_v63  ;;  %v13726_v24 = vcombine.low %v7790_v11, %v7793_v53  ;;  %v13711_v63 = vrot.slane %v13683_v28, 10  ;;  %v7806_v30 = vrot.slane %v13685_v4, 6  ;;  %v14119_v11 = vld [vmem:[%s17223_s17 + $0xed8] sm:$0xc]  ;;  %v14121_v53 = vld [vmem:[%s17223_s17 + $0xee0] sm:$0x3] }
 0x358   : > { %v10748_v28 = vrot.slane %v10746_v23, 4  ;;  %v10756_v34 = vrot.slane %v14121_v53, 6  ;;  %v10760_v36 = vrot.slane %v14123_v50, 6  ;;  %v7824_v40 = vrot.slane %v13693_v62, 6  ;;  %v13692_v43 = vld [vmem:[%s17223_s17 + $0xca8] sm:$0xc] }
 0x359   : > { %v7804_v25 = vsel %vm17216_vm4, %v13711_v63, %v7803_v59  ;;  %v7807_v15 = vsel %vm17216_vm4, %v7805_v19, %v7806_v30  ;;  %v10749_v59 = vrot.slane %v14118_v55, 6  ;;  %v7814_v63 = vsel %vm17216_vm4, %v7812_v14, %v7813_v38  ;;  %v13695_v55 = vld [vmem:[%s17223_s17 + $0xcd4] sm:$0xc]  ;;  %v13700_v50 = vld [vmem:[%s17223_s17 + $0xd08] sm:$0x3] }
 0x35a   : > { %v13728_v4 = vcombine.low %v7804_v25, %v7807_v15  ;;  %v10747_v19 = vsel %vm17216_vm4, %v14138_v20, %v10746_v23  ;;  %v10757_v18 = vsel %vm17216_vm4, %v10755_v27, %v10756_v34  ;;  %v13694_v23 = vld [vmem:[%s17223_s17 + $0xcb0] sm:$0x3]  ;;  %v7831_v54 = vrot.slane %v13696_v51, 6  ;;  %v13697_v25 = vld [vmem:[%s17223_s17 + $0xcdc] sm:$0x3] }
 0x35b   : > { %v10750_v30 = vsel %vm17216_vm4, %v10748_v28, %v10749_v59  ;;  %v13729_v13 = vcombine.low %v7811_v26, %v7814_v63  ;;  %v14140_v15 = vrot.slane %v14122_v9, 10  ;;  %v10762_v7 = vrot.slane %v10760_v36, 4  ;;  %v13698_v34 = vld [vmem:[%s17223_s17 + $0xd00] sm:$0xc]  ;;  %v17018_v9 = vld [vmem:[%s17223_s17 + $0xd34] sm:$0xff]  }
 0x35c   : > { %v14155_v47 = vcombine.low %v10747_v19, %v10750_v30  ;;  %v7827_v14 = vrot.slane %v13694_v23, 6  ;;  %v7833_v38 = vrot.slane %v7831_v54, 4  ;;  %v13716_v26 = vrot.slane %v13698_v34, 10  ;;  %v17024_v23 = vld [vmem:[%s17223_s17 + $0xe3c] sm:$0xff]  }
 0x35d   : > { %v7841_v63 = vrot.slane %v13700_v50, 6  ;;  %v17033_v50 = vld [vmem:[%s20988_s3 + $0x18] sm:$0xff]  }
 0x35e   : > { %15657 = vmatmul.mubr.msk.bf16.gmra.mrb[48].mxu1 %vm499_vm3, %v14151_v42  ;;  %15381 = vmatmul.mubr.msk.bf16.gmra.mrb[76].mxu0 %vm499_vm3, %v13725_v60  ;;  %v13689_v60 = vld [vmem:[%s17223_s17 + $0xc7c] sm:$0xc]  ;;  %v13691_v42 = vld [vmem:[%s17223_s17 + $0xc84] sm:$0x3] }
 0x35f   : > { %15660 = vmatprep.mubr.msk.bf16.mxu1 %vm499_vm3, %v14152_v48  ;;  %15384 = vmatprep.mubr.msk.bf16.mxu0 %vm499_vm3, %v13726_v24  ;;  %v14139_v48 = vrot.slane %v14119_v11, 10  ;;  %v13713_v49 = vrot.slane %v13689_v60, 10  ;;  %v7819_v24 = vrot.slane %v7817_v39, 4  ;;  %v7820_v56 = vrot.slane %v13691_v42, 6  ;;  %v13699_v42 = vld [vmem:[%s17223_s17 + $0xd04] sm:$0xf] }
 0x360   : > { %v10763_v11 = vrot.slane %v14124_v35, 6  ;;  %v7834_v60 = vrot.slane %v13697_v25, 6  ;;  %v17020_v35 = vld [vmem:[%s17223_s17 + $0xd8c] sm:$0xff]   ;;  %v17029_v25 = vld [vmem:[%s17223_s17 + $0xf18] sm:$0xff]  }
 0x361   : > { %v10754_v46 = vsel %vm17216_vm4, %v14139_v48, %v10753_v5  ;;  %v7818_v61 = vsel %vm17216_vm4, %v13713_v49, %v7817_v39  ;;  %v7821_v44 = vsel %vm17216_vm4, %v7819_v24, %v7820_v56  ;;  %v13715_v39 = vrot.slane %v13695_v55, 10  ;;  %v17014_v56 = vld [vmem:[%s17223_s17 + $0xc84] sm:$0xff]   ;;  %v17028_v55 = vld [vmem:[%s17223_s17 + $0xeec] sm:$0xff]  }
 0x362   : > { %v14156_v5 = vcombine.low %v10754_v46, %v10757_v18  ;;  %v13730_v53 = vcombine.low %v7818_v61, %v7821_v44  ;;  %v10764_v20 = vsel %vm17216_vm4, %v10762_v7, %v10763_v11  ;;  %v7835_v27 = vsel %vm17216_vm4, %v7833_v38, %v7834_v60  ;;  %v17016_v46 = vld [vmem:[%s17223_s17 + $0xcdc] sm:$0xff]   ;;  %v17017_v18 = vld [vmem:[%s17223_s17 + $0xd08] sm:$0xff]  }
 0x363   : > { %v7832_v48 = vsel %vm17216_vm4, %v13715_v39, %v7831_v54  ;;  %v17021_v61 = vld [vmem:[%s17223_s17 + $0xdb8] sm:$0xff]   ;;  %v17022_v44 = vld [vmem:[%s17223_s17 + $0xde4] sm:$0xff]  }
 0x364   : > { %v13732_v62 = vcombine.low %v7832_v48, %v7835_v27  ;;  %v17025_v54 = vld [vmem:[%s17223_s17 + $0xe68] sm:$0xff]  }
 0x366   : > { %15661 = vmatmul.mubr.msk.bf16.gmra.mrb[52].mxu1 %vm499_vm3, %v14153_v1  ;;  %15385 = vmatmul.mubr.msk.bf16.gmra.mrb[80].mxu0 %vm499_vm3, %v13727_v37  ;;  %v13714_v37 = vrot.slane %v13692_v43, 10  ;;  %v7826_v1 = vrot.slane %v7824_v40, 4  ;;  %v17023_v43 = vld [vmem:[%s17223_s17 + $0xe10] sm:$0xff]  }
 0x367   : > { %15664 = vmatprep.mubr.msk.bf16.mxu1 %vm499_vm3, %v14154_v0  ;;  %15388 = vmatprep.mubr.msk.bf16.mxu0 %vm499_vm3, %v13728_v4  ;;  %v10761_v0 = vsel %vm17216_vm4, %v14140_v15, %v10760_v36  ;;  %v7838_v4 = vrot.slane %v13699_v42, 6  ;;  %v17015_v36 = vld [vmem:[%s17223_s17 + $0xcb0] sm:$0xff]  }
 0x368   : > { %v7825_v28 = vsel %vm17216_vm4, %v13714_v37, %v7824_v40  ;;  %v7828_v59 = vsel %vm17216_vm4, %v7826_v1, %v7827_v14  ;;  %v14157_v49 = vcombine.low %v10761_v0, %v10764_v20  ;;  %v17031_v1 = vld [vmem:[%s20988_s3 + $0x8] sm:$0xff]   ;;  %v17032_v20 = vld [vmem:[%s20988_s3 + $0x10] sm:$0xff]  }
 0x369   : > { %v13731_v24 = vcombine.low %v7825_v28, %v7828_v59  ;;  %v7840_v51 = vrot.slane %v7838_v4, 4  ;;  %v7839_v19 = vsel %vm17216_vm4, %v13716_v26, %v7838_v4 }
 0x36b   : > { %v7842_v30 = vsel %vm17216_vm4, %v7840_v51, %v7841_v63 }
 0x36c   : > { %v13733_v40 = vcombine.low %v7839_v19, %v7842_v30  ;;  %v17036_v30 = vld [vmem:[%s20988_s3 + $0x30] sm:$0xff]  }
 0x36e   : > { %15665 = vmatmul.mubr.msk.bf16.gmra.mrb[56].mxu1 %vm499_vm3, %v14155_v47  ;;  %15389 = vmatmul.mubr.msk.bf16.gmra.mrb[84].mxu0 %vm499_vm3, %v13729_v13  ;;  %v17026_v13 = vld [vmem:[%s17223_s17 + $0xe94] sm:$0xff]   ;;  %v17027_v47 = vld [vmem:[%s17223_s17 + $0xec0] sm:$0xff]  }
 0x36f   : > { %15668 = vmatprep.mubr.msk.bf16.mxu1 %vm499_vm3, %v14156_v5  ;;  %15392 = vmatprep.mubr.msk.bf16.mxu0 %vm499_vm3, %v13730_v53  ;;  %v17030_v5 = vld [vmem:[%s20988_s3] sm:$0xff]  }
 0x370   : > { %15706 = vmatprep.subr.bf16.mxu0 %v17030_v5 }
 0x371   : > { %15707 = vmatpush3.bf16.msra.mxu0 %v17030_v5 }
 0x372   : > { %15708 = vmatprep.subr.bf16.mxu0 %v17031_v1 }
 0x375   : > { %15709 = vmatpush3.bf16.msra.mxu0 %v17031_v1 }
 0x376   : > { %15669 = vmatmul.mubr.msk.bf16.gmra.mrb[60].mxu1 %vm499_vm3, %v14157_v49  ;;  %15393 = vmatmul.mubr.msk.bf16.gmra.mrb[88].mxu0 %vm499_vm3, %v13731_v24  ;;  %v17034_v49 = vld [vmem:[%s20988_s3 + $0x20] sm:$0xff]  }
 0x377   : > { %15674 = vmatprep.mubr.msk.bf16.mxu1 %vm499_vm3, %v17014_v56  ;;  %15396 = vmatprep.mubr.msk.bf16.mxu0 %vm499_vm3, %v13732_v62  ;;  %v17035_v56 = vld [vmem:[%s20988_s3 + $0x28] sm:$0xff]  }
 0x378   : > { %15710 = vmatprep.subr.bf16.mxu0 %v17032_v20 }
 0x379   : > { %15711 = vmatpush3.bf16.msra.mxu0 %v17032_v20 }
 0x37a   : > { %15712 = vmatprep.subr.bf16.mxu0 %v17033_v50 }
 0x37d   : > { %15713 = vmatpush3.bf16.msra.mxu0 %v17033_v50 }
 0x37e   : > { %15675 = vmatmul.mubr.msk.bf16.vlgmr.msra.gmra.mrb[32].mxu1 %vm499_vm3, %v17015_v36  ;;  %15397 = vmatmul.mubr.msk.bf16.gmra.mrb[92].mxu0 %vm499_vm3, %v13733_v40  ;;  %v17037_v40 = vld [vmem:[%s20988_s3 + $0x38] sm:$0xff]  }
 0x37f   : > { %15678 = vmatprep.mubr.msk.bf16.mxu1 %vm499_vm3, %v17016_v46  ;;  %15714 = vmatprep.subr.bf16.mxu0 %v17034_v49 }
 0x381   : > { %15715 = vmatpush3.bf16.msra.mxu0 %v17034_v49 }
 0x382   : > { %15716 = vmatprep.subr.bf16.mxu0 %v17035_v56 }
 0x385   : > { %15717 = vmatpush3.bf16.msra.mxu0 %v17035_v56 }
 0x386   : > { %15679 = vmatmul.mubr.msk.bf16.gmra.mrb[36].mxu1 %vm499_vm3, %v17017_v18  ;;  %15718 = vmatprep.subr.bf16.mxu0 %v17036_v30 }
 0x387   : > { %15682 = vmatprep.mubr.msk.bf16.mxu1 %vm499_vm3, %v17018_v9 }
 0x389   : > { %15719 = vmatpush3.bf16.msra.mxu0 %v17036_v30 }
 0x38a   : > { %15720 = vmatprep.subr.bf16.mxu0 %v17037_v40 }
 0x38d   : > { %15721 = vmatpush3.bf16.msra.mxu0 %v17037_v40 }
 0x38e   : > { %15683 = vmatmul.mubr.msk.bf16.gmra.mrb[40].mxu1 %vm499_vm3, %v17019_v6 }
 0x38f   : > { %15686 = vmatprep.mubr.msk.bf16.mxu1 %vm499_vm3, %v17020_v35 }
 0x396   : > { %15687 = vmatmul.mubr.msk.bf16.gmra.mrb[44].mxu1 %vm499_vm3, %v17021_v61 }
 0x397   : > { %15690 = vmatprep.mubr.msk.bf16.mxu1 %vm499_vm3, %v17022_v44 }
 0x39e   : > { %15691 = vmatmul.mubr.msk.bf16.gmra.mrb[48].mxu1 %vm499_vm3, %v17023_v43 }
 0x39f   : > { %15694 = vmatprep.mubr.msk.bf16.mxu1 %vm499_vm3, %v17024_v23 }
 0x3a6   : > { %15695 = vmatmul.mubr.msk.bf16.gmra.mrb[52].mxu1 %vm499_vm3, %v17025_v54 }
 0x3a7   : > { %15698 = vmatprep.mubr.msk.bf16.mxu1 %vm499_vm3, %v17026_v13 }
 0x3ae   : > { %15699 = vmatmul.mubr.msk.bf16.gmra.mrb[56].mxu1 %vm499_vm3, %v17027_v47 }
 0x3af   : > { %15702 = vmatprep.mubr.msk.bf16.mxu1 %vm499_vm3, %v17028_v55 }
 0x3b6   : > { %15703 = vmatmul.mubr.msk.bf16.gmra.mrb[60].mxu1 %vm499_vm3, %v17029_v25 }
 0x419   : > { %v15370_v15 = vpop.f32.mrb[64].mxu0 }
 0x41a   : > { %v7977_v7 = vpop.f32.mrb[65].mxu0 }
 0x41b   : > { %v15371_v11 = vpop.f32.mrb[66].mxu0 }
 0x41c   : > { %v16648_v53 = vpack.i.bf16 %v15371_v11, %v15370_v15  ;;  %v7980_v37 = vpop.f32.mrb[67].mxu0 }
 0x41d   : > { %v16653_v14 = vpack.i.bf16 %v7980_v37, %v7977_v7 }
 0x41e   : > { %16649 = vrot.lane.b32.xlu1 %v16648_v53, %s17103_s15 }
 0x421   : > { %v15374_v39 = vpop.f32.mrb[68].mxu0 }
 0x422   : > { %16654 = vrot.lane.b32.xlu1 %v16653_v14, %s17103_s15  ;;  %v7993_v38 = vpop.f32.mrb[69].mxu0 }
 0x423   : > { %v15375_v60 = vpop.f32.mrb[70].mxu0 }
 0x424   : > { %v16658_v42 = vpack.i.bf16 %v15375_v60, %v15374_v39  ;;  %v7996_v0 = vpop.f32.mrb[71].mxu0 }
 0x425   : > { %v16663_v28 = vpack.i.bf16 %v7996_v0, %v7993_v38 }
 0x426   : > { %16659 = vrot.lane.b32.xlu1 %v16658_v42, %s17103_s15 }
 0x427   : > { %16664 = vrot.lane.b32.xlu0 %v16663_v28, %s17103_s15 }
 0x429   : > { %v15378_v59 = vpop.f32.mrb[72].mxu0 }
 0x42a   : > { %v8009_v4 = vpop.f32.mrb[73].mxu0 }
 0x42b   : > { %v15379_v48 = vpop.f32.mrb[74].mxu0 }
 0x42c   : > { %v16668_v27 = vpack.i.bf16 %v15379_v48, %v15378_v59  ;;  %v8012_v34 = vpop.f32.mrb[75].mxu0 }
 0x42d   : > { %v16673_v24 = vpack.i.bf16 %v8012_v34, %v8009_v4 }
 0x42e   : > { %16669 = vrot.lane.b32.xlu1 %v16668_v27, %s17103_s15 }
 0x42f   : > { %16674 = vrot.lane.b32.xlu0 %v16673_v24, %s17103_s15 }
 0x431   : > { %v15382_v62 = vpop.f32.mrb[76].mxu0 }
 0x432   : > { %v8025_v26 = vpop.f32.mrb[77].mxu0 }
 0x433   : > { %v15383_v51 = vpop.f32.mrb[78].mxu0 }
 0x434   : > { %v16678_v63 = vpack.i.bf16 %v15383_v51, %v15382_v62  ;;  %v8028_v19 = vpop.f32.mrb[79].mxu0 }
 0x435   : > { %v16683_v36 = vpack.i.bf16 %v8028_v19, %v8025_v26 }
 0x436   : > { %16679 = vrot.lane.b32.xlu1 %v16678_v63, %s17103_s15 }
 0x437   : > { %16684 = vrot.lane.b32.xlu0 %v16683_v36, %s17103_s15 }
 0x439   : > { %v15386_v46 = vpop.f32.mrb[80].mxu0 }
 0x43a   : > { %v8041_v18 = vpop.f32.mrb[81].mxu0 }
 0x43b   : > { %v15387_v9 = vpop.f32.mrb[82].mxu0 }
 0x43c   : > { %v16703_v6 = vpack.i.bf16 %v15387_v9, %v15386_v46  ;;  %v8044_v35 = vpop.f32.mrb[83].mxu0 }
 0x43d   : > { %v16698_v61 = vpack.i.bf16 %v8044_v35, %v8041_v18 }
 0x441   : > { %v15390_v44 = vpop.f32.mrb[84].mxu0 }
 0x442   : > { %v8057_v43 = vpop.f32.mrb[85].mxu0 }
 0x443   : > { %v15391_v23 = vpop.f32.mrb[86].mxu0 }
 0x444   : > { %v16743_v54 = vpack.i.bf16 %v15391_v23, %v15390_v44  ;;  %v8060_v13 = vpop.f32.mrb[87].mxu0 }
 0x445   : > { %v16738_v47 = vpack.i.bf16 %v8060_v13, %v8057_v43 }
 0x449   : > { %v20574_v55 = vpop.f32.mrb[88].mxu0 }
 0x44a   : > { %v20576_v25 = vpop.f32.mrb[89].mxu0 }
 0x44b   : > { %v15395_v5 = vpop.f32.mrb[90].mxu0 }
 0x44c   : > { %v16783_v15 = vpack.i.bf16 %v15395_v5, %v20574_v55  ;;  %v8076_v7 = vpop.f32.mrb[91].mxu0 }
 0x44d   : > { %v16778_v11 = vpack.i.bf16 %v8076_v7, %v20576_v25 }
 0x451   : > { %v15676_v53 = vpop.f32.mrb[32].mxu1  ;;  %v20580_v37 = vpop.f32.mrb[92].mxu0 }
 0x452   : > { %v11256_v1 = vpop.f32.mrb[33].mxu1  ;;  %v20582_v14 = vpop.f32.mrb[93].mxu0 }
 0x453   : > { %v15677_v39 = vpop.f32.mrb[34].mxu1  ;;  %v20584_v38 = vpop.f32.mrb[94].mxu0 }
 0x454   : > { %v16688_v60 = vpack.i.bf16 %v15677_v39, %v15676_v53  ;;  %v11259_v42 = vpop.f32.mrb[35].mxu1  ;;  %v16823_v0 = vpack.i.bf16 %v20584_v38, %v20580_v37  ;;  %v20588_v20 = vpop.f32.mrb[95].mxu0 }
 0x455   : > { %v16693_v28 = vpack.i.bf16 %v11259_v42, %v11256_v1  ;;  %v16818_v59 = vpack.i.bf16 %v20588_v20, %v20582_v14 }
 0x456   : > { %16689 = vrot.lane.b32.xlu1 %v16688_v60, %s17104_s14 }
 0x457   : > { %16694 = vrot.lane.b32.xlu0 %v16693_v28, %s17104_s14 }
 0x459   : > { %v15680_v4 = vpop.f32.mrb[36].mxu1 }
 0x45a   : > { %v11272_v48 = vpop.f32.mrb[37].mxu1  ;;  %16704 = vrot.lane.b32.xlu1 %v16703_v6, %s17103_s15 }
 0x45b   : > { %v15681_v27 = vpop.f32.mrb[38].mxu1  ;;  %16699 = vrot.lane.b32.xlu0 %v16698_v61, %s17103_s15 }
 0x45c   : > { %v16708_v34 = vpack.i.bf16 %v15681_v27, %v15680_v4  ;;  %v11275_v50 = vpop.f32.mrb[39].mxu1  ;;  %v21207_v4 = vld [vmem:[#allocation26_spill] sm:$0xff] }
 0x45d   : > { %v16713_v49 = vpack.i.bf16 %v11275_v50, %v11272_v48  ;;  %v21208_v50 = vld [vmem:[#allocation24_spill] sm:$0xff] }
 0x45e   : > { %16709 = vrot.lane.b32.xlu1 %v16708_v34, %s17104_s14 }
 0x45f   : > { %16714 = vrot.lane.b32.xlu0 %v16713_v49, %s17104_s14 }
 0x461   : > { %v15684_v24 = vpop.f32.mrb[40].mxu1 }
 0x462   : > { %v11288_v56 = vpop.f32.mrb[41].mxu1  ;;  %16724 = vrot.lane.b32.xlu1 %v16723_v33, %s17102_s8 }
 0x463   : > { %v15685_v62 = vpop.f32.mrb[42].mxu1  ;;  %16719 = vrot.lane.b32.xlu0 %v16718_v8, %s17102_s8 }
 0x464   : > { %v16728_v26 = vpack.i.bf16 %v15685_v62, %v15684_v24  ;;  %v11291_v51 = vpop.f32.mrb[43].mxu1  ;;  %v21209_v62 = vld [vmem:[#allocation27_spill] sm:$0xff] }
 0x465   : > { %v16733_v63 = vpack.i.bf16 %v11291_v51, %v11288_v56  ;;  %v21210_v51 = vld [vmem:[#allocation25_spill] sm:$0xff] }
 0x466   : > { %16729 = vrot.lane.b32.xlu1 %v16728_v26, %s17104_s14 }
 0x467   : > { %16734 = vrot.lane.b32.xlu0 %v16733_v63, %s17104_s14 }
 0x469   : > { %v15688_v19 = vpop.f32.mrb[44].mxu1 }
 0x46a   : > { %v11304_v30 = vpop.f32.mrb[45].mxu1  ;;  %16744 = vrot.lane.b32.xlu1 %v16743_v54, %s17103_s15 }
 0x46b   : > { %v15689_v36 = vpop.f32.mrb[46].mxu1  ;;  %16739 = vrot.lane.b32.xlu0 %v16738_v47, %s17103_s15 }
 0x46c   : > { %v16748_v45 = vpack.i.bf16 %v15689_v36, %v15688_v19  ;;  %v11307_v31 = vpop.f32.mrb[47].mxu1 }
 0x46d   : > { %v16753_v33 = vpack.i.bf16 %v11307_v31, %v11304_v30 }
 0x46e   : > { %16749 = vrot.lane.b32.xlu1 %v16748_v45, %s17104_s14 }
 0x46f   : > { %16754 = vrot.lane.b32.xlu0 %v16753_v33, %s17104_s14 }
 0x471   : > { %v15692_v52 = vpop.f32.mrb[48].mxu1 }
 0x472   : > { %v11320_v22 = vpop.f32.mrb[49].mxu1  ;;  %16764 = vrot.lane.b32.xlu1 %v16763_v10, %s17102_s8 }
 0x473   : > { %v15693_v8 = vpop.f32.mrb[50].mxu1  ;;  %16759 = vrot.lane.b32.xlu0 %v16758_v3, %s17102_s8 }
 0x474   : > { %v16768_v40 = vpack.i.bf16 %v15693_v8, %v15692_v52  ;;  %v11323_v46 = vpop.f32.mrb[51].mxu1 }
 0x475   : > { %v16773_v18 = vpack.i.bf16 %v11323_v46, %v11320_v22 }
 0x476   : > { %16769 = vrot.lane.b32.xlu1 %v16768_v40, %s17104_s14 }
 0x477   : > { %16774 = vrot.lane.b32.xlu0 %v16773_v18, %s17104_s14 }
 0x479   : > { %v15696_v9 = vpop.f32.mrb[52].mxu1 }
 0x47a   : > { %v11336_v6 = vpop.f32.mrb[53].mxu1  ;;  %16784 = vrot.lane.b32.xlu1 %v16783_v15, %s17103_s15 }
 0x47b   : > { %v15697_v35 = vpop.f32.mrb[54].mxu1  ;;  %16779 = vrot.lane.b32.xlu0 %v16778_v11, %s17103_s15 }
 0x47c   : > { %v16788_v17 = vpack.i.bf16 %v15697_v35, %v15696_v9  ;;  %v11339_v21 = vpop.f32.mrb[55].mxu1 }
 0x47d   : > { %v16793_v10 = vpack.i.bf16 %v11339_v21, %v11336_v6 }
 0x47e   : > { %16789 = vrot.lane.b32.xlu1 %v16788_v17, %s17104_s14 }
 0x47f   : > { %16794 = vrot.lane.b32.xlu0 %v16793_v10, %s17104_s14 }
 0x481   : > { %v15700_v2 = vpop.f32.mrb[56].mxu1 }
 0x482   : > { %v11352_v12 = vpop.f32.mrb[57].mxu1  ;;  %16804 = vrot.lane.b32.xlu1 %v16803_v41, %s17102_s8  ;;  %v20646_v41 = vpop.permute.xlu1 %16609 }
 0x483   : > { %v15701_v3 = vpop.f32.mrb[58].mxu1  ;;  %16799 = vrot.lane.b32.xlu0 %v16798_v57, %s17102_s8  ;;  %v16600_v57 = vpop.permute.xlu0 %16599  ;;  %v16612_v19 = vunpack.i.h.bf16 %v20646_v41  ;;  %v16611_v36 = vunpack.i.l.bf16 %v20646_v41  ;;  %v21213_v41 = vld [vmem:[#allocation31_spill] sm:$0xff]  ;;  %s226_s8 = sand.u32 1, %s17092_s19  }
 0x484   : > { %v16808_v61 = vpack.i.bf16 %v15701_v3, %v15700_v2  ;;  %v11355_v44 = vpop.f32.mrb[59].mxu1  ;;  %v16602_v60 = vunpack.i.h.bf16 %v16600_v57  ;;  %v16601_v42 = vunpack.i.l.bf16 %v16600_v57  ;;  %s12267_s23 = sshll.u32 %s226_s8, 8  ;;  %s20944_s22 = scalar_lea.sflag [#allocation3], %s226_s8 }
 0x485   : > { %v16813_v43 = vpack.i.bf16 %v11355_v44, %v11352_v12  ;;  %s20869_s25 = scalar_lea.vmem [#allocation2], %s12267_s23 }
 0x486   : > { %16809 = vrot.lane.b32.xlu1 %v16808_v61, %s17104_s14  ;;  %v20648_v13 = vpop.permute.xlu1 %16619  ;;  %v11803_v48 = vsel %vm11799_vm5, %v21207_v4, %v16602_v60  ;;  %v11802_v49 = vsel %vm11799_vm5, %v21208_v50, %v16601_v42  ;;  %s12192_s26 = sshll.u32 %s20869_s25, 4  ;;  %s20936_s26 = int_to_ptr.vmem [resolvable:$true] %s12192_s26 }
 0x487   : > { %16814 = vrot.lane.b32.xlu0 %v16813_v43, %s17104_s14  ;;  %v16605_v47 = vpop.permute.xlu0 %16604  ;;  %s17038_s9 = scalar_lea.vmem %s20936_s26, 4096  ;;  %p17045_p0 = scmp.lt.s32.totalorder %s20936_s26, %s17043_s12 }
 0x488   : > { %v16606_v20 = vunpack.i.l.bf16 %v16605_v47  ;;  %p17039_p11 = scmp.ne.s32.totalorder %s20936_s26, %s17038_s9  ;;  %p17046_p1 = scmp.lt.s32.totalorder %s17044_s13, %s17038_s9 }
 0x489   : > { %v15704_v23 = vpop.f32.mrb[60].mxu1 }
 0x48a   : > { %v11368_v54 = vpop.f32.mrb[61].mxu1  ;;  %16824 = vrot.lane.b32.xlu1 %v16823_v0, %s17103_s15  ;;  %v20650_v55 = vpop.permute.xlu1 %16629  ;;  %v16607_v0 = vunpack.i.h.bf16 %v16605_v47  ;;  %v11800_v63 = vsel %vm11799_vm5, %v21210_v51, %v16606_v20  ;;  %v21214_v47 = vld [vmem:[#allocation29_spill] sm:$0xff]  ;;  %p17040_p12 = pnand %p17039_p11, %p17176_p5  ;;  %p17047_p2 = por %p17046_p1, %p17045_p0 }
 0x48b   : > { %v15705_v29 = vpop.f32.mrb[62].mxu1  ;;  %16819 = vrot.lane.b32.xlu0 %v16818_v59, %s17103_s15  ;;  %v16615_v5 = vpop.permute.xlu0 %16614 }
 0x48c   : > { %v16833_v32 = vpack.i.bf16 %v15705_v29, %v15704_v23  ;;  %v11371_v16 = vpop.f32.mrb[63].mxu1  ;;  %v11801_v26 = vsel %vm11799_vm5, %v21209_v62, %v16607_v0  ;;  %v16617_v45 = vunpack.i.h.bf16 %v16615_v5  ;;  %v16616_v17 = vunpack.i.l.bf16 %v16615_v5  ;;  %v21211_v23 = vld [vmem:[#allocation30_spill] sm:$0xff]  ;;  %p17041_p13 = pneg %p17040_p12 }
 0x48d   : > { %v16828_v58 = vpack.i.bf16 %v11371_v16, %v11368_v54  ;;  %v11807_v54 = vsel %vm11799_vm5, %v21211_v23, %v16612_v19  ;;  %v21212_v16 = vld [vmem:[#allocation28_spill] sm:$0xff] }
 0x48e   : > { %16834 = vrot.lane.b32.xlu1 %v16833_v32, %s17104_s14  ;;  %v20652_v25 = vpop.permute.xlu1 %16639  ;;  %v11805_v57 = vsel %vm11799_vm5, %v21213_v41, %v16617_v45  ;;  %v11804_v5 = vsel %vm11799_vm5, %v21214_v47, %v16616_v17  ;;  %v21215_v45 = vld [vmem:[#allocation32_spill] sm:$0xff]  ;;  %p17048_p3 = pnand %p17047_p2, %p17041_p13 }
 0x48f   : > { %16829 = vrot.lane.b32.xlu0 %v16828_v58, %s17104_s14  ;;  %v20654_v7 = vpop.permute.xlu0 %16624  ;;  %v11806_v58 = vsel %vm11799_vm5, %v21212_v16, %v16611_v36 }
 0x490   : > { %v16627_v60 = vunpack.i.h.bf16 %v20654_v7 }
 0x492   : > { %v16650_v15 = vpop.permute.xlu1 %16649 }
 0x493   : > { %v20656_v11 = vpop.permute.xlu0 %16634  ;;  %v16652_v27 = vunpack.i.h.bf16 %v16650_v15  ;;  %v16651_v34 = vunpack.i.l.bf16 %v16650_v15  ;;  %v16622_v15 = vunpack.i.h.bf16 %v20648_v13 }
 0x495   : > { %v11836_v22 = vsel %vm11832_vm6, %v11803_v48, %v16652_v27  ;;  %v11835_v8 = vsel %vm11832_vm6, %v11802_v49, %v16651_v34 }
 0x496   : > { %v16655_v53 = vpop.permute.xlu1 %16654 }
 0x497   : > { %v20658_v37 = vpop.permute.xlu0 %16644  ;;  %v16657_v24 = vunpack.i.h.bf16 %v16655_v53  ;;  %v16656_v56 = vunpack.i.l.bf16 %v16655_v53 }
 0x499   : > { %v11834_v18 = vsel %vm11832_vm6, %v11801_v26, %v16657_v24  ;;  %v11833_v9 = vsel %vm11832_vm6, %v11800_v63, %v16656_v56 }
 0x49a   : > { %v20660_v1 = vpop.permute.xlu1 %16659 }
 0x49b   : > { %v20662_v14 = vpop.permute.xlu0 %16664  ;;  %v16662_v44 = vunpack.i.h.bf16 %v20660_v1  ;;  %v16661_v43 = vunpack.i.l.bf16 %v20660_v1  ;;  %v16621_v1 = vunpack.i.l.bf16 %v20648_v13  ;;  %v16626_v13 = vunpack.i.l.bf16 %v20654_v7 }
 0x49c   : > { %v16667_v29 = vunpack.i.h.bf16 %v20662_v14  ;;  %v16666_v32 = vunpack.i.l.bf16 %v20662_v14 }
 0x49d   : > { %v11840_v20 = vsel %vm11832_vm6, %v11807_v54, %v16662_v44  ;;  %v11839_v4 = vsel %vm11832_vm6, %v11806_v58, %v16661_v43 }
 0x49e   : > { %v11838_v34 = vsel %vm11832_vm6, %v11805_v57, %v16667_v29  ;;  %v11837_v50 = vsel %vm11832_vm6, %v11804_v5, %v16666_v32 }
 0x4a0   : > { %v20664_v39 = vpop.permute.xlu1 %16669 }
 0x4a1   : > { %v20666_v38 = vpop.permute.xlu0 %16674  ;;  %v16671_v36 = vunpack.i.l.bf16 %v20664_v39 }
 0x4a2   : > { %v16676_v7 = vunpack.i.l.bf16 %v20666_v38 }
 0x4a8   : > { %v20668_v28 = vpop.permute.xlu1 %16679 }
 0x4a9   : > { %v20670_v59 = vpop.permute.xlu0 %16684  ;;  %v16682_v5 = vunpack.i.h.bf16 %v20668_v28 }
 0x4c8   : > { %v16690_v30 = vpop.permute.xlu1 %16689 }
 0x4c9   : > { %v16692_v31 = vunpack.i.h.bf16 %v16690_v30  ;;  %v16691_v33 = vunpack.i.l.bf16 %v16690_v30  ;;  %v16695_v52 = vpop.permute.xlu0 %16694  ;;  %v16672_v30 = vunpack.i.h.bf16 %v20664_v39 }
 0x4ca   : > { %v16697_v40 = vunpack.i.h.bf16 %v16695_v52  ;;  %v16696_v46 = vunpack.i.l.bf16 %v16695_v52  ;;  %v21216_v52 = vld [vmem:[#allocation21_spill] sm:$0xff] }
 0x4cb   : > { %v11869_v6 = vsel %vm11865_vm7, %v11836_v22, %v16692_v31  ;;  %v11868_v35 = vsel %vm11865_vm7, %v11835_v8, %v16691_v33  ;;  %v11811_v31 = vsel %vm11799_vm5, %v21215_v45, %v16622_v15  ;;  %v16677_v33 = vunpack.i.h.bf16 %v20666_v38  ;;  %v21217_v8 = vld [vmem:[#allocation33_spill] sm:$0xff] }
 0x4cc   : > { %v11899_v21 = vpack.c.bf16 %v11869_v6, %v11868_v35  ;;  %v20688_v10 = vpop.permute.xlu1 %16704  ;;  %v11866_v2 = vsel %vm11865_vm7, %v11833_v9, %v16696_v46  ;;  %v11867_v12 = vsel %vm11865_vm7, %v11834_v18, %v16697_v40  ;;  %v11810_v22 = vsel %vm11799_vm5, %v21216_v52, %v16621_v1  ;;  %v21218_v46 = vld [vmem:[#allocation23_spill] sm:$0xff] }
 0x4cd   : > { %v20692_v3 = vpop.permute.xlu0 %16699  ;;  %v11898_v61 = vpack.c.bf16 %v11867_v12, %v11866_v2  ;;  %v11809_v40 = vsel %vm11799_vm5, %v21217_v8, %v16627_v60  ;;  %v11808_v18 = vsel %vm11799_vm5, %v21218_v46, %v16626_v13  ;;  %v16632_v9 = vunpack.i.h.bf16 %v20650_v55  ;;  %v21220_v60 = vld [vmem:[#allocation34_spill] sm:$0xff] }
 0x4ce   : > { %v16631_v6 = vunpack.i.l.bf16 %v20650_v55  ;;  %v16637_v35 = vunpack.i.h.bf16 %v20656_v11  ;;  %v11844_v2 = vsel %vm11832_vm6, %v11811_v31, %v16672_v30  ;;  %v11843_v12 = vsel %vm11832_vm6, %v11810_v22, %v16671_v36 }
 0x4cf   : > { %15722 = vmatprep.mubr.bf16.mxu0 %v11898_v61  ;;  %v11842_v43 = vsel %vm11832_vm6, %v11809_v40, %v16677_v33  ;;  %v11841_v23 = vsel %vm11832_vm6, %v11808_v18, %v16676_v7  ;;  %v16636_v55 = vunpack.i.l.bf16 %v20656_v11  ;;  %v16681_v15 = vunpack.i.l.bf16 %v20668_v28 }
 0x4d0   : > { %v16710_v53 = vpop.permute.xlu1 %16709  ;;  %15723 = vmatmul.mubr.bf16.vlgmr.msra.gmra.mrb[96].mxu0 %v11899_v21  ;;  %v11814_v11 = vsel %vm11799_vm5, %v21220_v60, %v16631_v6  ;;  %v16641_v28 = vunpack.i.l.bf16 %v20652_v25  ;;  %v16707_v31 = vunpack.i.h.bf16 %v20688_v10  ;;  %v16706_v22 = vunpack.i.l.bf16 %v20688_v10  ;;  %v21224_v6 = vld [vmem:[#allocation38_spill] sm:$0xff] }
 0x4d1   : > { %v16712_v42 = vunpack.i.h.bf16 %v16710_v53  ;;  %v16711_v14 = vunpack.i.l.bf16 %v16710_v53  ;;  %v16715_v0 = vpop.permute.xlu0 %16714  ;;  %v21219_v53 = vld [vmem:[#allocation36_spill] sm:$0xff]  ;;  %v16701_v8 = vunpack.i.l.bf16 %v20692_v3  ;;  %v16702_v18 = vunpack.i.h.bf16 %v20692_v3 }
 0x4d2   : > { %v16717_v48 = vunpack.i.h.bf16 %v16715_v0  ;;  %v16716_v27 = vunpack.i.l.bf16 %v16715_v0  ;;  %v11815_v1 = vsel %vm11799_vm5, %v21219_v53, %v16632_v9  ;;  %v21221_v0 = vld [vmem:[#allocation37_spill] sm:$0xff]  ;;  %v21223_v9 = vld [vmem:[#allocation40_spill] sm:$0xff] }
 0x4d3   : > { %v11872_v49 = vsel %vm11865_vm7, %v11839_v4, %v16711_v14  ;;  %v11873_v24 = vsel %vm11865_vm7, %v11840_v20, %v16712_v42  ;;  %v16687_v42 = vunpack.i.h.bf16 %v20670_v59  ;;  %v16686_v14 = vunpack.i.l.bf16 %v20670_v59  ;;  %v21222_v4 = vld [vmem:[#allocation35_spill] sm:$0xff] }
 0x4d4   : > { %v20716_v56 = vpop.permute.xlu1 %16724  ;;  %v11870_v62 = vsel %vm11865_vm7, %v11837_v50, %v16716_v27  ;;  %v11871_v26 = vsel %vm11865_vm7, %v11838_v34, %v16717_v48  ;;  %v11901_v51 = vpack.c.bf16 %v11873_v24, %v11872_v49  ;;  %v11813_v20 = vsel %vm11799_vm5, %v21221_v0, %v16637_v35 }
 0x4d5   : > { %v20720_v63 = vpop.permute.xlu0 %16719  ;;  %v11900_v19 = vpack.c.bf16 %v11871_v26, %v11870_v62  ;;  %v11812_v48 = vsel %vm11799_vm5, %v21222_v4, %v16636_v55  ;;  %v16642_v27 = vunpack.i.h.bf16 %v20652_v25  ;;  %v16647_v50 = vunpack.i.h.bf16 %v20658_v37 }
 0x4d6   : > { %v16646_v49 = vunpack.i.l.bf16 %v20658_v37  ;;  %v11848_v62 = vsel %vm11832_vm6, %v11815_v1, %v16682_v5  ;;  %v11847_v26 = vsel %vm11832_vm6, %v11814_v11, %v16681_v15  ;;  %v11845_v30 = vsel %vm11832_vm6, %v11812_v48, %v16686_v14  ;;  %v21227_v48 = vld [vmem:[#allocation44_spill] sm:$0xff] }
 0x4d7   : > { %15726 = vmatprep.mubr.bf16.mxu0 %v11900_v19  ;;  %v11846_v36 = vsel %vm11832_vm6, %v11813_v20, %v16687_v42  ;;  %v11818_v35 = vsel %vm11799_vm5, %v21224_v6, %v16641_v28  ;;  %v16721_v15 = vunpack.i.l.bf16 %v20720_v63 }
 0x4d8   : > { %v16730_v39 = vpop.permute.xlu1 %16729  ;;  %15727 = vmatmul.mubr.bf16.gmra.mrb[100].mxu0 %v11901_v51 }
 0x4d9   : > { %v16732_v17 = vunpack.i.h.bf16 %v16730_v39  ;;  %v16731_v38 = vunpack.i.l.bf16 %v16730_v39  ;;  %v16735_v21 = vpop.permute.xlu0 %16734  ;;  %v11819_v39 = vsel %vm11799_vm5, %v21223_v9, %v16642_v27  ;;  %v21228_v27 = vld [vmem:[#allocation42_spill] sm:$0xff] }
 0x4da   : > { %v16737_v61 = vunpack.i.h.bf16 %v16735_v21  ;;  %v16736_v44 = vunpack.i.l.bf16 %v16735_v21  ;;  %v21226_v21 = vld [vmem:[#allocation39_spill] sm:$0xff] }
 0x4db   : > { %v11876_v54 = vsel %vm11865_vm7, %v11843_v12, %v16731_v38  ;;  %v11877_v29 = vsel %vm11865_vm7, %v11844_v2, %v16732_v17  ;;  %v21225_v17 = vld [vmem:[#allocation41_spill] sm:$0xff]  ;;  %v11816_v10 = vsel %vm11799_vm5, %v21226_v21, %v16646_v49  ;;  %v11852_v2 = vsel %vm11832_vm6, %v11819_v39, %v16707_v31  ;;  %v21230_v49 = vld [vmem:[#allocation43_spill] sm:$0xff] }
 0x4dc   : > { %v20744_v32 = vpop.permute.xlu1 %16744  ;;  %v11874_v16 = vsel %vm11865_vm7, %v11841_v23, %v16736_v44  ;;  %v11875_v58 = vsel %vm11865_vm7, %v11842_v43, %v16737_v61  ;;  %v11903_v41 = vpack.c.bf16 %v11877_v29, %v11876_v54  ;;  %v11817_v38 = vsel %vm11799_vm5, %v21225_v17, %v16647_v50 }
 0x4dd   : > { %v20748_v57 = vpop.permute.xlu0 %16739  ;;  %v11902_v47 = vpack.c.bf16 %v11875_v58, %v11874_v16  ;;  %v11851_v61 = vsel %vm11832_vm6, %v11818_v35, %v16706_v22  ;;  %v11849_v3 = vsel %vm11832_vm6, %v11816_v10, %v16701_v8  ;;  %v11850_v54 = vsel %vm11832_vm6, %v11817_v38, %v16702_v18  ;;  %v21231_v38 = vld [vmem:[#allocation47_spill] sm:$0xff]  ;;  %v21232_v10 = vld [vmem:[#allocation22_spill] sm:$0xff] }
 0x4de   : > { %v16727_v29 = vunpack.i.h.bf16 %v20716_v56  ;;  %v16726_v58 = vunpack.i.l.bf16 %v20716_v56  ;;  %v16747_v42 = vunpack.i.h.bf16 %v20744_v32  ;;  %v16746_v14 = vunpack.i.l.bf16 %v20744_v32 }
 0x4df   : > { %15730 = vmatprep.mubr.bf16.mxu0 %v11902_v47  ;;  %v16742_v20 = vunpack.i.h.bf16 %v20748_v57  ;;  %v16741_v4 = vunpack.i.l.bf16 %v20748_v57 }
 0x4e0   : > { %v16750_v34 = vpop.permute.xlu1 %16749  ;;  %15731 = vmatmul.mubr.bf16.gmra.mrb[104].mxu0 %v11903_v41  ;;  %v16722_v41 = vunpack.i.h.bf16 %v20720_v63  ;;  %v11823_v63 = vsel %vm11799_vm5, %v21227_v48, %v16727_v29  ;;  %v11822_v28 = vsel %vm11799_vm5, %v21228_v27, %v16726_v58 }
 0x4e1   : > { %v16752_v24 = vunpack.i.h.bf16 %v16750_v34  ;;  %v16751_v13 = vunpack.i.l.bf16 %v16750_v34  ;;  %v16755_v59 = vpop.permute.xlu0 %16754  ;;  %v21229_v34 = vld [vmem:[#allocation45_spill] sm:$0xff] }
 0x4e2   : > { %v16757_v51 = vunpack.i.h.bf16 %v16755_v59  ;;  %v16756_v19 = vunpack.i.l.bf16 %v16755_v59  ;;  %v11821_v50 = vsel %vm11799_vm5, %v21229_v34, %v16722_v41  ;;  %v11855_v59 = vsel %vm11832_vm6, %v11822_v28, %v16746_v14  ;;  %v21235_v34 = vld [vmem:[#allocation51_spill] sm:$0xff] }
 0x4e3   : > { %v11880_v25 = vsel %vm11865_vm7, %v11847_v26, %v16751_v13  ;;  %v11881_v45 = vsel %vm11865_vm7, %v11848_v62, %v16752_v24  ;;  %v11820_v24 = vsel %vm11799_vm5, %v21230_v49, %v16721_v15  ;;  %v11856_v13 = vsel %vm11832_vm6, %v11823_v63, %v16747_v42  ;;  %v21236_v49 = vld [vmem:[#allocation49_spill] sm:$0xff] }
 0x4e4   : > { %v20773_v37 = vpop.permute.xlu1 %16764  ;;  %v11878_v33 = vsel %vm11865_vm7, %v11845_v30, %v16756_v19  ;;  %v11879_v7 = vsel %vm11865_vm7, %v11846_v36, %v16757_v51  ;;  %v11905_v52 = vpack.c.bf16 %v11881_v45, %v11880_v25  ;;  %v11853_v51 = vsel %vm11832_vm6, %v11820_v24, %v16741_v4 }
 0x4e5   : > { %v20779_v40 = vpop.permute.xlu0 %16759  ;;  %v11904_v46 = vpack.c.bf16 %v11879_v7, %v11878_v33  ;;  %v11854_v19 = vsel %vm11832_vm6, %v11821_v50, %v16742_v20  ;;  %v16767_v25 = vunpack.i.h.bf16 %v20773_v37  ;;  %v16766_v45 = vunpack.i.l.bf16 %v20773_v37 }
 0x4e6   : > { %v16762_v7 = vunpack.i.h.bf16 %v20779_v40  ;;  %v16761_v18 = vunpack.i.l.bf16 %v20779_v40 }
 0x4e7   : > { %15734 = vmatprep.mubr.bf16.mxu0 %v11904_v46  ;;  %v11827_v21 = vsel %vm11799_vm5, %v21231_v38, %v16767_v25 }
 0x4e8   : > { %v16770_v12 = vpop.permute.xlu1 %16769  ;;  %15735 = vmatmul.mubr.bf16.gmra.mrb[108].mxu0 %v11905_v52 }
 0x4e9   : > { %v16772_v44 = vunpack.i.h.bf16 %v16770_v12  ;;  %v16771_v43 = vunpack.i.l.bf16 %v16770_v12  ;;  %v16775_v23 = vpop.permute.xlu0 %16774  ;;  %v21233_v12 = vld [vmem:[#allocation48_spill] sm:$0xff] }
 0x4ea   : > { %v16777_v55 = vunpack.i.h.bf16 %v16775_v23  ;;  %v16776_v16 = vunpack.i.l.bf16 %v16775_v23 }
 0x4eb   : > { %v11884_v47 = vsel %vm11865_vm7, %v11851_v61, %v16771_v43  ;;  %v11885_v5 = vsel %vm11865_vm7, %v11852_v2, %v16772_v44  ;;  %v11826_v2 = vsel %vm11799_vm5, %v21232_v10, %v16766_v45  ;;  %v11825_v61 = vsel %vm11799_vm5, %v21233_v12, %v16762_v7  ;;  %v21234_v44 = vld [vmem:[#allocation46_spill] sm:$0xff] }
 0x4ec   : > { %v16785_v53 = vpop.permute.xlu1 %16784  ;;  %v11882_v1 = vsel %vm11865_vm7, %v11849_v3, %v16776_v16  ;;  %v11883_v60 = vsel %vm11865_vm7, %v11850_v54, %v16777_v55  ;;  %v11907_v11 = vpack.c.bf16 %v11885_v5, %v11884_v47  ;;  %v11824_v40 = vsel %vm11799_vm5, %v21234_v44, %v16761_v18 }
 0x4ed   : > { %v16780_v0 = vpop.permute.xlu0 %16779  ;;  %v11906_v56 = vpack.c.bf16 %v11883_v60, %v11882_v1  ;;  %v16787_v9 = vunpack.i.h.bf16 %v16785_v53  ;;  %v16786_v35 = vunpack.i.l.bf16 %v16785_v53 }
 0x4ee   : > { %v16781_v17 = vunpack.i.l.bf16 %v16780_v0  ;;  %v16782_v37 = vunpack.i.h.bf16 %v16780_v0 }
 0x4ef   : > { %15738 = vmatprep.mubr.bf16.mxu0 %v11906_v56  ;;  %v11860_v43 = vsel %vm11832_vm6, %v11827_v21, %v16787_v9  ;;  %v11859_v55 = vsel %vm11832_vm6, %v11826_v2, %v16786_v35  ;;  %v20865_v9 = vld [vmem:[%s236_s16] ss:$0 sm:$0xff] }
 0x4f0   : > { %v16790_v32 = vpop.permute.xlu1 %16789  ;;  %15739 = vmatmul.mubr.bf16.gmra.mrb[112].mxu0 %v11907_v11  ;;  %v11857_v16 = vsel %vm11832_vm6, %v11824_v40, %v16781_v17  ;;  %v11858_v47 = vsel %vm11832_vm6, %v11825_v61, %v16782_v37 }
 0x4f1   : > { %v16792_v57 = vunpack.i.h.bf16 %v16790_v32  ;;  %v16791_v62 = vunpack.i.l.bf16 %v16790_v32  ;;  %v16795_v26 = vpop.permute.xlu0 %16794 }
 0x4f2   : > { %v16797_v30 = vunpack.i.h.bf16 %v16795_v26  ;;  %v16796_v36 = vunpack.i.l.bf16 %v16795_v26 }
 0x4f3   : > { %v11888_v31 = vsel %vm11865_vm7, %v11855_v59, %v16791_v62  ;;  %v11889_v33 = vsel %vm11865_vm7, %v11856_v13, %v16792_v57  ;;  %v21237_v13 = vld [vmem:[#allocation52_spill] sm:$0xff]  ;;  %v21238_v57 = vld [vmem:[#allocation50_spill] sm:$0xff] }
 0x4f4   : > { %v16805_v52 = vpop.permute.xlu1 %16804  ;;  %v11886_v22 = vsel %vm11865_vm7, %v11853_v51, %v16796_v36  ;;  %v11887_v8 = vsel %vm11865_vm7, %v11854_v19, %v16797_v30  ;;  %v11909_v46 = vpack.c.bf16 %v11889_v33, %v11888_v31 }
 0x4f5   : > { %v16800_v39 = vpop.permute.xlu0 %16799  ;;  %v11908_v6 = vpack.c.bf16 %v11887_v8, %v11886_v22  ;;  %v16807_v5 = vunpack.i.h.bf16 %v16805_v52  ;;  %v16806_v1 = vunpack.i.l.bf16 %v16805_v52 }
 0x4f6   : > { %v16802_v0 = vunpack.i.h.bf16 %v16800_v39  ;;  %v16801_v56 = vunpack.i.l.bf16 %v16800_v39 }
 0x4f7   : > { %15742 = vmatprep.mubr.bf16.mxu0 %v11908_v6  ;;  %v11831_v50 = vsel %vm11799_vm5, %v21235_v34, %v16807_v5  ;;  %v11830_v24 = vsel %vm11799_vm5, %v21236_v49, %v16806_v1 }
 0x4f8   : > { %v16810_v3 = vpop.permute.xlu1 %16809  ;;  %15743 = vmatmul.mubr.bf16.gmra.mrb[116].mxu0 %v11909_v46  ;;  %v11829_v59 = vsel %vm11799_vm5, %v21237_v13, %v16802_v0  ;;  %v11828_v62 = vsel %vm11799_vm5, %v21238_v57, %v16801_v56 }
 0x4f9   : > { %v16812_v23 = vunpack.i.h.bf16 %v16810_v3  ;;  %v16811_v54 = vunpack.i.l.bf16 %v16810_v3  ;;  %v16815_v29 = vpop.permute.xlu0 %16814 }
 0x4fa   : > { %v16817_v58 = vunpack.i.h.bf16 %v16815_v29  ;;  %v16816_v41 = vunpack.i.l.bf16 %v16815_v29 }
 0x4fb   : > { %v11892_v15 = vsel %vm11865_vm7, %v11859_v55, %v16811_v54  ;;  %v11893_v53 = vsel %vm11865_vm7, %v11860_v43, %v16812_v23 }
 0x4fc   : > { %v16825_v60 = vpop.permute.xlu1 %16824  ;;  %v11890_v11 = vsel %vm11865_vm7, %v11857_v16, %v16816_v41  ;;  %v11891_v42 = vsel %vm11865_vm7, %v11858_v47, %v16817_v58  ;;  %v11911_v14 = vpack.c.bf16 %v11893_v53, %v11892_v15 }
 0x4fd   : > { %v16820_v20 = vpop.permute.xlu0 %16819  ;;  %v11910_v4 = vpack.c.bf16 %v11891_v42, %v11890_v11  ;;  %v16827_v48 = vunpack.i.h.bf16 %v16825_v60  ;;  %v16826_v63 = vunpack.i.l.bf16 %v16825_v60 }
 0x4fe   : > { %v16822_v27 = vunpack.i.h.bf16 %v16820_v20  ;;  %v16821_v28 = vunpack.i.l.bf16 %v16820_v20 }
 0x4ff   : > { %15746 = vmatprep.mubr.bf16.mxu0 %v11910_v4  ;;  %v11864_v30 = vsel %vm11832_vm6, %v11831_v50, %v16827_v48  ;;  %v11863_v36 = vsel %vm11832_vm6, %v11830_v24, %v16826_v63 }
 0x500   : > { %v16835_v32 = vpop.permute.xlu1 %16834  ;;  %15747 = vmatmul.mubr.bf16.gmra.mrb[120].mxu0 %v11911_v14  ;;  %v11861_v31 = vsel %vm11832_vm6, %v11828_v62, %v16821_v28  ;;  %v11862_v33 = vsel %vm11832_vm6, %v11829_v59, %v16822_v27 }
 0x501   : > { %v16837_v26 = vunpack.i.h.bf16 %v16835_v32  ;;  %v16836_v51 = vunpack.i.l.bf16 %v16835_v32  ;;  %v16830_v19 = vpop.permute.xlu0 %16829 }
 0x502   : > { %v16832_v25 = vunpack.i.h.bf16 %v16830_v19  ;;  %v16831_v45 = vunpack.i.l.bf16 %v16830_v19 }
 0x503   : > { %v11896_v7 = vsel %vm11865_vm7, %v11863_v36, %v16836_v51  ;;  %v11897_v52 = vsel %vm11865_vm7, %v11864_v30, %v16837_v26 }
 0x504   : > { %v11894_v22 = vsel %vm11865_vm7, %v11861_v31, %v16831_v45  ;;  %v11895_v8 = vsel %vm11865_vm7, %v11862_v33, %v16832_v25  ;;  %v11913_v46 = vpack.c.bf16 %v11897_v52, %v11896_v7 }
 0x505   : > { %v11912_v18 = vpack.c.bf16 %v11895_v8, %v11894_v22 }
 0x507   : > { %15750 = vmatprep.mubr.bf16.mxu0 %v11912_v18 }
 0x508   : > { %15751 = vmatmul.mubr.bf16.gmra.mrb[124].mxu0 %v11913_v46 }
 0x5a3   : > { %v15724_v39 = vpop.f32.mrb[96].mxu0 }
 0x5a4   : > { %v12028_v6 = vadd.f32 %v15724_v39, %v20865_v9  ;;  %v12019_v35 = vpop.f32.mrb[97].mxu0 }
 0x5a5   : > { %v12020_v17 = vadd.f32 %v20865_v9, %v12019_v35  ;;  %v15725_v37 = vpop.f32.mrb[98].mxu0 }
 0x5a6   : > { %12148 = vst [vmem:[%s20869_s25 + $0x10] sm:$0xff] %v12028_v6  ;;  %v12031_v38 = vadd.f32 %v15725_v37, %v20865_v9  ;;  %v12022_v21 = vpop.f32.mrb[99].mxu0 }
 0x5a7   : > { %12146 = vst [vmem:[%s20869_s25] sm:$0xff] %v12020_v17  ;;  %v12023_v10 = vadd.f32 %v20865_v9, %v12022_v21 }
 0x5a8   : > { %12149 = vst [vmem:[%s20869_s25 + $0x18] sm:$0xff] %v12031_v38 }
 0x5a9   : > { %12147 = vst [vmem:[%s20869_s25 + $0x8] sm:$0xff] %v12023_v10 }
 0x5ab   : > { %v15728_v2 = vpop.f32.mrb[100].mxu0 }
 0x5ac   : > { %v12044_v12 = vadd.f32 %v15728_v2, %v20865_v9  ;;  %v12035_v61 = vpop.f32.mrb[101].mxu0 }
 0x5ad   : > { %v12036_v3 = vadd.f32 %v20865_v9, %v12035_v61  ;;  %v15729_v44 = vpop.f32.mrb[102].mxu0 }
 0x5ae   : > { %12152 = vst [vmem:[%s20869_s25 + $0x30] sm:$0xff] %v12044_v12  ;;  %v12047_v40 = vadd.f32 %v15729_v44, %v20865_v9  ;;  %v12038_v43 = vpop.f32.mrb[103].mxu0 }
 0x5af   : > { %12150 = vst [vmem:[%s20869_s25 + $0x20] sm:$0xff] %v12036_v3  ;;  %v12039_v23 = vadd.f32 %v20865_v9, %v12038_v43 }
 0x5b0   : > { %12153 = vst [vmem:[%s20869_s25 + $0x38] sm:$0xff] %v12047_v40 }
 0x5b1   : > { %12151 = vst [vmem:[%s20869_s25 + $0x28] sm:$0xff] %v12039_v23 }
 0x5b3   : > { %v15732_v54 = vpop.f32.mrb[104].mxu0 }
 0x5b4   : > { %v12060_v29 = vadd.f32 %v15732_v54, %v20865_v9  ;;  %v12051_v55 = vpop.f32.mrb[105].mxu0 }
 0x5b5   : > { %v12052_v16 = vadd.f32 %v20865_v9, %v12051_v55  ;;  %v15733_v58 = vpop.f32.mrb[106].mxu0 }
 0x5b6   : > { %12156 = vst [vmem:[%s20869_s25 + $0x50] sm:$0xff] %v12060_v29  ;;  %v12063_v41 = vadd.f32 %v15733_v58, %v20865_v9  ;;  %v12054_v47 = vpop.f32.mrb[107].mxu0 }
 0x5b7   : > { %12154 = vst [vmem:[%s20869_s25 + $0x40] sm:$0xff] %v12052_v16  ;;  %v12055_v5 = vadd.f32 %v20865_v9, %v12054_v47 }
 0x5b8   : > { %12157 = vst [vmem:[%s20869_s25 + $0x58] sm:$0xff] %v12063_v41 }
 0x5b9   : > { %12155 = vst [vmem:[%s20869_s25 + $0x48] sm:$0xff] %v12055_v5 }
 0x5bb   : > { %v15736_v15 = vpop.f32.mrb[108].mxu0 }
 0x5bc   : > { %v12076_v53 = vadd.f32 %v15736_v15, %v20865_v9  ;;  %v12067_v1 = vpop.f32.mrb[109].mxu0 }
 0x5bd   : > { %v12068_v60 = vadd.f32 %v20865_v9, %v12067_v1  ;;  %v15737_v11 = vpop.f32.mrb[110].mxu0 }
 0x5be   : > { %12160 = vst [vmem:[%s20869_s25 + $0x70] sm:$0xff] %v12076_v53  ;;  %v12079_v42 = vadd.f32 %v15737_v11, %v20865_v9  ;;  %v12070_v14 = vpop.f32.mrb[111].mxu0 }
 0x5bf   : > { %12158 = vst [vmem:[%s20869_s25 + $0x60] sm:$0xff] %v12068_v60  ;;  %v12071_v0 = vadd.f32 %v20865_v9, %v12070_v14 }
 0x5c0   : > { %12161 = vst [vmem:[%s20869_s25 + $0x78] sm:$0xff] %v12079_v42 }
 0x5c1   : > { %12159 = vst [vmem:[%s20869_s25 + $0x68] sm:$0xff] %v12071_v0 }
 0x5c3   : > { %v15740_v56 = vpop.f32.mrb[112].mxu0 }
 0x5c4   : > { %v12092_v20 = vadd.f32 %v15740_v56, %v20865_v9  ;;  %v12083_v4 = vpop.f32.mrb[113].mxu0 }
 0x5c5   : > { %v12084_v48 = vadd.f32 %v20865_v9, %v12083_v4  ;;  %v15741_v63 = vpop.f32.mrb[114].mxu0 }
 0x5c6   : > { %12164 = vst [vmem:[%s20869_s25 + $0x90] sm:$0xff] %v12092_v20  ;;  %v12095_v27 = vadd.f32 %v15741_v63, %v20865_v9  ;;  %v12086_v28 = vpop.f32.mrb[115].mxu0 }
 0x5c7   : > { %12162 = vst [vmem:[%s20869_s25 + $0x80] sm:$0xff] %v12084_v48  ;;  %v12087_v34 = vadd.f32 %v20865_v9, %v12086_v28 }
 0x5c8   : > { %12165 = vst [vmem:[%s20869_s25 + $0x98] sm:$0xff] %v12095_v27 }
 0x5c9   : > { %12163 = vst [vmem:[%s20869_s25 + $0x88] sm:$0xff] %v12087_v34 }
 0x5cb   : > { %v15744_v50 = vpop.f32.mrb[116].mxu0 }
 0x5cc   : > { %v12108_v49 = vadd.f32 %v15744_v50, %v20865_v9  ;;  %v12099_v24 = vpop.f32.mrb[117].mxu0 }
 0x5cd   : > { %v12100_v32 = vadd.f32 %v20865_v9, %v12099_v24  ;;  %v15745_v13 = vpop.f32.mrb[118].mxu0 }
 0x5ce   : > { %12168 = vst [vmem:[%s20869_s25 + $0xb0] sm:$0xff] %v12108_v49  ;;  %v12111_v59 = vadd.f32 %v15745_v13, %v20865_v9  ;;  %v12102_v57 = vpop.f32.mrb[119].mxu0 }
 0x5cf   : > { %12166 = vst [vmem:[%s20869_s25 + $0xa0] sm:$0xff] %v12100_v32  ;;  %v12103_v62 = vadd.f32 %v20865_v9, %v12102_v57 }
 0x5d0   : > { %12169 = vst [vmem:[%s20869_s25 + $0xb8] sm:$0xff] %v12111_v59 }
 0x5d1   : > { %12167 = vst [vmem:[%s20869_s25 + $0xa8] sm:$0xff] %v12103_v62 }
 0x5d3   : > { %v15748_v26 = vpop.f32.mrb[120].mxu0 }
 0x5d4   : > { %v12124_v51 = vadd.f32 %v15748_v26, %v20865_v9  ;;  %v12115_v19 = vpop.f32.mrb[121].mxu0 }
 0x5d5   : > { %v12116_v30 = vadd.f32 %v20865_v9, %v12115_v19  ;;  %v15749_v36 = vpop.f32.mrb[122].mxu0 }
 0x5d6   : > { %12172 = vst [vmem:[%s20869_s25 + $0xd0] sm:$0xff] %v12124_v51  ;;  %v12127_v25 = vadd.f32 %v15749_v36, %v20865_v9  ;;  %v12118_v45 = vpop.f32.mrb[123].mxu0 }
 0x5d7   : > { %12170 = vst [vmem:[%s20869_s25 + $0xc0] sm:$0xff] %v12116_v30  ;;  %v12119_v31 = vadd.f32 %v20865_v9, %v12118_v45 }
 0x5d8   : > { %12173 = vst [vmem:[%s20869_s25 + $0xd8] sm:$0xff] %v12127_v25 }
 0x5d9   : > { %12171 = vst [vmem:[%s20869_s25 + $0xc8] sm:$0xff] %v12119_v31 }
 0x5db   : > { %v15752_v33 = vpop.f32.mrb[124].mxu0 }
 0x5dc   : > { %v12140_v7 = vadd.f32 %v15752_v33, %v20865_v9  ;;  %v12131_v52 = vpop.f32.mrb[125].mxu0 }
 0x5dd   : > { %v12132_v22 = vadd.f32 %v20865_v9, %v12131_v52  ;;  %v15753_v8 = vpop.f32.mrb[126].mxu0 }
 0x5de   : > { %12176 = vst [vmem:[%s20869_s25 + $0xf0] sm:$0xff] %v12140_v7  ;;  %v12143_v46 = vadd.f32 %v15753_v8, %v20865_v9  ;;  %v12134_v18 = vpop.f32.mrb[127].mxu0 }
 0x5df   : > { %12174 = vst [vmem:[%s20869_s25 + $0xe0] sm:$0xff] %v12132_v22  ;;  %v12135_v39 = vadd.f32 %v20865_v9, %v12134_v18 }
 0x5e0   : > { %12177 = vst [vmem:[%s20869_s25 + $0xf8] sm:$0xff] %v12143_v46 }
 0x5e1   : > { %12175 = vst [vmem:[%s20869_s25 + $0xe8] sm:$0xff] %v12135_v39 }
 0x5e2   : > { %17051 = shalt.err (!%p17048_p3)
}
 0x5e3   : > { %s17052_s14 = scalar_lea.hbm %s20934_s7, 4096  ;;  %s17056_s17 = scalar_lea.hbm %s20990_s5, 8192 }
 0x5e4   : > { %p17053_p4 = scmp.ne.s32.totalorder %s20934_s7, %s17052_s14  ;;  %p17057_p9 = scmp.lt.u32.totalorder %s20934_s7, %s20990_s5 }
 0x5e5   : > { %p17058_p10 = scmp.lt.u32.totalorder %s17056_s17, %s17052_s14  ;;  %p17060_p12 = scmp.lt.u32.totalorder %s17052_s14, %s20934_s7 }
 0x5e6   : > { %p17054_p7 = pnand %p17053_p4, %p17176_p5 }
 0x5e7   : > { %p17059_p11 = por %p17058_p10, %p17057_p9 }
 0x5e8   : > { %p17055_p8 = pneg %p17054_p7 }
 0x5e9   : > { %p17061_p13 = por %p17060_p12, %p17059_p11 }
 0x5eb   : > { %p17062_p0 = pnand %p17061_p13, %p17055_p8 }
 0x5ed   : > { %17065 = shalt.err (!%p17062_p0)
}
 0x5ee   : > { %s17106_s25 = smov 128   ;;  %s17107_s11 = smov 8  }
 0x5ef   : > { %16554 = dma.vmem_to_hbm [thread:$0]  (%p17176_p5), %s20936_s26, 4096, %s20934_s7, %s20944_s22, %s17106_s25, %s17106_s25, %s17107_s11  }
 0x5f0 PF: > { %p16560_p1 = scmp.ge.s32.totalorder %s17100_s21, 2  ;;  %s12207_s30 = sand.u32 1, %s17088_s18  }
 0x5f1   : > { %s12208_s6 = scalar_lea.sflag [#allocation3], %s12207_s30 }
 0x5f2   : > { %p16557_p2 = pnand %p16560_p1, %p17180_p6 }
 0x5f4   : > { %17083 = dma.done.wait (!%p16557_p2), %s12208_s6, 4096  }
 0x5f5   : > { %17085 = vsyncadd (!%p16557_p2), %s12208_s6, 4294963200  ;;  %p15_p3 = scmp.ge.s32.totalorder %s17163_s24, 4   ;;  %s21239_s18 = smov %s17092_s19 }
 0x5f6   : > { %s21240_s19 = smov %s17096_s20  ;;  %s21241_s20 = smov %s17174_s27 }
 0x5f7   : > { %s21242_s21 = smov %s17163_s24  ;;  %17 = sbr.rel (!%p15_p3) target bundleno = 3 (0x3), region = 86 }
 0x5fe   :  { %12213 = vsyncpa [#allocation3], 1 }
 0x5ff   :  { %12215 = vsyncpa [#allocation3 + $0x1], 1 }

</bundles_post_ra>
